<compile_context>
chip_gen: v5e
topology: v5e:2x2
jax: 0.10.0
libtpu: 0.0.40
codegen_flags: <defaults>
</compile_context>

<pallas_src>
import numpy as np
import jax
import jax.numpy as jnp
from jax.experimental import pallas as pl
from jax.experimental.pallas import tpu as pltpu

OP_NAMES = ('none', 'skip_connect', 'nor_conv_1x1', 'nor_conv_3x3', 'avg_pool_3x3')
OP_SKIP, OP_CONV1, OP_CONV3, OP_POOL = 1, 2, 3, 4
BN_EPS = 1e-5
BN_FOLD = float(1.0 / np.sqrt(1.0 + BN_EPS))   # inference-mode BN folded per-channel scale
MXU_DTYPE = jnp.bfloat16                       # MXU operand dtype (accumulation stays f32)
LANE = 128
TAPS = [(dy, dx) for dy in range(3) for dx in range(3)]


def _ceil_to(x, m):
    return ((x + m - 1) // m) * m


# ----------------------- host-side (numpy) spatial constants -----------------------

def _stage_consts(n, h, w, m_pad, cpad):
    """Per-stage constants:
       masks  [9, cpad, m_pad] f32 : tap validity, pre-broadcast over Cin_pad sublanes
       inv    [1, m_pad]       f32 : 1 / valid-neighbour-count (count_include_pad=False)
       avgsum [m_pad, m_pad]   f32 : 0/1 neighbour-sum matrix (avg_pool = (x @ avgsum)*inv)
    """
    masks = np.zeros((9, m_pad), np.float32)
    avgsum = np.zeros((m_pad, m_pad), np.float32)
    for t, (dy, dx) in enumerate(TAPS):
        for nn in range(n):
            for hh in range(h):
                sh = hh + dy - 1
                if not (0 <= sh < h):
                    continue
                for ww in range(w):
                    sw = ww + dx - 1
                    if 0 <= sw < w:
                        dst = nn * h * w + hh * w + ww
                        src = nn * h * w + sh * w + sw
                        masks[t, dst] = 1.0
                        avgsum[src, dst] = 1.0
    cnt = masks.sum(axis=0)
    inv = np.where(cnt > 0, 1.0 / np.maximum(cnt, 1.0), 0.0).astype(np.float32)[None, :]
    masks_b = np.broadcast_to(masks[:, None, :], (9, cpad, m_pad)).copy()
    return masks_b, inv, avgsum


def _subsample_mat(n, h, w, mp_in, mp_out):
    """Even-(h,w) column selection (stride-2) as a [Mp_in, Mp_out] 0/1 matrix."""
    ho, wo = h // 2, w // 2
    mat = np.zeros((mp_in, mp_out), np.float32)
    for nn in range(n):
        for i in range(ho):
            for j in range(wo):
                mat[nn * h * w + 2 * i * w + 2 * j, nn * ho * wo + i * wo + j] = 1.0
    return mat


def _avgpool2_mat(n, h, w, mp_in, mp_out):
    """AvgPool2d(kernel=2, stride=2, padding=0) as a [Mp_in, Mp_out] matrix (entries 0.25)."""
    ho, wo = h // 2, w // 2
    mat = np.zeros((mp_in, mp_out), np.float32)
    for nn in range(n):
        for i in range(ho):
            for j in range(wo):
                for a in range(2):
                    for b in range(2):
                        mat[nn * h * w + (2 * i + a) * w + (2 * j + b),
                            nn * ho * wo + i * wo + j] = 0.25
    return mat


def _gap01_mat(n, h, w, mp):
    """Global-average-pool membership (0/1) matrix [Mp, n]; 1/(h*w) applied in-kernel."""
    m = h * w
    mat = np.zeros((mp, n), np.float32)
    for nn in range(n):
        mat[nn * m:(nn + 1) * m, nn] = 1.0
    return mat


# ----------------------- weight repacking (done once at prepare) -----------------------

def _pack3x3_dense(w, cpo, cpi, fold_bn=True):
    """torch [Co, Ci, 3, 3] -> dense [cpo, 9*cpi]; column layout (tap=3*dy+dx, ci)."""
    if fold_bn:
        w = w * BN_FOLD
    co, ci = w.shape[0], w.shape[1]
    t = jnp.transpose(w, (0, 2, 3, 1))                       # [Co, dy, dx, Ci]
    t = jnp.pad(t, ((0, cpo - co), (0, 0), (0, 0), (0, cpi - ci)))
    return t.reshape(cpo, 9 * cpi)


def _pack1x1_center(w, cpo, cpi, fold_bn=True):
    """torch [Co, Ci, 1, 1] -> dense [cpo, 9*cpi] living only in the centre-tap columns."""
    if fold_bn:
        w = w * BN_FOLD
    co, ci = w.shape[0], w.shape[1]
    blk = jnp.zeros((cpo, 9, cpi), w.dtype)
    blk = blk.at[:co, 4, :ci].set(w[:, :, 0, 0])
    return blk.reshape(cpo, 9 * cpi)


def _pack1x1(w, cpo, cpi, fold_bn=False):
    """torch [Co, Ci, 1, 1] -> [cpo, cpi]."""
    if fold_bn:
        w = w * BN_FOLD
    co, ci = w.shape[0], w.shape[1]
    return jnp.pad(w[:, :, 0, 0], ((0, cpo - co), (0, cpi - ci)))


# ------------------------------------ model ------------------------------------

class TinyNetworkSETNPallas:
    """cal-mode 'joint' forward of TinyNetworkSETN as a single fused Pallas TPU kernel."""

    def __init__(self, C, N_layers, max_nodes, num_classes, batch, hw):
        assert hw % 4 == 0, 'two reduction cells need spatial divisible by 4'
        self.C, self.Nl, self.max_nodes = C, N_layers, max_nodes
        self.num_classes, self.batch, self.hw = num_classes, batch, hw
        self.layer_channels = ([C] * N_layers + [2 * C] + [2 * C] * N_layers
                               + [4 * C] + [4 * C] * N_layers)
        self.layer_reductions = ([False] * N_layers + [True] + [False] * N_layers
                                 + [True] + [False] * N_layers)
        self.edge2index = {}
        for i in range(1, max_nodes):
            for j in range(i):
                self.edge2index['{:}<-{:}'.format(i, j)] = len(self.edge2index)
        self.num_edges = len(self.edge2index)

        def _stage(h, w, ch):
            m = batch * h * w
            return dict(b=batch, h=h, w=w, m=m, mp=_ceil_to(m, LANE),
                        c=ch, cp=_ceil_to(ch, 8))

        self.stages = [_stage(hw, hw, C)]
        self.cells_cfg = []
        C_prev, si = C, 0
        for C_curr, red in zip(self.layer_channels, self.layer_reductions):
            if red:
                h, w = self.stages[si]['h'], self.stages[si]['w']
                self.stages.append(_stage(h // 2, w // 2, C_curr))
                self.cells_cfg.append(dict(type='resnet', C_in=C_prev, C_out=C_curr,
                                           stage_in=si, stage_out=si + 1))
                si += 1
            else:
                assert C_prev == C_curr
                self.cells_cfg.append(dict(type='search', C=C_curr, stage=si))
            C_prev = C_curr
        self.C_final, self.final_stage = C_prev, si

    # ------------------------------ init / prepare ------------------------------

    def init_params(self, key):
        keys = iter(jax.random.split(key, 256))

        def nrm(shape):
            return 0.1 * jax.random.normal(next(keys), shape, jnp.float32)

        params = {'stem_w': nrm((self.C, 3, 3, 3))}
        cells = []
        C_prev = self.C
        for C_curr, red in zip(self.layer_channels, self.layer_reductions):
            if red:
                cells.append({'conv_a_w': nrm((C_curr, C_prev, 3, 3)),
                              'conv_b_w': nrm((C_curr, C_curr, 3, 3)),
                              'down_w': nrm((C_curr, C_prev, 1, 1))})
            else:
                edges = {}
                for name in self.edge2index:
                    edges[name] = {'conv1_w': nrm((C_curr, C_curr, 1, 1)),
                                   'conv3_w': nrm((C_curr, C_curr, 3, 3))}
                cells.append({'edges': edges})
            C_prev = C_curr
        params['cells'] = cells
        params['classifier_w'] = nrm((self.num_classes, C_prev))
        params['classifier_b'] = nrm((self.num_classes,))
        params['arch'] = 0.001 * jax.random.normal(
            next(keys), (self.num_edges, len(OP_NAMES)), jnp.float32)
        return params

    def prepare(self, params):
        """Fold BN, repack every weight into dense kernel layouts, and build the host-side
        spatial constant matrices.  Done once, outside the forward hot path — nothing in
        here is re-executed per forward call."""
        st = self.stages
        prep = {'arch': params['arch']}
        cp0 = st[0]['cp']
        prep['stem_w'] = _pack3x3_dense(params['stem_w'], cp0, cp0).astype(MXU_DTYPE)

        cells = []
        for cp_params, cfg in zip(params['cells'], self.cells_cfg):
            if cfg['type'] == 'search':
                cp = st[cfg['stage']]['cp']
                wbig = []
                for j in range(self.max_nodes - 1):
                    blocks3, blocks1 = [], []
                    for i in range(j + 1, self.max_nodes):
                        name = '{:}<-{:}'.format(i, j)
                        blocks3.append(_pack3x3_dense(cp_params['edges'][name]['conv3_w'], cp, cp))
                        blocks1.append(_pack1x1_center(cp_params['edges'][name]['conv1_w'], cp, cp))
                    wbig.append(jnp.concatenate(blocks3 + blocks1, axis=0).astype(MXU_DTYPE))
                cells.append({'wbig': wbig})
            else:
                s_in, s_out = st[cfg['stage_in']], st[cfg['stage_out']]
                cells.append({
                    'wa': _pack3x3_dense(cp_params['conv_a_w'], s_out['cp'], s_in['cp']).astype(MXU_DTYPE),
                    'wb': _pack3x3_dense(cp_params['conv_b_w'], s_out['cp'], s_out['cp']).astype(MXU_DTYPE),
                    'wd': _pack1x1(cp_params['down_w'], s_out['cp'], s_in['cp'],
                                   fold_bn=False).astype(MXU_DTYPE),
                    'sel': jnp.asarray(_subsample_mat(s_in['b'], s_in['h'], s_in['w'],
                                                      s_in['mp'], s_out['mp'])).astype(MXU_DTYPE),
                    'pool2': jnp.asarray(_avgpool2_mat(s_in['b'], s_in['h'], s_in['w'],
                                                       s_in['mp'], s_out['mp'])).astype(MXU_DTYPE)})
        prep['cells'] = cells

        masks, invs, avgs = [], [], []
        for s in st:
            mk, iv, av = _stage_consts(s['b'], s['h'], s['w'], s['mp'], s['cp'])
            masks.append(jnp.asarray(mk))
            invs.append(jnp.asarray(iv))
            avgs.append(jnp.asarray(av).astype(MXU_DTYPE))
        prep['stage_masks'], prep['stage_inv'], prep['stage_avg'] = masks, invs, avgs

        sf = st[self.final_stage]
        prep['head'] = {
            'gap': jnp.asarray(_gap01_mat(sf['b'], sf['h'], sf['w'], sf['mp'])).astype(MXU_DTYPE),
            'cw': jnp.pad(params['classifier_w'].astype(jnp.float32),
                          ((0, 0), (0, sf['cp'] - self.C_final))),
            'cb': params['classifier_b'].reshape(self.num_classes, 1).astype(jnp.float32)}
        return prep

    # ------------------------------ forward ------------------------------

    def forward(self, prep, inputs_nchw):
        assert inputs_nchw.shape == (self.batch, 3, self.hw, self.hw)
        st, cfgs = self.stages, self.cells_cfg
        s0 = st[0]
        alphas = jax.nn.softmax(prep['arch'], axis=-1)           # [E, n_ops] -> SMEM

        # NCHW -> [C_pad, N*H*W (pad)] layout: channels on sublanes, batch*spatial on lanes
        x0 = jnp.transpose(inputs_nchw.astype(jnp.float32), (1, 0, 2, 3)).reshape(3, s0['m'])
        x0 = jnp.pad(x0, ((0, s0['cp'] - 3), (0, s0['mp'] - s0['m'])))

        kin = {'x': x0, 'stem_w': prep['stem_w'], 'cells': prep['cells'],
               'masks': prep['stage_masks'], 'inv': prep['stage_inv'],
               'avg': prep['stage_avg'], 'head': prep['head']}
        leaves, treedef = jax.tree_util.tree_flatten(kin)
        num_leaves = len(leaves)

        max_nodes, edge2index = self.max_nodes, self.edge2index
        cpf = st[self.final_stage]['cp']
        gap_scale = 1.0 / float(st[self.final_stage]['h'] * st[self.final_stage]['w'])

        def kernel(alphas_ref, *refs):
            kin_r = jax.tree_util.tree_unflatten(treedef, list(refs[:num_leaves]))
            out_ref, logits_ref = refs[num_leaves], refs[num_leaves + 1]

            def mxu(a, b):
                return jnp.dot(a, b, preferred_element_type=jnp.float32)

            def build_taps(x, si):
                """One fused [9*Cp, Mp] bf16 operand: rolled + boundary-masked copies of x,
                tap t = 3*dy + dx (sublane-aligned blocks of Cp rows each)."""
                wdim, mp = st[si]['w'], st[si]['mp']
                masks = kin_r['masks'][si]
                pieces = []
                for t, (dy, dx) in enumerate(TAPS):
                    if dy == 1 and dx == 1:
                        pieces.append(x)                                   # centre: no roll/mask
                    else:
                        s = (dy - 1) * wdim + (dx - 1)
                        pieces.append(masks[t] * pltpu.roll(x, shift=(-s) % mp, axis=1))
                return jnp.concatenate(pieces, axis=0).astype(MXU_DTYPE)

            def avg_pool3(x, si):
                """avg_pool_3x3 (count_include_pad=False) via an MXU 0/1 sum-matrix."""
                y = mxu(x.astype(MXU_DTYPE), kin_r['avg'][si][...])
                return y * kin_r['inv'][si][...]

            def search_cell(x, ck, cfg):
                si, cp = cfg['stage'], st[cfg['stage']]['cp']
                acc = [x] + [None] * (max_nodes - 1)
                for j in range(max_nodes - 1):                    # source node
                    xj = acc[j]
                    n_e = max_nodes - 1 - j
                    taps = build_taps(jnp.maximum(xj, 0.0), si)   # ReLU before both convs
                    # one batched matmul for ALL outgoing edges (conv3 rows, then conv1 rows)
                    y = mxu(ck['wbig'][j][...], taps)             # [(2*n_e)*cp, Mp] f32
                    pool_j = avg_pool3(xj, si)
                    for k, i in enumerate(range(j + 1, max_nodes)):   # destination node
                        e = edge2index['{:}<-{:}'.format(i, j)]
                        conv3 = y[k * cp:(k + 1) * cp, :]
                        conv1 = y[(n_e + k) * cp:(n_e + k + 1) * cp, :]
                        contrib = (alphas_ref[e, OP_CONV3] * conv3
                                   + alphas_ref[e, OP_CONV1] * conv1
                                   + alphas_ref[e, OP_SKIP] * xj
                                   + alphas_ref[e, OP_POOL] * pool_j)   # 'none' contributes 0
                        acc[i] = contrib if acc[i] is None else acc[i] + contrib
                return acc[max_nodes - 1]

            def resnet_cell(x, ck, cfg):
                si, so = cfg['stage_in'], cfg['stage_out']
                # conv_a: ReLU -> Conv3x3/s2 -> BN(folded) == stride-1 conv + even-(h,w) select
                ya = mxu(ck['wa'][...], build_taps(jnp.maximum(x, 0.0), si))
                ya = mxu(ya.astype(MXU_DTYPE), ck['sel'][...])
                # conv_b: ReLU -> Conv3x3/s1 -> BN(folded)
                yb = mxu(ck['wb'][...], build_taps(jnp.maximum(ya, 0.0), so))
                # downsample: AvgPool2d(2,2) -> Conv1x1 (no BN / ReLU)
                xp = mxu(x.astype(MXU_DTYPE), ck['pool2'][...])
                return yb + mxu(ck['wd'][...], xp.astype(MXU_DTYPE))

            # stem: Conv3x3(3->C) + BN(folded)   (no ReLU on the raw input)
            feat = mxu(kin_r['stem_w'][...], build_taps(kin_r['x'][...], 0))

            for ck, cfg in zip(kin_r['cells'], cfgs):
                if cfg['type'] == 'search':
                    feat = search_cell(feat, ck, cfg)
                else:
                    feat = resnet_cell(feat, ck, cfg)

            # head: lastact BN(folded) + ReLU, global average pool, linear classifier
            hk = kin_r['head']
            f = jnp.maximum(feat, 0.0) * BN_FOLD
            pooled = mxu(f.astype(MXU_DTYPE), hk['gap'][...]) * gap_scale   # [Cpf, batch]
            out_ref[...] = pooled
            logits_ref[...] = mxu(hk['cw'][...], pooled) + hk['cb'][...]

        out_t, logits_t = pl.pallas_call(
            kernel,
            out_shape=(jax.ShapeDtypeStruct((cpf, self.batch), jnp.float32),
                       jax.ShapeDtypeStruct((self.num_classes, self.batch), jnp.float32)),
            in_specs=([pl.BlockSpec(memory_space=pltpu.MemorySpace.SMEM)]
                      + [pl.BlockSpec(memory_space=pltpu.MemorySpace.VMEM)] * num_leaves),
        )(alphas, *leaves)
        return out_t[:self.C_final].T, logits_t.T


# ------------------------------------ main ------------------------------------

if __name__ == "__main__":
    key = jax.random.PRNGKey(0)
    C, N_layers, max_nodes, num_classes = 4, 1, 4, 10
    model = TinyNetworkSETNPallas(C=C, N_layers=N_layers, max_nodes=max_nodes,
                                  num_classes=num_classes, batch=2, hw=16)
    kp, kx = jax.random.split(key)
    params = model.init_params(kp)
    prep = model.prepare(params)

    x = jax.random.normal(kx, (2, 3, 16, 16), jnp.float32)   # NCHW like the PyTorch module

    fwd = jax.jit(model.forward)
    out, logits = fwd(prep, x)
    jax.block_until_ready((out, logits))

    assert out.shape == (2, 4 * C) and logits.shape == (2, num_classes)
    assert bool(jnp.all(jnp.isfinite(out))) and bool(jnp.all(jnp.isfinite(logits)))
    print("KERNEL_OK")
</pallas_src>

<mosaic_0001>
module attributes {stable_mosaic.version = 11 : i64} {
  func.func @kernel(%arg0: memref<6x5xf32, #tpu.memory_space<smem>>, %arg1: memref<512x512xbf16, #tpu.memory_space<vmem>>, %arg2: memref<128x128xbf16, #tpu.memory_space<vmem>>, %arg3: memref<128x128xbf16, #tpu.memory_space<vmem>>, %arg4: memref<48x72xbf16, #tpu.memory_space<vmem>>, %arg5: memref<32x72xbf16, #tpu.memory_space<vmem>>, %arg6: memref<16x72xbf16, #tpu.memory_space<vmem>>, %arg7: memref<512x128xbf16, #tpu.memory_space<vmem>>, %arg8: memref<512x128xbf16, #tpu.memory_space<vmem>>, %arg9: memref<8x72xbf16, #tpu.memory_space<vmem>>, %arg10: memref<8x72xbf16, #tpu.memory_space<vmem>>, %arg11: memref<8x8xbf16, #tpu.memory_space<vmem>>, %arg12: memref<48x72xbf16, #tpu.memory_space<vmem>>, %arg13: memref<32x72xbf16, #tpu.memory_space<vmem>>, %arg14: memref<16x72xbf16, #tpu.memory_space<vmem>>, %arg15: memref<128x128xbf16, #tpu.memory_space<vmem>>, %arg16: memref<128x128xbf16, #tpu.memory_space<vmem>>, %arg17: memref<16x72xbf16, #tpu.memory_space<vmem>>, %arg18: memref<16x144xbf16, #tpu.memory_space<vmem>>, %arg19: memref<16x8xbf16, #tpu.memory_space<vmem>>, %arg20: memref<96x144xbf16, #tpu.memory_space<vmem>>, %arg21: memref<64x144xbf16, #tpu.memory_space<vmem>>, %arg22: memref<32x144xbf16, #tpu.memory_space<vmem>>, %arg23: memref<10x1xf32, #tpu.memory_space<vmem>>, %arg24: memref<10x16xf32, #tpu.memory_space<vmem>>, %arg25: memref<128x2xbf16, #tpu.memory_space<vmem>>, %arg26: memref<1x512xf32, #tpu.memory_space<vmem>>, %arg27: memref<1x128xf32, #tpu.memory_space<vmem>>, %arg28: memref<1x128xf32, #tpu.memory_space<vmem>>, %arg29: memref<9x8x512xf32, #tpu.memory_space<vmem>>, %arg30: memref<9x8x128xf32, #tpu.memory_space<vmem>>, %arg31: memref<9x16x128xf32, #tpu.memory_space<vmem>>, %arg32: memref<8x72xbf16, #tpu.memory_space<vmem>>, %arg33: memref<8x512xf32, #tpu.memory_space<vmem>>, %arg34: memref<16x2xf32, #tpu.memory_space<vmem>>, %arg35: memref<10x2xf32, #tpu.memory_space<vmem>>) attributes {dimension_semantics = [], scalar_prefetch = 0 : i64, scratch_operands = 0 : i64, tpu.core_type = #tpu.core_type<tc>} {
    %c0 = arith.constant 0 : index
    %c0_0 = arith.constant 0 : index
    %0 = vector.load %arg32[%c0, %c0_0] : memref<8x72xbf16, #tpu.memory_space<vmem>>, vector<8x72xbf16>
    %c0_1 = arith.constant 0 : index
    %c0_2 = arith.constant 0 : index
    %1 = vector.load %arg33[%c0_1, %c0_2] : memref<8x512xf32, #tpu.memory_space<vmem>>, vector<8x512xf32>
    %c0_3 = arith.constant 0 : index
    %c0_4 = arith.constant 0 : index
    %c0_5 = arith.constant 0 : index
    %2 = vector.load %arg29[%c0_3, %c0_4, %c0_5] : memref<9x8x512xf32, #tpu.memory_space<vmem>>, vector<1x8x512xf32>
    %3 = vector.shape_cast %2 : vector<1x8x512xf32> to vector<8x512xf32>
    %c17_i32 = arith.constant 17 : i32
    %4 = tpu.dynamic_rotate %1 by %c17_i32 dim 1 : vector<8x512xf32>, i32 -> vector<8x512xf32>
    %5 = arith.mulf %3, %4 : vector<8x512xf32>
    %c1 = arith.constant 1 : index
    %c0_6 = arith.constant 0 : index
    %c0_7 = arith.constant 0 : index
    %6 = vector.load %arg29[%c1, %c0_6, %c0_7] : memref<9x8x512xf32, #tpu.memory_space<vmem>>, vector<1x8x512xf32>
    %7 = vector.shape_cast %6 : vector<1x8x512xf32> to vector<8x512xf32>
    %c16_i32 = arith.constant 16 : i32
    %8 = tpu.dynamic_rotate %1 by %c16_i32 dim 1 : vector<8x512xf32>, i32 -> vector<8x512xf32>
    %9 = arith.mulf %7, %8 : vector<8x512xf32>
    %c2 = arith.constant 2 : index
    %c0_8 = arith.constant 0 : index
    %c0_9 = arith.constant 0 : index
    %10 = vector.load %arg29[%c2, %c0_8, %c0_9] : memref<9x8x512xf32, #tpu.memory_space<vmem>>, vector<1x8x512xf32>
    %11 = vector.shape_cast %10 : vector<1x8x512xf32> to vector<8x512xf32>
    %c15_i32 = arith.constant 15 : i32
    %12 = tpu.dynamic_rotate %1 by %c15_i32 dim 1 : vector<8x512xf32>, i32 -> vector<8x512xf32>
    %13 = arith.mulf %11, %12 : vector<8x512xf32>
    %c3 = arith.constant 3 : index
    %c0_10 = arith.constant 0 : index
    %c0_11 = arith.constant 0 : index
    %14 = vector.load %arg29[%c3, %c0_10, %c0_11] : memref<9x8x512xf32, #tpu.memory_space<vmem>>, vector<1x8x512xf32>
    %15 = vector.shape_cast %14 : vector<1x8x512xf32> to vector<8x512xf32>
    %c1_i32 = arith.constant 1 : i32
    %16 = tpu.dynamic_rotate %1 by %c1_i32 dim 1 : vector<8x512xf32>, i32 -> vector<8x512xf32>
    %17 = arith.mulf %15, %16 : vector<8x512xf32>
    %c5 = arith.constant 5 : index
    %c0_12 = arith.constant 0 : index
    %c0_13 = arith.constant 0 : index
    %18 = vector.load %arg29[%c5, %c0_12, %c0_13] : memref<9x8x512xf32, #tpu.memory_space<vmem>>, vector<1x8x512xf32>
    %19 = vector.shape_cast %18 : vector<1x8x512xf32> to vector<8x512xf32>
    %c511_i32 = arith.constant 511 : i32
    %20 = tpu.dynamic_rotate %1 by %c511_i32 dim 1 : vector<8x512xf32>, i32 -> vector<8x512xf32>
    %21 = arith.mulf %19, %20 : vector<8x512xf32>
    %c6 = arith.constant 6 : index
    %c0_14 = arith.constant 0 : index
    %c0_15 = arith.constant 0 : index
    %22 = vector.load %arg29[%c6, %c0_14, %c0_15] : memref<9x8x512xf32, #tpu.memory_space<vmem>>, vector<1x8x512xf32>
    %23 = vector.shape_cast %22 : vector<1x8x512xf32> to vector<8x512xf32>
    %c497_i32 = arith.constant 497 : i32
    %24 = tpu.dynamic_rotate %1 by %c497_i32 dim 1 : vector<8x512xf32>, i32 -> vector<8x512xf32>
    %25 = arith.mulf %23, %24 : vector<8x512xf32>
    %c7 = arith.constant 7 : index
    %c0_16 = arith.constant 0 : index
    %c0_17 = arith.constant 0 : index
    %26 = vector.load %arg29[%c7, %c0_16, %c0_17] : memref<9x8x512xf32, #tpu.memory_space<vmem>>, vector<1x8x512xf32>
    %27 = vector.shape_cast %26 : vector<1x8x512xf32> to vector<8x512xf32>
    %c496_i32 = arith.constant 496 : i32
    %28 = tpu.dynamic_rotate %1 by %c496_i32 dim 1 : vector<8x512xf32>, i32 -> vector<8x512xf32>
    %29 = arith.mulf %27, %28 : vector<8x512xf32>
    %c8 = arith.constant 8 : index
    %c0_18 = arith.constant 0 : index
    %c0_19 = arith.constant 0 : index
    %30 = vector.load %arg29[%c8, %c0_18, %c0_19] : memref<9x8x512xf32, #tpu.memory_space<vmem>>, vector<1x8x512xf32>
    %31 = vector.shape_cast %30 : vector<1x8x512xf32> to vector<8x512xf32>
    %c495_i32 = arith.constant 495 : i32
    %32 = tpu.dynamic_rotate %1 by %c495_i32 dim 1 : vector<8x512xf32>, i32 -> vector<8x512xf32>
    %33 = arith.mulf %31, %32 : vector<8x512xf32>
    %34 = tpu.concatenate %5, %9, %13, %17, %1, %21, %25, %29, %33 in 0 : vector<8x512xf32>, vector<8x512xf32>, vector<8x512xf32>, vector<8x512xf32>, vector<8x512xf32>, vector<8x512xf32>, vector<8x512xf32>, vector<8x512xf32>, vector<8x512xf32> -> vector<72x512xf32>
    %35 = arith.truncf %34 : vector<72x512xf32> to vector<72x512xbf16>
    %cst = arith.constant dense<0.000000e+00> : vector<8x512xf32>
    %36 = tpu.matmul %0, %35, %cst {dimension_numbers = #tpu.dot_dimension_numbers<[1], [0], [0], [1], [0, 0, 1, 1], [], []>} : vector<8x72xbf16>, vector<72x512xbf16>, vector<8x512xf32> -> vector<8x512xf32>
    %cst_20 = arith.constant 0.000000e+00 : f32
    %37 = vector.broadcast %cst_20 : f32 to vector<8x512xf32>
    %38 = arith.maximumf %36, %37 : vector<8x512xf32>
    %c0_21 = arith.constant 0 : index
    %c0_22 = arith.constant 0 : index
    %c0_23 = arith.constant 0 : index
    %39 = vector.load %arg29[%c0_21, %c0_22, %c0_23] : memref<9x8x512xf32, #tpu.memory_space<vmem>>, vector<1x8x512xf32>
    %40 = vector.shape_cast %39 : vector<1x8x512xf32> to vector<8x512xf32>
    %c17_i32_24 = arith.constant 17 : i32
    %41 = tpu.dynamic_rotate %38 by %c17_i32_24 dim 1 : vector<8x512xf32>, i32 -> vector<8x512xf32>
    %42 = arith.mulf %40, %41 : vector<8x512xf32>
    %c1_25 = arith.constant 1 : index
    %c0_26 = arith.constant 0 : index
    %c0_27 = arith.constant 0 : index
    %43 = vector.load %arg29[%c1_25, %c0_26, %c0_27] : memref<9x8x512xf32, #tpu.memory_space<vmem>>, vector<1x8x512xf32>
    %44 = vector.shape_cast %43 : vector<1x8x512xf32> to vector<8x512xf32>
    %c16_i32_28 = arith.constant 16 : i32
    %45 = tpu.dynamic_rotate %38 by %c16_i32_28 dim 1 : vector<8x512xf32>, i32 -> vector<8x512xf32>
    %46 = arith.mulf %44, %45 : vector<8x512xf32>
    %c2_29 = arith.constant 2 : index
    %c0_30 = arith.constant 0 : index
    %c0_31 = arith.constant 0 : index
    %47 = vector.load %arg29[%c2_29, %c0_30, %c0_31] : memref<9x8x512xf32, #tpu.memory_space<vmem>>, vector<1x8x512xf32>
    %48 = vector.shape_cast %47 : vector<1x8x512xf32> to vector<8x512xf32>
    %c15_i32_32 = arith.constant 15 : i32
    %49 = tpu.dynamic_rotate %38 by %c15_i32_32 dim 1 : vector<8x512xf32>, i32 -> vector<8x512xf32>
    %50 = arith.mulf %48, %49 : vector<8x512xf32>
    %c3_33 = arith.constant 3 : index
    %c0_34 = arith.constant 0 : index
    %c0_35 = arith.constant 0 : index
    %51 = vector.load %arg29[%c3_33, %c0_34, %c0_35] : memref<9x8x512xf32, #tpu.memory_space<vmem>>, vector<1x8x512xf32>
    %52 = vector.shape_cast %51 : vector<1x8x512xf32> to vector<8x512xf32>
    %c1_i32_36 = arith.constant 1 : i32
    %53 = tpu.dynamic_rotate %38 by %c1_i32_36 dim 1 : vector<8x512xf32>, i32 -> vector<8x512xf32>
    %54 = arith.mulf %52, %53 : vector<8x512xf32>
    %c5_37 = arith.constant 5 : index
    %c0_38 = arith.constant 0 : index
    %c0_39 = arith.constant 0 : index
    %55 = vector.load %arg29[%c5_37, %c0_38, %c0_39] : memref<9x8x512xf32, #tpu.memory_space<vmem>>, vector<1x8x512xf32>
    %56 = vector.shape_cast %55 : vector<1x8x512xf32> to vector<8x512xf32>
    %c511_i32_40 = arith.constant 511 : i32
    %57 = tpu.dynamic_rotate %38 by %c511_i32_40 dim 1 : vector<8x512xf32>, i32 -> vector<8x512xf32>
    %58 = arith.mulf %56, %57 : vector<8x512xf32>
    %c6_41 = arith.constant 6 : index
    %c0_42 = arith.constant 0 : index
    %c0_43 = arith.constant 0 : index
    %59 = vector.load %arg29[%c6_41, %c0_42, %c0_43] : memref<9x8x512xf32, #tpu.memory_space<vmem>>, vector<1x8x512xf32>
    %60 = vector.shape_cast %59 : vector<1x8x512xf32> to vector<8x512xf32>
    %c497_i32_44 = arith.constant 497 : i32
    %61 = tpu.dynamic_rotate %38 by %c497_i32_44 dim 1 : vector<8x512xf32>, i32 -> vector<8x512xf32>
    %62 = arith.mulf %60, %61 : vector<8x512xf32>
    %c7_45 = arith.constant 7 : index
    %c0_46 = arith.constant 0 : index
    %c0_47 = arith.constant 0 : index
    %63 = vector.load %arg29[%c7_45, %c0_46, %c0_47] : memref<9x8x512xf32, #tpu.memory_space<vmem>>, vector<1x8x512xf32>
    %64 = vector.shape_cast %63 : vector<1x8x512xf32> to vector<8x512xf32>
    %c496_i32_48 = arith.constant 496 : i32
    %65 = tpu.dynamic_rotate %38 by %c496_i32_48 dim 1 : vector<8x512xf32>, i32 -> vector<8x512xf32>
    %66 = arith.mulf %64, %65 : vector<8x512xf32>
    %c8_49 = arith.constant 8 : index
    %c0_50 = arith.constant 0 : index
    %c0_51 = arith.constant 0 : index
    %67 = vector.load %arg29[%c8_49, %c0_50, %c0_51] : memref<9x8x512xf32, #tpu.memory_space<vmem>>, vector<1x8x512xf32>
    %68 = vector.shape_cast %67 : vector<1x8x512xf32> to vector<8x512xf32>
    %c495_i32_52 = arith.constant 495 : i32
    %69 = tpu.dynamic_rotate %38 by %c495_i32_52 dim 1 : vector<8x512xf32>, i32 -> vector<8x512xf32>
    %70 = arith.mulf %68, %69 : vector<8x512xf32>
    %71 = tpu.concatenate %42, %46, %50, %54, %38, %58, %62, %66, %70 in 0 : vector<8x512xf32>, vector<8x512xf32>, vector<8x512xf32>, vector<8x512xf32>, vector<8x512xf32>, vector<8x512xf32>, vector<8x512xf32>, vector<8x512xf32>, vector<8x512xf32> -> vector<72x512xf32>
    %72 = arith.truncf %71 : vector<72x512xf32> to vector<72x512xbf16>
    %c0_53 = arith.constant 0 : index
    %c0_54 = arith.constant 0 : index
    %73 = vector.load %arg4[%c0_53, %c0_54] : memref<48x72xbf16, #tpu.memory_space<vmem>>, vector<48x72xbf16>
    %cst_55 = arith.constant dense<0.000000e+00> : vector<48x512xf32>
    %74 = tpu.matmul %73, %72, %cst_55 {dimension_numbers = #tpu.dot_dimension_numbers<[1], [0], [0], [1], [0, 0, 1, 1], [], []>} : vector<48x72xbf16>, vector<72x512xbf16>, vector<48x512xf32> -> vector<48x512xf32>
    %75 = arith.truncf %36 : vector<8x512xf32> to vector<8x512xbf16>
    %c0_56 = arith.constant 0 : index
    %c0_57 = arith.constant 0 : index
    %76 = vector.load %arg1[%c0_56, %c0_57] : memref<512x512xbf16, #tpu.memory_space<vmem>>, vector<512x512xbf16>
    %cst_58 = arith.constant dense<0.000000e+00> : vector<8x512xf32>
    %77 = tpu.matmul %75, %76, %cst_58 {dimension_numbers = #tpu.dot_dimension_numbers<[1], [0], [0], [1], [0, 0, 1, 1], [], []>} : vector<8x512xbf16>, vector<512x512xbf16>, vector<8x512xf32> -> vector<8x512xf32>
    %c0_59 = arith.constant 0 : index
    %c0_60 = arith.constant 0 : index
    %78 = vector.load %arg26[%c0_59, %c0_60] : memref<1x512xf32, #tpu.memory_space<vmem>>, vector<1x512xf32>
    %79 = vector.broadcast %78 : vector<1x512xf32> to vector<8x512xf32>
    %80 = arith.mulf %77, %79 : vector<8x512xf32>
    %81 = vector.extract_strided_slice %74 {offsets = [0, 0], sizes = [8, 512], strides = [1, 1]} : vector<48x512xf32> to vector<8x512xf32>
    %82 = vector.extract_strided_slice %74 {offsets = [24, 0], sizes = [8, 512], strides = [1, 1]} : vector<48x512xf32> to vector<8x512xf32>
    %c0_61 = arith.constant 0 : index
    %c3_62 = arith.constant 3 : index
    %83 = memref.load %arg0[%c0_61, %c3_62] : memref<6x5xf32, #tpu.memory_space<smem>>
    %84 = vector.broadcast %83 : f32 to vector<8x512xf32>
    %85 = arith.mulf %84, %81 : vector<8x512xf32>
    %c0_63 = arith.constant 0 : index
    %c2_64 = arith.constant 2 : index
    %86 = memref.load %arg0[%c0_63, %c2_64] : memref<6x5xf32, #tpu.memory_space<smem>>
    %87 = vector.broadcast %86 : f32 to vector<8x512xf32>
    %88 = arith.mulf %87, %82 : vector<8x512xf32>
    %89 = arith.addf %85, %88 : vector<8x512xf32>
    %c0_65 = arith.constant 0 : index
    %c1_66 = arith.constant 1 : index
    %90 = memref.load %arg0[%c0_65, %c1_66] : memref<6x5xf32, #tpu.memory_space<smem>>
    %91 = vector.broadcast %90 : f32 to vector<8x512xf32>
    %92 = arith.mulf %91, %36 : vector<8x512xf32>
    %93 = arith.addf %89, %92 : vector<8x512xf32>
    %c0_67 = arith.constant 0 : index
    %c4 = arith.constant 4 : index
    %94 = memref.load %arg0[%c0_67, %c4] : memref<6x5xf32, #tpu.memory_space<smem>>
    %95 = vector.broadcast %94 : f32 to vector<8x512xf32>
    %96 = arith.mulf %95, %80 : vector<8x512xf32>
    %97 = arith.addf %93, %96 : vector<8x512xf32>
    %98 = vector.extract_strided_slice %74 {offsets = [8, 0], sizes = [8, 512], strides = [1, 1]} : vector<48x512xf32> to vector<8x512xf32>
    %99 = vector.extract_strided_slice %74 {offsets = [32, 0], sizes = [8, 512], strides = [1, 1]} : vector<48x512xf32> to vector<8x512xf32>
    %c1_68 = arith.constant 1 : index
    %c3_69 = arith.constant 3 : index
    %100 = memref.load %arg0[%c1_68, %c3_69] : memref<6x5xf32, #tpu.memory_space<smem>>
    %101 = vector.broadcast %100 : f32 to vector<8x512xf32>
    %102 = arith.mulf %101, %98 : vector<8x512xf32>
    %c1_70 = arith.constant 1 : index
    %c2_71 = arith.constant 2 : index
    %103 = memref.load %arg0[%c1_70, %c2_71] : memref<6x5xf32, #tpu.memory_space<smem>>
    %104 = vector.broadcast %103 : f32 to vector<8x512xf32>
    %105 = arith.mulf %104, %99 : vector<8x512xf32>
    %106 = arith.addf %102, %105 : vector<8x512xf32>
    %c1_72 = arith.constant 1 : index
    %c1_73 = arith.constant 1 : index
    %107 = memref.load %arg0[%c1_72, %c1_73] : memref<6x5xf32, #tpu.memory_space<smem>>
    %108 = vector.broadcast %107 : f32 to vector<8x512xf32>
    %109 = arith.mulf %108, %36 : vector<8x512xf32>
    %110 = arith.addf %106, %109 : vector<8x512xf32>
    %c1_74 = arith.constant 1 : index
    %c4_75 = arith.constant 4 : index
    %111 = memref.load %arg0[%c1_74, %c4_75] : memref<6x5xf32, #tpu.memory_space<smem>>
    %112 = vector.broadcast %111 : f32 to vector<8x512xf32>
    %113 = arith.mulf %112, %80 : vector<8x512xf32>
    %114 = arith.addf %110, %113 : vector<8x512xf32>
    %115 = vector.extract_strided_slice %74 {offsets = [16, 0], sizes = [8, 512], strides = [1, 1]} : vector<48x512xf32> to vector<8x512xf32>
    %116 = vector.extract_strided_slice %74 {offsets = [40, 0], sizes = [8, 512], strides = [1, 1]} : vector<48x512xf32> to vector<8x512xf32>
    %c3_76 = arith.constant 3 : index
    %c3_77 = arith.constant 3 : index
    %117 = memref.load %arg0[%c3_76, %c3_77] : memref<6x5xf32, #tpu.memory_space<smem>>
    %118 = vector.broadcast %117 : f32 to vector<8x512xf32>
    %119 = arith.mulf %118, %115 : vector<8x512xf32>
    %c3_78 = arith.constant 3 : index
    %c2_79 = arith.constant 2 : index
    %120 = memref.load %arg0[%c3_78, %c2_79] : memref<6x5xf32, #tpu.memory_space<smem>>
    %121 = vector.broadcast %120 : f32 to vector<8x512xf32>
    %122 = arith.mulf %121, %116 : vector<8x512xf32>
    %123 = arith.addf %119, %122 : vector<8x512xf32>
    %c3_80 = arith.constant 3 : index
    %c1_81 = arith.constant 1 : index
    %124 = memref.load %arg0[%c3_80, %c1_81] : memref<6x5xf32, #tpu.memory_space<smem>>
    %125 = vector.broadcast %124 : f32 to vector<8x512xf32>
    %126 = arith.mulf %125, %36 : vector<8x512xf32>
    %127 = arith.addf %123, %126 : vector<8x512xf32>
    %c3_82 = arith.constant 3 : index
    %c4_83 = arith.constant 4 : index
    %128 = memref.load %arg0[%c3_82, %c4_83] : memref<6x5xf32, #tpu.memory_space<smem>>
    %129 = vector.broadcast %128 : f32 to vector<8x512xf32>
    %130 = arith.mulf %129, %80 : vector<8x512xf32>
    %131 = arith.addf %127, %130 : vector<8x512xf32>
    %cst_84 = arith.constant 0.000000e+00 : f32
    %132 = vector.broadcast %cst_84 : f32 to vector<8x512xf32>
    %133 = arith.maximumf %97, %132 : vector<8x512xf32>
    %c0_85 = arith.constant 0 : index
    %c0_86 = arith.constant 0 : index
    %c0_87 = arith.constant 0 : index
    %134 = vector.load %arg29[%c0_85, %c0_86, %c0_87] : memref<9x8x512xf32, #tpu.memory_space<vmem>>, vector<1x8x512xf32>
    %135 = vector.shape_cast %134 : vector<1x8x512xf32> to vector<8x512xf32>
    %c17_i32_88 = arith.constant 17 : i32
    %136 = tpu.dynamic_rotate %133 by %c17_i32_88 dim 1 : vector<8x512xf32>, i32 -> vector<8x512xf32>
    %137 = arith.mulf %135, %136 : vector<8x512xf32>
    %c1_89 = arith.constant 1 : index
    %c0_90 = arith.constant 0 : index
    %c0_91 = arith.constant 0 : index
    %138 = vector.load %arg29[%c1_89, %c0_90, %c0_91] : memref<9x8x512xf32, #tpu.memory_space<vmem>>, vector<1x8x512xf32>
    %139 = vector.shape_cast %138 : vector<1x8x512xf32> to vector<8x512xf32>
    %c16_i32_92 = arith.constant 16 : i32
    %140 = tpu.dynamic_rotate %133 by %c16_i32_92 dim 1 : vector<8x512xf32>, i32 -> vector<8x512xf32>
    %141 = arith.mulf %139, %140 : vector<8x512xf32>
    %c2_93 = arith.constant 2 : index
    %c0_94 = arith.constant 0 : index
    %c0_95 = arith.constant 0 : index
    %142 = vector.load %arg29[%c2_93, %c0_94, %c0_95] : memref<9x8x512xf32, #tpu.memory_space<vmem>>, vector<1x8x512xf32>
    %143 = vector.shape_cast %142 : vector<1x8x512xf32> to vector<8x512xf32>
    %c15_i32_96 = arith.constant 15 : i32
    %144 = tpu.dynamic_rotate %133 by %c15_i32_96 dim 1 : vector<8x512xf32>, i32 -> vector<8x512xf32>
    %145 = arith.mulf %143, %144 : vector<8x512xf32>
    %c3_97 = arith.constant 3 : index
    %c0_98 = arith.constant 0 : index
    %c0_99 = arith.constant 0 : index
    %146 = vector.load %arg29[%c3_97, %c0_98, %c0_99] : memref<9x8x512xf32, #tpu.memory_space<vmem>>, vector<1x8x512xf32>
    %147 = vector.shape_cast %146 : vector<1x8x512xf32> to vector<8x512xf32>
    %c1_i32_100 = arith.constant 1 : i32
    %148 = tpu.dynamic_rotate %133 by %c1_i32_100 dim 1 : vector<8x512xf32>, i32 -> vector<8x512xf32>
    %149 = arith.mulf %147, %148 : vector<8x512xf32>
    %c5_101 = arith.constant 5 : index
    %c0_102 = arith.constant 0 : index
    %c0_103 = arith.constant 0 : index
    %150 = vector.load %arg29[%c5_101, %c0_102, %c0_103] : memref<9x8x512xf32, #tpu.memory_space<vmem>>, vector<1x8x512xf32>
    %151 = vector.shape_cast %150 : vector<1x8x512xf32> to vector<8x512xf32>
    %c511_i32_104 = arith.constant 511 : i32
    %152 = tpu.dynamic_rotate %133 by %c511_i32_104 dim 1 : vector<8x512xf32>, i32 -> vector<8x512xf32>
    %153 = arith.mulf %151, %152 : vector<8x512xf32>
    %c6_105 = arith.constant 6 : index
    %c0_106 = arith.constant 0 : index
    %c0_107 = arith.constant 0 : index
    %154 = vector.load %arg29[%c6_105, %c0_106, %c0_107] : memref<9x8x512xf32, #tpu.memory_space<vmem>>, vector<1x8x512xf32>
    %155 = vector.shape_cast %154 : vector<1x8x512xf32> to vector<8x512xf32>
    %c497_i32_108 = arith.constant 497 : i32
    %156 = tpu.dynamic_rotate %133 by %c497_i32_108 dim 1 : vector<8x512xf32>, i32 -> vector<8x512xf32>
    %157 = arith.mulf %155, %156 : vector<8x512xf32>
    %c7_109 = arith.constant 7 : index
    %c0_110 = arith.constant 0 : index
    %c0_111 = arith.constant 0 : index
    %158 = vector.load %arg29[%c7_109, %c0_110, %c0_111] : memref<9x8x512xf32, #tpu.memory_space<vmem>>, vector<1x8x512xf32>
    %159 = vector.shape_cast %158 : vector<1x8x512xf32> to vector<8x512xf32>
    %c496_i32_112 = arith.constant 496 : i32
    %160 = tpu.dynamic_rotate %133 by %c496_i32_112 dim 1 : vector<8x512xf32>, i32 -> vector<8x512xf32>
    %161 = arith.mulf %159, %160 : vector<8x512xf32>
    %c8_113 = arith.constant 8 : index
    %c0_114 = arith.constant 0 : index
    %c0_115 = arith.constant 0 : index
    %162 = vector.load %arg29[%c8_113, %c0_114, %c0_115] : memref<9x8x512xf32, #tpu.memory_space<vmem>>, vector<1x8x512xf32>
    %163 = vector.shape_cast %162 : vector<1x8x512xf32> to vector<8x512xf32>
    %c495_i32_116 = arith.constant 495 : i32
    %164 = tpu.dynamic_rotate %133 by %c495_i32_116 dim 1 : vector<8x512xf32>, i32 -> vector<8x512xf32>
    %165 = arith.mulf %163, %164 : vector<8x512xf32>
    %166 = tpu.concatenate %137, %141, %145, %149, %133, %153, %157, %161, %165 in 0 : vector<8x512xf32>, vector<8x512xf32>, vector<8x512xf32>, vector<8x512xf32>, vector<8x512xf32>, vector<8x512xf32>, vector<8x512xf32>, vector<8x512xf32>, vector<8x512xf32> -> vector<72x512xf32>
    %167 = arith.truncf %166 : vector<72x512xf32> to vector<72x512xbf16>
    %c0_117 = arith.constant 0 : index
    %c0_118 = arith.constant 0 : index
    %168 = vector.load %arg5[%c0_117, %c0_118] : memref<32x72xbf16, #tpu.memory_space<vmem>>, vector<32x72xbf16>
    %cst_119 = arith.constant dense<0.000000e+00> : vector<32x512xf32>
    %169 = tpu.matmul %168, %167, %cst_119 {dimension_numbers = #tpu.dot_dimension_numbers<[1], [0], [0], [1], [0, 0, 1, 1], [], []>} : vector<32x72xbf16>, vector<72x512xbf16>, vector<32x512xf32> -> vector<32x512xf32>
    %170 = arith.truncf %97 : vector<8x512xf32> to vector<8x512xbf16>
    %c0_120 = arith.constant 0 : index
    %c0_121 = arith.constant 0 : index
    %171 = vector.load %arg1[%c0_120, %c0_121] : memref<512x512xbf16, #tpu.memory_space<vmem>>, vector<512x512xbf16>
    %cst_122 = arith.constant dense<0.000000e+00> : vector<8x512xf32>
    %172 = tpu.matmul %170, %171, %cst_122 {dimension_numbers = #tpu.dot_dimension_numbers<[1], [0], [0], [1], [0, 0, 1, 1], [], []>} : vector<8x512xbf16>, vector<512x512xbf16>, vector<8x512xf32> -> vector<8x512xf32>
    %c0_123 = arith.constant 0 : index
    %c0_124 = arith.constant 0 : index
    %173 = vector.load %arg26[%c0_123, %c0_124] : memref<1x512xf32, #tpu.memory_space<vmem>>, vector<1x512xf32>
    %174 = vector.broadcast %173 : vector<1x512xf32> to vector<8x512xf32>
    %175 = arith.mulf %172, %174 : vector<8x512xf32>
    %176 = vector.extract_strided_slice %169 {offsets = [0, 0], sizes = [8, 512], strides = [1, 1]} : vector<32x512xf32> to vector<8x512xf32>
    %177 = vector.extract_strided_slice %169 {offsets = [16, 0], sizes = [8, 512], strides = [1, 1]} : vector<32x512xf32> to vector<8x512xf32>
    %c2_125 = arith.constant 2 : index
    %c3_126 = arith.constant 3 : index
    %178 = memref.load %arg0[%c2_125, %c3_126] : memref<6x5xf32, #tpu.memory_space<smem>>
    %179 = vector.broadcast %178 : f32 to vector<8x512xf32>
    %180 = arith.mulf %179, %176 : vector<8x512xf32>
    %c2_127 = arith.constant 2 : index
    %c2_128 = arith.constant 2 : index
    %181 = memref.load %arg0[%c2_127, %c2_128] : memref<6x5xf32, #tpu.memory_space<smem>>
    %182 = vector.broadcast %181 : f32 to vector<8x512xf32>
    %183 = arith.mulf %182, %177 : vector<8x512xf32>
    %184 = arith.addf %180, %183 : vector<8x512xf32>
    %c2_129 = arith.constant 2 : index
    %c1_130 = arith.constant 1 : index
    %185 = memref.load %arg0[%c2_129, %c1_130] : memref<6x5xf32, #tpu.memory_space<smem>>
    %186 = vector.broadcast %185 : f32 to vector<8x512xf32>
    %187 = arith.mulf %186, %97 : vector<8x512xf32>
    %188 = arith.addf %184, %187 : vector<8x512xf32>
    %c2_131 = arith.constant 2 : index
    %c4_132 = arith.constant 4 : index
    %189 = memref.load %arg0[%c2_131, %c4_132] : memref<6x5xf32, #tpu.memory_space<smem>>
    %190 = vector.broadcast %189 : f32 to vector<8x512xf32>
    %191 = arith.mulf %190, %175 : vector<8x512xf32>
    %192 = arith.addf %188, %191 : vector<8x512xf32>
    %193 = arith.addf %114, %192 : vector<8x512xf32>
    %194 = vector.extract_strided_slice %169 {offsets = [8, 0], sizes = [8, 512], strides = [1, 1]} : vector<32x512xf32> to vector<8x512xf32>
    %195 = vector.extract_strided_slice %169 {offsets = [24, 0], sizes = [8, 512], strides = [1, 1]} : vector<32x512xf32> to vector<8x512xf32>
    %c4_133 = arith.constant 4 : index
    %c3_134 = arith.constant 3 : index
    %196 = memref.load %arg0[%c4_133, %c3_134] : memref<6x5xf32, #tpu.memory_space<smem>>
    %197 = vector.broadcast %196 : f32 to vector<8x512xf32>
    %198 = arith.mulf %197, %194 : vector<8x512xf32>
    %c4_135 = arith.constant 4 : index
    %c2_136 = arith.constant 2 : index
    %199 = memref.load %arg0[%c4_135, %c2_136] : memref<6x5xf32, #tpu.memory_space<smem>>
    %200 = vector.broadcast %199 : f32 to vector<8x512xf32>
    %201 = arith.mulf %200, %195 : vector<8x512xf32>
    %202 = arith.addf %198, %201 : vector<8x512xf32>
    %c4_137 = arith.constant 4 : index
    %c1_138 = arith.constant 1 : index
    %203 = memref.load %arg0[%c4_137, %c1_138] : memref<6x5xf32, #tpu.memory_space<smem>>
    %204 = vector.broadcast %203 : f32 to vector<8x512xf32>
    %205 = arith.mulf %204, %97 : vector<8x512xf32>
    %206 = arith.addf %202, %205 : vector<8x512xf32>
    %c4_139 = arith.constant 4 : index
    %c4_140 = arith.constant 4 : index
    %207 = memref.load %arg0[%c4_139, %c4_140] : memref<6x5xf32, #tpu.memory_space<smem>>
    %208 = vector.broadcast %207 : f32 to vector<8x512xf32>
    %209 = arith.mulf %208, %175 : vector<8x512xf32>
    %210 = arith.addf %206, %209 : vector<8x512xf32>
    %211 = arith.addf %131, %210 : vector<8x512xf32>
    %cst_141 = arith.constant 0.000000e+00 : f32
    %212 = vector.broadcast %cst_141 : f32 to vector<8x512xf32>
    %213 = arith.maximumf %193, %212 : vector<8x512xf32>
    %c0_142 = arith.constant 0 : index
    %c0_143 = arith.constant 0 : index
    %c0_144 = arith.constant 0 : index
    %214 = vector.load %arg29[%c0_142, %c0_143, %c0_144] : memref<9x8x512xf32, #tpu.memory_space<vmem>>, vector<1x8x512xf32>
    %215 = vector.shape_cast %214 : vector<1x8x512xf32> to vector<8x512xf32>
    %c17_i32_145 = arith.constant 17 : i32
    %216 = tpu.dynamic_rotate %213 by %c17_i32_145 dim 1 : vector<8x512xf32>, i32 -> vector<8x512xf32>
    %217 = arith.mulf %215, %216 : vector<8x512xf32>
    %c1_146 = arith.constant 1 : index
    %c0_147 = arith.constant 0 : index
    %c0_148 = arith.constant 0 : index
    %218 = vector.load %arg29[%c1_146, %c0_147, %c0_148] : memref<9x8x512xf32, #tpu.memory_space<vmem>>, vector<1x8x512xf32>
    %219 = vector.shape_cast %218 : vector<1x8x512xf32> to vector<8x512xf32>
    %c16_i32_149 = arith.constant 16 : i32
    %220 = tpu.dynamic_rotate %213 by %c16_i32_149 dim 1 : vector<8x512xf32>, i32 -> vector<8x512xf32>
    %221 = arith.mulf %219, %220 : vector<8x512xf32>
    %c2_150 = arith.constant 2 : index
    %c0_151 = arith.constant 0 : index
    %c0_152 = arith.constant 0 : index
    %222 = vector.load %arg29[%c2_150, %c0_151, %c0_152] : memref<9x8x512xf32, #tpu.memory_space<vmem>>, vector<1x8x512xf32>
    %223 = vector.shape_cast %222 : vector<1x8x512xf32> to vector<8x512xf32>
    %c15_i32_153 = arith.constant 15 : i32
    %224 = tpu.dynamic_rotate %213 by %c15_i32_153 dim 1 : vector<8x512xf32>, i32 -> vector<8x512xf32>
    %225 = arith.mulf %223, %224 : vector<8x512xf32>
    %c3_154 = arith.constant 3 : index
    %c0_155 = arith.constant 0 : index
    %c0_156 = arith.constant 0 : index
    %226 = vector.load %arg29[%c3_154, %c0_155, %c0_156] : memref<9x8x512xf32, #tpu.memory_space<vmem>>, vector<1x8x512xf32>
    %227 = vector.shape_cast %226 : vector<1x8x512xf32> to vector<8x512xf32>
    %c1_i32_157 = arith.constant 1 : i32
    %228 = tpu.dynamic_rotate %213 by %c1_i32_157 dim 1 : vector<8x512xf32>, i32 -> vector<8x512xf32>
    %229 = arith.mulf %227, %228 : vector<8x512xf32>
    %c5_158 = arith.constant 5 : index
    %c0_159 = arith.constant 0 : index
    %c0_160 = arith.constant 0 : index
    %230 = vector.load %arg29[%c5_158, %c0_159, %c0_160] : memref<9x8x512xf32, #tpu.memory_space<vmem>>, vector<1x8x512xf32>
    %231 = vector.shape_cast %230 : vector<1x8x512xf32> to vector<8x512xf32>
    %c511_i32_161 = arith.constant 511 : i32
    %232 = tpu.dynamic_rotate %213 by %c511_i32_161 dim 1 : vector<8x512xf32>, i32 -> vector<8x512xf32>
    %233 = arith.mulf %231, %232 : vector<8x512xf32>
    %c6_162 = arith.constant 6 : index
    %c0_163 = arith.constant 0 : index
    %c0_164 = arith.constant 0 : index
    %234 = vector.load %arg29[%c6_162, %c0_163, %c0_164] : memref<9x8x512xf32, #tpu.memory_space<vmem>>, vector<1x8x512xf32>
    %235 = vector.shape_cast %234 : vector<1x8x512xf32> to vector<8x512xf32>
    %c497_i32_165 = arith.constant 497 : i32
    %236 = tpu.dynamic_rotate %213 by %c497_i32_165 dim 1 : vector<8x512xf32>, i32 -> vector<8x512xf32>
    %237 = arith.mulf %235, %236 : vector<8x512xf32>
    %c7_166 = arith.constant 7 : index
    %c0_167 = arith.constant 0 : index
    %c0_168 = arith.constant 0 : index
    %238 = vector.load %arg29[%c7_166, %c0_167, %c0_168] : memref<9x8x512xf32, #tpu.memory_space<vmem>>, vector<1x8x512xf32>
    %239 = vector.shape_cast %238 : vector<1x8x512xf32> to vector<8x512xf32>
    %c496_i32_169 = arith.constant 496 : i32
    %240 = tpu.dynamic_rotate %213 by %c496_i32_169 dim 1 : vector<8x512xf32>, i32 -> vector<8x512xf32>
    %241 = arith.mulf %239, %240 : vector<8x512xf32>
    %c8_170 = arith.constant 8 : index
    %c0_171 = arith.constant 0 : index
    %c0_172 = arith.constant 0 : index
    %242 = vector.load %arg29[%c8_170, %c0_171, %c0_172] : memref<9x8x512xf32, #tpu.memory_space<vmem>>, vector<1x8x512xf32>
    %243 = vector.shape_cast %242 : vector<1x8x512xf32> to vector<8x512xf32>
    %c495_i32_173 = arith.constant 495 : i32
    %244 = tpu.dynamic_rotate %213 by %c495_i32_173 dim 1 : vector<8x512xf32>, i32 -> vector<8x512xf32>
    %245 = arith.mulf %243, %244 : vector<8x512xf32>
    %246 = tpu.concatenate %217, %221, %225, %229, %213, %233, %237, %241, %245 in 0 : vector<8x512xf32>, vector<8x512xf32>, vector<8x512xf32>, vector<8x512xf32>, vector<8x512xf32>, vector<8x512xf32>, vector<8x512xf32>, vector<8x512xf32>, vector<8x512xf32> -> vector<72x512xf32>
    %247 = arith.truncf %246 : vector<72x512xf32> to vector<72x512xbf16>
    %c0_174 = arith.constant 0 : index
    %c0_175 = arith.constant 0 : index
    %248 = vector.load %arg6[%c0_174, %c0_175] : memref<16x72xbf16, #tpu.memory_space<vmem>>, vector<16x72xbf16>
    %cst_176 = arith.constant dense<0.000000e+00> : vector<16x512xf32>
    %249 = tpu.matmul %248, %247, %cst_176 {dimension_numbers = #tpu.dot_dimension_numbers<[1], [0], [0], [1], [0, 0, 1, 1], [], []>} : vector<16x72xbf16>, vector<72x512xbf16>, vector<16x512xf32> -> vector<16x512xf32>
    %250 = arith.truncf %193 : vector<8x512xf32> to vector<8x512xbf16>
    %c0_177 = arith.constant 0 : index
    %c0_178 = arith.constant 0 : index
    %251 = vector.load %arg1[%c0_177, %c0_178] : memref<512x512xbf16, #tpu.memory_space<vmem>>, vector<512x512xbf16>
    %cst_179 = arith.constant dense<0.000000e+00> : vector<8x512xf32>
    %252 = tpu.matmul %250, %251, %cst_179 {dimension_numbers = #tpu.dot_dimension_numbers<[1], [0], [0], [1], [0, 0, 1, 1], [], []>} : vector<8x512xbf16>, vector<512x512xbf16>, vector<8x512xf32> -> vector<8x512xf32>
    %c0_180 = arith.constant 0 : index
    %c0_181 = arith.constant 0 : index
    %253 = vector.load %arg26[%c0_180, %c0_181] : memref<1x512xf32, #tpu.memory_space<vmem>>, vector<1x512xf32>
    %254 = vector.broadcast %253 : vector<1x512xf32> to vector<8x512xf32>
    %255 = arith.mulf %252, %254 : vector<8x512xf32>
    %256 = vector.extract_strided_slice %249 {offsets = [0, 0], sizes = [8, 512], strides = [1, 1]} : vector<16x512xf32> to vector<8x512xf32>
    %257 = vector.extract_strided_slice %249 {offsets = [8, 0], sizes = [8, 512], strides = [1, 1]} : vector<16x512xf32> to vector<8x512xf32>
    %c5_182 = arith.constant 5 : index
    %c3_183 = arith.constant 3 : index
    %258 = memref.load %arg0[%c5_182, %c3_183] : memref<6x5xf32, #tpu.memory_space<smem>>
    %259 = vector.broadcast %258 : f32 to vector<8x512xf32>
    %260 = arith.mulf %259, %256 : vector<8x512xf32>
    %c5_184 = arith.constant 5 : index
    %c2_185 = arith.constant 2 : index
    %261 = memref.load %arg0[%c5_184, %c2_185] : memref<6x5xf32, #tpu.memory_space<smem>>
    %262 = vector.broadcast %261 : f32 to vector<8x512xf32>
    %263 = arith.mulf %262, %257 : vector<8x512xf32>
    %264 = arith.addf %260, %263 : vector<8x512xf32>
    %c5_186 = arith.constant 5 : index
    %c1_187 = arith.constant 1 : index
    %265 = memref.load %arg0[%c5_186, %c1_187] : memref<6x5xf32, #tpu.memory_space<smem>>
    %266 = vector.broadcast %265 : f32 to vector<8x512xf32>
    %267 = arith.mulf %266, %193 : vector<8x512xf32>
    %268 = arith.addf %264, %267 : vector<8x512xf32>
    %c5_188 = arith.constant 5 : index
    %c4_189 = arith.constant 4 : index
    %269 = memref.load %arg0[%c5_188, %c4_189] : memref<6x5xf32, #tpu.memory_space<smem>>
    %270 = vector.broadcast %269 : f32 to vector<8x512xf32>
    %271 = arith.mulf %270, %255 : vector<8x512xf32>
    %272 = arith.addf %268, %271 : vector<8x512xf32>
    %273 = arith.addf %211, %272 : vector<8x512xf32>
    %c0_190 = arith.constant 0 : index
    %c0_191 = arith.constant 0 : index
    %274 = vector.load %arg9[%c0_190, %c0_191] : memref<8x72xbf16, #tpu.memory_space<vmem>>, vector<8x72xbf16>
    %cst_192 = arith.constant 0.000000e+00 : f32
    %275 = vector.broadcast %cst_192 : f32 to vector<8x512xf32>
    %276 = arith.maximumf %273, %275 : vector<8x512xf32>
    %c0_193 = arith.constant 0 : index
    %c0_194 = arith.constant 0 : index
    %c0_195 = arith.constant 0 : index
    %277 = vector.load %arg29[%c0_193, %c0_194, %c0_195] : memref<9x8x512xf32, #tpu.memory_space<vmem>>, vector<1x8x512xf32>
    %278 = vector.shape_cast %277 : vector<1x8x512xf32> to vector<8x512xf32>
    %c17_i32_196 = arith.constant 17 : i32
    %279 = tpu.dynamic_rotate %276 by %c17_i32_196 dim 1 : vector<8x512xf32>, i32 -> vector<8x512xf32>
    %280 = arith.mulf %278, %279 : vector<8x512xf32>
    %c1_197 = arith.constant 1 : index
    %c0_198 = arith.constant 0 : index
    %c0_199 = arith.constant 0 : index
    %281 = vector.load %arg29[%c1_197, %c0_198, %c0_199] : memref<9x8x512xf32, #tpu.memory_space<vmem>>, vector<1x8x512xf32>
    %282 = vector.shape_cast %281 : vector<1x8x512xf32> to vector<8x512xf32>
    %c16_i32_200 = arith.constant 16 : i32
    %283 = tpu.dynamic_rotate %276 by %c16_i32_200 dim 1 : vector<8x512xf32>, i32 -> vector<8x512xf32>
    %284 = arith.mulf %282, %283 : vector<8x512xf32>
    %c2_201 = arith.constant 2 : index
    %c0_202 = arith.constant 0 : index
    %c0_203 = arith.constant 0 : index
    %285 = vector.load %arg29[%c2_201, %c0_202, %c0_203] : memref<9x8x512xf32, #tpu.memory_space<vmem>>, vector<1x8x512xf32>
    %286 = vector.shape_cast %285 : vector<1x8x512xf32> to vector<8x512xf32>
    %c15_i32_204 = arith.constant 15 : i32
    %287 = tpu.dynamic_rotate %276 by %c15_i32_204 dim 1 : vector<8x512xf32>, i32 -> vector<8x512xf32>
    %288 = arith.mulf %286, %287 : vector<8x512xf32>
    %c3_205 = arith.constant 3 : index
    %c0_206 = arith.constant 0 : index
    %c0_207 = arith.constant 0 : index
    %289 = vector.load %arg29[%c3_205, %c0_206, %c0_207] : memref<9x8x512xf32, #tpu.memory_space<vmem>>, vector<1x8x512xf32>
    %290 = vector.shape_cast %289 : vector<1x8x512xf32> to vector<8x512xf32>
    %c1_i32_208 = arith.constant 1 : i32
    %291 = tpu.dynamic_rotate %276 by %c1_i32_208 dim 1 : vector<8x512xf32>, i32 -> vector<8x512xf32>
    %292 = arith.mulf %290, %291 : vector<8x512xf32>
    %c5_209 = arith.constant 5 : index
    %c0_210 = arith.constant 0 : index
    %c0_211 = arith.constant 0 : index
    %293 = vector.load %arg29[%c5_209, %c0_210, %c0_211] : memref<9x8x512xf32, #tpu.memory_space<vmem>>, vector<1x8x512xf32>
    %294 = vector.shape_cast %293 : vector<1x8x512xf32> to vector<8x512xf32>
    %c511_i32_212 = arith.constant 511 : i32
    %295 = tpu.dynamic_rotate %276 by %c511_i32_212 dim 1 : vector<8x512xf32>, i32 -> vector<8x512xf32>
    %296 = arith.mulf %294, %295 : vector<8x512xf32>
    %c6_213 = arith.constant 6 : index
    %c0_214 = arith.constant 0 : index
    %c0_215 = arith.constant 0 : index
    %297 = vector.load %arg29[%c6_213, %c0_214, %c0_215] : memref<9x8x512xf32, #tpu.memory_space<vmem>>, vector<1x8x512xf32>
    %298 = vector.shape_cast %297 : vector<1x8x512xf32> to vector<8x512xf32>
    %c497_i32_216 = arith.constant 497 : i32
    %299 = tpu.dynamic_rotate %276 by %c497_i32_216 dim 1 : vector<8x512xf32>, i32 -> vector<8x512xf32>
    %300 = arith.mulf %298, %299 : vector<8x512xf32>
    %c7_217 = arith.constant 7 : index
    %c0_218 = arith.constant 0 : index
    %c0_219 = arith.constant 0 : index
    %301 = vector.load %arg29[%c7_217, %c0_218, %c0_219] : memref<9x8x512xf32, #tpu.memory_space<vmem>>, vector<1x8x512xf32>
    %302 = vector.shape_cast %301 : vector<1x8x512xf32> to vector<8x512xf32>
    %c496_i32_220 = arith.constant 496 : i32
    %303 = tpu.dynamic_rotate %276 by %c496_i32_220 dim 1 : vector<8x512xf32>, i32 -> vector<8x512xf32>
    %304 = arith.mulf %302, %303 : vector<8x512xf32>
    %c8_221 = arith.constant 8 : index
    %c0_222 = arith.constant 0 : index
    %c0_223 = arith.constant 0 : index
    %305 = vector.load %arg29[%c8_221, %c0_222, %c0_223] : memref<9x8x512xf32, #tpu.memory_space<vmem>>, vector<1x8x512xf32>
    %306 = vector.shape_cast %305 : vector<1x8x512xf32> to vector<8x512xf32>
    %c495_i32_224 = arith.constant 495 : i32
    %307 = tpu.dynamic_rotate %276 by %c495_i32_224 dim 1 : vector<8x512xf32>, i32 -> vector<8x512xf32>
    %308 = arith.mulf %306, %307 : vector<8x512xf32>
    %309 = tpu.concatenate %280, %284, %288, %292, %276, %296, %300, %304, %308 in 0 : vector<8x512xf32>, vector<8x512xf32>, vector<8x512xf32>, vector<8x512xf32>, vector<8x512xf32>, vector<8x512xf32>, vector<8x512xf32>, vector<8x512xf32>, vector<8x512xf32> -> vector<72x512xf32>
    %310 = arith.truncf %309 : vector<72x512xf32> to vector<72x512xbf16>
    %cst_225 = arith.constant dense<0.000000e+00> : vector<8x512xf32>
    %311 = tpu.matmul %274, %310, %cst_225 {dimension_numbers = #tpu.dot_dimension_numbers<[1], [0], [0], [1], [0, 0, 1, 1], [], []>} : vector<8x72xbf16>, vector<72x512xbf16>, vector<8x512xf32> -> vector<8x512xf32>
    %312 = arith.truncf %311 : vector<8x512xf32> to vector<8x512xbf16>
    %c0_226 = arith.constant 0 : index
    %c0_227 = arith.constant 0 : index
    %313 = vector.load %arg8[%c0_226, %c0_227] : memref<512x128xbf16, #tpu.memory_space<vmem>>, vector<512x128xbf16>
    %cst_228 = arith.constant dense<0.000000e+00> : vector<8x128xf32>
    %314 = tpu.matmul %312, %313, %cst_228 {dimension_numbers = #tpu.dot_dimension_numbers<[1], [0], [0], [1], [0, 0, 1, 1], [], []>} : vector<8x512xbf16>, vector<512x128xbf16>, vector<8x128xf32> -> vector<8x128xf32>
    %c0_229 = arith.constant 0 : index
    %c0_230 = arith.constant 0 : index
    %315 = vector.load %arg10[%c0_229, %c0_230] : memref<8x72xbf16, #tpu.memory_space<vmem>>, vector<8x72xbf16>
    %cst_231 = arith.constant 0.000000e+00 : f32
    %316 = vector.broadcast %cst_231 : f32 to vector<8x128xf32>
    %317 = arith.maximumf %314, %316 : vector<8x128xf32>
    %c0_232 = arith.constant 0 : index
    %c0_233 = arith.constant 0 : index
    %c0_234 = arith.constant 0 : index
    %318 = vector.load %arg30[%c0_232, %c0_233, %c0_234] : memref<9x8x128xf32, #tpu.memory_space<vmem>>, vector<1x8x128xf32>
    %319 = vector.shape_cast %318 : vector<1x8x128xf32> to vector<8x128xf32>
    %c9_i32 = arith.constant 9 : i32
    %320 = tpu.dynamic_rotate %317 by %c9_i32 dim 1 : vector<8x128xf32>, i32 -> vector<8x128xf32>
    %321 = arith.mulf %319, %320 : vector<8x128xf32>
    %c1_235 = arith.constant 1 : index
    %c0_236 = arith.constant 0 : index
    %c0_237 = arith.constant 0 : index
    %322 = vector.load %arg30[%c1_235, %c0_236, %c0_237] : memref<9x8x128xf32, #tpu.memory_space<vmem>>, vector<1x8x128xf32>
    %323 = vector.shape_cast %322 : vector<1x8x128xf32> to vector<8x128xf32>
    %c8_i32 = arith.constant 8 : i32
    %324 = tpu.dynamic_rotate %317 by %c8_i32 dim 1 : vector<8x128xf32>, i32 -> vector<8x128xf32>
    %325 = arith.mulf %323, %324 : vector<8x128xf32>
    %c2_238 = arith.constant 2 : index
    %c0_239 = arith.constant 0 : index
    %c0_240 = arith.constant 0 : index
    %326 = vector.load %arg30[%c2_238, %c0_239, %c0_240] : memref<9x8x128xf32, #tpu.memory_space<vmem>>, vector<1x8x128xf32>
    %327 = vector.shape_cast %326 : vector<1x8x128xf32> to vector<8x128xf32>
    %c7_i32 = arith.constant 7 : i32
    %328 = tpu.dynamic_rotate %317 by %c7_i32 dim 1 : vector<8x128xf32>, i32 -> vector<8x128xf32>
    %329 = arith.mulf %327, %328 : vector<8x128xf32>
    %c3_241 = arith.constant 3 : index
    %c0_242 = arith.constant 0 : index
    %c0_243 = arith.constant 0 : index
    %330 = vector.load %arg30[%c3_241, %c0_242, %c0_243] : memref<9x8x128xf32, #tpu.memory_space<vmem>>, vector<1x8x128xf32>
    %331 = vector.shape_cast %330 : vector<1x8x128xf32> to vector<8x128xf32>
    %c1_i32_244 = arith.constant 1 : i32
    %332 = tpu.dynamic_rotate %317 by %c1_i32_244 dim 1 : vector<8x128xf32>, i32 -> vector<8x128xf32>
    %333 = arith.mulf %331, %332 : vector<8x128xf32>
    %c5_245 = arith.constant 5 : index
    %c0_246 = arith.constant 0 : index
    %c0_247 = arith.constant 0 : index
    %334 = vector.load %arg30[%c5_245, %c0_246, %c0_247] : memref<9x8x128xf32, #tpu.memory_space<vmem>>, vector<1x8x128xf32>
    %335 = vector.shape_cast %334 : vector<1x8x128xf32> to vector<8x128xf32>
    %c127_i32 = arith.constant 127 : i32
    %336 = tpu.dynamic_rotate %317 by %c127_i32 dim 1 : vector<8x128xf32>, i32 -> vector<8x128xf32>
    %337 = arith.mulf %335, %336 : vector<8x128xf32>
    %c6_248 = arith.constant 6 : index
    %c0_249 = arith.constant 0 : index
    %c0_250 = arith.constant 0 : index
    %338 = vector.load %arg30[%c6_248, %c0_249, %c0_250] : memref<9x8x128xf32, #tpu.memory_space<vmem>>, vector<1x8x128xf32>
    %339 = vector.shape_cast %338 : vector<1x8x128xf32> to vector<8x128xf32>
    %c121_i32 = arith.constant 121 : i32
    %340 = tpu.dynamic_rotate %317 by %c121_i32 dim 1 : vector<8x128xf32>, i32 -> vector<8x128xf32>
    %341 = arith.mulf %339, %340 : vector<8x128xf32>
    %c7_251 = arith.constant 7 : index
    %c0_252 = arith.constant 0 : index
    %c0_253 = arith.constant 0 : index
    %342 = vector.load %arg30[%c7_251, %c0_252, %c0_253] : memref<9x8x128xf32, #tpu.memory_space<vmem>>, vector<1x8x128xf32>
    %343 = vector.shape_cast %342 : vector<1x8x128xf32> to vector<8x128xf32>
    %c120_i32 = arith.constant 120 : i32
    %344 = tpu.dynamic_rotate %317 by %c120_i32 dim 1 : vector<8x128xf32>, i32 -> vector<8x128xf32>
    %345 = arith.mulf %343, %344 : vector<8x128xf32>
    %c8_254 = arith.constant 8 : index
    %c0_255 = arith.constant 0 : index
    %c0_256 = arith.constant 0 : index
    %346 = vector.load %arg30[%c8_254, %c0_255, %c0_256] : memref<9x8x128xf32, #tpu.memory_space<vmem>>, vector<1x8x128xf32>
    %347 = vector.shape_cast %346 : vector<1x8x128xf32> to vector<8x128xf32>
    %c119_i32 = arith.constant 119 : i32
    %348 = tpu.dynamic_rotate %317 by %c119_i32 dim 1 : vector<8x128xf32>, i32 -> vector<8x128xf32>
    %349 = arith.mulf %347, %348 : vector<8x128xf32>
    %350 = tpu.concatenate %321, %325, %329, %333, %317, %337, %341, %345, %349 in 0 : vector<8x128xf32>, vector<8x128xf32>, vector<8x128xf32>, vector<8x128xf32>, vector<8x128xf32>, vector<8x128xf32>, vector<8x128xf32>, vector<8x128xf32>, vector<8x128xf32> -> vector<72x128xf32>
    %351 = arith.truncf %350 : vector<72x128xf32> to vector<72x128xbf16>
    %cst_257 = arith.constant dense<0.000000e+00> : vector<8x128xf32>
    %352 = tpu.matmul %315, %351, %cst_257 {dimension_numbers = #tpu.dot_dimension_numbers<[1], [0], [0], [1], [0, 0, 1, 1], [], []>} : vector<8x72xbf16>, vector<72x128xbf16>, vector<8x128xf32> -> vector<8x128xf32>
    %353 = arith.truncf %273 : vector<8x512xf32> to vector<8x512xbf16>
    %c0_258 = arith.constant 0 : index
    %c0_259 = arith.constant 0 : index
    %354 = vector.load %arg7[%c0_258, %c0_259] : memref<512x128xbf16, #tpu.memory_space<vmem>>, vector<512x128xbf16>
    %cst_260 = arith.constant dense<0.000000e+00> : vector<8x128xf32>
    %355 = tpu.matmul %353, %354, %cst_260 {dimension_numbers = #tpu.dot_dimension_numbers<[1], [0], [0], [1], [0, 0, 1, 1], [], []>} : vector<8x512xbf16>, vector<512x128xbf16>, vector<8x128xf32> -> vector<8x128xf32>
    %c0_261 = arith.constant 0 : index
    %c0_262 = arith.constant 0 : index
    %356 = vector.load %arg11[%c0_261, %c0_262] : memref<8x8xbf16, #tpu.memory_space<vmem>>, vector<8x8xbf16>
    %357 = arith.truncf %355 : vector<8x128xf32> to vector<8x128xbf16>
    %cst_263 = arith.constant dense<0.000000e+00> : vector<8x128xf32>
    %358 = tpu.matmul %356, %357, %cst_263 {dimension_numbers = #tpu.dot_dimension_numbers<[1], [0], [0], [1], [0, 0, 1, 1], [], []>} : vector<8x8xbf16>, vector<8x128xbf16>, vector<8x128xf32> -> vector<8x128xf32>
    %359 = arith.addf %352, %358 : vector<8x128xf32>
    %cst_264 = arith.constant 0.000000e+00 : f32
    %360 = vector.broadcast %cst_264 : f32 to vector<8x128xf32>
    %361 = arith.maximumf %359, %360 : vector<8x128xf32>
    %c0_265 = arith.constant 0 : index
    %c0_266 = arith.constant 0 : index
    %c0_267 = arith.constant 0 : index
    %362 = vector.load %arg30[%c0_265, %c0_266, %c0_267] : memref<9x8x128xf32, #tpu.memory_space<vmem>>, vector<1x8x128xf32>
    %363 = vector.shape_cast %362 : vector<1x8x128xf32> to vector<8x128xf32>
    %c9_i32_268 = arith.constant 9 : i32
    %364 = tpu.dynamic_rotate %361 by %c9_i32_268 dim 1 : vector<8x128xf32>, i32 -> vector<8x128xf32>
    %365 = arith.mulf %363, %364 : vector<8x128xf32>
    %c1_269 = arith.constant 1 : index
    %c0_270 = arith.constant 0 : index
    %c0_271 = arith.constant 0 : index
    %366 = vector.load %arg30[%c1_269, %c0_270, %c0_271] : memref<9x8x128xf32, #tpu.memory_space<vmem>>, vector<1x8x128xf32>
    %367 = vector.shape_cast %366 : vector<1x8x128xf32> to vector<8x128xf32>
    %c8_i32_272 = arith.constant 8 : i32
    %368 = tpu.dynamic_rotate %361 by %c8_i32_272 dim 1 : vector<8x128xf32>, i32 -> vector<8x128xf32>
    %369 = arith.mulf %367, %368 : vector<8x128xf32>
    %c2_273 = arith.constant 2 : index
    %c0_274 = arith.constant 0 : index
    %c0_275 = arith.constant 0 : index
    %370 = vector.load %arg30[%c2_273, %c0_274, %c0_275] : memref<9x8x128xf32, #tpu.memory_space<vmem>>, vector<1x8x128xf32>
    %371 = vector.shape_cast %370 : vector<1x8x128xf32> to vector<8x128xf32>
    %c7_i32_276 = arith.constant 7 : i32
    %372 = tpu.dynamic_rotate %361 by %c7_i32_276 dim 1 : vector<8x128xf32>, i32 -> vector<8x128xf32>
    %373 = arith.mulf %371, %372 : vector<8x128xf32>
    %c3_277 = arith.constant 3 : index
    %c0_278 = arith.constant 0 : index
    %c0_279 = arith.constant 0 : index
    %374 = vector.load %arg30[%c3_277, %c0_278, %c0_279] : memref<9x8x128xf32, #tpu.memory_space<vmem>>, vector<1x8x128xf32>
    %375 = vector.shape_cast %374 : vector<1x8x128xf32> to vector<8x128xf32>
    %c1_i32_280 = arith.constant 1 : i32
    %376 = tpu.dynamic_rotate %361 by %c1_i32_280 dim 1 : vector<8x128xf32>, i32 -> vector<8x128xf32>
    %377 = arith.mulf %375, %376 : vector<8x128xf32>
    %c5_281 = arith.constant 5 : index
    %c0_282 = arith.constant 0 : index
    %c0_283 = arith.constant 0 : index
    %378 = vector.load %arg30[%c5_281, %c0_282, %c0_283] : memref<9x8x128xf32, #tpu.memory_space<vmem>>, vector<1x8x128xf32>
    %379 = vector.shape_cast %378 : vector<1x8x128xf32> to vector<8x128xf32>
    %c127_i32_284 = arith.constant 127 : i32
    %380 = tpu.dynamic_rotate %361 by %c127_i32_284 dim 1 : vector<8x128xf32>, i32 -> vector<8x128xf32>
    %381 = arith.mulf %379, %380 : vector<8x128xf32>
    %c6_285 = arith.constant 6 : index
    %c0_286 = arith.constant 0 : index
    %c0_287 = arith.constant 0 : index
    %382 = vector.load %arg30[%c6_285, %c0_286, %c0_287] : memref<9x8x128xf32, #tpu.memory_space<vmem>>, vector<1x8x128xf32>
    %383 = vector.shape_cast %382 : vector<1x8x128xf32> to vector<8x128xf32>
    %c121_i32_288 = arith.constant 121 : i32
    %384 = tpu.dynamic_rotate %361 by %c121_i32_288 dim 1 : vector<8x128xf32>, i32 -> vector<8x128xf32>
    %385 = arith.mulf %383, %384 : vector<8x128xf32>
    %c7_289 = arith.constant 7 : index
    %c0_290 = arith.constant 0 : index
    %c0_291 = arith.constant 0 : index
    %386 = vector.load %arg30[%c7_289, %c0_290, %c0_291] : memref<9x8x128xf32, #tpu.memory_space<vmem>>, vector<1x8x128xf32>
    %387 = vector.shape_cast %386 : vector<1x8x128xf32> to vector<8x128xf32>
    %c120_i32_292 = arith.constant 120 : i32
    %388 = tpu.dynamic_rotate %361 by %c120_i32_292 dim 1 : vector<8x128xf32>, i32 -> vector<8x128xf32>
    %389 = arith.mulf %387, %388 : vector<8x128xf32>
    %c8_293 = arith.constant 8 : index
    %c0_294 = arith.constant 0 : index
    %c0_295 = arith.constant 0 : index
    %390 = vector.load %arg30[%c8_293, %c0_294, %c0_295] : memref<9x8x128xf32, #tpu.memory_space<vmem>>, vector<1x8x128xf32>
    %391 = vector.shape_cast %390 : vector<1x8x128xf32> to vector<8x128xf32>
    %c119_i32_296 = arith.constant 119 : i32
    %392 = tpu.dynamic_rotate %361 by %c119_i32_296 dim 1 : vector<8x128xf32>, i32 -> vector<8x128xf32>
    %393 = arith.mulf %391, %392 : vector<8x128xf32>
    %394 = tpu.concatenate %365, %369, %373, %377, %361, %381, %385, %389, %393 in 0 : vector<8x128xf32>, vector<8x128xf32>, vector<8x128xf32>, vector<8x128xf32>, vector<8x128xf32>, vector<8x128xf32>, vector<8x128xf32>, vector<8x128xf32>, vector<8x128xf32> -> vector<72x128xf32>
    %395 = arith.truncf %394 : vector<72x128xf32> to vector<72x128xbf16>
    %c0_297 = arith.constant 0 : index
    %c0_298 = arith.constant 0 : index
    %396 = vector.load %arg12[%c0_297, %c0_298] : memref<48x72xbf16, #tpu.memory_space<vmem>>, vector<48x72xbf16>
    %cst_299 = arith.constant dense<0.000000e+00> : vector<48x128xf32>
    %397 = tpu.matmul %396, %395, %cst_299 {dimension_numbers = #tpu.dot_dimension_numbers<[1], [0], [0], [1], [0, 0, 1, 1], [], []>} : vector<48x72xbf16>, vector<72x128xbf16>, vector<48x128xf32> -> vector<48x128xf32>
    %398 = arith.truncf %359 : vector<8x128xf32> to vector<8x128xbf16>
    %c0_300 = arith.constant 0 : index
    %c0_301 = arith.constant 0 : index
    %399 = vector.load %arg2[%c0_300, %c0_301] : memref<128x128xbf16, #tpu.memory_space<vmem>>, vector<128x128xbf16>
    %cst_302 = arith.constant dense<0.000000e+00> : vector<8x128xf32>
    %400 = tpu.matmul %398, %399, %cst_302 {dimension_numbers = #tpu.dot_dimension_numbers<[1], [0], [0], [1], [0, 0, 1, 1], [], []>} : vector<8x128xbf16>, vector<128x128xbf16>, vector<8x128xf32> -> vector<8x128xf32>
    %c0_303 = arith.constant 0 : index
    %c0_304 = arith.constant 0 : index
    %401 = vector.load %arg27[%c0_303, %c0_304] : memref<1x128xf32, #tpu.memory_space<vmem>>, vector<1x128xf32>
    %402 = vector.broadcast %401 : vector<1x128xf32> to vector<8x128xf32>
    %403 = arith.mulf %400, %402 : vector<8x128xf32>
    %404 = vector.extract_strided_slice %397 {offsets = [0, 0], sizes = [8, 128], strides = [1, 1]} : vector<48x128xf32> to vector<8x128xf32>
    %405 = vector.extract_strided_slice %397 {offsets = [24, 0], sizes = [8, 128], strides = [1, 1]} : vector<48x128xf32> to vector<8x128xf32>
    %c0_305 = arith.constant 0 : index
    %c3_306 = arith.constant 3 : index
    %406 = memref.load %arg0[%c0_305, %c3_306] : memref<6x5xf32, #tpu.memory_space<smem>>
    %407 = vector.broadcast %406 : f32 to vector<8x128xf32>
    %408 = arith.mulf %407, %404 : vector<8x128xf32>
    %c0_307 = arith.constant 0 : index
    %c2_308 = arith.constant 2 : index
    %409 = memref.load %arg0[%c0_307, %c2_308] : memref<6x5xf32, #tpu.memory_space<smem>>
    %410 = vector.broadcast %409 : f32 to vector<8x128xf32>
    %411 = arith.mulf %410, %405 : vector<8x128xf32>
    %412 = arith.addf %408, %411 : vector<8x128xf32>
    %c0_309 = arith.constant 0 : index
    %c1_310 = arith.constant 1 : index
    %413 = memref.load %arg0[%c0_309, %c1_310] : memref<6x5xf32, #tpu.memory_space<smem>>
    %414 = vector.broadcast %413 : f32 to vector<8x128xf32>
    %415 = arith.mulf %414, %359 : vector<8x128xf32>
    %416 = arith.addf %412, %415 : vector<8x128xf32>
    %c0_311 = arith.constant 0 : index
    %c4_312 = arith.constant 4 : index
    %417 = memref.load %arg0[%c0_311, %c4_312] : memref<6x5xf32, #tpu.memory_space<smem>>
    %418 = vector.broadcast %417 : f32 to vector<8x128xf32>
    %419 = arith.mulf %418, %403 : vector<8x128xf32>
    %420 = arith.addf %416, %419 : vector<8x128xf32>
    %421 = vector.extract_strided_slice %397 {offsets = [8, 0], sizes = [8, 128], strides = [1, 1]} : vector<48x128xf32> to vector<8x128xf32>
    %422 = vector.extract_strided_slice %397 {offsets = [32, 0], sizes = [8, 128], strides = [1, 1]} : vector<48x128xf32> to vector<8x128xf32>
    %c1_313 = arith.constant 1 : index
    %c3_314 = arith.constant 3 : index
    %423 = memref.load %arg0[%c1_313, %c3_314] : memref<6x5xf32, #tpu.memory_space<smem>>
    %424 = vector.broadcast %423 : f32 to vector<8x128xf32>
    %425 = arith.mulf %424, %421 : vector<8x128xf32>
    %c1_315 = arith.constant 1 : index
    %c2_316 = arith.constant 2 : index
    %426 = memref.load %arg0[%c1_315, %c2_316] : memref<6x5xf32, #tpu.memory_space<smem>>
    %427 = vector.broadcast %426 : f32 to vector<8x128xf32>
    %428 = arith.mulf %427, %422 : vector<8x128xf32>
    %429 = arith.addf %425, %428 : vector<8x128xf32>
    %c1_317 = arith.constant 1 : index
    %c1_318 = arith.constant 1 : index
    %430 = memref.load %arg0[%c1_317, %c1_318] : memref<6x5xf32, #tpu.memory_space<smem>>
    %431 = vector.broadcast %430 : f32 to vector<8x128xf32>
    %432 = arith.mulf %431, %359 : vector<8x128xf32>
    %433 = arith.addf %429, %432 : vector<8x128xf32>
    %c1_319 = arith.constant 1 : index
    %c4_320 = arith.constant 4 : index
    %434 = memref.load %arg0[%c1_319, %c4_320] : memref<6x5xf32, #tpu.memory_space<smem>>
    %435 = vector.broadcast %434 : f32 to vector<8x128xf32>
    %436 = arith.mulf %435, %403 : vector<8x128xf32>
    %437 = arith.addf %433, %436 : vector<8x128xf32>
    %438 = vector.extract_strided_slice %397 {offsets = [16, 0], sizes = [8, 128], strides = [1, 1]} : vector<48x128xf32> to vector<8x128xf32>
    %439 = vector.extract_strided_slice %397 {offsets = [40, 0], sizes = [8, 128], strides = [1, 1]} : vector<48x128xf32> to vector<8x128xf32>
    %c3_321 = arith.constant 3 : index
    %c3_322 = arith.constant 3 : index
    %440 = memref.load %arg0[%c3_321, %c3_322] : memref<6x5xf32, #tpu.memory_space<smem>>
    %441 = vector.broadcast %440 : f32 to vector<8x128xf32>
    %442 = arith.mulf %441, %438 : vector<8x128xf32>
    %c3_323 = arith.constant 3 : index
    %c2_324 = arith.constant 2 : index
    %443 = memref.load %arg0[%c3_323, %c2_324] : memref<6x5xf32, #tpu.memory_space<smem>>
    %444 = vector.broadcast %443 : f32 to vector<8x128xf32>
    %445 = arith.mulf %444, %439 : vector<8x128xf32>
    %446 = arith.addf %442, %445 : vector<8x128xf32>
    %c3_325 = arith.constant 3 : index
    %c1_326 = arith.constant 1 : index
    %447 = memref.load %arg0[%c3_325, %c1_326] : memref<6x5xf32, #tpu.memory_space<smem>>
    %448 = vector.broadcast %447 : f32 to vector<8x128xf32>
    %449 = arith.mulf %448, %359 : vector<8x128xf32>
    %450 = arith.addf %446, %449 : vector<8x128xf32>
    %c3_327 = arith.constant 3 : index
    %c4_328 = arith.constant 4 : index
    %451 = memref.load %arg0[%c3_327, %c4_328] : memref<6x5xf32, #tpu.memory_space<smem>>
    %452 = vector.broadcast %451 : f32 to vector<8x128xf32>
    %453 = arith.mulf %452, %403 : vector<8x128xf32>
    %454 = arith.addf %450, %453 : vector<8x128xf32>
    %cst_329 = arith.constant 0.000000e+00 : f32
    %455 = vector.broadcast %cst_329 : f32 to vector<8x128xf32>
    %456 = arith.maximumf %420, %455 : vector<8x128xf32>
    %c0_330 = arith.constant 0 : index
    %c0_331 = arith.constant 0 : index
    %c0_332 = arith.constant 0 : index
    %457 = vector.load %arg30[%c0_330, %c0_331, %c0_332] : memref<9x8x128xf32, #tpu.memory_space<vmem>>, vector<1x8x128xf32>
    %458 = vector.shape_cast %457 : vector<1x8x128xf32> to vector<8x128xf32>
    %c9_i32_333 = arith.constant 9 : i32
    %459 = tpu.dynamic_rotate %456 by %c9_i32_333 dim 1 : vector<8x128xf32>, i32 -> vector<8x128xf32>
    %460 = arith.mulf %458, %459 : vector<8x128xf32>
    %c1_334 = arith.constant 1 : index
    %c0_335 = arith.constant 0 : index
    %c0_336 = arith.constant 0 : index
    %461 = vector.load %arg30[%c1_334, %c0_335, %c0_336] : memref<9x8x128xf32, #tpu.memory_space<vmem>>, vector<1x8x128xf32>
    %462 = vector.shape_cast %461 : vector<1x8x128xf32> to vector<8x128xf32>
    %c8_i32_337 = arith.constant 8 : i32
    %463 = tpu.dynamic_rotate %456 by %c8_i32_337 dim 1 : vector<8x128xf32>, i32 -> vector<8x128xf32>
    %464 = arith.mulf %462, %463 : vector<8x128xf32>
    %c2_338 = arith.constant 2 : index
    %c0_339 = arith.constant 0 : index
    %c0_340 = arith.constant 0 : index
    %465 = vector.load %arg30[%c2_338, %c0_339, %c0_340] : memref<9x8x128xf32, #tpu.memory_space<vmem>>, vector<1x8x128xf32>
    %466 = vector.shape_cast %465 : vector<1x8x128xf32> to vector<8x128xf32>
    %c7_i32_341 = arith.constant 7 : i32
    %467 = tpu.dynamic_rotate %456 by %c7_i32_341 dim 1 : vector<8x128xf32>, i32 -> vector<8x128xf32>
    %468 = arith.mulf %466, %467 : vector<8x128xf32>
    %c3_342 = arith.constant 3 : index
    %c0_343 = arith.constant 0 : index
    %c0_344 = arith.constant 0 : index
    %469 = vector.load %arg30[%c3_342, %c0_343, %c0_344] : memref<9x8x128xf32, #tpu.memory_space<vmem>>, vector<1x8x128xf32>
    %470 = vector.shape_cast %469 : vector<1x8x128xf32> to vector<8x128xf32>
    %c1_i32_345 = arith.constant 1 : i32
    %471 = tpu.dynamic_rotate %456 by %c1_i32_345 dim 1 : vector<8x128xf32>, i32 -> vector<8x128xf32>
    %472 = arith.mulf %470, %471 : vector<8x128xf32>
    %c5_346 = arith.constant 5 : index
    %c0_347 = arith.constant 0 : index
    %c0_348 = arith.constant 0 : index
    %473 = vector.load %arg30[%c5_346, %c0_347, %c0_348] : memref<9x8x128xf32, #tpu.memory_space<vmem>>, vector<1x8x128xf32>
    %474 = vector.shape_cast %473 : vector<1x8x128xf32> to vector<8x128xf32>
    %c127_i32_349 = arith.constant 127 : i32
    %475 = tpu.dynamic_rotate %456 by %c127_i32_349 dim 1 : vector<8x128xf32>, i32 -> vector<8x128xf32>
    %476 = arith.mulf %474, %475 : vector<8x128xf32>
    %c6_350 = arith.constant 6 : index
    %c0_351 = arith.constant 0 : index
    %c0_352 = arith.constant 0 : index
    %477 = vector.load %arg30[%c6_350, %c0_351, %c0_352] : memref<9x8x128xf32, #tpu.memory_space<vmem>>, vector<1x8x128xf32>
    %478 = vector.shape_cast %477 : vector<1x8x128xf32> to vector<8x128xf32>
    %c121_i32_353 = arith.constant 121 : i32
    %479 = tpu.dynamic_rotate %456 by %c121_i32_353 dim 1 : vector<8x128xf32>, i32 -> vector<8x128xf32>
    %480 = arith.mulf %478, %479 : vector<8x128xf32>
    %c7_354 = arith.constant 7 : index
    %c0_355 = arith.constant 0 : index
    %c0_356 = arith.constant 0 : index
    %481 = vector.load %arg30[%c7_354, %c0_355, %c0_356] : memref<9x8x128xf32, #tpu.memory_space<vmem>>, vector<1x8x128xf32>
    %482 = vector.shape_cast %481 : vector<1x8x128xf32> to vector<8x128xf32>
    %c120_i32_357 = arith.constant 120 : i32
    %483 = tpu.dynamic_rotate %456 by %c120_i32_357 dim 1 : vector<8x128xf32>, i32 -> vector<8x128xf32>
    %484 = arith.mulf %482, %483 : vector<8x128xf32>
    %c8_358 = arith.constant 8 : index
    %c0_359 = arith.constant 0 : index
    %c0_360 = arith.constant 0 : index
    %485 = vector.load %arg30[%c8_358, %c0_359, %c0_360] : memref<9x8x128xf32, #tpu.memory_space<vmem>>, vector<1x8x128xf32>
    %486 = vector.shape_cast %485 : vector<1x8x128xf32> to vector<8x128xf32>
    %c119_i32_361 = arith.constant 119 : i32
    %487 = tpu.dynamic_rotate %456 by %c119_i32_361 dim 1 : vector<8x128xf32>, i32 -> vector<8x128xf32>
    %488 = arith.mulf %486, %487 : vector<8x128xf32>
    %489 = tpu.concatenate %460, %464, %468, %472, %456, %476, %480, %484, %488 in 0 : vector<8x128xf32>, vector<8x128xf32>, vector<8x128xf32>, vector<8x128xf32>, vector<8x128xf32>, vector<8x128xf32>, vector<8x128xf32>, vector<8x128xf32>, vector<8x128xf32> -> vector<72x128xf32>
    %490 = arith.truncf %489 : vector<72x128xf32> to vector<72x128xbf16>
    %c0_362 = arith.constant 0 : index
    %c0_363 = arith.constant 0 : index
    %491 = vector.load %arg13[%c0_362, %c0_363] : memref<32x72xbf16, #tpu.memory_space<vmem>>, vector<32x72xbf16>
    %cst_364 = arith.constant dense<0.000000e+00> : vector<32x128xf32>
    %492 = tpu.matmul %491, %490, %cst_364 {dimension_numbers = #tpu.dot_dimension_numbers<[1], [0], [0], [1], [0, 0, 1, 1], [], []>} : vector<32x72xbf16>, vector<72x128xbf16>, vector<32x128xf32> -> vector<32x128xf32>
    %493 = arith.truncf %420 : vector<8x128xf32> to vector<8x128xbf16>
    %c0_365 = arith.constant 0 : index
    %c0_366 = arith.constant 0 : index
    %494 = vector.load %arg2[%c0_365, %c0_366] : memref<128x128xbf16, #tpu.memory_space<vmem>>, vector<128x128xbf16>
    %cst_367 = arith.constant dense<0.000000e+00> : vector<8x128xf32>
    %495 = tpu.matmul %493, %494, %cst_367 {dimension_numbers = #tpu.dot_dimension_numbers<[1], [0], [0], [1], [0, 0, 1, 1], [], []>} : vector<8x128xbf16>, vector<128x128xbf16>, vector<8x128xf32> -> vector<8x128xf32>
    %c0_368 = arith.constant 0 : index
    %c0_369 = arith.constant 0 : index
    %496 = vector.load %arg27[%c0_368, %c0_369] : memref<1x128xf32, #tpu.memory_space<vmem>>, vector<1x128xf32>
    %497 = vector.broadcast %496 : vector<1x128xf32> to vector<8x128xf32>
    %498 = arith.mulf %495, %497 : vector<8x128xf32>
    %499 = vector.extract_strided_slice %492 {offsets = [0, 0], sizes = [8, 128], strides = [1, 1]} : vector<32x128xf32> to vector<8x128xf32>
    %500 = vector.extract_strided_slice %492 {offsets = [16, 0], sizes = [8, 128], strides = [1, 1]} : vector<32x128xf32> to vector<8x128xf32>
    %c2_370 = arith.constant 2 : index
    %c3_371 = arith.constant 3 : index
    %501 = memref.load %arg0[%c2_370, %c3_371] : memref<6x5xf32, #tpu.memory_space<smem>>
    %502 = vector.broadcast %501 : f32 to vector<8x128xf32>
    %503 = arith.mulf %502, %499 : vector<8x128xf32>
    %c2_372 = arith.constant 2 : index
    %c2_373 = arith.constant 2 : index
    %504 = memref.load %arg0[%c2_372, %c2_373] : memref<6x5xf32, #tpu.memory_space<smem>>
    %505 = vector.broadcast %504 : f32 to vector<8x128xf32>
    %506 = arith.mulf %505, %500 : vector<8x128xf32>
    %507 = arith.addf %503, %506 : vector<8x128xf32>
    %c2_374 = arith.constant 2 : index
    %c1_375 = arith.constant 1 : index
    %508 = memref.load %arg0[%c2_374, %c1_375] : memref<6x5xf32, #tpu.memory_space<smem>>
    %509 = vector.broadcast %508 : f32 to vector<8x128xf32>
    %510 = arith.mulf %509, %420 : vector<8x128xf32>
    %511 = arith.addf %507, %510 : vector<8x128xf32>
    %c2_376 = arith.constant 2 : index
    %c4_377 = arith.constant 4 : index
    %512 = memref.load %arg0[%c2_376, %c4_377] : memref<6x5xf32, #tpu.memory_space<smem>>
    %513 = vector.broadcast %512 : f32 to vector<8x128xf32>
    %514 = arith.mulf %513, %498 : vector<8x128xf32>
    %515 = arith.addf %511, %514 : vector<8x128xf32>
    %516 = arith.addf %437, %515 : vector<8x128xf32>
    %517 = vector.extract_strided_slice %492 {offsets = [8, 0], sizes = [8, 128], strides = [1, 1]} : vector<32x128xf32> to vector<8x128xf32>
    %518 = vector.extract_strided_slice %492 {offsets = [24, 0], sizes = [8, 128], strides = [1, 1]} : vector<32x128xf32> to vector<8x128xf32>
    %c4_378 = arith.constant 4 : index
    %c3_379 = arith.constant 3 : index
    %519 = memref.load %arg0[%c4_378, %c3_379] : memref<6x5xf32, #tpu.memory_space<smem>>
    %520 = vector.broadcast %519 : f32 to vector<8x128xf32>
    %521 = arith.mulf %520, %517 : vector<8x128xf32>
    %c4_380 = arith.constant 4 : index
    %c2_381 = arith.constant 2 : index
    %522 = memref.load %arg0[%c4_380, %c2_381] : memref<6x5xf32, #tpu.memory_space<smem>>
    %523 = vector.broadcast %522 : f32 to vector<8x128xf32>
    %524 = arith.mulf %523, %518 : vector<8x128xf32>
    %525 = arith.addf %521, %524 : vector<8x128xf32>
    %c4_382 = arith.constant 4 : index
    %c1_383 = arith.constant 1 : index
    %526 = memref.load %arg0[%c4_382, %c1_383] : memref<6x5xf32, #tpu.memory_space<smem>>
    %527 = vector.broadcast %526 : f32 to vector<8x128xf32>
    %528 = arith.mulf %527, %420 : vector<8x128xf32>
    %529 = arith.addf %525, %528 : vector<8x128xf32>
    %c4_384 = arith.constant 4 : index
    %c4_385 = arith.constant 4 : index
    %530 = memref.load %arg0[%c4_384, %c4_385] : memref<6x5xf32, #tpu.memory_space<smem>>
    %531 = vector.broadcast %530 : f32 to vector<8x128xf32>
    %532 = arith.mulf %531, %498 : vector<8x128xf32>
    %533 = arith.addf %529, %532 : vector<8x128xf32>
    %534 = arith.addf %454, %533 : vector<8x128xf32>
    %cst_386 = arith.constant 0.000000e+00 : f32
    %535 = vector.broadcast %cst_386 : f32 to vector<8x128xf32>
    %536 = arith.maximumf %516, %535 : vector<8x128xf32>
    %c0_387 = arith.constant 0 : index
    %c0_388 = arith.constant 0 : index
    %c0_389 = arith.constant 0 : index
    %537 = vector.load %arg30[%c0_387, %c0_388, %c0_389] : memref<9x8x128xf32, #tpu.memory_space<vmem>>, vector<1x8x128xf32>
    %538 = vector.shape_cast %537 : vector<1x8x128xf32> to vector<8x128xf32>
    %c9_i32_390 = arith.constant 9 : i32
    %539 = tpu.dynamic_rotate %536 by %c9_i32_390 dim 1 : vector<8x128xf32>, i32 -> vector<8x128xf32>
    %540 = arith.mulf %538, %539 : vector<8x128xf32>
    %c1_391 = arith.constant 1 : index
    %c0_392 = arith.constant 0 : index
    %c0_393 = arith.constant 0 : index
    %541 = vector.load %arg30[%c1_391, %c0_392, %c0_393] : memref<9x8x128xf32, #tpu.memory_space<vmem>>, vector<1x8x128xf32>
    %542 = vector.shape_cast %541 : vector<1x8x128xf32> to vector<8x128xf32>
    %c8_i32_394 = arith.constant 8 : i32
    %543 = tpu.dynamic_rotate %536 by %c8_i32_394 dim 1 : vector<8x128xf32>, i32 -> vector<8x128xf32>
    %544 = arith.mulf %542, %543 : vector<8x128xf32>
    %c2_395 = arith.constant 2 : index
    %c0_396 = arith.constant 0 : index
    %c0_397 = arith.constant 0 : index
    %545 = vector.load %arg30[%c2_395, %c0_396, %c0_397] : memref<9x8x128xf32, #tpu.memory_space<vmem>>, vector<1x8x128xf32>
    %546 = vector.shape_cast %545 : vector<1x8x128xf32> to vector<8x128xf32>
    %c7_i32_398 = arith.constant 7 : i32
    %547 = tpu.dynamic_rotate %536 by %c7_i32_398 dim 1 : vector<8x128xf32>, i32 -> vector<8x128xf32>
    %548 = arith.mulf %546, %547 : vector<8x128xf32>
    %c3_399 = arith.constant 3 : index
    %c0_400 = arith.constant 0 : index
    %c0_401 = arith.constant 0 : index
    %549 = vector.load %arg30[%c3_399, %c0_400, %c0_401] : memref<9x8x128xf32, #tpu.memory_space<vmem>>, vector<1x8x128xf32>
    %550 = vector.shape_cast %549 : vector<1x8x128xf32> to vector<8x128xf32>
    %c1_i32_402 = arith.constant 1 : i32
    %551 = tpu.dynamic_rotate %536 by %c1_i32_402 dim 1 : vector<8x128xf32>, i32 -> vector<8x128xf32>
    %552 = arith.mulf %550, %551 : vector<8x128xf32>
    %c5_403 = arith.constant 5 : index
    %c0_404 = arith.constant 0 : index
    %c0_405 = arith.constant 0 : index
    %553 = vector.load %arg30[%c5_403, %c0_404, %c0_405] : memref<9x8x128xf32, #tpu.memory_space<vmem>>, vector<1x8x128xf32>
    %554 = vector.shape_cast %553 : vector<1x8x128xf32> to vector<8x128xf32>
    %c127_i32_406 = arith.constant 127 : i32
    %555 = tpu.dynamic_rotate %536 by %c127_i32_406 dim 1 : vector<8x128xf32>, i32 -> vector<8x128xf32>
    %556 = arith.mulf %554, %555 : vector<8x128xf32>
    %c6_407 = arith.constant 6 : index
    %c0_408 = arith.constant 0 : index
    %c0_409 = arith.constant 0 : index
    %557 = vector.load %arg30[%c6_407, %c0_408, %c0_409] : memref<9x8x128xf32, #tpu.memory_space<vmem>>, vector<1x8x128xf32>
    %558 = vector.shape_cast %557 : vector<1x8x128xf32> to vector<8x128xf32>
    %c121_i32_410 = arith.constant 121 : i32
    %559 = tpu.dynamic_rotate %536 by %c121_i32_410 dim 1 : vector<8x128xf32>, i32 -> vector<8x128xf32>
    %560 = arith.mulf %558, %559 : vector<8x128xf32>
    %c7_411 = arith.constant 7 : index
    %c0_412 = arith.constant 0 : index
    %c0_413 = arith.constant 0 : index
    %561 = vector.load %arg30[%c7_411, %c0_412, %c0_413] : memref<9x8x128xf32, #tpu.memory_space<vmem>>, vector<1x8x128xf32>
    %562 = vector.shape_cast %561 : vector<1x8x128xf32> to vector<8x128xf32>
    %c120_i32_414 = arith.constant 120 : i32
    %563 = tpu.dynamic_rotate %536 by %c120_i32_414 dim 1 : vector<8x128xf32>, i32 -> vector<8x128xf32>
    %564 = arith.mulf %562, %563 : vector<8x128xf32>
    %c8_415 = arith.constant 8 : index
    %c0_416 = arith.constant 0 : index
    %c0_417 = arith.constant 0 : index
    %565 = vector.load %arg30[%c8_415, %c0_416, %c0_417] : memref<9x8x128xf32, #tpu.memory_space<vmem>>, vector<1x8x128xf32>
    %566 = vector.shape_cast %565 : vector<1x8x128xf32> to vector<8x128xf32>
    %c119_i32_418 = arith.constant 119 : i32
    %567 = tpu.dynamic_rotate %536 by %c119_i32_418 dim 1 : vector<8x128xf32>, i32 -> vector<8x128xf32>
    %568 = arith.mulf %566, %567 : vector<8x128xf32>
    %569 = tpu.concatenate %540, %544, %548, %552, %536, %556, %560, %564, %568 in 0 : vector<8x128xf32>, vector<8x128xf32>, vector<8x128xf32>, vector<8x128xf32>, vector<8x128xf32>, vector<8x128xf32>, vector<8x128xf32>, vector<8x128xf32>, vector<8x128xf32> -> vector<72x128xf32>
    %570 = arith.truncf %569 : vector<72x128xf32> to vector<72x128xbf16>
    %c0_419 = arith.constant 0 : index
    %c0_420 = arith.constant 0 : index
    %571 = vector.load %arg14[%c0_419, %c0_420] : memref<16x72xbf16, #tpu.memory_space<vmem>>, vector<16x72xbf16>
    %cst_421 = arith.constant dense<0.000000e+00> : vector<16x128xf32>
    %572 = tpu.matmul %571, %570, %cst_421 {dimension_numbers = #tpu.dot_dimension_numbers<[1], [0], [0], [1], [0, 0, 1, 1], [], []>} : vector<16x72xbf16>, vector<72x128xbf16>, vector<16x128xf32> -> vector<16x128xf32>
    %573 = arith.truncf %516 : vector<8x128xf32> to vector<8x128xbf16>
    %c0_422 = arith.constant 0 : index
    %c0_423 = arith.constant 0 : index
    %574 = vector.load %arg2[%c0_422, %c0_423] : memref<128x128xbf16, #tpu.memory_space<vmem>>, vector<128x128xbf16>
    %cst_424 = arith.constant dense<0.000000e+00> : vector<8x128xf32>
    %575 = tpu.matmul %573, %574, %cst_424 {dimension_numbers = #tpu.dot_dimension_numbers<[1], [0], [0], [1], [0, 0, 1, 1], [], []>} : vector<8x128xbf16>, vector<128x128xbf16>, vector<8x128xf32> -> vector<8x128xf32>
    %c0_425 = arith.constant 0 : index
    %c0_426 = arith.constant 0 : index
    %576 = vector.load %arg27[%c0_425, %c0_426] : memref<1x128xf32, #tpu.memory_space<vmem>>, vector<1x128xf32>
    %577 = vector.broadcast %576 : vector<1x128xf32> to vector<8x128xf32>
    %578 = arith.mulf %575, %577 : vector<8x128xf32>
    %579 = vector.extract_strided_slice %572 {offsets = [0, 0], sizes = [8, 128], strides = [1, 1]} : vector<16x128xf32> to vector<8x128xf32>
    %580 = vector.extract_strided_slice %572 {offsets = [8, 0], sizes = [8, 128], strides = [1, 1]} : vector<16x128xf32> to vector<8x128xf32>
    %c5_427 = arith.constant 5 : index
    %c3_428 = arith.constant 3 : index
    %581 = memref.load %arg0[%c5_427, %c3_428] : memref<6x5xf32, #tpu.memory_space<smem>>
    %582 = vector.broadcast %581 : f32 to vector<8x128xf32>
    %583 = arith.mulf %582, %579 : vector<8x128xf32>
    %c5_429 = arith.constant 5 : index
    %c2_430 = arith.constant 2 : index
    %584 = memref.load %arg0[%c5_429, %c2_430] : memref<6x5xf32, #tpu.memory_space<smem>>
    %585 = vector.broadcast %584 : f32 to vector<8x128xf32>
    %586 = arith.mulf %585, %580 : vector<8x128xf32>
    %587 = arith.addf %583, %586 : vector<8x128xf32>
    %c5_431 = arith.constant 5 : index
    %c1_432 = arith.constant 1 : index
    %588 = memref.load %arg0[%c5_431, %c1_432] : memref<6x5xf32, #tpu.memory_space<smem>>
    %589 = vector.broadcast %588 : f32 to vector<8x128xf32>
    %590 = arith.mulf %589, %516 : vector<8x128xf32>
    %591 = arith.addf %587, %590 : vector<8x128xf32>
    %c5_433 = arith.constant 5 : index
    %c4_434 = arith.constant 4 : index
    %592 = memref.load %arg0[%c5_433, %c4_434] : memref<6x5xf32, #tpu.memory_space<smem>>
    %593 = vector.broadcast %592 : f32 to vector<8x128xf32>
    %594 = arith.mulf %593, %578 : vector<8x128xf32>
    %595 = arith.addf %591, %594 : vector<8x128xf32>
    %596 = arith.addf %534, %595 : vector<8x128xf32>
    %c0_435 = arith.constant 0 : index
    %c0_436 = arith.constant 0 : index
    %597 = vector.load %arg17[%c0_435, %c0_436] : memref<16x72xbf16, #tpu.memory_space<vmem>>, vector<16x72xbf16>
    %cst_437 = arith.constant 0.000000e+00 : f32
    %598 = vector.broadcast %cst_437 : f32 to vector<8x128xf32>
    %599 = arith.maximumf %596, %598 : vector<8x128xf32>
    %c0_438 = arith.constant 0 : index
    %c0_439 = arith.constant 0 : index
    %c0_440 = arith.constant 0 : index
    %600 = vector.load %arg30[%c0_438, %c0_439, %c0_440] : memref<9x8x128xf32, #tpu.memory_space<vmem>>, vector<1x8x128xf32>
    %601 = vector.shape_cast %600 : vector<1x8x128xf32> to vector<8x128xf32>
    %c9_i32_441 = arith.constant 9 : i32
    %602 = tpu.dynamic_rotate %599 by %c9_i32_441 dim 1 : vector<8x128xf32>, i32 -> vector<8x128xf32>
    %603 = arith.mulf %601, %602 : vector<8x128xf32>
    %c1_442 = arith.constant 1 : index
    %c0_443 = arith.constant 0 : index
    %c0_444 = arith.constant 0 : index
    %604 = vector.load %arg30[%c1_442, %c0_443, %c0_444] : memref<9x8x128xf32, #tpu.memory_space<vmem>>, vector<1x8x128xf32>
    %605 = vector.shape_cast %604 : vector<1x8x128xf32> to vector<8x128xf32>
    %c8_i32_445 = arith.constant 8 : i32
    %606 = tpu.dynamic_rotate %599 by %c8_i32_445 dim 1 : vector<8x128xf32>, i32 -> vector<8x128xf32>
    %607 = arith.mulf %605, %606 : vector<8x128xf32>
    %c2_446 = arith.constant 2 : index
    %c0_447 = arith.constant 0 : index
    %c0_448 = arith.constant 0 : index
    %608 = vector.load %arg30[%c2_446, %c0_447, %c0_448] : memref<9x8x128xf32, #tpu.memory_space<vmem>>, vector<1x8x128xf32>
    %609 = vector.shape_cast %608 : vector<1x8x128xf32> to vector<8x128xf32>
    %c7_i32_449 = arith.constant 7 : i32
    %610 = tpu.dynamic_rotate %599 by %c7_i32_449 dim 1 : vector<8x128xf32>, i32 -> vector<8x128xf32>
    %611 = arith.mulf %609, %610 : vector<8x128xf32>
    %c3_450 = arith.constant 3 : index
    %c0_451 = arith.constant 0 : index
    %c0_452 = arith.constant 0 : index
    %612 = vector.load %arg30[%c3_450, %c0_451, %c0_452] : memref<9x8x128xf32, #tpu.memory_space<vmem>>, vector<1x8x128xf32>
    %613 = vector.shape_cast %612 : vector<1x8x128xf32> to vector<8x128xf32>
    %c1_i32_453 = arith.constant 1 : i32
    %614 = tpu.dynamic_rotate %599 by %c1_i32_453 dim 1 : vector<8x128xf32>, i32 -> vector<8x128xf32>
    %615 = arith.mulf %613, %614 : vector<8x128xf32>
    %c5_454 = arith.constant 5 : index
    %c0_455 = arith.constant 0 : index
    %c0_456 = arith.constant 0 : index
    %616 = vector.load %arg30[%c5_454, %c0_455, %c0_456] : memref<9x8x128xf32, #tpu.memory_space<vmem>>, vector<1x8x128xf32>
    %617 = vector.shape_cast %616 : vector<1x8x128xf32> to vector<8x128xf32>
    %c127_i32_457 = arith.constant 127 : i32
    %618 = tpu.dynamic_rotate %599 by %c127_i32_457 dim 1 : vector<8x128xf32>, i32 -> vector<8x128xf32>
    %619 = arith.mulf %617, %618 : vector<8x128xf32>
    %c6_458 = arith.constant 6 : index
    %c0_459 = arith.constant 0 : index
    %c0_460 = arith.constant 0 : index
    %620 = vector.load %arg30[%c6_458, %c0_459, %c0_460] : memref<9x8x128xf32, #tpu.memory_space<vmem>>, vector<1x8x128xf32>
    %621 = vector.shape_cast %620 : vector<1x8x128xf32> to vector<8x128xf32>
    %c121_i32_461 = arith.constant 121 : i32
    %622 = tpu.dynamic_rotate %599 by %c121_i32_461 dim 1 : vector<8x128xf32>, i32 -> vector<8x128xf32>
    %623 = arith.mulf %621, %622 : vector<8x128xf32>
    %c7_462 = arith.constant 7 : index
    %c0_463 = arith.constant 0 : index
    %c0_464 = arith.constant 0 : index
    %624 = vector.load %arg30[%c7_462, %c0_463, %c0_464] : memref<9x8x128xf32, #tpu.memory_space<vmem>>, vector<1x8x128xf32>
    %625 = vector.shape_cast %624 : vector<1x8x128xf32> to vector<8x128xf32>
    %c120_i32_465 = arith.constant 120 : i32
    %626 = tpu.dynamic_rotate %599 by %c120_i32_465 dim 1 : vector<8x128xf32>, i32 -> vector<8x128xf32>
    %627 = arith.mulf %625, %626 : vector<8x128xf32>
    %c8_466 = arith.constant 8 : index
    %c0_467 = arith.constant 0 : index
    %c0_468 = arith.constant 0 : index
    %628 = vector.load %arg30[%c8_466, %c0_467, %c0_468] : memref<9x8x128xf32, #tpu.memory_space<vmem>>, vector<1x8x128xf32>
    %629 = vector.shape_cast %628 : vector<1x8x128xf32> to vector<8x128xf32>
    %c119_i32_469 = arith.constant 119 : i32
    %630 = tpu.dynamic_rotate %599 by %c119_i32_469 dim 1 : vector<8x128xf32>, i32 -> vector<8x128xf32>
    %631 = arith.mulf %629, %630 : vector<8x128xf32>
    %632 = tpu.concatenate %603, %607, %611, %615, %599, %619, %623, %627, %631 in 0 : vector<8x128xf32>, vector<8x128xf32>, vector<8x128xf32>, vector<8x128xf32>, vector<8x128xf32>, vector<8x128xf32>, vector<8x128xf32>, vector<8x128xf32>, vector<8x128xf32> -> vector<72x128xf32>
    %633 = arith.truncf %632 : vector<72x128xf32> to vector<72x128xbf16>
    %cst_470 = arith.constant dense<0.000000e+00> : vector<16x128xf32>
    %634 = tpu.matmul %597, %633, %cst_470 {dimension_numbers = #tpu.dot_dimension_numbers<[1], [0], [0], [1], [0, 0, 1, 1], [], []>} : vector<16x72xbf16>, vector<72x128xbf16>, vector<16x128xf32> -> vector<16x128xf32>
    %635 = arith.truncf %634 : vector<16x128xf32> to vector<16x128xbf16>
    %c0_471 = arith.constant 0 : index
    %c0_472 = arith.constant 0 : index
    %636 = vector.load %arg16[%c0_471, %c0_472] : memref<128x128xbf16, #tpu.memory_space<vmem>>, vector<128x128xbf16>
    %cst_473 = arith.constant dense<0.000000e+00> : vector<16x128xf32>
    %637 = tpu.matmul %635, %636, %cst_473 {dimension_numbers = #tpu.dot_dimension_numbers<[1], [0], [0], [1], [0, 0, 1, 1], [], []>} : vector<16x128xbf16>, vector<128x128xbf16>, vector<16x128xf32> -> vector<16x128xf32>
    %c0_474 = arith.constant 0 : index
    %c0_475 = arith.constant 0 : index
    %638 = vector.load %arg18[%c0_474, %c0_475] : memref<16x144xbf16, #tpu.memory_space<vmem>>, vector<16x144xbf16>
    %cst_476 = arith.constant 0.000000e+00 : f32
    %639 = vector.broadcast %cst_476 : f32 to vector<16x128xf32>
    %640 = arith.maximumf %637, %639 : vector<16x128xf32>
    %c0_477 = arith.constant 0 : index
    %c0_478 = arith.constant 0 : index
    %c0_479 = arith.constant 0 : index
    %641 = vector.load %arg31[%c0_477, %c0_478, %c0_479] : memref<9x16x128xf32, #tpu.memory_space<vmem>>, vector<1x16x128xf32>
    %642 = vector.shape_cast %641 : vector<1x16x128xf32> to vector<16x128xf32>
    %c5_i32 = arith.constant 5 : i32
    %643 = tpu.dynamic_rotate %640 by %c5_i32 dim 1 : vector<16x128xf32>, i32 -> vector<16x128xf32>
    %644 = arith.mulf %642, %643 : vector<16x128xf32>
    %c1_480 = arith.constant 1 : index
    %c0_481 = arith.constant 0 : index
    %c0_482 = arith.constant 0 : index
    %645 = vector.load %arg31[%c1_480, %c0_481, %c0_482] : memref<9x16x128xf32, #tpu.memory_space<vmem>>, vector<1x16x128xf32>
    %646 = vector.shape_cast %645 : vector<1x16x128xf32> to vector<16x128xf32>
    %c4_i32 = arith.constant 4 : i32
    %647 = tpu.dynamic_rotate %640 by %c4_i32 dim 1 : vector<16x128xf32>, i32 -> vector<16x128xf32>
    %648 = arith.mulf %646, %647 : vector<16x128xf32>
    %c2_483 = arith.constant 2 : index
    %c0_484 = arith.constant 0 : index
    %c0_485 = arith.constant 0 : index
    %649 = vector.load %arg31[%c2_483, %c0_484, %c0_485] : memref<9x16x128xf32, #tpu.memory_space<vmem>>, vector<1x16x128xf32>
    %650 = vector.shape_cast %649 : vector<1x16x128xf32> to vector<16x128xf32>
    %c3_i32 = arith.constant 3 : i32
    %651 = tpu.dynamic_rotate %640 by %c3_i32 dim 1 : vector<16x128xf32>, i32 -> vector<16x128xf32>
    %652 = arith.mulf %650, %651 : vector<16x128xf32>
    %c3_486 = arith.constant 3 : index
    %c0_487 = arith.constant 0 : index
    %c0_488 = arith.constant 0 : index
    %653 = vector.load %arg31[%c3_486, %c0_487, %c0_488] : memref<9x16x128xf32, #tpu.memory_space<vmem>>, vector<1x16x128xf32>
    %654 = vector.shape_cast %653 : vector<1x16x128xf32> to vector<16x128xf32>
    %c1_i32_489 = arith.constant 1 : i32
    %655 = tpu.dynamic_rotate %640 by %c1_i32_489 dim 1 : vector<16x128xf32>, i32 -> vector<16x128xf32>
    %656 = arith.mulf %654, %655 : vector<16x128xf32>
    %c5_490 = arith.constant 5 : index
    %c0_491 = arith.constant 0 : index
    %c0_492 = arith.constant 0 : index
    %657 = vector.load %arg31[%c5_490, %c0_491, %c0_492] : memref<9x16x128xf32, #tpu.memory_space<vmem>>, vector<1x16x128xf32>
    %658 = vector.shape_cast %657 : vector<1x16x128xf32> to vector<16x128xf32>
    %c127_i32_493 = arith.constant 127 : i32
    %659 = tpu.dynamic_rotate %640 by %c127_i32_493 dim 1 : vector<16x128xf32>, i32 -> vector<16x128xf32>
    %660 = arith.mulf %658, %659 : vector<16x128xf32>
    %c6_494 = arith.constant 6 : index
    %c0_495 = arith.constant 0 : index
    %c0_496 = arith.constant 0 : index
    %661 = vector.load %arg31[%c6_494, %c0_495, %c0_496] : memref<9x16x128xf32, #tpu.memory_space<vmem>>, vector<1x16x128xf32>
    %662 = vector.shape_cast %661 : vector<1x16x128xf32> to vector<16x128xf32>
    %c125_i32 = arith.constant 125 : i32
    %663 = tpu.dynamic_rotate %640 by %c125_i32 dim 1 : vector<16x128xf32>, i32 -> vector<16x128xf32>
    %664 = arith.mulf %662, %663 : vector<16x128xf32>
    %c7_497 = arith.constant 7 : index
    %c0_498 = arith.constant 0 : index
    %c0_499 = arith.constant 0 : index
    %665 = vector.load %arg31[%c7_497, %c0_498, %c0_499] : memref<9x16x128xf32, #tpu.memory_space<vmem>>, vector<1x16x128xf32>
    %666 = vector.shape_cast %665 : vector<1x16x128xf32> to vector<16x128xf32>
    %c124_i32 = arith.constant 124 : i32
    %667 = tpu.dynamic_rotate %640 by %c124_i32 dim 1 : vector<16x128xf32>, i32 -> vector<16x128xf32>
    %668 = arith.mulf %666, %667 : vector<16x128xf32>
    %c8_500 = arith.constant 8 : index
    %c0_501 = arith.constant 0 : index
    %c0_502 = arith.constant 0 : index
    %669 = vector.load %arg31[%c8_500, %c0_501, %c0_502] : memref<9x16x128xf32, #tpu.memory_space<vmem>>, vector<1x16x128xf32>
    %670 = vector.shape_cast %669 : vector<1x16x128xf32> to vector<16x128xf32>
    %c123_i32 = arith.constant 123 : i32
    %671 = tpu.dynamic_rotate %640 by %c123_i32 dim 1 : vector<16x128xf32>, i32 -> vector<16x128xf32>
    %672 = arith.mulf %670, %671 : vector<16x128xf32>
    %673 = tpu.concatenate %644, %648, %652, %656, %640, %660, %664, %668, %672 in 0 : vector<16x128xf32>, vector<16x128xf32>, vector<16x128xf32>, vector<16x128xf32>, vector<16x128xf32>, vector<16x128xf32>, vector<16x128xf32>, vector<16x128xf32>, vector<16x128xf32> -> vector<144x128xf32>
    %674 = arith.truncf %673 : vector<144x128xf32> to vector<144x128xbf16>
    %cst_503 = arith.constant dense<0.000000e+00> : vector<16x128xf32>
    %675 = tpu.matmul %638, %674, %cst_503 {dimension_numbers = #tpu.dot_dimension_numbers<[1], [0], [0], [1], [0, 0, 1, 1], [], []>} : vector<16x144xbf16>, vector<144x128xbf16>, vector<16x128xf32> -> vector<16x128xf32>
    %676 = arith.truncf %596 : vector<8x128xf32> to vector<8x128xbf16>
    %c0_504 = arith.constant 0 : index
    %c0_505 = arith.constant 0 : index
    %677 = vector.load %arg15[%c0_504, %c0_505] : memref<128x128xbf16, #tpu.memory_space<vmem>>, vector<128x128xbf16>
    %cst_506 = arith.constant dense<0.000000e+00> : vector<8x128xf32>
    %678 = tpu.matmul %676, %677, %cst_506 {dimension_numbers = #tpu.dot_dimension_numbers<[1], [0], [0], [1], [0, 0, 1, 1], [], []>} : vector<8x128xbf16>, vector<128x128xbf16>, vector<8x128xf32> -> vector<8x128xf32>
    %c0_507 = arith.constant 0 : index
    %c0_508 = arith.constant 0 : index
    %679 = vector.load %arg19[%c0_507, %c0_508] : memref<16x8xbf16, #tpu.memory_space<vmem>>, vector<16x8xbf16>
    %680 = arith.truncf %678 : vector<8x128xf32> to vector<8x128xbf16>
    %cst_509 = arith.constant dense<0.000000e+00> : vector<16x128xf32>
    %681 = tpu.matmul %679, %680, %cst_509 {dimension_numbers = #tpu.dot_dimension_numbers<[1], [0], [0], [1], [0, 0, 1, 1], [], []>} : vector<16x8xbf16>, vector<8x128xbf16>, vector<16x128xf32> -> vector<16x128xf32>
    %682 = arith.addf %675, %681 : vector<16x128xf32>
    %cst_510 = arith.constant 0.000000e+00 : f32
    %683 = vector.broadcast %cst_510 : f32 to vector<16x128xf32>
    %684 = arith.maximumf %682, %683 : vector<16x128xf32>
    %c0_511 = arith.constant 0 : index
    %c0_512 = arith.constant 0 : index
    %c0_513 = arith.constant 0 : index
    %685 = vector.load %arg31[%c0_511, %c0_512, %c0_513] : memref<9x16x128xf32, #tpu.memory_space<vmem>>, vector<1x16x128xf32>
    %686 = vector.shape_cast %685 : vector<1x16x128xf32> to vector<16x128xf32>
    %c5_i32_514 = arith.constant 5 : i32
    %687 = tpu.dynamic_rotate %684 by %c5_i32_514 dim 1 : vector<16x128xf32>, i32 -> vector<16x128xf32>
    %688 = arith.mulf %686, %687 : vector<16x128xf32>
    %c1_515 = arith.constant 1 : index
    %c0_516 = arith.constant 0 : index
    %c0_517 = arith.constant 0 : index
    %689 = vector.load %arg31[%c1_515, %c0_516, %c0_517] : memref<9x16x128xf32, #tpu.memory_space<vmem>>, vector<1x16x128xf32>
    %690 = vector.shape_cast %689 : vector<1x16x128xf32> to vector<16x128xf32>
    %c4_i32_518 = arith.constant 4 : i32
    %691 = tpu.dynamic_rotate %684 by %c4_i32_518 dim 1 : vector<16x128xf32>, i32 -> vector<16x128xf32>
    %692 = arith.mulf %690, %691 : vector<16x128xf32>
    %c2_519 = arith.constant 2 : index
    %c0_520 = arith.constant 0 : index
    %c0_521 = arith.constant 0 : index
    %693 = vector.load %arg31[%c2_519, %c0_520, %c0_521] : memref<9x16x128xf32, #tpu.memory_space<vmem>>, vector<1x16x128xf32>
    %694 = vector.shape_cast %693 : vector<1x16x128xf32> to vector<16x128xf32>
    %c3_i32_522 = arith.constant 3 : i32
    %695 = tpu.dynamic_rotate %684 by %c3_i32_522 dim 1 : vector<16x128xf32>, i32 -> vector<16x128xf32>
    %696 = arith.mulf %694, %695 : vector<16x128xf32>
    %c3_523 = arith.constant 3 : index
    %c0_524 = arith.constant 0 : index
    %c0_525 = arith.constant 0 : index
    %697 = vector.load %arg31[%c3_523, %c0_524, %c0_525] : memref<9x16x128xf32, #tpu.memory_space<vmem>>, vector<1x16x128xf32>
    %698 = vector.shape_cast %697 : vector<1x16x128xf32> to vector<16x128xf32>
    %c1_i32_526 = arith.constant 1 : i32
    %699 = tpu.dynamic_rotate %684 by %c1_i32_526 dim 1 : vector<16x128xf32>, i32 -> vector<16x128xf32>
    %700 = arith.mulf %698, %699 : vector<16x128xf32>
    %c5_527 = arith.constant 5 : index
    %c0_528 = arith.constant 0 : index
    %c0_529 = arith.constant 0 : index
    %701 = vector.load %arg31[%c5_527, %c0_528, %c0_529] : memref<9x16x128xf32, #tpu.memory_space<vmem>>, vector<1x16x128xf32>
    %702 = vector.shape_cast %701 : vector<1x16x128xf32> to vector<16x128xf32>
    %c127_i32_530 = arith.constant 127 : i32
    %703 = tpu.dynamic_rotate %684 by %c127_i32_530 dim 1 : vector<16x128xf32>, i32 -> vector<16x128xf32>
    %704 = arith.mulf %702, %703 : vector<16x128xf32>
    %c6_531 = arith.constant 6 : index
    %c0_532 = arith.constant 0 : index
    %c0_533 = arith.constant 0 : index
    %705 = vector.load %arg31[%c6_531, %c0_532, %c0_533] : memref<9x16x128xf32, #tpu.memory_space<vmem>>, vector<1x16x128xf32>
    %706 = vector.shape_cast %705 : vector<1x16x128xf32> to vector<16x128xf32>
    %c125_i32_534 = arith.constant 125 : i32
    %707 = tpu.dynamic_rotate %684 by %c125_i32_534 dim 1 : vector<16x128xf32>, i32 -> vector<16x128xf32>
    %708 = arith.mulf %706, %707 : vector<16x128xf32>
    %c7_535 = arith.constant 7 : index
    %c0_536 = arith.constant 0 : index
    %c0_537 = arith.constant 0 : index
    %709 = vector.load %arg31[%c7_535, %c0_536, %c0_537] : memref<9x16x128xf32, #tpu.memory_space<vmem>>, vector<1x16x128xf32>
    %710 = vector.shape_cast %709 : vector<1x16x128xf32> to vector<16x128xf32>
    %c124_i32_538 = arith.constant 124 : i32
    %711 = tpu.dynamic_rotate %684 by %c124_i32_538 dim 1 : vector<16x128xf32>, i32 -> vector<16x128xf32>
    %712 = arith.mulf %710, %711 : vector<16x128xf32>
    %c8_539 = arith.constant 8 : index
    %c0_540 = arith.constant 0 : index
    %c0_541 = arith.constant 0 : index
    %713 = vector.load %arg31[%c8_539, %c0_540, %c0_541] : memref<9x16x128xf32, #tpu.memory_space<vmem>>, vector<1x16x128xf32>
    %714 = vector.shape_cast %713 : vector<1x16x128xf32> to vector<16x128xf32>
    %c123_i32_542 = arith.constant 123 : i32
    %715 = tpu.dynamic_rotate %684 by %c123_i32_542 dim 1 : vector<16x128xf32>, i32 -> vector<16x128xf32>
    %716 = arith.mulf %714, %715 : vector<16x128xf32>
    %717 = tpu.concatenate %688, %692, %696, %700, %684, %704, %708, %712, %716 in 0 : vector<16x128xf32>, vector<16x128xf32>, vector<16x128xf32>, vector<16x128xf32>, vector<16x128xf32>, vector<16x128xf32>, vector<16x128xf32>, vector<16x128xf32>, vector<16x128xf32> -> vector<144x128xf32>
    %718 = arith.truncf %717 : vector<144x128xf32> to vector<144x128xbf16>
    %c0_543 = arith.constant 0 : index
    %c0_544 = arith.constant 0 : index
    %719 = vector.load %arg20[%c0_543, %c0_544] : memref<96x144xbf16, #tpu.memory_space<vmem>>, vector<96x144xbf16>
    %cst_545 = arith.constant dense<0.000000e+00> : vector<96x128xf32>
    %720 = tpu.matmul %719, %718, %cst_545 {dimension_numbers = #tpu.dot_dimension_numbers<[1], [0], [0], [1], [0, 0, 1, 1], [], []>} : vector<96x144xbf16>, vector<144x128xbf16>, vector<96x128xf32> -> vector<96x128xf32>
    %721 = arith.truncf %682 : vector<16x128xf32> to vector<16x128xbf16>
    %c0_546 = arith.constant 0 : index
    %c0_547 = arith.constant 0 : index
    %722 = vector.load %arg3[%c0_546, %c0_547] : memref<128x128xbf16, #tpu.memory_space<vmem>>, vector<128x128xbf16>
    %cst_548 = arith.constant dense<0.000000e+00> : vector<16x128xf32>
    %723 = tpu.matmul %721, %722, %cst_548 {dimension_numbers = #tpu.dot_dimension_numbers<[1], [0], [0], [1], [0, 0, 1, 1], [], []>} : vector<16x128xbf16>, vector<128x128xbf16>, vector<16x128xf32> -> vector<16x128xf32>
    %c0_549 = arith.constant 0 : index
    %c0_550 = arith.constant 0 : index
    %724 = vector.load %arg28[%c0_549, %c0_550] : memref<1x128xf32, #tpu.memory_space<vmem>>, vector<1x128xf32>
    %725 = vector.broadcast %724 : vector<1x128xf32> to vector<16x128xf32>
    %726 = arith.mulf %723, %725 : vector<16x128xf32>
    %727 = vector.extract_strided_slice %720 {offsets = [0, 0], sizes = [16, 128], strides = [1, 1]} : vector<96x128xf32> to vector<16x128xf32>
    %728 = vector.extract_strided_slice %720 {offsets = [48, 0], sizes = [16, 128], strides = [1, 1]} : vector<96x128xf32> to vector<16x128xf32>
    %c0_551 = arith.constant 0 : index
    %c3_552 = arith.constant 3 : index
    %729 = memref.load %arg0[%c0_551, %c3_552] : memref<6x5xf32, #tpu.memory_space<smem>>
    %730 = vector.broadcast %729 : f32 to vector<16x128xf32>
    %731 = arith.mulf %730, %727 : vector<16x128xf32>
    %c0_553 = arith.constant 0 : index
    %c2_554 = arith.constant 2 : index
    %732 = memref.load %arg0[%c0_553, %c2_554] : memref<6x5xf32, #tpu.memory_space<smem>>
    %733 = vector.broadcast %732 : f32 to vector<16x128xf32>
    %734 = arith.mulf %733, %728 : vector<16x128xf32>
    %735 = arith.addf %731, %734 : vector<16x128xf32>
    %c0_555 = arith.constant 0 : index
    %c1_556 = arith.constant 1 : index
    %736 = memref.load %arg0[%c0_555, %c1_556] : memref<6x5xf32, #tpu.memory_space<smem>>
    %737 = vector.broadcast %736 : f32 to vector<16x128xf32>
    %738 = arith.mulf %737, %682 : vector<16x128xf32>
    %739 = arith.addf %735, %738 : vector<16x128xf32>
    %c0_557 = arith.constant 0 : index
    %c4_558 = arith.constant 4 : index
    %740 = memref.load %arg0[%c0_557, %c4_558] : memref<6x5xf32, #tpu.memory_space<smem>>
    %741 = vector.broadcast %740 : f32 to vector<16x128xf32>
    %742 = arith.mulf %741, %726 : vector<16x128xf32>
    %743 = arith.addf %739, %742 : vector<16x128xf32>
    %744 = vector.extract_strided_slice %720 {offsets = [16, 0], sizes = [16, 128], strides = [1, 1]} : vector<96x128xf32> to vector<16x128xf32>
    %745 = vector.extract_strided_slice %720 {offsets = [64, 0], sizes = [16, 128], strides = [1, 1]} : vector<96x128xf32> to vector<16x128xf32>
    %c1_559 = arith.constant 1 : index
    %c3_560 = arith.constant 3 : index
    %746 = memref.load %arg0[%c1_559, %c3_560] : memref<6x5xf32, #tpu.memory_space<smem>>
    %747 = vector.broadcast %746 : f32 to vector<16x128xf32>
    %748 = arith.mulf %747, %744 : vector<16x128xf32>
    %c1_561 = arith.constant 1 : index
    %c2_562 = arith.constant 2 : index
    %749 = memref.load %arg0[%c1_561, %c2_562] : memref<6x5xf32, #tpu.memory_space<smem>>
    %750 = vector.broadcast %749 : f32 to vector<16x128xf32>
    %751 = arith.mulf %750, %745 : vector<16x128xf32>
    %752 = arith.addf %748, %751 : vector<16x128xf32>
    %c1_563 = arith.constant 1 : index
    %c1_564 = arith.constant 1 : index
    %753 = memref.load %arg0[%c1_563, %c1_564] : memref<6x5xf32, #tpu.memory_space<smem>>
    %754 = vector.broadcast %753 : f32 to vector<16x128xf32>
    %755 = arith.mulf %754, %682 : vector<16x128xf32>
    %756 = arith.addf %752, %755 : vector<16x128xf32>
    %c1_565 = arith.constant 1 : index
    %c4_566 = arith.constant 4 : index
    %757 = memref.load %arg0[%c1_565, %c4_566] : memref<6x5xf32, #tpu.memory_space<smem>>
    %758 = vector.broadcast %757 : f32 to vector<16x128xf32>
    %759 = arith.mulf %758, %726 : vector<16x128xf32>
    %760 = arith.addf %756, %759 : vector<16x128xf32>
    %761 = vector.extract_strided_slice %720 {offsets = [32, 0], sizes = [16, 128], strides = [1, 1]} : vector<96x128xf32> to vector<16x128xf32>
    %762 = vector.extract_strided_slice %720 {offsets = [80, 0], sizes = [16, 128], strides = [1, 1]} : vector<96x128xf32> to vector<16x128xf32>
    %c3_567 = arith.constant 3 : index
    %c3_568 = arith.constant 3 : index
    %763 = memref.load %arg0[%c3_567, %c3_568] : memref<6x5xf32, #tpu.memory_space<smem>>
    %764 = vector.broadcast %763 : f32 to vector<16x128xf32>
    %765 = arith.mulf %764, %761 : vector<16x128xf32>
    %c3_569 = arith.constant 3 : index
    %c2_570 = arith.constant 2 : index
    %766 = memref.load %arg0[%c3_569, %c2_570] : memref<6x5xf32, #tpu.memory_space<smem>>
    %767 = vector.broadcast %766 : f32 to vector<16x128xf32>
    %768 = arith.mulf %767, %762 : vector<16x128xf32>
    %769 = arith.addf %765, %768 : vector<16x128xf32>
    %c3_571 = arith.constant 3 : index
    %c1_572 = arith.constant 1 : index
    %770 = memref.load %arg0[%c3_571, %c1_572] : memref<6x5xf32, #tpu.memory_space<smem>>
    %771 = vector.broadcast %770 : f32 to vector<16x128xf32>
    %772 = arith.mulf %771, %682 : vector<16x128xf32>
    %773 = arith.addf %769, %772 : vector<16x128xf32>
    %c3_573 = arith.constant 3 : index
    %c4_574 = arith.constant 4 : index
    %774 = memref.load %arg0[%c3_573, %c4_574] : memref<6x5xf32, #tpu.memory_space<smem>>
    %775 = vector.broadcast %774 : f32 to vector<16x128xf32>
    %776 = arith.mulf %775, %726 : vector<16x128xf32>
    %777 = arith.addf %773, %776 : vector<16x128xf32>
    %cst_575 = arith.constant 0.000000e+00 : f32
    %778 = vector.broadcast %cst_575 : f32 to vector<16x128xf32>
    %779 = arith.maximumf %743, %778 : vector<16x128xf32>
    %c0_576 = arith.constant 0 : index
    %c0_577 = arith.constant 0 : index
    %c0_578 = arith.constant 0 : index
    %780 = vector.load %arg31[%c0_576, %c0_577, %c0_578] : memref<9x16x128xf32, #tpu.memory_space<vmem>>, vector<1x16x128xf32>
    %781 = vector.shape_cast %780 : vector<1x16x128xf32> to vector<16x128xf32>
    %c5_i32_579 = arith.constant 5 : i32
    %782 = tpu.dynamic_rotate %779 by %c5_i32_579 dim 1 : vector<16x128xf32>, i32 -> vector<16x128xf32>
    %783 = arith.mulf %781, %782 : vector<16x128xf32>
    %c1_580 = arith.constant 1 : index
    %c0_581 = arith.constant 0 : index
    %c0_582 = arith.constant 0 : index
    %784 = vector.load %arg31[%c1_580, %c0_581, %c0_582] : memref<9x16x128xf32, #tpu.memory_space<vmem>>, vector<1x16x128xf32>
    %785 = vector.shape_cast %784 : vector<1x16x128xf32> to vector<16x128xf32>
    %c4_i32_583 = arith.constant 4 : i32
    %786 = tpu.dynamic_rotate %779 by %c4_i32_583 dim 1 : vector<16x128xf32>, i32 -> vector<16x128xf32>
    %787 = arith.mulf %785, %786 : vector<16x128xf32>
    %c2_584 = arith.constant 2 : index
    %c0_585 = arith.constant 0 : index
    %c0_586 = arith.constant 0 : index
    %788 = vector.load %arg31[%c2_584, %c0_585, %c0_586] : memref<9x16x128xf32, #tpu.memory_space<vmem>>, vector<1x16x128xf32>
    %789 = vector.shape_cast %788 : vector<1x16x128xf32> to vector<16x128xf32>
    %c3_i32_587 = arith.constant 3 : i32
    %790 = tpu.dynamic_rotate %779 by %c3_i32_587 dim 1 : vector<16x128xf32>, i32 -> vector<16x128xf32>
    %791 = arith.mulf %789, %790 : vector<16x128xf32>
    %c3_588 = arith.constant 3 : index
    %c0_589 = arith.constant 0 : index
    %c0_590 = arith.constant 0 : index
    %792 = vector.load %arg31[%c3_588, %c0_589, %c0_590] : memref<9x16x128xf32, #tpu.memory_space<vmem>>, vector<1x16x128xf32>
    %793 = vector.shape_cast %792 : vector<1x16x128xf32> to vector<16x128xf32>
    %c1_i32_591 = arith.constant 1 : i32
    %794 = tpu.dynamic_rotate %779 by %c1_i32_591 dim 1 : vector<16x128xf32>, i32 -> vector<16x128xf32>
    %795 = arith.mulf %793, %794 : vector<16x128xf32>
    %c5_592 = arith.constant 5 : index
    %c0_593 = arith.constant 0 : index
    %c0_594 = arith.constant 0 : index
    %796 = vector.load %arg31[%c5_592, %c0_593, %c0_594] : memref<9x16x128xf32, #tpu.memory_space<vmem>>, vector<1x16x128xf32>
    %797 = vector.shape_cast %796 : vector<1x16x128xf32> to vector<16x128xf32>
    %c127_i32_595 = arith.constant 127 : i32
    %798 = tpu.dynamic_rotate %779 by %c127_i32_595 dim 1 : vector<16x128xf32>, i32 -> vector<16x128xf32>
    %799 = arith.mulf %797, %798 : vector<16x128xf32>
    %c6_596 = arith.constant 6 : index
    %c0_597 = arith.constant 0 : index
    %c0_598 = arith.constant 0 : index
    %800 = vector.load %arg31[%c6_596, %c0_597, %c0_598] : memref<9x16x128xf32, #tpu.memory_space<vmem>>, vector<1x16x128xf32>
    %801 = vector.shape_cast %800 : vector<1x16x128xf32> to vector<16x128xf32>
    %c125_i32_599 = arith.constant 125 : i32
    %802 = tpu.dynamic_rotate %779 by %c125_i32_599 dim 1 : vector<16x128xf32>, i32 -> vector<16x128xf32>
    %803 = arith.mulf %801, %802 : vector<16x128xf32>
    %c7_600 = arith.constant 7 : index
    %c0_601 = arith.constant 0 : index
    %c0_602 = arith.constant 0 : index
    %804 = vector.load %arg31[%c7_600, %c0_601, %c0_602] : memref<9x16x128xf32, #tpu.memory_space<vmem>>, vector<1x16x128xf32>
    %805 = vector.shape_cast %804 : vector<1x16x128xf32> to vector<16x128xf32>
    %c124_i32_603 = arith.constant 124 : i32
    %806 = tpu.dynamic_rotate %779 by %c124_i32_603 dim 1 : vector<16x128xf32>, i32 -> vector<16x128xf32>
    %807 = arith.mulf %805, %806 : vector<16x128xf32>
    %c8_604 = arith.constant 8 : index
    %c0_605 = arith.constant 0 : index
    %c0_606 = arith.constant 0 : index
    %808 = vector.load %arg31[%c8_604, %c0_605, %c0_606] : memref<9x16x128xf32, #tpu.memory_space<vmem>>, vector<1x16x128xf32>
    %809 = vector.shape_cast %808 : vector<1x16x128xf32> to vector<16x128xf32>
    %c123_i32_607 = arith.constant 123 : i32
    %810 = tpu.dynamic_rotate %779 by %c123_i32_607 dim 1 : vector<16x128xf32>, i32 -> vector<16x128xf32>
    %811 = arith.mulf %809, %810 : vector<16x128xf32>
    %812 = tpu.concatenate %783, %787, %791, %795, %779, %799, %803, %807, %811 in 0 : vector<16x128xf32>, vector<16x128xf32>, vector<16x128xf32>, vector<16x128xf32>, vector<16x128xf32>, vector<16x128xf32>, vector<16x128xf32>, vector<16x128xf32>, vector<16x128xf32> -> vector<144x128xf32>
    %813 = arith.truncf %812 : vector<144x128xf32> to vector<144x128xbf16>
    %c0_608 = arith.constant 0 : index
    %c0_609 = arith.constant 0 : index
    %814 = vector.load %arg21[%c0_608, %c0_609] : memref<64x144xbf16, #tpu.memory_space<vmem>>, vector<64x144xbf16>
    %cst_610 = arith.constant dense<0.000000e+00> : vector<64x128xf32>
    %815 = tpu.matmul %814, %813, %cst_610 {dimension_numbers = #tpu.dot_dimension_numbers<[1], [0], [0], [1], [0, 0, 1, 1], [], []>} : vector<64x144xbf16>, vector<144x128xbf16>, vector<64x128xf32> -> vector<64x128xf32>
    %816 = arith.truncf %743 : vector<16x128xf32> to vector<16x128xbf16>
    %c0_611 = arith.constant 0 : index
    %c0_612 = arith.constant 0 : index
    %817 = vector.load %arg3[%c0_611, %c0_612] : memref<128x128xbf16, #tpu.memory_space<vmem>>, vector<128x128xbf16>
    %cst_613 = arith.constant dense<0.000000e+00> : vector<16x128xf32>
    %818 = tpu.matmul %816, %817, %cst_613 {dimension_numbers = #tpu.dot_dimension_numbers<[1], [0], [0], [1], [0, 0, 1, 1], [], []>} : vector<16x128xbf16>, vector<128x128xbf16>, vector<16x128xf32> -> vector<16x128xf32>
    %c0_614 = arith.constant 0 : index
    %c0_615 = arith.constant 0 : index
    %819 = vector.load %arg28[%c0_614, %c0_615] : memref<1x128xf32, #tpu.memory_space<vmem>>, vector<1x128xf32>
    %820 = vector.broadcast %819 : vector<1x128xf32> to vector<16x128xf32>
    %821 = arith.mulf %818, %820 : vector<16x128xf32>
    %822 = vector.extract_strided_slice %815 {offsets = [0, 0], sizes = [16, 128], strides = [1, 1]} : vector<64x128xf32> to vector<16x128xf32>
    %823 = vector.extract_strided_slice %815 {offsets = [32, 0], sizes = [16, 128], strides = [1, 1]} : vector<64x128xf32> to vector<16x128xf32>
    %c2_616 = arith.constant 2 : index
    %c3_617 = arith.constant 3 : index
    %824 = memref.load %arg0[%c2_616, %c3_617] : memref<6x5xf32, #tpu.memory_space<smem>>
    %825 = vector.broadcast %824 : f32 to vector<16x128xf32>
    %826 = arith.mulf %825, %822 : vector<16x128xf32>
    %c2_618 = arith.constant 2 : index
    %c2_619 = arith.constant 2 : index
    %827 = memref.load %arg0[%c2_618, %c2_619] : memref<6x5xf32, #tpu.memory_space<smem>>
    %828 = vector.broadcast %827 : f32 to vector<16x128xf32>
    %829 = arith.mulf %828, %823 : vector<16x128xf32>
    %830 = arith.addf %826, %829 : vector<16x128xf32>
    %c2_620 = arith.constant 2 : index
    %c1_621 = arith.constant 1 : index
    %831 = memref.load %arg0[%c2_620, %c1_621] : memref<6x5xf32, #tpu.memory_space<smem>>
    %832 = vector.broadcast %831 : f32 to vector<16x128xf32>
    %833 = arith.mulf %832, %743 : vector<16x128xf32>
    %834 = arith.addf %830, %833 : vector<16x128xf32>
    %c2_622 = arith.constant 2 : index
    %c4_623 = arith.constant 4 : index
    %835 = memref.load %arg0[%c2_622, %c4_623] : memref<6x5xf32, #tpu.memory_space<smem>>
    %836 = vector.broadcast %835 : f32 to vector<16x128xf32>
    %837 = arith.mulf %836, %821 : vector<16x128xf32>
    %838 = arith.addf %834, %837 : vector<16x128xf32>
    %839 = arith.addf %760, %838 : vector<16x128xf32>
    %840 = vector.extract_strided_slice %815 {offsets = [16, 0], sizes = [16, 128], strides = [1, 1]} : vector<64x128xf32> to vector<16x128xf32>
    %841 = vector.extract_strided_slice %815 {offsets = [48, 0], sizes = [16, 128], strides = [1, 1]} : vector<64x128xf32> to vector<16x128xf32>
    %c4_624 = arith.constant 4 : index
    %c3_625 = arith.constant 3 : index
    %842 = memref.load %arg0[%c4_624, %c3_625] : memref<6x5xf32, #tpu.memory_space<smem>>
    %843 = vector.broadcast %842 : f32 to vector<16x128xf32>
    %844 = arith.mulf %843, %840 : vector<16x128xf32>
    %c4_626 = arith.constant 4 : index
    %c2_627 = arith.constant 2 : index
    %845 = memref.load %arg0[%c4_626, %c2_627] : memref<6x5xf32, #tpu.memory_space<smem>>
    %846 = vector.broadcast %845 : f32 to vector<16x128xf32>
    %847 = arith.mulf %846, %841 : vector<16x128xf32>
    %848 = arith.addf %844, %847 : vector<16x128xf32>
    %c4_628 = arith.constant 4 : index
    %c1_629 = arith.constant 1 : index
    %849 = memref.load %arg0[%c4_628, %c1_629] : memref<6x5xf32, #tpu.memory_space<smem>>
    %850 = vector.broadcast %849 : f32 to vector<16x128xf32>
    %851 = arith.mulf %850, %743 : vector<16x128xf32>
    %852 = arith.addf %848, %851 : vector<16x128xf32>
    %c4_630 = arith.constant 4 : index
    %c4_631 = arith.constant 4 : index
    %853 = memref.load %arg0[%c4_630, %c4_631] : memref<6x5xf32, #tpu.memory_space<smem>>
    %854 = vector.broadcast %853 : f32 to vector<16x128xf32>
    %855 = arith.mulf %854, %821 : vector<16x128xf32>
    %856 = arith.addf %852, %855 : vector<16x128xf32>
    %857 = arith.addf %777, %856 : vector<16x128xf32>
    %cst_632 = arith.constant 0.000000e+00 : f32
    %858 = vector.broadcast %cst_632 : f32 to vector<16x128xf32>
    %859 = arith.maximumf %839, %858 : vector<16x128xf32>
    %c0_633 = arith.constant 0 : index
    %c0_634 = arith.constant 0 : index
    %c0_635 = arith.constant 0 : index
    %860 = vector.load %arg31[%c0_633, %c0_634, %c0_635] : memref<9x16x128xf32, #tpu.memory_space<vmem>>, vector<1x16x128xf32>
    %861 = vector.shape_cast %860 : vector<1x16x128xf32> to vector<16x128xf32>
    %c5_i32_636 = arith.constant 5 : i32
    %862 = tpu.dynamic_rotate %859 by %c5_i32_636 dim 1 : vector<16x128xf32>, i32 -> vector<16x128xf32>
    %863 = arith.mulf %861, %862 : vector<16x128xf32>
    %c1_637 = arith.constant 1 : index
    %c0_638 = arith.constant 0 : index
    %c0_639 = arith.constant 0 : index
    %864 = vector.load %arg31[%c1_637, %c0_638, %c0_639] : memref<9x16x128xf32, #tpu.memory_space<vmem>>, vector<1x16x128xf32>
    %865 = vector.shape_cast %864 : vector<1x16x128xf32> to vector<16x128xf32>
    %c4_i32_640 = arith.constant 4 : i32
    %866 = tpu.dynamic_rotate %859 by %c4_i32_640 dim 1 : vector<16x128xf32>, i32 -> vector<16x128xf32>
    %867 = arith.mulf %865, %866 : vector<16x128xf32>
    %c2_641 = arith.constant 2 : index
    %c0_642 = arith.constant 0 : index
    %c0_643 = arith.constant 0 : index
    %868 = vector.load %arg31[%c2_641, %c0_642, %c0_643] : memref<9x16x128xf32, #tpu.memory_space<vmem>>, vector<1x16x128xf32>
    %869 = vector.shape_cast %868 : vector<1x16x128xf32> to vector<16x128xf32>
    %c3_i32_644 = arith.constant 3 : i32
    %870 = tpu.dynamic_rotate %859 by %c3_i32_644 dim 1 : vector<16x128xf32>, i32 -> vector<16x128xf32>
    %871 = arith.mulf %869, %870 : vector<16x128xf32>
    %c3_645 = arith.constant 3 : index
    %c0_646 = arith.constant 0 : index
    %c0_647 = arith.constant 0 : index
    %872 = vector.load %arg31[%c3_645, %c0_646, %c0_647] : memref<9x16x128xf32, #tpu.memory_space<vmem>>, vector<1x16x128xf32>
    %873 = vector.shape_cast %872 : vector<1x16x128xf32> to vector<16x128xf32>
    %c1_i32_648 = arith.constant 1 : i32
    %874 = tpu.dynamic_rotate %859 by %c1_i32_648 dim 1 : vector<16x128xf32>, i32 -> vector<16x128xf32>
    %875 = arith.mulf %873, %874 : vector<16x128xf32>
    %c5_649 = arith.constant 5 : index
    %c0_650 = arith.constant 0 : index
    %c0_651 = arith.constant 0 : index
    %876 = vector.load %arg31[%c5_649, %c0_650, %c0_651] : memref<9x16x128xf32, #tpu.memory_space<vmem>>, vector<1x16x128xf32>
    %877 = vector.shape_cast %876 : vector<1x16x128xf32> to vector<16x128xf32>
    %c127_i32_652 = arith.constant 127 : i32
    %878 = tpu.dynamic_rotate %859 by %c127_i32_652 dim 1 : vector<16x128xf32>, i32 -> vector<16x128xf32>
    %879 = arith.mulf %877, %878 : vector<16x128xf32>
    %c6_653 = arith.constant 6 : index
    %c0_654 = arith.constant 0 : index
    %c0_655 = arith.constant 0 : index
    %880 = vector.load %arg31[%c6_653, %c0_654, %c0_655] : memref<9x16x128xf32, #tpu.memory_space<vmem>>, vector<1x16x128xf32>
    %881 = vector.shape_cast %880 : vector<1x16x128xf32> to vector<16x128xf32>
    %c125_i32_656 = arith.constant 125 : i32
    %882 = tpu.dynamic_rotate %859 by %c125_i32_656 dim 1 : vector<16x128xf32>, i32 -> vector<16x128xf32>
    %883 = arith.mulf %881, %882 : vector<16x128xf32>
    %c7_657 = arith.constant 7 : index
    %c0_658 = arith.constant 0 : index
    %c0_659 = arith.constant 0 : index
    %884 = vector.load %arg31[%c7_657, %c0_658, %c0_659] : memref<9x16x128xf32, #tpu.memory_space<vmem>>, vector<1x16x128xf32>
    %885 = vector.shape_cast %884 : vector<1x16x128xf32> to vector<16x128xf32>
    %c124_i32_660 = arith.constant 124 : i32
    %886 = tpu.dynamic_rotate %859 by %c124_i32_660 dim 1 : vector<16x128xf32>, i32 -> vector<16x128xf32>
    %887 = arith.mulf %885, %886 : vector<16x128xf32>
    %c8_661 = arith.constant 8 : index
    %c0_662 = arith.constant 0 : index
    %c0_663 = arith.constant 0 : index
    %888 = vector.load %arg31[%c8_661, %c0_662, %c0_663] : memref<9x16x128xf32, #tpu.memory_space<vmem>>, vector<1x16x128xf32>
    %889 = vector.shape_cast %888 : vector<1x16x128xf32> to vector<16x128xf32>
    %c123_i32_664 = arith.constant 123 : i32
    %890 = tpu.dynamic_rotate %859 by %c123_i32_664 dim 1 : vector<16x128xf32>, i32 -> vector<16x128xf32>
    %891 = arith.mulf %889, %890 : vector<16x128xf32>
    %892 = tpu.concatenate %863, %867, %871, %875, %859, %879, %883, %887, %891 in 0 : vector<16x128xf32>, vector<16x128xf32>, vector<16x128xf32>, vector<16x128xf32>, vector<16x128xf32>, vector<16x128xf32>, vector<16x128xf32>, vector<16x128xf32>, vector<16x128xf32> -> vector<144x128xf32>
    %893 = arith.truncf %892 : vector<144x128xf32> to vector<144x128xbf16>
    %c0_665 = arith.constant 0 : index
    %c0_666 = arith.constant 0 : index
    %894 = vector.load %arg22[%c0_665, %c0_666] : memref<32x144xbf16, #tpu.memory_space<vmem>>, vector<32x144xbf16>
    %cst_667 = arith.constant dense<0.000000e+00> : vector<32x128xf32>
    %895 = tpu.matmul %894, %893, %cst_667 {dimension_numbers = #tpu.dot_dimension_numbers<[1], [0], [0], [1], [0, 0, 1, 1], [], []>} : vector<32x144xbf16>, vector<144x128xbf16>, vector<32x128xf32> -> vector<32x128xf32>
    %896 = arith.truncf %839 : vector<16x128xf32> to vector<16x128xbf16>
    %c0_668 = arith.constant 0 : index
    %c0_669 = arith.constant 0 : index
    %897 = vector.load %arg3[%c0_668, %c0_669] : memref<128x128xbf16, #tpu.memory_space<vmem>>, vector<128x128xbf16>
    %cst_670 = arith.constant dense<0.000000e+00> : vector<16x128xf32>
    %898 = tpu.matmul %896, %897, %cst_670 {dimension_numbers = #tpu.dot_dimension_numbers<[1], [0], [0], [1], [0, 0, 1, 1], [], []>} : vector<16x128xbf16>, vector<128x128xbf16>, vector<16x128xf32> -> vector<16x128xf32>
    %c0_671 = arith.constant 0 : index
    %c0_672 = arith.constant 0 : index
    %899 = vector.load %arg28[%c0_671, %c0_672] : memref<1x128xf32, #tpu.memory_space<vmem>>, vector<1x128xf32>
    %900 = vector.broadcast %899 : vector<1x128xf32> to vector<16x128xf32>
    %901 = arith.mulf %898, %900 : vector<16x128xf32>
    %902 = vector.extract_strided_slice %895 {offsets = [0, 0], sizes = [16, 128], strides = [1, 1]} : vector<32x128xf32> to vector<16x128xf32>
    %903 = vector.extract_strided_slice %895 {offsets = [16, 0], sizes = [16, 128], strides = [1, 1]} : vector<32x128xf32> to vector<16x128xf32>
    %c5_673 = arith.constant 5 : index
    %c3_674 = arith.constant 3 : index
    %904 = memref.load %arg0[%c5_673, %c3_674] : memref<6x5xf32, #tpu.memory_space<smem>>
    %905 = vector.broadcast %904 : f32 to vector<16x128xf32>
    %906 = arith.mulf %905, %902 : vector<16x128xf32>
    %c5_675 = arith.constant 5 : index
    %c2_676 = arith.constant 2 : index
    %907 = memref.load %arg0[%c5_675, %c2_676] : memref<6x5xf32, #tpu.memory_space<smem>>
    %908 = vector.broadcast %907 : f32 to vector<16x128xf32>
    %909 = arith.mulf %908, %903 : vector<16x128xf32>
    %910 = arith.addf %906, %909 : vector<16x128xf32>
    %c5_677 = arith.constant 5 : index
    %c1_678 = arith.constant 1 : index
    %911 = memref.load %arg0[%c5_677, %c1_678] : memref<6x5xf32, #tpu.memory_space<smem>>
    %912 = vector.broadcast %911 : f32 to vector<16x128xf32>
    %913 = arith.mulf %912, %839 : vector<16x128xf32>
    %914 = arith.addf %910, %913 : vector<16x128xf32>
    %c5_679 = arith.constant 5 : index
    %c4_680 = arith.constant 4 : index
    %915 = memref.load %arg0[%c5_679, %c4_680] : memref<6x5xf32, #tpu.memory_space<smem>>
    %916 = vector.broadcast %915 : f32 to vector<16x128xf32>
    %917 = arith.mulf %916, %901 : vector<16x128xf32>
    %918 = arith.addf %914, %917 : vector<16x128xf32>
    %919 = arith.addf %857, %918 : vector<16x128xf32>
    %cst_681 = arith.constant 0.000000e+00 : f32
    %920 = vector.broadcast %cst_681 : f32 to vector<16x128xf32>
    %921 = arith.maximumf %919, %920 : vector<16x128xf32>
    %cst_682 = arith.constant 0.999994993 : f32
    %922 = vector.broadcast %cst_682 : f32 to vector<16x128xf32>
    %923 = arith.mulf %921, %922 : vector<16x128xf32>
    %924 = arith.truncf %923 : vector<16x128xf32> to vector<16x128xbf16>
    %c0_683 = arith.constant 0 : index
    %c0_684 = arith.constant 0 : index
    %925 = vector.load %arg25[%c0_683, %c0_684] : memref<128x2xbf16, #tpu.memory_space<vmem>>, vector<128x2xbf16>
    %cst_685 = arith.constant dense<0.000000e+00> : vector<16x2xf32>
    %926 = tpu.matmul %924, %925, %cst_685 {dimension_numbers = #tpu.dot_dimension_numbers<[1], [0], [0], [1], [0, 0, 1, 1], [], []>} : vector<16x128xbf16>, vector<128x2xbf16>, vector<16x2xf32> -> vector<16x2xf32>
    %cst_686 = arith.constant 6.250000e-02 : f32
    %927 = vector.broadcast %cst_686 : f32 to vector<16x2xf32>
    %928 = arith.mulf %926, %927 : vector<16x2xf32>
    %c0_687 = arith.constant 0 : index
    %c0_688 = arith.constant 0 : index
    %929 = vector.load %arg34[%c0_687, %c0_688] : memref<16x2xf32, #tpu.memory_space<vmem>>, vector<16x2xf32>
    tpu.vector_store %arg34[%c0_687, %c0_688], %928 {strides = array<i32>} : memref<16x2xf32, #tpu.memory_space<vmem>>, vector<16x2xf32>,
    %c0_689 = arith.constant 0 : index
    %c0_690 = arith.constant 0 : index
    %930 = vector.load %arg24[%c0_689, %c0_690] : memref<10x16xf32, #tpu.memory_space<vmem>>, vector<10x16xf32>
    %cst_691 = arith.constant dense<0.000000e+00> : vector<10x2xf32>
    %931 = tpu.matmul %930, %928, %cst_691 {dimension_numbers = #tpu.dot_dimension_numbers<[1], [0], [0], [1], [0, 0, 1, 1], [], []>} : vector<10x16xf32>, vector<16x2xf32>, vector<10x2xf32> -> vector<10x2xf32>
    %c0_692 = arith.constant 0 : index
    %c0_693 = arith.constant 0 : index
    %932 = vector.load %arg23[%c0_692, %c0_693] : memref<10x1xf32, #tpu.memory_space<vmem>>, vector<10x1xf32>
    %933 = vector.broadcast %932 : vector<10x1xf32> to vector<10x2xf32>
    %934 = arith.addf %931, %933 : vector<10x2xf32>
    %c0_694 = arith.constant 0 : index
    %c0_695 = arith.constant 0 : index
    %935 = vector.load %arg35[%c0_694, %c0_695] : memref<10x2xf32, #tpu.memory_space<vmem>>, vector<10x2xf32>
    tpu.vector_store %arg35[%c0_694, %c0_695], %934 {strides = array<i32>} : memref<10x2xf32, #tpu.memory_space<vmem>>, vector<10x2xf32>,
    return
  }
}

</mosaic_0001>

<bundles_post_ra>
// kernel: forward.1
= control target key start
LH: loop header
LB: loop body
LE: loop exit
PB: predicated region body
PF: predicated region fallthrough
CT: control target
= control target key end

     0   :  { %s7864_s6 = smov 1   ;;  %s7865_s10 = smov 2   ;;  %s11353_s0 = inlined_call_operand.smem [shape: u32[36], index: -1, kind: input, shape index: {}] }
   0x1   :  { %s7951_s5 = sld [smem:[%s11353_s0]]   ;;  %s7866_s14 = smov 3  }
   0x2   :  { %s7956_s9 = sld [smem:[%s11353_s0 + %s7864_s6]]   ;;  %s7867_s18 = smov 4  }
   0x3   :  { %s7961_s13 = sld [smem:[%s11353_s0 + %s7865_s10]]   ;;  %s7868_s22 = smov 5  }
   0x4   :  { %s7966_s17 = sld [smem:[%s11353_s0 + %s7866_s14]]   ;;  %s7869_s26 = smov 6  }
   0x5   :  { %s7971_s21 = sld [smem:[%s11353_s0 + %s7867_s18]]   ;;  %s7870_s30 = smov 7  }
   0x6   :  { %s7976_s25 = sld [smem:[%s11353_s0 + %s7868_s22]]   ;;  %s7871_s4 = smov 8  }
   0x7   :  { %s7981_s29 = sld [smem:[%s11353_s0 + %s7869_s26]]   ;;  %s7872_s10 = smov 9  }
   0x8   :  { %s7986_s3 = sld [smem:[%s11353_s0 + %s7870_s30]]   ;;  %s7873_s15 = smov 10  }
   0x9   :  { %s7991_s8 = sld [smem:[%s11353_s0 + %s7871_s4]]   ;;  %s7874_s20 = smov 11  }
   0xa   :  { %s7996_s14 = sld [smem:[%s11353_s0 + %s7872_s10]]   ;;  %s7875_s26 = smov 12  }
   0xb   :  { %11666 = sst [smem:[#allocation44_spill]] %s7971_s21  ;;  %s7876_s1 = smov 13  }
   0xc   :  { %s8001_s19 = sld [smem:[%s11353_s0 + %s7873_s15]]   ;;  %s7877_s7 = smov 14  }
   0xd   :  { %11667 = sst [smem:[#allocation45_spill]] %s7981_s29  ;;  %s7878_s15 = smov 15  }
   0xe   :  { %s8006_s24 = sld [smem:[%s11353_s0 + %s7874_s20]]   ;;  %s7879_s22 = smov 16  }
   0xf   :  { %s8011_s30 = sld [smem:[%s11353_s0 + %s7875_s26]]   ;;  %s7880_s28 = smov 17  }
  0x10   :  { %11668 = sst [smem:[#allocation46_spill]] %s7996_s14 }
  0x11   :  { %s8016_s6 = sld [smem:[%s11353_s0 + %s7876_s1]]  }
  0x12   :  { %11669 = sst [smem:[#allocation47_spill]] %s8001_s19 }
  0x13   :  { %s8021_s12 = sld [smem:[%s11353_s0 + %s7877_s7]]   ;;  %s7881_s7 = smov 18  }
  0x14   :  { %s8026_s20 = sld [smem:[%s11353_s0 + %s7878_s15]]   ;;  %s7882_s15 = smov 19  }
  0x15   :  { %s8031_s27 = sld [smem:[%s11353_s0 + %s7879_s22]]   ;;  %s7883_s22 = smov 20  }
  0x16   :  { %s8036_s4 = sld [smem:[%s11353_s0 + %s7880_s28]]   ;;  %s7884_s28 = smov 21  }
  0x17   :  { %11670 = sst [smem:[#allocation48_spill]] %s8016_s6 }
  0x18   :  { %s8046_s19 = sld [smem:[%s11353_s0 + %s7882_s15]]   ;;  %s7886_s15 = smov 23  }
  0x19   :  { %11671 = sst [smem:[#allocation49_spill]] %s8021_s12 }
  0x1a   :  { %s8041_s12 = sld [smem:[%s11353_s0 + %s7881_s7]]   ;;  %s7885_s7 = smov 22  }
  0x1b   :  { %11672 = sst [smem:[#allocation50_spill]] %s8031_s27 }
  0x1c   :  { %s8051_s14 = sld [smem:[%s11353_s0 + %s7883_s22]]   ;;  %s7887_s22 = smov 24  }
  0x1d   :  { %s8056_s29 = sld [smem:[%s11353_s0 + %s7884_s28]]   ;;  %s7888_s28 = smov 25  }
  0x1e   :  { %11674 = sst [smem:[#allocation52_spill]] %s8046_s19 }
  0x1f   :  { %s8061_s21 = sld [smem:[%s11353_s0 + %s7885_s7]]   ;;  %s7889_s7 = smov 26  }
  0x20   :  { %11673 = sst [smem:[#allocation51_spill]] %s8041_s12 }
  0x21   :  { %s8066_s19 = sld [smem:[%s11353_s0 + %s7886_s15]]   ;;  %s7890_s15 = smov 27  }
  0x22   :  { %11675 = sst [smem:[#allocation53_spill]] %s8051_s14 }
  0x23   :  { %s8071_s14 = sld [smem:[%s11353_s0 + %s7887_s22]]   ;;  %s7891_s22 = smov 28  }
  0x24   :  { %s8076_s12 = sld [smem:[%s11353_s0 + %s7888_s28]]   ;;  %s7892_s28 = smov 29  }
  0x25   :  { %11676 = sst [smem:[#allocation54_spill]] %s8061_s21 }
  0x26   :  { %s8081_s21 = sld [smem:[%s11353_s0 + %s7889_s7]]   ;;  %s7893_s7 = smov 30  }
  0x27   :  { %11677 = sst [smem:[#allocation55_spill]] %s8066_s19 }
  0x28   :  { %s8086_s19 = sld [smem:[%s11353_s0 + %s7890_s15]]   ;;  %s7894_s15 = smov 31  }
  0x29   :  { %11678 = sst [smem:[#allocation56_spill]] %s8071_s14 }
  0x2a   :  { %11679 = sst [smem:[#allocation57_spill]] %s8076_s12 }
  0x2b   :  { %s8091_s14 = sld [smem:[%s11353_s0 + %s7891_s22]]   ;;  %s7895_s22 = smov 32  }
  0x2c   :  { %s8096_s12 = sld [smem:[%s11353_s0 + %s7892_s28]]   ;;  %s7896_s28 = smov 33  }
  0x2d   :  { %s8101_s27 = sld [smem:[%s11353_s0 + %s7893_s7]]   ;;  %s7897_s7 = smov 34  }
  0x2e   :  { %11680 = sst [smem:[#allocation58_spill]] %s8086_s19 }
  0x2f   :  { %s8106_s19 = sld [smem:[%s11353_s0 + %s7894_s15]]   ;;  %s7898_s15 = smov 35  }
  0x30   :  { %s8111_s6 = sld [smem:[%s11353_s0 + %s7895_s22]]  }
  0x32   :  { %11681 = sst [smem:[#allocation59_spill]] %s8096_s12 }
  0x33   :  { %11682 = sst [smem:[#allocation60_spill]] %s8101_s27 }
  0x34   :  { %s8116_s12 = sld [smem:[%s11353_s0 + %s7896_s28]]  }
  0x35   :  { %11683 = sst [smem:[#allocation61_spill]] %s8106_s19 }
  0x36   :  { %s8121_s27 = sld [smem:[%s11353_s0 + %s7897_s7]]  }
  0x37   :  { %s8126_s19 = sld [smem:[%s11353_s0 + %s7898_s15]]  }
  0x38   :  { %77 = vsyncpa [#allocation4], 0 }
  0x39   :  { %78 = vsyncpa [#allocation3], 0 }
  0x3a   :  { %79 = vsyncpa [#allocation7], 0 }
  0x3b   :  { %80 = vsyncpa [#allocation10], 0 }
  0x3c   :  { %81 = vsyncpa [#allocation13], 0 }
  0x3d   :  { %82 = vsyncpa [#allocation16], 0 }
  0x3e   :  { %83 = vsyncpa [#allocation19], 0 }
  0x3f   :  { %84 = vsyncpa [#allocation22], 0 }
  0x40   :  { %85 = vsyncpa [#allocation25], 0 }
  0x41   :  { %86 = vsyncpa [#allocation28], 0  ;;  %s114_s22 = sshll.u32 %s7961_s13, 4  ;;  %s115_s22 = int_to_ptr.hbm [resolvable:$true] %s114_s22 }
  0x42   :  { %87 = vsyncpa [#allocation31], 0  ;;  %s7899_s23 = smov [#allocation6]   ;;  %s142_s26 = sshll.u32 %s7976_s25, 4  ;;  %s143_s26 = int_to_ptr.hbm [resolvable:$true] %s142_s26 }
  0x43   :  { %s116_s0 = sshll.u32 %s7899_s23, 4  ;;  %s7374_s28 = sshra.s32 %s115_s22, 4  ;;  %s117_s0 = int_to_ptr.vmem [resolvable:$true] %s116_s0  ;;  %s7375_s28 = int_to_ptr.hbm [resolvable:$true] %s7374_s28 }
  0x44   :  { %s7376_s1 = scalar_lea.hbm %s7375_s28, 64  ;;  %s7378_s2 = scalar_lea.hbm %s7961_s13, 64 }
  0x45   :  { %p7377_p0 = scmp.ne.s32.totalorder %s7375_s28, %s7376_s1  ;;  %p7379_p1 = scmp.lt.s32.totalorder %s7375_s28, %s7961_s13 }
  0x46   :  { %p7380_p2 = scmp.lt.s32.totalorder %s7378_s2, %s7376_s1 }
  0x48   :  { %p7381_p3 = por %p7380_p2, %p7379_p1 }
  0x4a   :  { %p7382_p4 = pnand %p7381_p3, %p7377_p0 }
  0x4c   :  { %7385 = shalt.err (!%p7382_p4)
}
  0x4d   :  { %s7900_s7 = smov 64   ;;  %s7901_s10 = smov 4  }
  0x4e   :  { %122 = dma.hbm_to_vmem [thread:$0]  %s115_s22, 1024, %s117_s0, [#allocation7], %s7900_s7, %s7900_s7, %s7901_s10  }
  0x4f   :  { %s7902_s11 = smov [#allocation9]   ;;  %s170_s16 = sshll.u32 %s7991_s8, 4  ;;  %s8136_s16 = int_to_ptr.hbm [resolvable:$true] %s170_s16 }
  0x50   :  { %s144_s15 = sshll.u32 %s7902_s11, 4  ;;  %s7398_s13 = sshra.s32 %s143_s26, 4  ;;  %s145_s15 = int_to_ptr.vmem [resolvable:$true] %s144_s15  ;;  %s7399_s13 = int_to_ptr.hbm [resolvable:$true] %s7398_s13 }
  0x51   :  { %s7400_s18 = scalar_lea.hbm %s7399_s13, 16  ;;  %s7402_s23 = scalar_lea.hbm %s7976_s25, 16 }
  0x52   :  { %p7401_p5 = scmp.ne.s32.totalorder %s7399_s13, %s7400_s18  ;;  %p7403_p6 = scmp.lt.s32.totalorder %s7399_s13, %s7976_s25 }
  0x53   :  { %p7404_p7 = scmp.lt.s32.totalorder %s7402_s23, %s7400_s18 }
  0x55   :  { %p7405_p8 = por %p7404_p7, %p7403_p6 }
  0x57   :  { %p7406_p9 = pnand %p7405_p8, %p7401_p5 }
  0x59   :  { %7409 = shalt.err (!%p7406_p9)
}
  0x5a   :  { %150 = dma.hbm_to_vmem [thread:$0]  %s143_s26, 256, %s145_s15, [#allocation10], %s7900_s7, %s7900_s7, %s7901_s10  }
  0x5b   :  { %s198_s22 = sshll.u32 %s8011_s30, 4  ;;  %s7903_s0 = smov [#allocation12]   ;;  %s8144_s22 = int_to_ptr.hbm [resolvable:$true] %s198_s22 }
  0x5c   :  { %s172_s28 = sshll.u32 %s7903_s0, 4  ;;  %s7422_s1 = sshra.s32 %s8136_s16, 4  ;;  %s173_s28 = int_to_ptr.vmem [resolvable:$true] %s172_s28  ;;  %s7423_s1 = int_to_ptr.hbm [resolvable:$true] %s7422_s1 }
  0x5d   :  { %s7424_s25 = scalar_lea.hbm %s7423_s1, 256  ;;  %s7426_s2 = scalar_lea.hbm %s7991_s8, 256 }
  0x5e   :  { %p7425_p10 = scmp.ne.s32.totalorder %s7423_s1, %s7424_s25  ;;  %p7427_p11 = scmp.lt.s32.totalorder %s7423_s1, %s7991_s8 }
  0x5f   :  { %p7428_p12 = scmp.lt.s32.totalorder %s7426_s2, %s7424_s25 }
  0x61   :  { %p7429_p13 = por %p7428_p12, %p7427_p11 }
  0x63   :  { %p7430_p0 = pnand %p7429_p13, %p7425_p10 }
  0x65   :  { %7433 = shalt.err (!%p7430_p0)
}
  0x66   :  { %178 = dma.hbm_to_vmem [thread:$0]  %s8136_s16, 4096, %s173_s28, [#allocation13], %s7900_s7, %s7900_s7, %s7901_s10  }
  0x67   :  { %s7904_s26 = smov [#allocation15]   ;;  %s226_s15 = sshll.u32 %s8026_s20, 4  ;;  %s8154_s15 = int_to_ptr.hbm [resolvable:$true] %s226_s15 }
  0x68   :  { %s200_s11 = sshll.u32 %s7904_s26, 4  ;;  %s7446_s8 = sshra.s32 %s8144_s22, 4  ;;  %s201_s11 = int_to_ptr.vmem [resolvable:$true] %s200_s11  ;;  %s7447_s8 = int_to_ptr.hbm [resolvable:$true] %s7446_s8 }
  0x69   :  { %s7448_s13 = scalar_lea.hbm %s7447_s8, 24  ;;  %s7450_s18 = scalar_lea.hbm %s8011_s30, 24 }
  0x6a   :  { %p7449_p1 = scmp.ne.s32.totalorder %s7447_s8, %s7448_s13  ;;  %p7451_p2 = scmp.lt.s32.totalorder %s7447_s8, %s8011_s30 }
  0x6b   :  { %p7452_p3 = scmp.lt.s32.totalorder %s7450_s18, %s7448_s13 }
  0x6d   :  { %p7453_p4 = por %p7452_p3, %p7451_p2 }
  0x6f   :  { %p7454_p5 = pnand %p7453_p4, %p7449_p1 }
  0x71   :  { %7457 = shalt.err (!%p7454_p5)
}
  0x72   :  { %206 = dma.hbm_to_vmem [thread:$0]  %s8144_s22, 384, %s201_s11, [#allocation16], %s7900_s7, %s7900_s7, %s7901_s10  }
  0x73   :  { %s252_s16 = sshll.u32 %s8036_s4, 4  ;;  %s7905_s23 = smov [#allocation18]   ;;  %s8164_s16 = int_to_ptr.hbm [resolvable:$true] %s252_s16 }
  0x74   :  { %s228_s0 = sshll.u32 %s7905_s23, 4  ;;  %s7470_s30 = sshra.s32 %s8154_s15, 4  ;;  %s229_s0 = int_to_ptr.vmem [resolvable:$true] %s228_s0  ;;  %s7471_s30 = int_to_ptr.hbm [resolvable:$true] %s7470_s30 }
  0x75   :  { %s7472_s28 = scalar_lea.hbm %s7471_s30, 64  ;;  %s7474_s1 = scalar_lea.hbm %s8026_s20, 64 }
  0x76   :  { %p7473_p6 = scmp.ne.s32.totalorder %s7471_s30, %s7472_s28  ;;  %p7475_p7 = scmp.lt.s32.totalorder %s7471_s30, %s8026_s20 }
  0x77   :  { %p7476_p8 = scmp.lt.s32.totalorder %s7474_s1, %s7472_s28 }
  0x79   :  { %p7477_p9 = por %p7476_p8, %p7475_p7 }
  0x7b   :  { %p7478_p10 = pnand %p7477_p9, %p7473_p6 }
  0x7d   :  { %7481 = shalt.err (!%p7478_p10)
}
  0x7e   :  { %234 = dma.hbm_to_vmem [thread:$0]  %s8154_s15, 1024, %s229_s0, [#allocation19], %s7900_s7, %s7900_s7, %s7901_s10  }
  0x7f   :  { %s7906_s22 = smov [#allocation21]   ;;  %s7494_s2 = sshra.s32 %s8164_s16, 4  ;;  %s7495_s2 = int_to_ptr.hbm [resolvable:$true] %s7494_s2 }
  0x80   :  { %s254_s25 = sshll.u32 %s7906_s22, 4  ;;  %s7496_s26 = scalar_lea.hbm %s7495_s2, 8  ;;  %s255_s25 = int_to_ptr.vmem [resolvable:$true] %s254_s25 }
  0x81   :  { %p7497_p11 = scmp.ne.s32.totalorder %s7495_s2, %s7496_s26  ;;  %s7498_s20 = scalar_lea.hbm %s8036_s4, 8 }
  0x82   :  { %p7499_p12 = scmp.lt.s32.totalorder %s7495_s2, %s8036_s4  ;;  %p7500_p13 = scmp.lt.s32.totalorder %s7498_s20, %s7496_s26 }
  0x84   :  { %p7501_p0 = por %p7500_p13, %p7499_p12 }
  0x86   :  { %p7502_p1 = pnand %p7501_p0, %p7497_p11 }
  0x88   :  { %7505 = shalt.err (!%p7502_p1)
}
  0x89   :  { %260 = dma.hbm_to_vmem [thread:$0]  %s8164_s16, 128, %s255_s25, [#allocation22], %s7900_s7, %s7900_s7, %s7901_s10  }
  0x8a   :  { %s282_s11 = sshll.u32 %s8056_s29, 4  ;;  %s7907_s15 = smov [#allocation24]   ;;  %s283_s11 = int_to_ptr.hbm [resolvable:$true] %s282_s11 }
  0x8b   :  { %s284_s8 = sshll.u32 %s7907_s15, 4  ;;  %s315_s13 = sshll.u32 %s8081_s21, 4  ;;  %s285_s8 = int_to_ptr.vmem [resolvable:$true] %s284_s8  ;;  %s316_s13 = int_to_ptr.hbm [resolvable:$true] %s315_s13 }
  0x8c   :  { %s7518_s4 = sshra.s32 %s283_s11, 4  ;;  %s7522_s23 = scalar_lea.hbm %s8056_s29, 64  ;;  %s7519_s4 = int_to_ptr.hbm [resolvable:$true] %s7518_s4 }
  0x8d   :  { %s7520_s18 = scalar_lea.hbm %s7519_s4, 64  ;;  %p7523_p3 = scmp.lt.s32.totalorder %s7519_s4, %s8056_s29 }
  0x8e   :  { %p7521_p2 = scmp.ne.s32.totalorder %s7519_s4, %s7520_s18  ;;  %p7524_p4 = scmp.lt.s32.totalorder %s7522_s23, %s7520_s18 }
  0x90   :  { %p7525_p5 = por %p7524_p4, %p7523_p3 }
  0x92   :  { %p7526_p6 = pnand %p7525_p5, %p7521_p2 }
  0x94   :  { %7529 = shalt.err (!%p7526_p6)
}
  0x95   :  { %s7908_s0 = smov 128   ;;  %s7909_s16 = smov 8  }
  0x96   :  { %290 = dma.hbm_to_vmem [thread:$0]  %s283_s11, 1024, %s285_s8, [#allocation25], %s7908_s0, %s7908_s0, %s7909_s16  }
  0x97   :  { %s7910_s30 = smov [#allocation27]   ;;  %s337_s1 = sshll.u32 %s8091_s14, 4  ;;  %s338_s1 = int_to_ptr.hbm [resolvable:$true] %s337_s1 }
  0x98   :  { %s317_s28 = sshll.u32 %s7910_s30, 4  ;;  %s7542_s29 = sshra.s32 %s316_s13, 4  ;;  %s318_s28 = int_to_ptr.vmem [resolvable:$true] %s317_s28  ;;  %s7543_s29 = int_to_ptr.hbm [resolvable:$true] %s7542_s29 }
  0x99   :  { %s7544_s22 = scalar_lea.hbm %s7543_s29, 4  ;;  %s7546_s25 = scalar_lea.hbm %s8081_s21, 4 }
  0x9a   :  { %p7545_p7 = scmp.ne.s32.totalorder %s7543_s29, %s7544_s22  ;;  %p7547_p8 = scmp.lt.s32.totalorder %s7543_s29, %s8081_s21 }
  0x9b   :  { %p7548_p9 = scmp.lt.s32.totalorder %s7546_s25, %s7544_s22 }
  0x9d   :  { %p7549_p10 = por %p7548_p9, %p7547_p8 }
  0x9f   :  { %p7550_p11 = pnand %p7549_p10, %p7545_p7 }
  0xa1   :  { %7553 = shalt.err (!%p7550_p11)
}
  0xa2   :  { %320 = dma.hbm_to_vmem [thread:$0]  %s316_s13, 64, %s318_s28, [#allocation28]  }
  0xa3   :  { %s93_s2 = sshll.u32 %s7951_s5, 4  ;;  %s7911_s26 = smov [#allocation30]   ;;  %s94_s2 = int_to_ptr.vmem [resolvable:$true] %s93_s2 }
  0xa4   :  { %s339_s20 = sshll.u32 %s7911_s26, 4  ;;  %s7566_s11 = sshra.s32 %s338_s1, 4  ;;  %s340_s20 = int_to_ptr.vmem [resolvable:$true] %s339_s20  ;;  %s7567_s11 = int_to_ptr.hbm [resolvable:$true] %s7566_s11 }
  0xa5   :  { %s7568_s15 = scalar_lea.hbm %s7567_s11, 1  ;;  %s7570_s8 = scalar_lea.hbm %s8091_s14, 1 }
  0xa6   :  { %p7569_p12 = scmp.ne.s32.totalorder %s7567_s11, %s7568_s15  ;;  %p7571_p13 = scmp.lt.s32.totalorder %s7567_s11, %s8091_s14 }
  0xa7   :  { %p7572_p0 = scmp.lt.s32.totalorder %s7570_s8, %s7568_s15 }
  0xa9   :  { %p7573_p1 = por %p7572_p0, %p7571_p13 }
  0xab   :  { %p7574_p2 = pnand %p7573_p1, %p7569_p12 }
  0xad   :  { %7577 = shalt.err (!%p7574_p2)
}
  0xae   :  { %342 = dma.hbm_to_vmem [thread:$0]  %s338_s1, 16, %s340_s20, [#allocation31]  }
  0xaf   :  { %s7590_s21 = sshra.s32 %s94_s2, 4  ;;  %s7594_s4 = scalar_lea.vmem %s7951_s5, 8  ;;  %s7591_s21 = int_to_ptr.vmem [resolvable:$true] %s7590_s21 }
  0xb0   :  { %s7592_s13 = scalar_lea.vmem %s7591_s21, 8  ;;  %p7595_p4 = scmp.lt.s32.totalorder %s7591_s21, %s7951_s5 }
  0xb1   :  { %p7593_p3 = scmp.ne.s32.totalorder %s7591_s21, %s7592_s13  ;;  %p7596_p5 = scmp.lt.s32.totalorder %s7594_s4, %s7592_s13 }
  0xb3   :  { %p7597_p6 = por %p7596_p5, %p7595_p4 }
  0xb5   :  { %p7598_p7 = pnand %p7597_p6, %p7593_p3 }
  0xb7   :  { %7601 = shalt.err (!%p7598_p7)
}
  0xb8   :  { %s7912_s18 = smov [#allocation2]   ;;  %s101_s14 = sshll.u32 %s7956_s9, 4  ;;  %s102_s14 = int_to_ptr.hbm [resolvable:$true] %s101_s14 }
  0xb9   :  { %96 = dma.vmem_to_smem %s94_s2, 128, %s7912_s18, [#allocation4]  }
  0xba   :  { %s7913_s23 = smov [#allocation5]   ;;  %s127_s28 = sshll.u32 %s7966_s17, 4  ;;  %s128_s28 = int_to_ptr.hbm [resolvable:$true] %s127_s28 }
  0xbb   :  { %s103_s30 = sshll.u32 %s7913_s23, 4  ;;  %s7602_s1 = sshra.s32 %s102_s14, 4  ;;  %s104_s30 = int_to_ptr.vmem [resolvable:$true] %s103_s30  ;;  %s7603_s1 = int_to_ptr.hbm [resolvable:$true] %s7602_s1 }
  0xbc   :  { %s7604_s29 = scalar_lea.hbm %s7603_s1, 1024  ;;  %s7606_s5 = scalar_lea.hbm %s7956_s9, 1024 }
  0xbd   :  { %p7605_p8 = scmp.ne.s32.totalorder %s7603_s1, %s7604_s29  ;;  %p7607_p9 = scmp.lt.s32.totalorder %s7603_s1, %s7956_s9 }
  0xbe   :  { %p7608_p10 = scmp.lt.s32.totalorder %s7606_s5, %s7604_s29 }
  0xc0   :  { %p7609_p11 = por %p7608_p10, %p7607_p9 }
  0xc2   :  { %p7610_p12 = pnand %p7609_p11, %p7605_p8 }
  0xc4   :  { %7613 = shalt.err (!%p7610_p12)
}
  0xc5   :  { %s7914_s22 = smov 256   ;;  %s7915_s25 = smov 16  }
  0xc6   :  { %109 = dma.hbm_to_vmem [thread:$0]  %s102_s14, 16384, %s104_s30, [#allocation3], %s7914_s22, %s7914_s22, %s7915_s25  }
  0xc7   :  { %s7916_s2 = smov [#allocation8]   ;;  %s157_s20 = sshll.u32 %s7986_s3, 4  ;;  %s8201_s20 = int_to_ptr.hbm [resolvable:$true] %s157_s20 }
  0xc8   :  { %s129_s26 = sshll.u32 %s7916_s2, 4  ;;  %s7626_s11 = sshra.s32 %s128_s28, 4  ;;  %s130_s26 = int_to_ptr.vmem [resolvable:$true] %s129_s26  ;;  %s7627_s11 = int_to_ptr.hbm [resolvable:$true] %s7626_s11 }
  0xc9   :  { %s7628_s9 = scalar_lea.hbm %s7627_s11, 64  ;;  %s7630_s15 = scalar_lea.hbm %s7966_s17, 64 }
  0xca   :  { %p7629_p13 = scmp.ne.s32.totalorder %s7627_s11, %s7628_s9  ;;  %p7631_p0 = scmp.lt.s32.totalorder %s7627_s11, %s7966_s17 }
  0xcb   :  { %p7632_p1 = scmp.lt.s32.totalorder %s7630_s15, %s7628_s9 }
  0xcd   :  { %p7633_p2 = por %p7632_p1, %p7631_p0 }
  0xcf   :  { %p7634_p3 = pnand %p7633_p2, %p7629_p13 }
  0xd1   :  { %7637 = shalt.err (!%p7634_p3)
}
  0xd2   :  { %135 = dma.hbm_to_vmem [thread:$0]  %s128_s28, 1024, %s130_s26, [#allocation7], %s7900_s7, %s7900_s7, %s7901_s10  }
  0xd3   :  { %s188_s8 = sshll.u32 %s8006_s24, 4  ;;  %s7917_s21 = smov [#allocation11]   ;;  %s189_s8 = int_to_ptr.hbm [resolvable:$true] %s188_s8 }
  0xd4   :  { %s159_s13 = sshll.u32 %s7917_s21, 4  ;;  %s7650_s4 = sshra.s32 %s8201_s20, 4  ;;  %s160_s13 = int_to_ptr.vmem [resolvable:$true] %s159_s13  ;;  %s7651_s4 = int_to_ptr.hbm [resolvable:$true] %s7650_s4 }
  0xd5   :  { %s7652_s17 = scalar_lea.hbm %s7651_s4, 256  ;;  %s7654_s18 = scalar_lea.hbm %s7986_s3, 256 }
  0xd6   :  { %p7653_p4 = scmp.ne.s32.totalorder %s7651_s4, %s7652_s17  ;;  %p7655_p5 = scmp.lt.s32.totalorder %s7651_s4, %s7986_s3 }
  0xd7   :  { %p7656_p6 = scmp.lt.s32.totalorder %s7654_s18, %s7652_s17 }
  0xd9   :  { %p7657_p7 = por %p7656_p6, %p7655_p5 }
  0xdb   :  { %p7658_p8 = pnand %p7657_p7, %p7653_p4 }
  0xdd   :  { %7661 = shalt.err (!%p7658_p8)
}
  0xde   :  { %s11684_s14 = sld [smem:[#allocation48_spill]]  ;;  %s7918_s23 = smov [#allocation14]  }
  0xdf   :  { %165 = dma.hbm_to_vmem [thread:$0]  %s8201_s20, 4096, %s160_s13, [#allocation10], %s7900_s7, %s7900_s7, %s7901_s10  }
  0xe0   :  { %s190_s30 = sshll.u32 %s7918_s23, 4  ;;  %s7674_s1 = sshra.s32 %s189_s8, 4  ;;  %s191_s30 = int_to_ptr.vmem [resolvable:$true] %s190_s30  ;;  %s7675_s1 = int_to_ptr.hbm [resolvable:$true] %s7674_s1 }
  0xe1   :  { %s7676_s3 = scalar_lea.hbm %s7675_s1, 4  ;;  %s7678_s29 = scalar_lea.hbm %s8006_s24, 4 }
  0xe2   :  { %p7677_p9 = scmp.ne.s32.totalorder %s7675_s1, %s7676_s3  ;;  %p7679_p10 = scmp.lt.s32.totalorder %s7675_s1, %s8006_s24 }
  0xe3   :  { %p7680_p11 = scmp.lt.s32.totalorder %s7678_s29, %s7676_s3 }
  0xe4   :  { %s211_s28 = sshll.u32 %s11684_s14, 4  ;;  %s8217_s28 = int_to_ptr.hbm [resolvable:$true] %s211_s28 }
  0xe5   :  { %p7681_p12 = por %p7680_p11, %p7679_p10 }
  0xe7   :  { %p7682_p13 = pnand %p7681_p12, %p7677_p9 }
  0xe9   :  { %7685 = shalt.err (!%p7682_p13)
}
  0xea   :  { %193 = dma.hbm_to_vmem [thread:$0]  %s189_s8, 64, %s191_s30, [#allocation13]  }
  0xeb   :  { %s11685_s5 = sld [smem:[#allocation50_spill]]  ;;  %s7919_s2 = smov [#allocation17]  }
  0xec   :  { %s213_s26 = sshll.u32 %s7919_s2, 4  ;;  %s7698_s20 = sshra.s32 %s8217_s28, 4  ;;  %s214_s26 = int_to_ptr.vmem [resolvable:$true] %s213_s26  ;;  %s7699_s20 = int_to_ptr.hbm [resolvable:$true] %s7698_s20 }
  0xed   :  { %s7700_s11 = scalar_lea.hbm %s7699_s20, 16  ;;  %s7702_s24 = scalar_lea.hbm %s11684_s14, 16 }
  0xee   :  { %p7701_p0 = scmp.ne.s32.totalorder %s7699_s20, %s7700_s11  ;;  %p7703_p1 = scmp.lt.s32.totalorder %s7699_s20, %s11684_s14 }
  0xef   :  { %p7704_p2 = scmp.lt.s32.totalorder %s7702_s24, %s7700_s11 }
  0xf1   :  { %s239_s22 = sshll.u32 %s11685_s5, 4  ;;  %p7705_p3 = por %p7704_p2, %p7703_p1  ;;  %s8222_s22 = int_to_ptr.hbm [resolvable:$true] %s239_s22 }
  0xf3   :  { %p7706_p4 = pnand %p7705_p3, %p7701_p0 }
  0xf5   :  { %7709 = shalt.err (!%p7706_p4)
}
  0xf6   :  { %s11686_s9 = sld [smem:[#allocation51_spill]]  ;;  %s7920_s15 = smov [#allocation20]  }
  0xf7   :  { %219 = dma.hbm_to_vmem [thread:$0]  %s8217_s28, 256, %s214_s26, [#allocation16], %s7900_s7, %s7900_s7, %s7901_s10  }
  0xf8   :  { %s241_s8 = sshll.u32 %s7920_s15, 4  ;;  %s7722_s13 = sshra.s32 %s8222_s22, 4  ;;  %s242_s8 = int_to_ptr.vmem [resolvable:$true] %s241_s8  ;;  %s7723_s13 = int_to_ptr.hbm [resolvable:$true] %s7722_s13 }
  0xf9   :  { %s7724_s4 = scalar_lea.hbm %s7723_s13, 64  ;;  %s7726_s17 = scalar_lea.hbm %s11685_s5, 64 }
  0xfa   :  { %p7725_p5 = scmp.ne.s32.totalorder %s7723_s13, %s7724_s4  ;;  %p7727_p6 = scmp.lt.s32.totalorder %s7723_s13, %s11685_s5 }
  0xfb   :  { %p7728_p7 = scmp.lt.s32.totalorder %s7726_s17, %s7724_s4 }
  0xfc   :  { %s265_s21 = sshll.u32 %s11686_s9, 4  ;;  %s8232_s21 = int_to_ptr.hbm [resolvable:$true] %s265_s21 }
  0xfd   :  { %p7729_p8 = por %p7728_p7, %p7727_p6 }
  0xff   :  { %p7730_p9 = pnand %p7729_p8, %p7725_p5 }
 0x101   :  { %7733 = shalt.err (!%p7730_p9)
}
 0x102   :  { %s11687_s18 = sld [smem:[#allocation56_spill]]  ;;  %s7921_s23 = smov [#allocation23]  }
 0x103   :  { %247 = dma.hbm_to_vmem [thread:$0]  %s8222_s22, 1024, %s242_s8, [#allocation19], %s7900_s7, %s7900_s7, %s7901_s10  }
 0x104   :  { %s267_s30 = sshll.u32 %s7921_s23, 4  ;;  %s7746_s28 = sshra.s32 %s8232_s21, 4  ;;  %s268_s30 = int_to_ptr.vmem [resolvable:$true] %s267_s30  ;;  %s7747_s28 = int_to_ptr.hbm [resolvable:$true] %s7746_s28 }
 0x105   :  { %s7748_s1 = scalar_lea.hbm %s7747_s28, 16  ;;  %s7750_s3 = scalar_lea.hbm %s11686_s9, 16 }
 0x106   :  { %p7749_p10 = scmp.ne.s32.totalorder %s7747_s28, %s7748_s1  ;;  %p7751_p11 = scmp.lt.s32.totalorder %s7747_s28, %s11686_s9 }
 0x107   :  { %p7752_p12 = scmp.lt.s32.totalorder %s7750_s3, %s7748_s1 }
 0x108   :  { %s299_s14 = sshll.u32 %s11687_s18, 4  ;;  %s8242_s14 = int_to_ptr.hbm [resolvable:$true] %s299_s14 }
 0x109   :  { %p7753_p13 = por %p7752_p12, %p7751_p11 }
 0x10b   :  { %p7754_p0 = pnand %p7753_p13, %p7749_p10 }
 0x10d   :  { %7757 = shalt.err (!%p7754_p0)
}
 0x10e   :  { %s11688_s7 = sld [smem:[#allocation58_spill]]  ;;  %s7922_s29 = smov [#allocation26]  }
 0x10f   :  { %273 = dma.hbm_to_vmem [thread:$0]  %s8232_s21, 256, %s268_s30, [#allocation22], %s7908_s0, %s7908_s0, %s7909_s16  }
 0x110   :  { %s301_s5 = sshll.u32 %s7922_s29, 4  ;;  %s7770_s2 = sshra.s32 %s8242_s14, 4  ;;  %s302_s5 = int_to_ptr.vmem [resolvable:$true] %s301_s5  ;;  %s7771_s2 = int_to_ptr.hbm [resolvable:$true] %s7770_s2 }
 0x111   :  { %s7772_s26 = scalar_lea.hbm %s7771_s2, 16  ;;  %s7774_s20 = scalar_lea.hbm %s11687_s18, 16 }
 0x112   :  { %p7773_p1 = scmp.ne.s32.totalorder %s7771_s2, %s7772_s26  ;;  %p7775_p2 = scmp.lt.s32.totalorder %s7771_s2, %s11687_s18 }
 0x113   :  { %p7776_p3 = scmp.lt.s32.totalorder %s7774_s20, %s7772_s26 }
 0x114   :  { %s326_s22 = sshll.u32 %s11688_s7, 4  ;;  %s327_s22 = int_to_ptr.hbm [resolvable:$true] %s326_s22 }
 0x115   :  { %p7777_p4 = por %p7776_p3, %p7775_p2 }
 0x117   :  { %p7778_p5 = pnand %p7777_p4, %p7773_p1 }
 0x119   :  { %7781 = shalt.err (!%p7778_p5)
}
 0x11a   :  { %307 = dma.hbm_to_vmem [thread:$0]  %s8242_s14, 256, %s302_s5, [#allocation25], %s7908_s0, %s7908_s0, %s7909_s16  }
 0x11b   :  { %s354_s11 = sshll.u32 %s8111_s6, 4  ;;  %s7923_s24 = smov [#allocation29]   ;;  %s355_s11 = int_to_ptr.hbm [resolvable:$true] %s354_s11 }
 0x11c   :  { %s328_s9 = sshll.u32 %s7923_s24, 4  ;;  %s7794_s15 = sshra.s32 %s327_s22, 4  ;;  %s329_s9 = int_to_ptr.vmem [resolvable:$true] %s328_s9  ;;  %s7795_s15 = int_to_ptr.hbm [resolvable:$true] %s7794_s15 }
 0x11d   :  { %s7796_s8 = scalar_lea.hbm %s7795_s15, 1  ;;  %s7798_s21 = scalar_lea.hbm %s11688_s7, 1 }
 0x11e   :  { %p7797_p6 = scmp.ne.s32.totalorder %s7795_s15, %s7796_s8  ;;  %p7799_p7 = scmp.lt.s32.totalorder %s7795_s15, %s11688_s7 }
 0x11f   :  { %p7800_p8 = scmp.lt.s32.totalorder %s7798_s21, %s7796_s8 }
 0x121   :  { %p7801_p9 = por %p7800_p8, %p7799_p7 }
 0x123   :  { %p7802_p10 = pnand %p7801_p9, %p7797_p6 }
 0x125   :  { %7805 = shalt.err (!%p7802_p10)
}
 0x126   :  { %331 = dma.hbm_to_vmem [thread:$0]  %s327_s22, 16, %s329_s9, [#allocation28]  }
 0x127   :  { %s7924_s13 = smov [#allocation32]   ;;  %s7818_s4 = sshra.s32 %s355_s11, 4  ;;  %s7819_s4 = int_to_ptr.hbm [resolvable:$true] %s7818_s4 }
 0x128   :  { %s356_s0 = sshll.u32 %s7924_s13, 4  ;;  %s7820_s17 = scalar_lea.hbm %s7819_s4, 4  ;;  %s357_s0 = int_to_ptr.vmem [resolvable:$true] %s356_s0 }
 0x129   :  { %p7821_p11 = scmp.ne.s32.totalorder %s7819_s4, %s7820_s17  ;;  %s7822_s18 = scalar_lea.hbm %s8111_s6, 4 }
 0x12a   :  { %p7823_p12 = scmp.lt.s32.totalorder %s7819_s4, %s8111_s6  ;;  %p7824_p13 = scmp.lt.s32.totalorder %s7822_s18, %s7820_s17 }
 0x12c   :  { %p7825_p0 = por %p7824_p13, %p7823_p12 }
 0x12e   :  { %p7826_p1 = pnand %p7825_p0, %p7821_p11 }
 0x130   :  { %7829 = shalt.err (!%p7826_p1)
}
 0x131   :  { %359 = dma.hbm_to_vmem [thread:$0]  %s355_s11, 64, %s357_s0, [#allocation31]  }
 0x132   :  { %7842 = dma.done.wait [#allocation4], 128  }
 0x133   :  { %7843 = vsyncadd [#allocation4], 4294967168 }
 0x134   :  { %7844 = dma.done.wait [#allocation3], 16384  }
 0x135   :  { %7845 = vsyncadd [#allocation3], 4294950912 }
 0x136   :  { %7846 = dma.done.wait [#allocation7], 2048  }
 0x137   :  { %7847 = vsyncadd [#allocation7], 4294965248 }
 0x138   :  { %7848 = dma.done.wait [#allocation10], 4352  }
 0x139   :  { %7849 = vsyncadd [#allocation10], 4294962944 }
 0x13a   :  { %7850 = dma.done.wait [#allocation13], 4160  }
 0x13b   :  { %7851 = vsyncadd [#allocation13], 4294963136 }
 0x13c   :  { %7852 = dma.done.wait [#allocation16], 640  }
 0x13d   :  { %7853 = vsyncadd [#allocation16], 4294966656 }
 0x13e   :  { %7854 = dma.done.wait [#allocation19], 2048  }
 0x13f   :  { %7855 = vsyncadd [#allocation19], 4294965248 }
 0x140   :  { %7856 = dma.done.wait [#allocation22], 384  }
 0x141   :  { %7857 = vsyncadd [#allocation22], 4294966912 }
 0x142   :  { %7858 = dma.done.wait [#allocation25], 1280  }
 0x143   :  { %7859 = vsyncadd [#allocation25], 4294966016 }
 0x144   :  { %7860 = dma.done.wait [#allocation28], 80  }
 0x145   :  { %7861 = vsyncadd [#allocation28], 4294967216 }
 0x146   :  { %7862 = dma.done.wait [#allocation31], 80  }
 0x147   :  { %7863 = vsyncadd [#allocation31], 4294967216 }
 0x148   :  { %442 = sfence }
 0x149   :  { %v8265_v0 = vld [vmem:[%s8116_s12 + $0x18] sm:$0xff]  ;;  %v8268_v1 = vld [vmem:[%s8116_s12 + $0x10] sm:$0xff]  ;;  %v8271_v2 = vld [vmem:[%s8116_s12] sm:$0xff]  ;;  %s7925_s6 = smov 111   ;;  %s7926_s14 = smov 113   ;;  %v461_v5 = vlaneseq  ;;  %vm650_vm1 = vcmask 1043456  }
 0x14a   :  { %615 = vrot.lane.b32.xlu1 %v8265_v0, %s7925_s6  ;;  %569 = vrot.lane.b32.xlu2 %v8268_v1, %s7926_s14  ;;  %s7927_s23 = smov 112   ;;  %v8292_v3 = vld [vmem:[%s8116_s12 + $0x8] sm:$0xff]  ;;  %s7928_s30 = smov 127   ;;  %vm646_vm9 = vcmask 588800   ;;  %vm4041_vm10 = vcmask 64512   ;;  %vm4789_vm11 = vcmask 130048  }
 0x14b   :  { %609 = vrot.lane.b32.xlu0 %v8271_v2, %s7925_s6  ;;  %s7929_s28 = smov 15   ;;  %s7930_s12 = smov 1   ;;  %v8342_v7 = vand.u32 127, %v461_v5  ;;  %vm5634_vm12 = vcmask 15360   ;;  %vm5681_vm13 = vcmask 9216  }
 0x14c   :  { %s7931_s1 = smov 17   ;;  %s11689_s3 = sld [smem:[#allocation59_spill]] }
 0x14d   :  { %vm617_vm0 = vcmp.lt.s32.totalorder %v8342_v7, 111  ;;  %vm573_vm2 = vcmp.lt.s32.totalorder %v8342_v7, 113  ;;  %vm595_vm3 = vcmp.lt.s32.totalorder %v8342_v7, 112  ;;  %vm551_vm4 = vcmp.lt.s32.totalorder %v8342_v7, 127  ;;  %s11690_s7 = sld [smem:[#allocation44_spill]] }
 0x14e   :  { %vm507_vm5 = vcmp.lt.s32.totalorder %v8342_v7, 15  ;;  %vm529_vm6 = vcmp.lt.s32.totalorder %v8342_v7, 1  ;;  %vm463_vm7 = vcmp.lt.s32.totalorder %v8342_v7, 17  ;;  %vm485_vm8 = vcmp.lt.s32.totalorder %v8342_v7, 16  ;;  %s6306_s29 = sld [smem:[#allocation2 + $0x2]]  ;;  %v7095_v7 = vld [vmem:[#allocation12 + $0x30] sm:$0xff] }
 0x14f   :  { %s6305_s5 = sld [smem:[#allocation2 + $0x3]] }
 0x150   :  { %s6307_s22 = sld [smem:[#allocation2 + $0x1]] }
 0x151   :  { %s6310_s2 = sld [smem:[#allocation2 + $0x82]] }
 0x152   :  { %571 = vrot.lane.b32.xlu2 %v8265_v0, %s7926_s14  ;;  %565 = vrot.lane.b32.xlu1 %v8271_v2, %s7926_s14  ;;  %v8346_v9 = vld [vmem:[%s11689_s3 + $0x118] sm:$0xff]  ;;  %v8355_v17 = vld [vmem:[%s11689_s3 + $0x110] sm:$0xff]  ;;  %s6311_s26 = sld [smem:[#allocation2 + $0x81]] }
 0x153   :  { %613 = vrot.lane.b32.xlu0 %v8268_v1, %s7925_s6  ;;  %v8369_v25 = vld [vmem:[%s11689_s3 + $0xd0] sm:$0xff]  ;;  %v8378_v29 = vld [vmem:[%s11689_s3 + $0xd8] sm:$0xff]  ;;  %v8394_v42 = vld [vmem:[%s11689_s3 + $0x100] sm:$0xff]  ;;  %s6309_s20 = sld [smem:[#allocation2 + $0x83]] }
 0x154   :  { %v8372_v26 = vld [vmem:[%s11689_s3 + $0xf0] sm:$0xff]  ;;  %v8381_v30 = vld [vmem:[%s11689_s3 + $0xf8] sm:$0xff]  ;;  %v8397_v43 = vld [vmem:[%s11689_s3 + $0x108] sm:$0xff]  ;;  %s6314_s11 = sld [smem:[#allocation2 + $0x182]] }
 0x155   :  { %v8411_v54 = vld [vmem:[%s11689_s3 + $0xb0] sm:$0xff]  ;;  %v8414_v55 = vld [vmem:[%s11689_s3 + $0xb8] sm:$0xff]  ;;  %s6315_s24 = sld [smem:[#allocation2 + $0x181]] }
 0x156   :  { %s6313_s9 = sld [smem:[#allocation2 + $0x183]] }
 0x157   :  { %s6308_s15 = sld [smem:[#allocation2 + $0x4]] }
 0x158   :  { %s6312_s8 = sld [smem:[#allocation2 + $0x84]] }
 0x159   :  { %s6316_s21 = sld [smem:[#allocation2 + $0x184]] }
 0x15a   :  { %593 = vrot.lane.b32.xlu2 %v8265_v0, %s7927_s23  ;;  %591 = vrot.lane.b32.xlu1 %v8268_v1, %s7927_s23  ;;  %s6333_s13 = sld [smem:[#allocation2 + $0x103]] }
 0x15b   :  { %587 = vrot.lane.b32.xlu0 %v8271_v2, %s7927_s23  ;;  %s6334_s0 = sld [smem:[#allocation2 + $0x102]] }
 0x15c   :  { %s6335_s4 = sld [smem:[#allocation2 + $0x101]] }
 0x15d   :  { %s6338_s17 = sld [smem:[#allocation2 + $0x202]] }
 0x15e   :  { %s6337_s18 = sld [smem:[#allocation2 + $0x203]] }
 0x162   :  { %547 = vrot.lane.b32.xlu2 %v8268_v1, %s7928_s30  ;;  %543 = vrot.lane.b32.xlu1 %v8271_v2, %s7928_s30 }
 0x163   :  { %611 = vrot.lane.b32.xlu0 %v8292_v3, %s7925_s6 }
 0x16a   :  { %503 = vrot.lane.b32.xlu2 %v8268_v1, %s7929_s28  ;;  %501 = vrot.lane.b32.xlu1 %v8292_v3, %s7929_s28 }
 0x16b   :  { %549 = vrot.lane.b32.xlu0 %v8265_v0, %s7928_s30 }
 0x172   :  { %525 = vrot.lane.b32.xlu2 %v8268_v1, %s7930_s12  ;;  %523 = vrot.lane.b32.xlu1 %v8292_v3, %s7930_s12 }
 0x173   :  { %505 = vrot.lane.b32.xlu0 %v8265_v0, %s7929_s28 }
 0x17a   :  { %589 = vrot.lane.b32.xlu2 %v8292_v3, %s7927_s23  ;;  %567 = vrot.lane.b32.xlu1 %v8292_v3, %s7926_s14 }
 0x17b   :  { %527 = vrot.lane.b32.xlu0 %v8265_v0, %s7930_s12 }
 0x182   :  { %459 = vrot.lane.b32.xlu2 %v8265_v0, %s7931_s1  ;;  %457 = vrot.lane.b32.xlu1 %v8268_v1, %s7931_s1 }
 0x183   :  { %455 = vrot.lane.b32.xlu0 %v8292_v3, %s7931_s1 }
 0x18a   :  { %483 = vrot.lane.b32.xlu2 %v8265_v0, %s7915_s25  ;;  %481 = vrot.lane.b32.xlu1 %v8268_v1, %s7915_s25 }
 0x18b   :  { %479 = vrot.lane.b32.xlu0 %v8292_v3, %s7915_s25 }
 0x192   :  { %521 = vrot.lane.b32.xlu2 %v8271_v2, %s7930_s12  ;;  %499 = vrot.lane.b32.xlu1 %v8271_v2, %s7929_s28 }
 0x193   :  { %545 = vrot.lane.b32.xlu0 %v8292_v3, %s7928_s30 }
 0x19a   :  { %477 = vrot.lane.b32.xlu1 %v8271_v2, %s7915_s25 }
 0x19b   :  { %453 = vrot.lane.b32.xlu0 %v8271_v2, %s7931_s1 }
 0x1a4   :  { %v8340_v4 = vpop.permute.xlu2 %569 }
 0x1ac   :  { %v572_v6 = vpop.permute.xlu2 %571 }
 0x1ad   :  { %v574_v23 = vsel %vm573_vm2, %v8340_v4, %v572_v6 }
 0x1ae   :  { %v580_v34 = vmul.f32 %v8369_v25, %v574_v23  ;;  %v8460_v23 = vld [vmem:[%s11689_s3 + $0xe8] sm:$0xff] }
 0x1b4   :  { %v594_v12 = vpop.permute.xlu2 %593 }
 0x1bc   :  { %v616_v8 = vpop.permute.xlu1 %615  ;;  %v8361_v21 = vpop.permute.xlu2 %547 }
 0x1bd   :  { %v610_v10 = vpop.permute.xlu0 %609 }
 0x1be   :  { %v621_v11 = vsel %vm617_vm0, %v616_v8, %v610_v10 }
 0x1bf   :  { %v625_v13 = vmul.f32 %v8346_v9, %v621_v11 }
 0x1c1   :  { %v645_v14 = vpack.c.bf16 %v625_v13, %v625_v13 }
 0x1c3   :  { %v661_v15 = vsel %vm650_vm1, %v645_v14, 0 }
 0x1c4   :  { %705 = vmatpush.bf16.msra.mxu3 %v661_v15  ;;  %v8352_v16 = vpop.permute.xlu1 %565  ;;  %v504_v40 = vpop.permute.xlu2 %503 }
 0x1c5   :  { %v614_v18 = vpop.permute.xlu0 %613  ;;  %v577_v27 = vsel %vm573_vm2, %v572_v6, %v8352_v16  ;;  %v8432_v6 = vld [vmem:[%s11689_s3 + $0x50] sm:$0xff] }
 0x1c6   :  { %v618_v19 = vsel %vm617_vm0, %v614_v18, %v616_v8  ;;  %v581_v36 = vmul.f32 %v8378_v29, %v577_v27  ;;  %v8435_v8 = vld [vmem:[%s11689_s3 + $0x70] sm:$0xff] }
 0x1c7   :  { %v624_v20 = vmul.f32 %v8355_v17, %v618_v19 }
 0x1c9   :  { %v644_v22 = vpack.c.bf16 %v624_v20, %v624_v20  ;;  %v8454_v20 = vld [vmem:[%s11689_s3 + $0xc0] sm:$0xff] }
 0x1cb   :  { %v658_v24 = vsel %vm650_vm1, %v644_v22, 0  ;;  %v8457_v22 = vld [vmem:[%s11689_s3 + $0xc8] sm:$0xff] }
 0x1cc   :  { %692 = vmatpush.bf16.msra.mxu2 %v658_v24  ;;  %v592_v28 = vpop.permute.xlu1 %591  ;;  %v526_v56 = vpop.permute.xlu2 %525 }
 0x1cd   :  { %v596_v31 = vsel %vm595_vm3, %v592_v28, %v594_v12  ;;  %v588_v32 = vpop.permute.xlu0 %587 }
 0x1ce   :  { %v599_v33 = vsel %vm595_vm3, %v594_v12, %v588_v32  ;;  %v602_v35 = vmul.f32 %v8372_v26, %v596_v31  ;;  %v8466_v31 = vld [vmem:[%s11689_s3 + $0x58] sm:$0xff] }
 0x1cf   :  { %v603_v37 = vmul.f32 %v8381_v30, %v599_v33 }
 0x1d0   :  { %v640_v38 = vpack.c.bf16 %v602_v35, %v580_v34 }
 0x1d1   :  { %v641_v39 = vpack.c.bf16 %v603_v37, %v581_v36 }
 0x1d2   :  { %693 = vmatpush.bf16.msra.mxu2 %v640_v38 }
 0x1d3   :  { %706 = vmatpush.bf16.msra.mxu3 %v641_v39 }
 0x1d4   :  { %v8391_v41 = vpop.permute.xlu1 %543  ;;  %v590_v13 = vpop.permute.xlu2 %589 }
 0x1d5   :  { %v612_v44 = vpop.permute.xlu0 %611  ;;  %v598_v15 = vsel %vm595_vm3, %v588_v32, %v590_v13  ;;  %v597_v19 = vsel %vm595_vm3, %v590_v13, %v592_v28  ;;  %v8469_v32 = vld [vmem:[%s11689_s3 + $0x78] sm:$0xff] }
 0x1d6   :  { %v620_v45 = vsel %vm617_vm0, %v610_v10, %v612_v44  ;;  %v619_v46 = vsel %vm617_vm0, %v612_v44, %v614_v18  ;;  %v8449_v18 = vld [vmem:[%s11689_s3 + $0xe0] sm:$0xff]  ;;  %v601_v39 = vmul.f32 %v8460_v23, %v597_v19  ;;  %v8518_v19 = vld [vmem:[%s11689_s3 + $0xa8] sm:$0xff] }
 0x1d7   :  { %v622_v47 = vmul.f32 %v8394_v42, %v620_v45  ;;  %v623_v48 = vmul.f32 %v8397_v43, %v619_v46  ;;  %v600_v35 = vmul.f32 %v8449_v18, %v598_v15  ;;  %v8515_v15 = vld [vmem:[%s11689_s3 + $0xa0] sm:$0xff] }
 0x1d9   :  { %v642_v49 = vpack.c.bf16 %v622_v47, %v622_v47  ;;  %v643_v50 = vpack.c.bf16 %v623_v48, %v623_v48 }
 0x1db   :  { %v652_v51 = vsel %vm650_vm1, %v642_v49, 0  ;;  %v655_v52 = vsel %vm650_vm1, %v643_v50, 0 }
 0x1dc   :  { %666 = vmatpush.bf16.msra.mxu0 %v652_v51  ;;  %679 = vmatpush.bf16.msra.mxu1 %v655_v52  ;;  %v8408_v53 = vpop.permute.xlu1 %501  ;;  %v8485_v45 = vpop.permute.xlu2 %459  ;;  %v8493_v51 = vld [vmem:[%s11689_s3 + $0x18] sm:$0xff] }
 0x1dd   :  { %v550_v57 = vpop.permute.xlu0 %549  ;;  %v509_v5 = vsel %vm507_vm5, %v8408_v53, %v504_v40  ;;  %v8496_v52 = vld [vmem:[%s11689_s3 + $0x38] sm:$0xff] }
 0x1de   :  { %v552_v58 = vsel %vm551_vm4, %v8361_v21, %v550_v57  ;;  %v555_v59 = vsel %vm551_vm4, %v550_v57, %v8391_v41  ;;  %v514_v11 = vmul.f32 %v8432_v6, %v509_v5 }
 0x1df   :  { %v558_v60 = vmul.f32 %v8411_v54, %v552_v58  ;;  %v559_v61 = vmul.f32 %v8414_v55, %v555_v59  ;;  %v8501_v58 = vld [vmem:[%s11689_s3 + $0x10] sm:$0xff] }
 0x1e0   :  { %v8504_v59 = vld [vmem:[%s11689_s3 + $0x30] sm:$0xff] }
 0x1e1   :  { %v636_v62 = vpack.c.bf16 %v558_v60, %v8268_v1  ;;  %v637_v63 = vpack.c.bf16 %v559_v61, %v8265_v0 }
 0x1e3   :  { %694 = vmatpush.bf16.msra.mxu2 %v636_v62  ;;  %707 = vmatpush.bf16.msra.mxu3 %v637_v63 }
 0x1e4   :  { %v8437_v10 = vpop.permute.xlu1 %523  ;;  %v484_v49 = vpop.permute.xlu2 %483 }
 0x1e5   :  { %v531_v0 = vsel %vm529_vm6, %v8437_v10, %v526_v56  ;;  %v8442_v1 = vpop.permute.xlu0 %505 }
 0x1e6   :  { %v536_v12 = vmul.f32 %v8435_v8, %v531_v0  ;;  %v508_v24 = vsel %vm507_vm5, %v504_v40, %v8442_v1 }
 0x1e7   :  { %v515_v40 = vmul.f32 %v8466_v31, %v508_v24  ;;  %v444_v24 = vld [vmem:[#allocation32] sm:$0xf] }
 0x1e8   :  { %v632_v14 = vpack.c.bf16 %v536_v12, %v514_v11 }
 0x1ea   :  { %695 = vmatpush.bf16.msra.mxu2 %v632_v14 }
 0x1ec   :  { %v568_v27 = vpop.permute.xlu1 %567 }
 0x1ed   :  { %v575_v33 = vsel %vm573_vm2, %v568_v27, %v8340_v4  ;;  %v576_v28 = vsel %vm573_vm2, %v8352_v16, %v568_v27  ;;  %v528_v34 = vpop.permute.xlu0 %527  ;;  %v522_v27 = vpop.permute.xlu2 %521 }
 0x1ee   :  { %v530_v36 = vsel %vm529_vm6, %v526_v56, %v528_v34  ;;  %v578_v37 = vmul.f32 %v8454_v20, %v576_v28  ;;  %v579_v38 = vmul.f32 %v8457_v22, %v575_v33 }
 0x1ef   :  { %v537_v4 = vmul.f32 %v8469_v32, %v530_v36 }
 0x1f0   :  { %v638_v44 = vpack.c.bf16 %v600_v35, %v578_v37  ;;  %v639_v16 = vpack.c.bf16 %v601_v39, %v579_v38  ;;  %v8534_v38 = vld [vmem:[%s11689_s3 + $0x40] sm:$0xff]  ;;  %v8537_v39 = vld [vmem:[%s11689_s3 + $0x48] sm:$0xff] }
 0x1f1   :  { %v633_v46 = vpack.c.bf16 %v537_v4, %v515_v40  ;;  %v8548_v40 = vld [vmem:[%s11689_s3 + $0x60] sm:$0xff]  ;;  %v8551_v4 = vld [vmem:[%s11689_s3 + $0x68] sm:$0xff] }
 0x1f2   :  { %667 = vmatpush.bf16.msra.mxu0 %v638_v44  ;;  %680 = vmatpush.bf16.msra.mxu1 %v639_v16 }
 0x1f3   :  { %708 = vmatpush.bf16.msra.mxu3 %v633_v46 }
 0x1f4   :  { %v458_v47 = vpop.permute.xlu1 %457 }
 0x1f5   :  { %v456_v48 = vpop.permute.xlu0 %455  ;;  %v464_v50 = vsel %vm463_vm7, %v458_v47, %v8485_v45 }
 0x1f6   :  { %v465_v56 = vsel %vm463_vm7, %v456_v48, %v458_v47  ;;  %v471_v63 = vmul.f32 %v464_v50, %v8493_v51 }
 0x1f7   :  { %v470_v0 = vmul.f32 %v465_v56, %v8501_v58  ;;  %v8560_v56 = vld [vmem:[%s11689_s3 + $0x20] sm:$0xff] }
 0x1fc   :  { %v482_v57 = vpop.permute.xlu1 %481 }
 0x1fd   :  { %v486_v60 = vsel %vm485_vm8, %v482_v57, %v484_v49  ;;  %v480_v61 = vpop.permute.xlu0 %479 }
 0x1fe   :  { %v487_v62 = vsel %vm485_vm8, %v480_v61, %v482_v57  ;;  %v493_v5 = vmul.f32 %v8496_v52, %v486_v60  ;;  %v8566_v60 = vld [vmem:[%s11689_s3] sm:$0xff] }
 0x1ff   :  { %v492_v11 = vmul.f32 %v8504_v59, %v487_v62 }
 0x200   :  { %v629_v12 = vpack.c.bf16 %v493_v5, %v471_v63 }
 0x201   :  { %v628_v13 = vpack.c.bf16 %v492_v11, %v470_v0 }
 0x202   :  { %709 = vmatpush.bf16.msra.mxu3 %v629_v12 }
 0x203   :  { %696 = vmatpush.bf16.msra.mxu2 %v628_v13 }
 0x204   :  { %v500_v14 = vpop.permute.xlu1 %499 }
 0x205   :  { %v546_v33 = vpop.permute.xlu0 %545  ;;  %5768 = vmatmul.msk.bf16.vlgmr.msra.gmra.mxu3 %vm646_vm9, %v444_v24  ;;  %v510_v28 = vsel %vm507_vm5, %v500_v14, %v8408_v53  ;;  %v511_v35 = vsel %vm507_vm5, %v8442_v1, %v500_v14 }
 0x206   :  { %v553_v36 = vsel %vm551_vm4, %v546_v33, %v8361_v21  ;;  %v554_v37 = vsel %vm551_vm4, %v8391_v41, %v546_v33  ;;  %5767 = vmatmul.msk.bf16.vlgmr.msra.gmra.mxu2 %vm646_vm9, %v444_v24  ;;  %v532_v21 = vsel %vm529_vm6, %v522_v27, %v8437_v10  ;;  %v533_v41 = vsel %vm529_vm6, %v528_v34, %v522_v27  ;;  %v8563_v34 = vld [vmem:[%s11689_s3 + $0x28] sm:$0xff] }
 0x207   :  { %v556_v53 = vmul.f32 %v8515_v15, %v554_v37  ;;  %v557_v1 = vmul.f32 %v8518_v19, %v553_v36  ;;  %v512_v46 = vmul.f32 %v8534_v38, %v511_v35  ;;  %v513_v47 = vmul.f32 %v8537_v39, %v510_v28 }
 0x208   :  { %v534_v10 = vmul.f32 %v8548_v40, %v533_v41  ;;  %v535_v50 = vmul.f32 %v8551_v4, %v532_v21 }
 0x209   :  { %v634_v44 = vpack.c.bf16 %v556_v53, %v8271_v2  ;;  %v635_v16 = vpack.c.bf16 %v557_v1, %v8292_v3  ;;  %v8569_v2 = vld [vmem:[%s11689_s3 + $0x8] sm:$0xff] }
 0x20a   :  { %v630_v5 = vpack.c.bf16 %v534_v10, %v512_v46  ;;  %v631_v0 = vpack.c.bf16 %v535_v50, %v513_v47 }
 0x20b   :  { %668 = vmatpush.bf16.msra.mxu0 %v634_v44  ;;  %681 = vmatpush.bf16.msra.mxu1 %v635_v16 }
 0x20c   :  { %v478_v57 = vpop.permute.xlu1 %477 }
 0x20d   :  { %v488_v3 = vsel %vm485_vm8, %v478_v57, %v480_v61  ;;  %v489_v62 = vsel %vm485_vm8, %v484_v49, %v478_v57  ;;  %v454_v63 = vpop.permute.xlu0 %453 }
 0x20e   :  { %v466_v11 = vsel %vm463_vm7, %v454_v63, %v456_v48  ;;  %v467_v12 = vsel %vm463_vm7, %v8485_v45, %v454_v63  ;;  %v490_v13 = vmul.f32 %v8560_v56, %v489_v62  ;;  %v491_v14 = vmul.f32 %v8563_v34, %v488_v3 }
 0x20f   :  { %669 = vmatpush.bf16.msra.mxu0 %v630_v5  ;;  %682 = vmatpush.bf16.msra.mxu1 %v631_v0  ;;  %v468_v61 = vmul.f32 %v467_v12, %v8566_v60  ;;  %v469_v49 = vmul.f32 %v466_v11, %v8569_v2 }
 0x211   :  { %v626_v27 = vpack.c.bf16 %v490_v13, %v468_v61  ;;  %v627_v33 = vpack.c.bf16 %v491_v14, %v469_v49 }
 0x213   :  { %670 = vmatpush.bf16.msra.mxu0 %v626_v27  ;;  %683 = vmatpush.bf16.msra.mxu1 %v627_v33 }
 0x216   :  { %5765 = vmatmul.msk.bf16.vlgmr.msra.gmra.mxu0 %vm646_vm9, %v444_v24  ;;  %5766 = vmatmul.msk.bf16.vlgmr.msra.gmra.mxu1 %vm646_vm9, %v444_v24 }
 0x288   :  { %v8586_v48 = vpop.f32.mrf.mxu3 }
 0x289   :  { %v8588_v45 = vpop.f32.mrf.mxu2  ;;  %v8619_v41 = vmax.f32 %v8586_v48, 0.0 }
 0x28a   :  { %v8628_v44 = vmax.f32 %v8588_v45, 0.0 }
 0x290   :  { %v713_v28 = vpop.f32.mrf.mxu3 }
 0x291   :  { %v700_v35 = vpop.f32.mrf.mxu2 }
 0x293   :  { %v8590_v36 = vpop.f32.mrf.mxu0  ;;  %v8592_v37 = vpop.f32.mrf.mxu1 }
 0x294   :  { %v8595_v53 = vmax.f32 %v8590_v36, 0.0  ;;  %v8598_v1 = vmax.f32 %v8592_v37, 0.0 }
 0x296   :  { %817 = vrot.lane.b32.xlu0 %v8598_v1, %s7927_s23  ;;  %833 = vrot.lane.b32.xlu2 %v8598_v1, %s7925_s6 }
 0x297   :  { %831 = vrot.lane.b32.xlu1 %v8595_v53, %s7925_s6 }
 0x29b   :  { %v674_v24 = vpop.f32.mrf.mxu0  ;;  %v687_v21 = vpop.f32.mrf.mxu1 }
 0x29e   :  { %785 = vrot.lane.b32.xlu0 %v8598_v1, %s7928_s30  ;;  %815 = vrot.lane.b32.xlu2 %v8595_v53, %s7927_s23 }
 0x29f   :  { %799 = vrot.lane.b32.xlu1 %v8595_v53, %s7926_s14 }
 0x2a6   :  { %721 = vrot.lane.b32.xlu0 %v8598_v1, %s7931_s1  ;;  %801 = vrot.lane.b32.xlu2 %v8598_v1, %s7926_s14 }
 0x2a7   :  { %783 = vrot.lane.b32.xlu1 %v8595_v53, %s7928_s30 }
 0x2ae   :  { %837 = vrot.lane.b32.xlu0 %v8619_v41, %s7925_s6  ;;  %753 = vrot.lane.b32.xlu2 %v8598_v1, %s7929_s28 }
 0x2af   :  { %769 = vrot.lane.b32.xlu1 %v8598_v1, %s7930_s12 }
 0x2b6   :  { %803 = vrot.lane.b32.xlu0 %v8628_v44, %s7926_s14  ;;  %737 = vrot.lane.b32.xlu2 %v8598_v1, %s7915_s25 }
 0x2b7   :  { %751 = vrot.lane.b32.xlu1 %v8595_v53, %s7929_s28 }
 0x2be   :  { %821 = vrot.lane.b32.xlu0 %v8619_v41, %s7927_s23  ;;  %767 = vrot.lane.b32.xlu2 %v8595_v53, %s7930_s12 }
 0x2bf   :  { %805 = vrot.lane.b32.xlu1 %v8619_v41, %s7926_s14 }
 0x2c6   :  { %787 = vrot.lane.b32.xlu0 %v8628_v44, %s7928_s30  ;;  %835 = vrot.lane.b32.xlu2 %v8628_v44, %s7925_s6 }
 0x2c7   :  { %789 = vrot.lane.b32.xlu1 %v8619_v41, %s7928_s30 }
 0x2ce   :  { %755 = vrot.lane.b32.xlu0 %v8628_v44, %s7929_s28  ;;  %819 = vrot.lane.b32.xlu2 %v8628_v44, %s7927_s23 }
 0x2cf   :  { %757 = vrot.lane.b32.xlu1 %v8619_v41, %s7929_s28 }
 0x2d6   :  { %739 = vrot.lane.b32.xlu0 %v8628_v44, %s7915_s25  ;;  %771 = vrot.lane.b32.xlu2 %v8628_v44, %s7930_s12 }
 0x2d7   :  { %723 = vrot.lane.b32.xlu1 %v8628_v44, %s7931_s1 }
 0x2de   :  { %725 = vrot.lane.b32.xlu0 %v8619_v41, %s7931_s1  ;;  %773 = vrot.lane.b32.xlu2 %v8619_v41, %s7930_s12 }
 0x2df   :  { %741 = vrot.lane.b32.xlu1 %v8619_v41, %s7915_s25 }
 0x2e6   :  { %735 = vrot.lane.b32.xlu0 %v8595_v53, %s7915_s25  ;;  %719 = vrot.lane.b32.xlu2 %v8595_v53, %s7931_s1 }
 0x2f0   :  { %v834_v16 = vpop.permute.xlu2 %833 }
 0x2f8   :  { %v816_v46 = vpop.permute.xlu2 %815 }
 0x300   :  { %v802_v47 = vpop.permute.xlu2 %801 }
 0x308   :  { %v818_v10 = vpop.permute.xlu0 %817  ;;  %v8670_v50 = vpop.permute.xlu2 %753 }
 0x309   :  { %v832_v57 = vpop.permute.xlu1 %831  ;;  %v825_v0 = vsel %vm595_vm3, %v816_v46, %v818_v10 }
 0x30a   :  { %v841_v3 = vsel %vm617_vm0, %v832_v57, %v834_v16  ;;  %v827_v49 = vmul.f32 %v8449_v18, %v825_v0 }
 0x30b   :  { %v843_v62 = vmul.f32 %v8394_v42, %v841_v3 }
 0x30d   :  { %v863_v63 = vpack.c.bf16 %v843_v62, %v843_v62 }
 0x30f   :  { %v898_v5 = vsel %vm650_vm1, %v863_v63, 0 }
 0x310   :  { %912 = vmatpush.bf16.msrb.mxu0 %v898_v5  ;;  %v786_v11 = vpop.permute.xlu0 %785  ;;  %v8678_v12 = vpop.permute.xlu2 %737 }
 0x311   :  { %v800_v13 = vpop.permute.xlu1 %799 }
 0x312   :  { %v809_v14 = vsel %vm573_vm2, %v800_v13, %v802_v47 }
 0x313   :  { %v811_v61 = vmul.f32 %v8454_v20, %v809_v14 }
 0x315   :  { %v859_v27 = vpack.c.bf16 %v827_v49, %v811_v61 }
 0x317   :  { %913 = vmatpush.bf16.msrb.mxu0 %v859_v27 }
 0x318   :  { %v8684_v42 = vpop.permute.xlu0 %721  ;;  %v8686_v33 = vpop.permute.xlu2 %767 }
 0x319   :  { %v784_v28 = vpop.permute.xlu1 %783 }
 0x31a   :  { %v793_v35 = vsel %vm551_vm4, %v784_v28, %v786_v11 }
 0x31b   :  { %v795_v24 = vmul.f32 %v8515_v15, %v793_v35 }
 0x31d   :  { %v855_v21 = vpack.c.bf16 %v795_v24, %v8595_v53 }
 0x31f   :  { %914 = vmatpush.bf16.msrb.mxu0 %v855_v21 }
 0x320   :  { %v838_v3 = vpop.permute.xlu0 %837  ;;  %v836_v62 = vpop.permute.xlu2 %835 }
 0x321   :  { %v842_v18 = vsel %vm617_vm0, %v838_v3, %v832_v57  ;;  %v839_v20 = vsel %vm617_vm0, %v836_v62, %v838_v3  ;;  %v840_v63 = vsel %vm617_vm0, %v834_v16, %v836_v62  ;;  %v770_v5 = vpop.permute.xlu1 %769 }
 0x322   :  { %v844_v0 = vmul.f32 %v8397_v43, %v840_v63  ;;  %v845_v14 = vmul.f32 %v8355_v17, %v839_v20  ;;  %v846_v15 = vmul.f32 %v8346_v9, %v842_v18 }
 0x324   :  { %v864_v53 = vpack.c.bf16 %v844_v0, %v844_v0  ;;  %v865_v61 = vpack.c.bf16 %v845_v14, %v845_v14  ;;  %v866_v49 = vpack.c.bf16 %v846_v15, %v846_v15 }
 0x326   :  { %v901_v27 = vsel %vm650_vm1, %v864_v53, 0  ;;  %v904_v57 = vsel %vm650_vm1, %v865_v61, 0  ;;  %v907_v35 = vsel %vm650_vm1, %v866_v49, 0 }
 0x327   :  { %936 = vmatpush.bf16.msrb.mxu1 %v901_v27  ;;  %960 = vmatpush.bf16.msrb.mxu2 %v904_v57  ;;  %v777_v57 = vsel %vm529_vm6, %v8686_v33, %v770_v5 }
 0x328   :  { %984 = vmatpush.bf16.msrb.mxu3 %v907_v35  ;;  %v804_v16 = vpop.permute.xlu0 %803  ;;  %v820_v24 = vpop.permute.xlu2 %819 }
 0x329   :  { %v808_v43 = vsel %vm573_vm2, %v802_v47, %v804_v16  ;;  %v824_v9 = vsel %vm595_vm3, %v818_v10, %v820_v24  ;;  %v752_v17 = vpop.permute.xlu1 %751 }
 0x32a   :  { %v812_v21 = vmul.f32 %v8457_v22, %v808_v43  ;;  %v828_v3 = vmul.f32 %v8460_v23, %v824_v9  ;;  %v761_v27 = vsel %vm507_vm5, %v752_v17, %v8670_v50 }
 0x32c   :  { %v860_v62 = vpack.c.bf16 %v828_v3, %v812_v21 }
 0x32e   :  { %937 = vmatpush.bf16.msrb.mxu1 %v860_v62 }
 0x330   :  { %v822_v18 = vpop.permute.xlu0 %821  ;;  %v772_v14 = vpop.permute.xlu2 %771 }
 0x331   :  { %v823_v20 = vsel %vm595_vm3, %v820_v24, %v822_v18  ;;  %v826_v63 = vsel %vm595_vm3, %v822_v18, %v816_v46  ;;  %v806_v0 = vpop.permute.xlu1 %805 }
 0x332   :  { %v807_v47 = vsel %vm573_vm2, %v804_v16, %v806_v0  ;;  %v810_v10 = vsel %vm573_vm2, %v806_v0, %v800_v13  ;;  %v829_v22 = vmul.f32 %v8372_v26, %v823_v20  ;;  %v830_v23 = vmul.f32 %v8381_v30, %v826_v63 }
 0x333   :  { %v813_v15 = vmul.f32 %v8369_v25, %v807_v47  ;;  %v814_v53 = vmul.f32 %v8378_v29, %v810_v10  ;;  %v7052_v10 = vld [vmem:[#allocation5 + $0x2ec] sm:$0xf0] }
 0x335   :  { %v861_v61 = vpack.c.bf16 %v829_v22, %v813_v15  ;;  %v862_v49 = vpack.c.bf16 %v830_v23, %v814_v53  ;;  %v7048_v15 = vld [vmem:[#allocation5 + $0x2cc] sm:$0xf0]  ;;  %v8773_v53 = vld [vmem:[%s11690_s7] sm:$0xff] }
 0x337   :  { %961 = vmatpush.bf16.msrb.mxu2 %v861_v61  ;;  %985 = vmatpush.bf16.msrb.mxu3 %v862_v49 }
 0x338   :  { %v788_v46 = vpop.permute.xlu0 %787  ;;  %v774_v43 = vpop.permute.xlu2 %773 }
 0x339   :  { %v792_v13 = vsel %vm551_vm4, %v786_v11, %v788_v46  ;;  %v790_v26 = vpop.permute.xlu1 %789  ;;  %v764_v11 = vmul.f32 %v8537_v39, %v761_v27 }
 0x33a   :  { %v791_v30 = vsel %vm551_vm4, %v788_v46, %v790_v26  ;;  %v794_v25 = vsel %vm551_vm4, %v790_v26, %v784_v28  ;;  %v796_v29 = vmul.f32 %v8518_v19, %v792_v13  ;;  %v780_v19 = vmul.f32 %v8551_v4, %v777_v57  ;;  %v6131_v46 = vld [vmem:[#allocation5 + $0x2a0] sm:$0xf]  ;;  %v7044_v13 = vld [vmem:[#allocation5 + $0x2ac] sm:$0xf0] }
 0x33b   :  { %v797_v35 = vmul.f32 %v8411_v54, %v791_v30  ;;  %v798_v16 = vmul.f32 %v8414_v55, %v794_v25  ;;  %v776_v28 = vsel %vm529_vm6, %v770_v5, %v772_v14  ;;  %v775_v54 = vsel %vm529_vm6, %v772_v14, %v774_v43  ;;  %v6147_v14 = vld [vmem:[#allocation5 + $0x2c0] sm:$0xf]  ;;  %v7084_v26 = vld [vmem:[#allocation5 + $0x3ec] sm:$0xf0] }
 0x33c   :  { %v856_v24 = vpack.c.bf16 %v796_v29, %v8598_v1  ;;  %v778_v55 = vsel %vm529_vm6, %v774_v43, %v8686_v33  ;;  %v852_v1 = vpack.c.bf16 %v780_v19, %v764_v11  ;;  %v781_v62 = vmul.f32 %v8435_v8, %v776_v28  ;;  %v7040_v43 = vld [vmem:[#allocation5 + $0x28c] sm:$0xf0] }
 0x33d   :  { %v857_v9 = vpack.c.bf16 %v797_v35, %v8628_v44  ;;  %v858_v21 = vpack.c.bf16 %v798_v16, %v8619_v41  ;;  %v779_v18 = vmul.f32 %v8548_v40, %v778_v55  ;;  %v8776_v49 = vor.u32 %v7048_v15, %v6147_v14  ;;  %v6988_v28 = vld [vmem:[#allocation5 + $0xec] sm:$0xf0]  ;;  %v5875_v14 = vld [vmem:[#allocation5 + $0xa0] sm:$0xf] }
 0x33e   :  { %938 = vmatpush.bf16.msrb.mxu1 %v856_v24  ;;  %v8787_v35 = vor.u32 %v7044_v13, %v6131_v46  ;;  %v6115_v24 = vld [vmem:[#allocation5 + $0x280] sm:$0xf]  ;;  %v6980_v15 = vld [vmem:[#allocation5 + $0xac] sm:$0xf0] }
 0x33f   :  { %962 = vmatpush.bf16.msrb.mxu2 %v857_v9  ;;  %986 = vmatpush.bf16.msrb.mxu3 %v858_v21  ;;  %v6275_v9 = vld [vmem:[#allocation5 + $0x3c0] sm:$0xf]  ;;  %v7080_v21 = vld [vmem:[#allocation5 + $0x3cc] sm:$0xf0] }
 0x340   :  { %v756_v39 = vpop.permute.xlu0 %755  ;;  %v720_v57 = vpop.permute.xlu2 %719  ;;  %11691 = vst [vmem:[#allocation62_spill] sm:$0xff] %v8787_v35  ;;  %v6067_v13 = vld [vmem:[#allocation5 + $0x220] sm:$0xf] }
 0x341   :  { %v760_v41 = vsel %vm507_vm5, %v8670_v50, %v756_v39  ;;  %v758_v44 = vpop.permute.xlu1 %757  ;;  %v782_v50 = vmul.f32 %v8469_v32, %v775_v54  ;;  %v729_v19 = vsel %vm463_vm7, %v720_v57, %v8684_v42  ;;  %v6035_v54 = vld [vmem:[#allocation5 + $0x1e0] sm:$0xf] }
 0x342   :  { %v759_v4 = vsel %vm507_vm5, %v756_v39, %v758_v44  ;;  %v762_v5 = vsel %vm507_vm5, %v758_v44, %v752_v17  ;;  %939 = vmatpush.bf16.msrb.mxu1 %v852_v1  ;;  %v765_v3 = vmul.f32 %v8432_v6, %v760_v41  ;;  %v8798_v39 = vor.u32 %v7040_v43, %v6115_v24  ;;  %v7020_v41 = vld [vmem:[#allocation5 + $0x1ec] sm:$0xf0]  ;;  %v6099_v44 = vld [vmem:[#allocation5 + $0x260] sm:$0xf] }
 0x343   :  { %v763_v33 = vmul.f32 %v8534_v38, %v762_v5  ;;  %v766_v20 = vmul.f32 %v8466_v31, %v759_v4  ;;  %v6163_v38 = vld [vmem:[#allocation5 + $0x2e0] sm:$0xf]  ;;  %v8800_v1 = vor.u32 %v7080_v21, %v6275_v9  ;;  %v7036_v4 = vld [vmem:[#allocation5 + $0x26c] sm:$0xf0] }
 0x344   :  { %v853_v63 = vpack.c.bf16 %v781_v62, %v765_v3  ;;  %v8770_v22 = vor.u32 %v7052_v10, %v6163_v38  ;;  %11692 = vst [vmem:[#allocation63_spill] sm:$0xff] %v8798_v39  ;;  %v6259_v3 = vld [vmem:[#allocation5 + $0x3a0] sm:$0xf]  ;;  %v7076_v62 = vld [vmem:[#allocation5 + $0x3ac] sm:$0xf0] }
 0x345   :  { %v851_v0 = vpack.c.bf16 %v779_v18, %v763_v33  ;;  %v854_v47 = vpack.c.bf16 %v782_v50, %v766_v20  ;;  %v732_v20 = vmul.f32 %v729_v19, %v8569_v2  ;;  %v6019_v2 = vld [vmem:[#allocation5 + $0x1c0] sm:$0xf]  ;;  %v7032_v38 = vld [vmem:[#allocation5 + $0x24c] sm:$0xf0] }
 0x346   :  { %963 = vmatpush.bf16.msrb.mxu2 %v853_v63  ;;  %v6243_v10 = vld [vmem:[#allocation5 + $0x380] sm:$0xf]  ;;  %v6976_v24 = vld [vmem:[#allocation5 + $0x8c] sm:$0xf0] }
 0x347   :  { %915 = vmatpush.bf16.msrb.mxu0 %v851_v0  ;;  %987 = vmatpush.bf16.msrb.mxu3 %v854_v47  ;;  %v8815_v0 = vor.u32 %v7020_v41, %v6035_v54  ;;  %v5891_v47 = vld [vmem:[#allocation5 + $0xc0] sm:$0xf]  ;;  %v7008_v9 = vld [vmem:[#allocation5 + $0x18c] sm:$0xf0]  ;;  %v6165_v54 = vld [vmem:[#allocation5 + $0x2f0] sm:$0xf0] }
 0x348   :  { %v740_v17 = vpop.permute.xlu0 %739  ;;  %v5987_v43 = vld [vmem:[#allocation5 + $0x180] sm:$0xf]  ;;  %v7024_v19 = vld [vmem:[#allocation5 + $0x20c] sm:$0xf0] }
 0x349   :  { %v744_v6 = vsel %vm485_vm8, %v8678_v12, %v740_v17  ;;  %v724_v8 = vpop.permute.xlu1 %723  ;;  %v6051_v21 = vld [vmem:[#allocation5 + $0x200] sm:$0xf]  ;;  %v8860_v41 = vor.u32 %v7008_v9, %v5987_v43  ;;  %v6964_v43 = vld [vmem:[#allocation5 + $0x2c] sm:$0xf0] }
 0x34a   :  { %v728_v31 = vsel %vm463_vm7, %v8684_v42, %v724_v8  ;;  %v749_v32 = vmul.f32 %v8504_v59, %v744_v6  ;;  %v5939_v9 = vld [vmem:[#allocation5 + $0x120] sm:$0xf] }
 0x34b   :  { %v733_v40 = vmul.f32 %v728_v31, %v8501_v58  ;;  %v6291_v58 = vld [vmem:[#allocation5 + $0x3e0] sm:$0xf]  ;;  %v7072_v31 = vld [vmem:[#allocation5 + $0x38c] sm:$0xf0]  ;;  %11704 = vst [vmem:[#allocation75_spill] sm:$0xff] %v8860_v41 }
 0x34c   :  { %v8789_v16 = vor.u32 %v7084_v26, %v6291_v58  ;;  %v8836_v46 = vor.u32 %v7072_v31, %v6243_v10  ;;  %v7028_v58 = vld [vmem:[#allocation5 + $0x22c] sm:$0xf0]  ;;  %v6227_v26 = vld [vmem:[#allocation5 + $0x360] sm:$0xf] }
 0x34d   :  { %v849_v23 = vpack.c.bf16 %v749_v32, %v733_v40  ;;  %v8824_v32 = vld [vmem:[%s11690_s7 + $0x8] sm:$0xff]  ;;  %v7000_v10 = vld [vmem:[#allocation5 + $0x14c] sm:$0xf0] }
 0x34e   :  { %11698 = vst [vmem:[#allocation69_spill] sm:$0xff] %v8836_v46 }
 0x34f   :  { %964 = vmatpush.bf16.msrb.mxu2 %v849_v23 }
 0x350   :  { %v726_v61 = vpop.permute.xlu0 %725 }
 0x351   :  { %v727_v27 = vsel %vm463_vm7, %v724_v8, %v726_v61  ;;  %v742_v59 = vpop.permute.xlu1 %741  ;;  %v7016_v8 = vld [vmem:[#allocation5 + $0x1cc] sm:$0xf0] }
 0x352   :  { %v743_v30 = vsel %vm485_vm8, %v740_v17, %v742_v59  ;;  %5787 = vmatmul.msk.bf16.vlgmr.msrb.gmra.mxu2 %vm646_vm9, %v8773_v53  ;;  %v734_v25 = vmul.f32 %v727_v27, %v8493_v51  ;;  %v730_v51 = vsel %vm463_vm7, %v726_v61, %v720_v57  ;;  %v6984_v17 = vld [vmem:[#allocation5 + $0xcc] sm:$0xf0]  ;;  %v8830_v23 = vor.u32 %v7016_v8, %v6019_v2  ;;  %v6003_v27 = vld [vmem:[#allocation5 + $0x1a0] sm:$0xf] }
 0x353   :  { %1803 = vmatpush.bf16.msra.mxu2 %v8770_v22  ;;  %v750_v29 = vmul.f32 %v8496_v52, %v743_v30  ;;  %v5907_v52 = vld [vmem:[#allocation5 + $0xe0] sm:$0xf]  ;;  %v731_v33 = vmul.f32 %v730_v51, %v8566_v60  ;;  %v8828_v40 = vor.u32 %v6984_v17, %v5891_v47  ;;  %v7068_v30 = vld [vmem:[#allocation5 + $0x36c] sm:$0xf0]  ;;  %v6149_v47 = vld [vmem:[#allocation5 + $0x2d0] sm:$0xf0] }
 0x354   :  { %v8813_v63 = vor.u32 %v6988_v28, %v5907_v52  ;;  %11696 = vst [vmem:[#allocation67_spill] sm:$0xff] %v8830_v23  ;;  %v5859_v57 = vld [vmem:[#allocation5 + $0x80] sm:$0xf]  ;;  %v7064_v52 = vld [vmem:[#allocation5 + $0x34c] sm:$0xf0] }
 0x355   :  { %v850_v11 = vpack.c.bf16 %v750_v29, %v734_v25  ;;  %11695 = vst [vmem:[#allocation66_spill] sm:$0xff] %v8828_v40  ;;  %v8846_v25 = vor.u32 %v6980_v15, %v5875_v14  ;;  %v6211_v51 = vld [vmem:[#allocation5 + $0x340] sm:$0xf]  ;;  %v7050_v28 = vld [vmem:[#allocation5 + $0x2e4] sm:$0xf]  ;;  %v8883_v8 = vld [vmem:[%s11690_s7 + $0x10] sm:$0xff] }
 0x356   :  { %v6179_v14 = vld [vmem:[#allocation5 + $0x300] sm:$0xf]  ;;  %v7056_v15 = vld [vmem:[#allocation5 + $0x30c] sm:$0xf0]  ;;  %s6339_s7 = sld [smem:[#allocation2 + $0x201]] }
 0x357   :  { %1804 = vmatpush.bf16.msra.mxu2 %v8776_v49  ;;  %988 = vmatpush.bf16.msrb.mxu3 %v850_v11  ;;  %11699 = vst [vmem:[#allocation70_spill] sm:$0xff] %v8846_v25  ;;  %v8854_v11 = vor.u32 %v7068_v30, %v6227_v26 }
 0x358   :  { %v736_v55 = vpop.permute.xlu0 %735 }
 0x359   :  { %v745_v42 = vsel %vm485_vm8, %v736_v55, %v8678_v12  ;;  %v746_v5 = vsel %vm485_vm8, %v742_v59, %v736_v55  ;;  %v8817_v12 = vor.u32 %v7036_v4, %v6099_v44  ;;  %v7012_v59 = vld [vmem:[#allocation5 + $0x1ac] sm:$0xf0]  ;;  %11702 = vst [vmem:[#allocation73_spill] sm:$0xff] %v8854_v11  ;;  %v8858_v55 = vor.u32 %v6976_v24, %v5859_v57  ;;  %v5843_v44 = vld [vmem:[#allocation5 + $0x60] sm:$0xf] }
 0x35a   :  { %5790 = vmatmul.msk.bf16.vlgmr.msrb.gmra.mxu3 %vm646_vm9, %v8773_v53  ;;  %v747_v18 = vmul.f32 %v8560_v56, %v746_v5  ;;  %v748_v50 = vmul.f32 %v8563_v34, %v745_v42  ;;  %v8821_v56 = vor.u32 %v7076_v62, %v6259_v3  ;;  %v6083_v34 = vld [vmem:[#allocation5 + $0x240] sm:$0xf]  ;;  %v8848_v29 = vor.u32 %v7012_v59, %v6003_v27  ;;  %v6972_v5 = vld [vmem:[#allocation5 + $0x6c] sm:$0xf0]  ;;  %v7042_v27 = vld [vmem:[#allocation5 + $0x2a4] sm:$0xf] }
 0x35b   :  { %1805 = vmatpush.bf16.msra.mxu2 %v8787_v35  ;;  %1816 = vmatpush.bf16.msra.mxu3 %v8789_v16  ;;  %11693 = vst [vmem:[#allocation64_spill] sm:$0xff] %v8817_v12  ;;  %v8834_v61 = vor.u32 %v7032_v38, %v6083_v34  ;;  %v8864_v4 = vor.u32 %v7024_v19, %v6051_v21  ;;  %v5971_v3 = vld [vmem:[#allocation5 + $0x160] sm:$0xf]  ;;  %v7004_v62 = vld [vmem:[#allocation5 + $0x16c] sm:$0xf0] }
 0x35c   :  { %v847_v60 = vpack.c.bf16 %v747_v18, %v731_v33  ;;  %v848_v6 = vpack.c.bf16 %v748_v50, %v732_v20  ;;  %11694 = vst [vmem:[#allocation65_spill] sm:$0xff] %v8821_v56  ;;  %v8866_v42 = vor.u32 %v7064_v52, %v6211_v51  ;;  %v8868_v33 = vor.u32 %v7050_v28, %v6165_v54  ;;  %v6195_v18 = vld [vmem:[#allocation5 + $0x320] sm:$0xf]  ;;  %v7060_v20 = vld [vmem:[#allocation5 + $0x32c] sm:$0xf0] }
 0x35d   :  { %11697 = vst [vmem:[#allocation68_spill] sm:$0xff] %v8834_v61  ;;  %v7046_v50 = vld [vmem:[#allocation5 + $0x2c4] sm:$0xf]  ;;  %v8874_v17 = vor.u32 %v6972_v5, %v5843_v44  ;;  %v8880_v2 = vor.u32 %v7060_v20, %v6195_v18  ;;  %v6968_v34 = vld [vmem:[#allocation5 + $0x4c] sm:$0xf0]  ;;  %v8895_v24 = vor.u32 %v7056_v15, %v6179_v14 }
 0x35e   :  { %916 = vmatpush.bf16.msrb.mxu0 %v847_v60  ;;  %940 = vmatpush.bf16.msrb.mxu1 %v848_v6  ;;  %11700 = vst [vmem:[#allocation71_spill] sm:$0xff] %v8848_v29  ;;  %v8876_v60 = vor.u32 %v7004_v62, %v5971_v3  ;;  %v5827_v6 = vld [vmem:[#allocation5 + $0x40] sm:$0xf]  ;;  %v8886_v31 = vor.u32 %v7046_v50, %v6149_v47  ;;  %v6133_v59 = vld [vmem:[#allocation5 + $0x2b0] sm:$0xf0] }
 0x35f   :  { %1806 = vmatpush.bf16.msra.mxu2 %v8798_v39  ;;  %1817 = vmatpush.bf16.msra.mxu3 %v8800_v1  ;;  %11703 = vst [vmem:[#allocation74_spill] sm:$0xff] %v8858_v55  ;;  %v5955_v38 = vld [vmem:[#allocation5 + $0x140] sm:$0xf]  ;;  %v8890_v26 = vor.u32 %v6968_v34, %v5827_v6  ;;  %v6996_v21 = vld [vmem:[#allocation5 + $0x12c] sm:$0xf0]  ;;  %v8900_v19 = vor.u32 %v7042_v27, %v6133_v59 }
 0x360   :  { %11705 = vst [vmem:[#allocation76_spill] sm:$0xff] %v8864_v4  ;;  %v8892_v30 = vor.u32 %v7000_v10, %v5955_v38  ;;  %v5811_v57 = vld [vmem:[#allocation5 + $0x20] sm:$0xf]  ;;  %v7038_v52 = vld [vmem:[#allocation5 + $0x284] sm:$0xf]  ;;  %v8912_v3 = vor.u32 %v6996_v21, %v5939_v9 }
 0x361   :  { %5781 = vmatmul.msk.bf16.vlgmr.msrb.gmra.mxu0 %vm646_vm9, %v8773_v53  ;;  %5784 = vmatmul.msk.bf16.vlgmr.msrb.gmra.mxu1 %vm646_vm9, %v8773_v53  ;;  %v8852_v53 = vor.u32 %v7028_v58, %v6067_v13  ;;  %11706 = vst [vmem:[#allocation77_spill] sm:$0xff] %v8866_v42  ;;  %v7082_v13 = vld [vmem:[#allocation5 + $0x3e4] sm:$0xf]  ;;  %v6293_v58 = vld [vmem:[#allocation5 + $0x3f0] sm:$0xf0]  ;;  %v8910_v5 = vor.u32 %v6964_v43, %v5811_v57 }
 0x362   :  { %1777 = vmatpush.bf16.msra.mxu0 %v8813_v63  ;;  %1790 = vmatpush.bf16.msra.mxu1 %v8815_v0  ;;  %11707 = vst [vmem:[#allocation78_spill] sm:$0xff] %v8868_v33  ;;  %v8902_v51 = vor.u32 %v7082_v13, %v6293_v58  ;;  %v6117_v28 = vld [vmem:[#allocation5 + $0x290] sm:$0xf0]  ;;  %v7078_v54 = vld [vmem:[#allocation5 + $0x3c4] sm:$0xf] }
 0x363   :  { %1807 = vmatpush.bf16.msra.mxu2 %v8817_v12  ;;  %1818 = vmatpush.bf16.msra.mxu3 %v8821_v56  ;;  %11701 = vst [vmem:[#allocation72_spill] sm:$0xff] %v8852_v53  ;;  %v6277_v44 = vld [vmem:[#allocation5 + $0x3d0] sm:$0xf0]  ;;  %v5795_v62 = vld [vmem:[#allocation5] sm:$0xf]  ;;  %v8917_v6 = vor.u32 %v7038_v52, %v6117_v28 }
 0x364   :  { %5788 = vmatmul.msk.bf16.gmra.mxu2 %vm646_vm9, %v8824_v32  ;;  %11708 = vst [vmem:[#allocation79_spill] sm:$0xff] %v8874_v17  ;;  %v6960_v18 = vld [vmem:[#allocation5 + $0xc] sm:$0xf0]  ;;  %v5923_v20 = vld [vmem:[#allocation5 + $0x100] sm:$0xf]  ;;  %v8919_v34 = vor.u32 %v7078_v54, %v6277_v44 }
 0x365   :  { %11709 = vst [vmem:[#allocation80_spill] sm:$0xff] %v8876_v60  ;;  %v6986_v50 = vld [vmem:[#allocation5 + $0xe4] sm:$0xf]  ;;  %v5909_v47 = vld [vmem:[#allocation5 + $0xf0] sm:$0xf0]  ;;  %v8923_v13 = vor.u32 %v6960_v18, %v5795_v62 }
 0x366   :  { %1778 = vmatpush.bf16.msra.mxu0 %v8828_v40  ;;  %1791 = vmatpush.bf16.msra.mxu1 %v8830_v23  ;;  %11710 = vst [vmem:[#allocation81_spill] sm:$0xff] %v8880_v2  ;;  %v7018_v38 = vld [vmem:[#allocation5 + $0x1e4] sm:$0xf]  ;;  %v6037_v10 = vld [vmem:[#allocation5 + $0x1f0] sm:$0xf0]  ;;  %v8927_v57 = vor.u32 %v6986_v50, %v5909_v47 }
 0x367   :  { %1808 = vmatpush.bf16.msra.mxu2 %v8834_v61  ;;  %1819 = vmatpush.bf16.msra.mxu3 %v8836_v46  ;;  %11711 = vst [vmem:[#allocation82_spill] sm:$0xff] %v8886_v31  ;;  %v7034_v14 = vld [vmem:[#allocation5 + $0x264] sm:$0xf]  ;;  %v6101_v15 = vld [vmem:[#allocation5 + $0x270] sm:$0xf0]  ;;  %v8929_v43 = vor.u32 %v7018_v38, %v6037_v10 }
 0x368   :  { %11712 = vst [vmem:[#allocation83_spill] sm:$0xff] %v8890_v26  ;;  %v7074_v27 = vld [vmem:[#allocation5 + $0x3a4] sm:$0xf]  ;;  %v6261_v59 = vld [vmem:[#allocation5 + $0x3b0] sm:$0xf0]  ;;  %v8933_v52 = vor.u32 %v7034_v14, %v6101_v15 }
 0x369   :  { %11713 = vst [vmem:[#allocation84_spill] sm:$0xff] %v8892_v30  ;;  %v6982_v9 = vld [vmem:[#allocation5 + $0xc4] sm:$0xf]  ;;  %v5893_v21 = vld [vmem:[#allocation5 + $0xd0] sm:$0xf0]  ;;  %v8935_v28 = vor.u32 %v7074_v27, %v6261_v59 }
 0x36a   :  { %1779 = vmatpush.bf16.msra.mxu0 %v8846_v25  ;;  %1792 = vmatpush.bf16.msra.mxu1 %v8848_v29  ;;  %11714 = vst [vmem:[#allocation85_spill] sm:$0xff] %v8895_v24  ;;  %v7014_v54 = vld [vmem:[#allocation5 + $0x1c4] sm:$0xf]  ;;  %v6021_v44 = vld [vmem:[#allocation5 + $0x1d0] sm:$0xf0]  ;;  %v8943_v50 = vor.u32 %v6982_v9, %v5893_v21 }
 0x36b   :  { %1809 = vmatpush.bf16.msra.mxu2 %v8852_v53  ;;  %1820 = vmatpush.bf16.msra.mxu3 %v8854_v11  ;;  %11715 = vst [vmem:[#allocation86_spill] sm:$0xff] %v8900_v19  ;;  %v7030_v62 = vld [vmem:[#allocation5 + $0x244] sm:$0xf]  ;;  %v6085_v18 = vld [vmem:[#allocation5 + $0x250] sm:$0xf0]  ;;  %v8945_v47 = vor.u32 %v7014_v54, %v6021_v44  ;;  %v9283_v11 = vstv %s6313_s9  ;;  %s12148_s9 = sld [smem:[#allocation49_spill]] }
 0x36c   :  { %5791 = vmatmul.msk.bf16.gmra.mxu3 %vm646_vm9, %v8824_v32  ;;  %11716 = vst [vmem:[#allocation87_spill] sm:$0xff] %v8902_v51  ;;  %v6978_v38 = vld [vmem:[#allocation5 + $0xa4] sm:$0xf]  ;;  %v5877_v10 = vld [vmem:[#allocation5 + $0xb0] sm:$0xf0]  ;;  %v8949_v14 = vor.u32 %v7030_v62, %v6085_v18  ;;  %v8963_v62 = vpack.c.bf16 %v8588_v45, %v8588_v45 }
 0x36d   :  { %11717 = vst [vmem:[#allocation88_spill] sm:$0xff] %v8910_v5  ;;  %v7010_v27 = vld [vmem:[#allocation5 + $0x1a4] sm:$0xf]  ;;  %v6005_v59 = vld [vmem:[#allocation5 + $0x1b0] sm:$0xf0]  ;;  %v8955_v9 = vor.u32 %v6978_v38, %v5877_v10 }
 0x36e   :  { %1780 = vmatpush.bf16.msra.mxu0 %v8858_v55  ;;  %1793 = vmatpush.bf16.msra.mxu1 %v8860_v41  ;;  %11718 = vst [vmem:[#allocation89_spill] sm:$0xff] %v8912_v3  ;;  %v8957_v21 = vor.u32 %v7010_v27, %v6005_v59  ;;  %v6974_v54 = vld [vmem:[#allocation5 + $0x84] sm:$0xf]  ;;  %v5861_v44 = vld [vmem:[#allocation5 + $0x90] sm:$0xf0] }
 0x36f   :  { %1810 = vmatpush.bf16.msra.mxu2 %v8864_v4  ;;  %1821 = vmatpush.bf16.msra.mxu3 %v8866_v42  ;;  %11719 = vst [vmem:[#allocation90_spill] sm:$0xff] %v8917_v6  ;;  %v7022_v38 = vld [vmem:[#allocation5 + $0x204] sm:$0xf]  ;;  %v6053_v10 = vld [vmem:[#allocation5 + $0x210] sm:$0xf0] }
 0x370   :  { %11720 = vst [vmem:[#allocation91_spill] sm:$0xff] %v8919_v34  ;;  %v7062_v27 = vld [vmem:[#allocation5 + $0x344] sm:$0xf]  ;;  %v6213_v59 = vld [vmem:[#allocation5 + $0x350] sm:$0xf0] }
 0x371   :  { %5782 = vmatmul.msk.bf16.gmra.mxu0 %vm646_vm9, %v8824_v32  ;;  %5785 = vmatmul.msk.bf16.gmra.mxu1 %vm646_vm9, %v8824_v32  ;;  %v6992_v32 = vld [vmem:[#allocation5 + $0x10c] sm:$0xf0]  ;;  %11721 = vst [vmem:[#allocation92_spill] sm:$0xff] %v8923_v13 }
 0x372   :  { %1781 = vmatpush.bf16.msra.mxu0 %v8874_v17  ;;  %1794 = vmatpush.bf16.msra.mxu1 %v8876_v60  ;;  %v8925_v58 = vor.u32 %v6992_v32, %v5923_v20  ;;  %11723 = vst [vmem:[#allocation94_spill] sm:$0xff] %v8927_v57  ;;  %v7070_v20 = vld [vmem:[#allocation5 + $0x384] sm:$0xf]  ;;  %v6245_v32 = vld [vmem:[#allocation5 + $0x390] sm:$0xf0] }
 0x373   :  { %1855 = vmatpush.bf16.msrb.mxu2 %v8868_v33  ;;  %1822 = vmatpush.bf16.msra.mxu3 %v8880_v2  ;;  %11724 = vst [vmem:[#allocation95_spill] sm:$0xff] %v8929_v43  ;;  %v8951_v15 = vor.u32 %v7070_v20, %v6245_v32  ;;  %v7006_v32 = vld [vmem:[#allocation5 + $0x184] sm:$0xf] }
 0x374   :  { %5789 = vmatmul.msk.bf16.gmra.mxu2 %vm646_vm9, %v8883_v8  ;;  %11722 = vst [vmem:[#allocation93_spill] sm:$0xff] %v8925_v58 }
 0x375   :  { %11725 = vst [vmem:[#allocation96_spill] sm:$0xff] %v8933_v52 }
 0x376   :  { %1782 = vmatpush.bf16.msra.mxu0 %v8890_v26  ;;  %1795 = vmatpush.bf16.msra.mxu1 %v8892_v30  ;;  %11726 = vst [vmem:[#allocation97_spill] sm:$0xff] %v8935_v28  ;;  %v9279_v26 = vstv %s6314_s11  ;;  %s6352_s11 = sld [smem:[#allocation2 + $0x284]] }
 0x377   :  { %1856 = vmatpush.bf16.msrb.mxu2 %v8886_v31  ;;  %1823 = vmatpush.bf16.msra.mxu3 %v8895_v24  ;;  %11727 = vst [vmem:[#allocation98_spill] sm:$0xff] %v8943_v50  ;;  %v7077_v31 = vld [vmem:[#allocation5 + $0x3b4] sm:$0xf0] }
 0x378   :  { %11728 = vst [vmem:[#allocation99_spill] sm:$0xff] %v8945_v47 }
 0x379   :  { %11729 = vst [vmem:[#allocation100_spill] sm:$0xff] %v8949_v14 }
 0x37a   :  { %1783 = vmatpush.bf16.msra.mxu0 %v8910_v5  ;;  %1796 = vmatpush.bf16.msra.mxu1 %v8912_v3  ;;  %11730 = vst [vmem:[#allocation101_spill] sm:$0xff] %v8951_v15  ;;  %v5899_v5 = vld [vmem:[#allocation5 + $0xc8] sm:$0xf] }
 0x37b   :  { %1857 = vmatpush.bf16.msrb.mxu2 %v8900_v19  ;;  %1868 = vmatpush.bf16.msrb.mxu3 %v8902_v51  ;;  %v7066_v51 = vld [vmem:[#allocation5 + $0x364] sm:$0xf]  ;;  %v6229_v19 = vld [vmem:[#allocation5 + $0x370] sm:$0xf0]  ;;  %11731 = vst [vmem:[#allocation102_spill] sm:$0xff] %v8955_v9 }
 0x37c   :  { %5792 = vmatmul.msk.bf16.gmra.mxu3 %vm646_vm9, %v8883_v8  ;;  %11732 = vst [vmem:[#allocation103_spill] sm:$0xff] %v8957_v21  ;;  %v8967_v20 = vor.u32 %v7066_v51, %v6229_v19  ;;  %v8976_v19 = vor.u32 %v6974_v54, %v5861_v44  ;;  %v6155_v54 = vld [vmem:[#allocation5 + $0x2c8] sm:$0xf]  ;;  %v7049_v44 = vld [vmem:[#allocation5 + $0x2d4] sm:$0xf0] }
 0x37d   :  { %11819 = vst [vmem:[#allocation190_spill] sm:$0xff] %v9279_v26 }
 0x37e   :  { %1784 = vmatpush.bf16.msra.mxu0 %v8923_v13  ;;  %1797 = vmatpush.bf16.msra.mxu1 %v8925_v58  ;;  %11734 = vst [vmem:[#allocation105_spill] sm:$0xff] %v8967_v20  ;;  %v6197_v13 = vld [vmem:[#allocation5 + $0x330] sm:$0xf0] }
 0x37f   :  { %1858 = vmatpush.bf16.msrb.mxu2 %v8917_v6  ;;  %1869 = vmatpush.bf16.msrb.mxu3 %v8919_v34  ;;  %v7026_v34 = vld [vmem:[#allocation5 + $0x224] sm:$0xf]  ;;  %v6069_v6 = vld [vmem:[#allocation5 + $0x230] sm:$0xf0]  ;;  %11735 = vst [vmem:[#allocation106_spill] sm:$0xff] %v8976_v19 }
 0x380   :  { %v8965_v18 = vor.u32 %v7026_v34, %v6069_v6  ;;  %v6970_v6 = vld [vmem:[#allocation5 + $0x64] sm:$0xf]  ;;  %v8984_v34 = vor.u32 %v7062_v27, %v6213_v59  ;;  %v5957_v59 = vld [vmem:[#allocation5 + $0x150] sm:$0xf0]  ;;  %11820 = vst [vmem:[#allocation191_spill] sm:$0xff] %v9283_v11 }
 0x381   :  { %5783 = vmatmul.msk.bf16.gmra.mxu0 %vm646_vm9, %v8883_v8  ;;  %5786 = vmatmul.msk.bf16.gmra.mxu1 %vm646_vm9, %v8883_v8  ;;  %v8982_v8 = vor.u32 %v7022_v38, %v6053_v10  ;;  %v6966_v10 = vld [vmem:[#allocation5 + $0x44] sm:$0xf] }
 0x382   :  { %1829 = vmatpush.bf16.msrb.mxu0 %v8927_v57  ;;  %1842 = vmatpush.bf16.msrb.mxu1 %v8929_v43  ;;  %11733 = vst [vmem:[#allocation104_spill] sm:$0xff] %v8965_v18  ;;  %v5973_v57 = vld [vmem:[#allocation5 + $0x170] sm:$0xf0]  ;;  %v6998_v27 = vld [vmem:[#allocation5 + $0x144] sm:$0xf] }
 0x383   :  { %1859 = vmatpush.bf16.msrb.mxu2 %v8933_v52  ;;  %1870 = vmatpush.bf16.msrb.mxu3 %v8935_v28  ;;  %v5989_v28 = vld [vmem:[#allocation5 + $0x190] sm:$0xf0]  ;;  %11737 = vst [vmem:[#allocation108_spill] sm:$0xff] %v8982_v8 }
 0x384   :  { %1811 = vmatmul.bf16.vlgmr.msra.gmra.mxu2 %v8963_v62  ;;  %v8978_v51 = vor.u32 %v7006_v32, %v5989_v28  ;;  %11738 = vst [vmem:[#allocation109_spill] sm:$0xff] %v8984_v34  ;;  %v5845_v52 = vld [vmem:[#allocation5 + $0x70] sm:$0xf0]  ;;  %v8992_v28 = vpack.c.bf16 %v8586_v48, %v8586_v48 }
 0x385   :  { %v8994_v32 = vor.u32 %v6970_v6, %v5845_v52  ;;  %v7054_v52 = vld [vmem:[#allocation5 + $0x304] sm:$0xf]  ;;  %v6181_v6 = vld [vmem:[#allocation5 + $0x310] sm:$0xf0] }
 0x386   :  { %1830 = vmatpush.bf16.msrb.mxu0 %v8943_v50  ;;  %1843 = vmatpush.bf16.msrb.mxu1 %v8945_v47  ;;  %11736 = vst [vmem:[#allocation107_spill] sm:$0xff] %v8978_v51  ;;  %v7002_v50 = vld [vmem:[#allocation5 + $0x164] sm:$0xf] }
 0x387   :  { %1860 = vmatpush.bf16.msrb.mxu2 %v8949_v14  ;;  %1871 = vmatpush.bf16.msrb.mxu3 %v8951_v15  ;;  %v6171_v15 = vld [vmem:[#allocation5 + $0x2e8] sm:$0xf]  ;;  %v7053_v14 = vld [vmem:[#allocation5 + $0x2f4] sm:$0xf0]  ;;  %11740 = vst [vmem:[#allocation111_spill] sm:$0xff] %v8994_v32  ;;  %v8996_v38 = vor.u32 %v7002_v50, %v5973_v57  ;;  %v9010_v50 = vor.u32 %v6998_v27, %v5957_v59 }
 0x388   :  { %v8986_v24 = vor.u32 %v7053_v14, %v6171_v15  ;;  %v5829_v15 = vld [vmem:[#allocation5 + $0x50] sm:$0xf0]  ;;  %v6123_v27 = vld [vmem:[#allocation5 + $0x288] sm:$0xf]  ;;  %v9026_v59 = vpack.c.bf16 %v8592_v37, %v8592_v37 }
 0x389   :  { %11741 = vst [vmem:[#allocation112_spill] sm:$0xff] %v8996_v38  ;;  %v9008_v57 = vor.u32 %v6966_v10, %v5829_v15  ;;  %v9018_v10 = vpack.c.bf16 %v8590_v36, %v8590_v36 }
 0x38a   :  { %1831 = vmatpush.bf16.msrb.mxu0 %v8955_v9  ;;  %1844 = vmatpush.bf16.msrb.mxu1 %v8957_v21  ;;  %11739 = vst [vmem:[#allocation110_spill] sm:$0xff] %v8986_v24  ;;  %v7058_v9 = vld [vmem:[#allocation5 + $0x324] sm:$0xf] }
 0x38b   :  { %1861 = vmatpush.bf16.msrb.mxu2 %v8965_v18  ;;  %1872 = vmatpush.bf16.msrb.mxu3 %v8967_v20  ;;  %v9000_v14 = vor.u32 %v7058_v9, %v6197_v13  ;;  %v9004_v20 = vor.u32 %v7049_v44, %v6155_v54  ;;  %11744 = vst [vmem:[#allocation115_spill] sm:$0xff] %v9008_v57  ;;  %v6139_v13 = vld [vmem:[#allocation5 + $0x2a8] sm:$0xf]  ;;  %v6962_v54 = vld [vmem:[#allocation5 + $0x24] sm:$0xf] }
 0x38c   :  { %1824 = vmatmul.bf16.vlgmr.msra.gmra.mxu3 %v8992_v28  ;;  %11745 = vst [vmem:[#allocation116_spill] sm:$0xff] %v9010_v50  ;;  %v6299_v9 = vld [vmem:[#allocation5 + $0x3e8] sm:$0xf]  ;;  %v5813_v44 = vld [vmem:[#allocation5 + $0x30] sm:$0xf0] }
 0x38d   :  { %11742 = vst [vmem:[#allocation113_spill] sm:$0xff] %v9000_v14  ;;  %v6994_v18 = vld [vmem:[#allocation5 + $0x124] sm:$0xf] }
 0x38e   :  { %1832 = vmatpush.bf16.msrb.mxu0 %v8976_v19  ;;  %1845 = vmatpush.bf16.msrb.mxu1 %v8978_v51  ;;  %11743 = vst [vmem:[#allocation114_spill] sm:$0xff] %v9004_v20  ;;  %v7081_v19 = vld [vmem:[#allocation5 + $0x3d4] sm:$0xf0]  ;;  %v5915_v51 = vld [vmem:[#allocation5 + $0xe8] sm:$0xf] }
 0x38f   :  { %1862 = vmatpush.bf16.msrb.mxu2 %v8982_v8  ;;  %1873 = vmatpush.bf16.msrb.mxu3 %v8984_v34  ;;  %v7085_v34 = vld [vmem:[#allocation5 + $0x3f4] sm:$0xf0]  ;;  %v9013_v8 = vor.u32 %v7054_v52, %v6181_v6  ;;  %v9030_v6 = vor.u32 %v6962_v54, %v5813_v44  ;;  %v6043_v54 = vld [vmem:[#allocation5 + $0x1e8] sm:$0xf] }
 0x390   :  { %v9020_v15 = vor.u32 %v7085_v34, %v6299_v9  ;;  %v6958_v9 = vld [vmem:[#allocation5 + $0x4] sm:$0xf]  ;;  %v7021_v44 = vld [vmem:[#allocation5 + $0x1f4] sm:$0xf0] }
 0x391   :  { %11746 = vst [vmem:[#allocation117_spill] sm:$0xff] %v9013_v8  ;;  %1785 = vmatmul.bf16.vlgmr.msra.gmra.mxu0 %v9018_v10  ;;  %1798 = vmatmul.bf16.vlgmr.msra.gmra.mxu1 %v9026_v59 }
 0x392   :  { %1833 = vmatpush.bf16.msrb.mxu0 %v8994_v32  ;;  %1846 = vmatpush.bf16.msrb.mxu1 %v8996_v38  ;;  %v5941_v32 = vld [vmem:[#allocation5 + $0x130] sm:$0xf0]  ;;  %11747 = vst [vmem:[#allocation118_spill] sm:$0xff] %v9020_v15 }
 0x393   :  { %1907 = vmatpush.bf16.msra.mxu2 %v8986_v24  ;;  %1874 = vmatpush.bf16.msrb.mxu3 %v9000_v14  ;;  %v7045_v24 = vld [vmem:[#allocation5 + $0x2b4] sm:$0xf0]  ;;  %11749 = vst [vmem:[#allocation120_spill] sm:$0xff] %v9030_v6  ;;  %v6283_v14 = vld [vmem:[#allocation5 + $0x3c8] sm:$0xf]  ;;  %v9033_v34 = vor.u32 %v6994_v18, %v5941_v32 }
 0x394   :  { %v9028_v52 = vor.u32 %v7045_v24, %v6139_v13  ;;  %v5797_v38 = vld [vmem:[#allocation5 + $0x10] sm:$0xf0]  ;;  %v6989_v24 = vld [vmem:[#allocation5 + $0xf4] sm:$0xf0]  ;;  %1863 = vmatmul.bf16.vlgmr.msrb.gmra.mxu2 %v8963_v62  ;;  %v9039_v13 = vor.u32 %v7081_v19, %v6283_v14  ;;  %v6107_v19 = vld [vmem:[#allocation5 + $0x268] sm:$0xf] }
 0x395   :  { %11750 = vst [vmem:[#allocation121_spill] sm:$0xff] %v9033_v34  ;;  %v9045_v32 = vor.u32 %v6958_v9, %v5797_v38  ;;  %v9050_v2 = vor.u32 %v6989_v24, %v5915_v51  ;;  %v7037_v14 = vld [vmem:[#allocation5 + $0x274] sm:$0xf0]  ;;  %v6027_v38 = vld [vmem:[#allocation5 + $0x1c8] sm:$0xf] }
 0x396   :  { %1834 = vmatpush.bf16.msrb.mxu0 %v9008_v57  ;;  %1847 = vmatpush.bf16.msrb.mxu1 %v9010_v50  ;;  %11748 = vst [vmem:[#allocation119_spill] sm:$0xff] %v9028_v52  ;;  %v6990_v57 = vld [vmem:[#allocation5 + $0x104] sm:$0xf]  ;;  %v5925_v50 = vld [vmem:[#allocation5 + $0x110] sm:$0xf0] }
 0x397   :  { %1908 = vmatpush.bf16.msra.mxu2 %v9004_v20  ;;  %v7041_v20 = vld [vmem:[#allocation5 + $0x294] sm:$0xf0]  ;;  %1875 = vmatpush.bf16.msrb.mxu3 %v9013_v8  ;;  %11751 = vst [vmem:[#allocation122_spill] sm:$0xff] %v9039_v13  ;;  %v6267_v8 = vld [vmem:[#allocation5 + $0x3a8] sm:$0xf]  ;;  %v9048_v21 = vor.u32 %v6990_v57, %v5925_v50  ;;  %v9059_v57 = vor.u32 %v7037_v14, %v6107_v19 }
 0x398   :  { %v9043_v18 = vor.u32 %v7041_v20, %v6123_v27  ;;  %11753 = vst [vmem:[#allocation124_spill] sm:$0xff] %v9045_v32  ;;  %v9055_v20 = vor.u32 %v7077_v31, %v6267_v8  ;;  %v7017_v27 = vld [vmem:[#allocation5 + $0x1d4] sm:$0xf0]  ;;  %v6251_v51 = vld [vmem:[#allocation5 + $0x388] sm:$0xf] }
 0x399   :  { %11754 = vst [vmem:[#allocation125_spill] sm:$0xff] %v9048_v21  ;;  %v7073_v50 = vld [vmem:[#allocation5 + $0x394] sm:$0xf0]  ;;  %v6091_v24 = vld [vmem:[#allocation5 + $0x248] sm:$0xf]  ;;  %v9067_v31 = vor.u32 %v7017_v27, %v6027_v38 }
 0x39a   :  { %1835 = vmatpush.bf16.msrb.mxu0 %v9030_v6  ;;  %11752 = vst [vmem:[#allocation123_spill] sm:$0xff] %v9043_v18  ;;  %1848 = vmatpush.bf16.msrb.mxu1 %v9033_v34  ;;  %v5883_v8 = vld [vmem:[#allocation5 + $0xa8] sm:$0xf]  ;;  %v9070_v19 = vor.u32 %v7073_v50, %v6251_v51  ;;  %v7029_v27 = vld [vmem:[#allocation5 + $0x234] sm:$0xf0] }
 0x39b   :  { %1920 = vmatpush.bf16.msra.mxu3 %v9020_v15  ;;  %1909 = vmatpush.bf16.msra.mxu2 %v9028_v52  ;;  %11755 = vst [vmem:[#allocation126_spill] sm:$0xff] %v9050_v2  ;;  %v9052_v15 = vor.u32 %v7021_v44, %v6043_v54  ;;  %v6985_v52 = vld [vmem:[#allocation5 + $0xd4] sm:$0xf0]  ;;  %v6011_v14 = vld [vmem:[#allocation5 + $0x1a8] sm:$0xf] }
 0x39c   :  { %11757 = vst [vmem:[#allocation128_spill] sm:$0xff] %v9055_v20  ;;  %v9063_v9 = vor.u32 %v6985_v52, %v5899_v5  ;;  %v7033_v54 = vld [vmem:[#allocation5 + $0x254] sm:$0xf0]  ;;  %1876 = vmatmul.bf16.vlgmr.msrb.gmra.mxu3 %v8992_v28  ;;  %v6235_v52 = vld [vmem:[#allocation5 + $0x368] sm:$0xf] }
 0x39d   :  { %11756 = vst [vmem:[#allocation127_spill] sm:$0xff] %v9052_v15  ;;  %v6981_v44 = vld [vmem:[#allocation5 + $0xb4] sm:$0xf0]  ;;  %v6075_v38 = vld [vmem:[#allocation5 + $0x228] sm:$0xf] }
 0x39e   :  { %1836 = vmatpush.bf16.msrb.mxu0 %v9045_v32  ;;  %11758 = vst [vmem:[#allocation129_spill] sm:$0xff] %v9059_v57  ;;  %1849 = vmatpush.bf16.msrb.mxu1 %v9048_v21  ;;  %v7013_v5 = vld [vmem:[#allocation5 + $0x1b4] sm:$0xf0]  ;;  %v5867_v32 = vld [vmem:[#allocation5 + $0x88] sm:$0xf] }
 0x39f   :  { %1921 = vmatpush.bf16.msra.mxu3 %v9039_v13  ;;  %1910 = vmatpush.bf16.msra.mxu2 %v9043_v18  ;;  %11759 = vst [vmem:[#allocation130_spill] sm:$0xff] %v9063_v9  ;;  %v9073_v13 = vor.u32 %v7033_v54, %v6091_v24  ;;  %v7069_v18 = vld [vmem:[#allocation5 + $0x374] sm:$0xf0]  ;;  %v9080_v51 = vor.u32 %v7013_v5, %v6011_v14  ;;  %v5995_v24 = vld [vmem:[#allocation5 + $0x188] sm:$0xf] }
 0x3a0   :  { %11760 = vst [vmem:[#allocation131_spill] sm:$0xff] %v9067_v31  ;;  %v9082_v50 = vor.u32 %v7069_v18, %v6235_v52  ;;  %v9085_v54 = vor.u32 %v7029_v27, %v6075_v38  ;;  %v6059_v6 = vld [vmem:[#allocation5 + $0x208] sm:$0xf]  ;;  %v6173_v18 = vld [vmem:[#allocation5 + $0x2f8] sm:$0xf0] }
 0x3a1   :  { %11761 = vst [vmem:[#allocation132_spill] sm:$0xff] %v9070_v19  ;;  %1837 = vmatmul.bf16.vlgmr.msrb.gmra.mxu0 %v9018_v10  ;;  %1850 = vmatmul.bf16.vlgmr.msrb.gmra.mxu1 %v9026_v59  ;;  %v5851_v14 = vld [vmem:[#allocation5 + $0x68] sm:$0xf]  ;;  %v6973_v5 = vld [vmem:[#allocation5 + $0x74] sm:$0xf0] }
 0x3a2   :  { %1881 = vmatpush.bf16.msra.mxu0 %v9050_v2  ;;  %1894 = vmatpush.bf16.msra.mxu1 %v9052_v15  ;;  %11762 = vst [vmem:[#allocation133_spill] sm:$0xff] %v9073_v13  ;;  %v9076_v2 = vor.u32 %v6981_v44, %v5883_v8  ;;  %v6219_v8 = vld [vmem:[#allocation5 + $0x348] sm:$0xf]  ;;  %v7065_v44 = vld [vmem:[#allocation5 + $0x354] sm:$0xf0] }
 0x3a3   :  { %1922 = vmatpush.bf16.msra.mxu3 %v9055_v20  ;;  %1911 = vmatpush.bf16.msra.mxu2 %v9059_v57  ;;  %v6977_v20 = vld [vmem:[#allocation5 + $0x94] sm:$0xf0]  ;;  %11764 = vst [vmem:[#allocation135_spill] sm:$0xff] %v9080_v51  ;;  %v7051_v15 = vld [vmem:[#allocation5 + $0x2ec] sm:$0xf]  ;;  %v9096_v38 = vor.u32 %v7065_v44, %v6219_v8 }
 0x3a4   :  { %11763 = vst [vmem:[#allocation134_spill] sm:$0xff] %v9076_v2  ;;  %v7009_v57 = vld [vmem:[#allocation5 + $0x194] sm:$0xf0]  ;;  %v7047_v21 = vld [vmem:[#allocation5 + $0x2cc] sm:$0xf] }
 0x3a5   :  { %11765 = vst [vmem:[#allocation136_spill] sm:$0xff] %v9082_v50  ;;  %v9094_v52 = vor.u32 %v7009_v57, %v5995_v24  ;;  %v7005_v27 = vld [vmem:[#allocation5 + $0x174] sm:$0xf0]  ;;  %v5835_v57 = vld [vmem:[#allocation5 + $0x48] sm:$0xf] }
 0x3a6   :  { %1882 = vmatpush.bf16.msra.mxu0 %v9063_v9  ;;  %1895 = vmatpush.bf16.msra.mxu1 %v9067_v31  ;;  %11766 = vst [vmem:[#allocation137_spill] sm:$0xff] %v9085_v54  ;;  %v9088_v9 = vor.u32 %v6977_v20, %v5867_v32  ;;  %v7025_v31 = vld [vmem:[#allocation5 + $0x214] sm:$0xf0]  ;;  %v5979_v20 = vld [vmem:[#allocation5 + $0x168] sm:$0xf] }
 0x3a7   :  { %1923 = vmatpush.bf16.msra.mxu3 %v9070_v19  ;;  %1912 = vmatpush.bf16.msra.mxu2 %v9073_v13  ;;  %11768 = vst [vmem:[#allocation139_spill] sm:$0xff] %v9094_v52  ;;  %v9099_v32 = vor.u32 %v7025_v31, %v6059_v6  ;;  %v9102_v19 = vor.u32 %v7051_v15, %v6173_v18  ;;  %v6969_v24 = vld [vmem:[#allocation5 + $0x54] sm:$0xf0]  ;;  %v5963_v15 = vld [vmem:[#allocation5 + $0x148] sm:$0xf] }
 0x3a8   :  { %11767 = vst [vmem:[#allocation138_spill] sm:$0xff] %v9088_v9  ;;  %v9104_v13 = vor.u32 %v6973_v5, %v5851_v14  ;;  %v9108_v6 = vor.u32 %v7005_v27, %v5979_v20  ;;  %v7001_v8 = vld [vmem:[#allocation5 + $0x154] sm:$0xf0]  ;;  %v9117_v18 = vor.u32 %v6969_v24, %v5835_v57  ;;  %v6187_v14 = vld [vmem:[#allocation5 + $0x308] sm:$0xf] }
 0x3a9   :  { %11769 = vst [vmem:[#allocation140_spill] sm:$0xff] %v9096_v38  ;;  %v7057_v5 = vld [vmem:[#allocation5 + $0x314] sm:$0xf0]  ;;  %v7083_v20 = vld [vmem:[#allocation5 + $0x3ec] sm:$0xf] }
 0x3aa   :  { %1883 = vmatpush.bf16.msra.mxu0 %v9076_v2  ;;  %1896 = vmatpush.bf16.msra.mxu1 %v9080_v51  ;;  %11770 = vst [vmem:[#allocation141_spill] sm:$0xff] %v9099_v32  ;;  %v6203_v2 = vld [vmem:[#allocation5 + $0x328] sm:$0xf]  ;;  %v7061_v51 = vld [vmem:[#allocation5 + $0x334] sm:$0xf0] }
 0x3ab   :  { %1924 = vmatpush.bf16.msra.mxu3 %v9082_v50  ;;  %1913 = vmatpush.bf16.msra.mxu2 %v9085_v54  ;;  %11771 = vst [vmem:[#allocation142_spill] sm:$0xff] %v9102_v19  ;;  %v6157_v50 = vld [vmem:[#allocation5 + $0x2d8] sm:$0xf0]  ;;  %v9111_v31 = vor.u32 %v7061_v51, %v6203_v2  ;;  %v7043_v54 = vld [vmem:[#allocation5 + $0x2ac] sm:$0xf]  ;;  %v9121_v2 = vor.u32 %v7001_v8, %v5963_v15 }
 0x3ac   :  { %11772 = vst [vmem:[#allocation143_spill] sm:$0xff] %v9104_v13  ;;  %v9115_v44 = vor.u32 %v7047_v21, %v6157_v50  ;;  %v6301_v27 = vld [vmem:[#allocation5 + $0x3f8] sm:$0xf0]  ;;  %v5819_v51 = vld [vmem:[#allocation5 + $0x28] sm:$0xf]  ;;  %v9124_v21 = vor.u32 %v7057_v5, %v6187_v14 }
 0x3ad   :  { %11773 = vst [vmem:[#allocation144_spill] sm:$0xff] %v9108_v6  ;;  %v5947_v50 = vld [vmem:[#allocation5 + $0x128] sm:$0xf]  ;;  %v6997_v57 = vld [vmem:[#allocation5 + $0x134] sm:$0xf0] }
 0x3ae   :  { %1884 = vmatpush.bf16.msra.mxu0 %v9088_v9  ;;  %1897 = vmatpush.bf16.msra.mxu1 %v9094_v52  ;;  %11774 = vst [vmem:[#allocation145_spill] sm:$0xff] %v9111_v31  ;;  %v6125_v15 = vld [vmem:[#allocation5 + $0x298] sm:$0xf0]  ;;  %v7079_v8 = vld [vmem:[#allocation5 + $0x3cc] sm:$0xf]  ;;  %v9135_v14 = vor.u32 %v6997_v57, %v5947_v50 }
 0x3af   :  { %1925 = vmatpush.bf16.msra.mxu3 %v9096_v38  ;;  %1914 = vmatpush.bf16.msra.mxu2 %v9099_v32  ;;  %11775 = vst [vmem:[#allocation146_spill] sm:$0xff] %v9115_v44  ;;  %v6141_v38 = vld [vmem:[#allocation5 + $0x2b8] sm:$0xf0]  ;;  %v9130_v32 = vor.u32 %v7083_v20, %v6301_v27  ;;  %v5803_v5 = vld [vmem:[#allocation5 + $0x8] sm:$0xf] }
 0x3b0   :  { %11776 = vst [vmem:[#allocation147_spill] sm:$0xff] %v9117_v18  ;;  %v9128_v24 = vor.u32 %v7043_v54, %v6141_v38  ;;  %v5931_v52 = vld [vmem:[#allocation5 + $0x108] sm:$0xf]  ;;  %v6987_v54 = vld [vmem:[#allocation5 + $0xec] sm:$0xf] }
 0x3b1   :  { %11777 = vst [vmem:[#allocation148_spill] sm:$0xff] %v9121_v2  ;;  %v5917_v38 = vld [vmem:[#allocation5 + $0xf8] sm:$0xf0]  ;;  %v7019_v27 = vld [vmem:[#allocation5 + $0x1ec] sm:$0xf] }
 0x3b2   :  { %1885 = vmatpush.bf16.msra.mxu0 %v9104_v13  ;;  %1915 = vmatmul.bf16.vlgmr.msra.gmra.mxu2 %v8963_v62  ;;  %11778 = vst [vmem:[#allocation149_spill] sm:$0xff] %v9124_v21  ;;  %v7039_v13 = vld [vmem:[#allocation5 + $0x28c] sm:$0xf] }
 0x3b3   :  { %1959 = vmatpush.bf16.msrb.mxu2 %v9102_v19  ;;  %1898 = vmatpush.bf16.msra.mxu1 %v9108_v6  ;;  %v6965_v19 = vld [vmem:[#allocation5 + $0x34] sm:$0xf0]  ;;  %11779 = vst [vmem:[#allocation150_spill] sm:$0xff] %v9128_v24  ;;  %v6285_v6 = vld [vmem:[#allocation5 + $0x3d8] sm:$0xf0] }
 0x3b4   :  { %1926 = vmatpush.bf16.msra.mxu3 %v9111_v31  ;;  %11780 = vst [vmem:[#allocation151_spill] sm:$0xff] %v9130_v32  ;;  %v9132_v9 = vor.u32 %v6965_v19, %v5819_v51  ;;  %v6961_v31 = vld [vmem:[#allocation5 + $0x14] sm:$0xf0]  ;;  %v9140_v19 = vor.u32 %v7039_v13, %v6125_v15  ;;  %v9142_v20 = vor.u32 %v7079_v8, %v6285_v6  ;;  %v6045_v51 = vld [vmem:[#allocation5 + $0x1f8] sm:$0xf0] }
 0x3b5   :  { %11782 = vst [vmem:[#allocation153_spill] sm:$0xff] %v9135_v14  ;;  %v7035_v50 = vld [vmem:[#allocation5 + $0x26c] sm:$0xf]  ;;  %v9145_v57 = vor.u32 %v6961_v31, %v5803_v5  ;;  %v9151_v13 = vor.u32 %v6987_v54, %v5917_v38  ;;  %v9153_v6 = vor.u32 %v7019_v27, %v6045_v51  ;;  %v5901_v8 = vld [vmem:[#allocation5 + $0xd8] sm:$0xf0] }
 0x3b6   :  { %1886 = vmatpush.bf16.msra.mxu0 %v9117_v18  ;;  %11781 = vst [vmem:[#allocation152_spill] sm:$0xff] %v9132_v9  ;;  %v6109_v18 = vld [vmem:[#allocation5 + $0x278] sm:$0xf0]  ;;  %v6983_v15 = vld [vmem:[#allocation5 + $0xcc] sm:$0xf] }
 0x3b7   :  { %1960 = vmatpush.bf16.msrb.mxu2 %v9115_v44  ;;  %1899 = vmatpush.bf16.msra.mxu1 %v9121_v2  ;;  %v6993_v44 = vld [vmem:[#allocation5 + $0x114] sm:$0xf0]  ;;  %11783 = vst [vmem:[#allocation154_spill] sm:$0xff] %v9140_v19  ;;  %v6269_v2 = vld [vmem:[#allocation5 + $0x3b8] sm:$0xf0]  ;;  %v9157_v31 = vor.u32 %v7035_v50, %v6109_v18  ;;  %v9164_v38 = vor.u32 %v6983_v15, %v5901_v8 }
 0x3b8   :  { %1927 = vmatpush.bf16.msra.mxu3 %v9124_v21  ;;  %11784 = vst [vmem:[#allocation155_spill] sm:$0xff] %v9142_v20  ;;  %v7075_v21 = vld [vmem:[#allocation5 + $0x3ac] sm:$0xf]  ;;  %v6253_v54 = vld [vmem:[#allocation5 + $0x398] sm:$0xf0] }
 0x3b9   :  { %11785 = vst [vmem:[#allocation156_spill] sm:$0xff] %v9145_v57  ;;  %v9159_v5 = vor.u32 %v7075_v21, %v6269_v2  ;;  %v7031_v34 = vld [vmem:[#allocation5 + $0x24c] sm:$0xf]  ;;  %v5885_v21 = vld [vmem:[#allocation5 + $0xb8] sm:$0xf0] }
 0x3ba   :  { %1887 = vmatpush.bf16.msra.mxu0 %v9132_v9  ;;  %11787 = vst [vmem:[#allocation158_spill] sm:$0xff] %v9151_v13  ;;  %v6029_v9 = vld [vmem:[#allocation5 + $0x1d8] sm:$0xf0]  ;;  %v6979_v2 = vld [vmem:[#allocation5 + $0xac] sm:$0xf] }
 0x3bb   :  { %1961 = vmatpush.bf16.msrb.mxu2 %v9128_v24  ;;  %1928 = vmatmul.bf16.vlgmr.msra.gmra.mxu3 %v8992_v28  ;;  %v9149_v24 = vor.u32 %v6993_v44, %v5931_v52  ;;  %11788 = vst [vmem:[#allocation159_spill] sm:$0xff] %v9153_v6  ;;  %v6093_v52 = vld [vmem:[#allocation5 + $0x258] sm:$0xf0]  ;;  %v7071_v44 = vld [vmem:[#allocation5 + $0x38c] sm:$0xf]  ;;  %v9178_v8 = vor.u32 %v6979_v2, %v5885_v21 }
 0x3bc   :  { %1972 = vmatpush.bf16.msrb.mxu3 %v9130_v32  ;;  %1900 = vmatpush.bf16.msra.mxu1 %v9135_v14  ;;  %11789 = vst [vmem:[#allocation160_spill] sm:$0xff] %v9157_v31  ;;  %v7015_v32 = vld [vmem:[#allocation5 + $0x1cc] sm:$0xf]  ;;  %v9171_v27 = vor.u32 %v7031_v34, %v6093_v52  ;;  %v9173_v51 = vor.u32 %v7071_v44, %v6253_v54  ;;  %v6077_v15 = vld [vmem:[#allocation5 + $0x238] sm:$0xf0] }
 0x3bd   :  { %11786 = vst [vmem:[#allocation157_spill] sm:$0xff] %v9149_v24  ;;  %v9167_v18 = vor.u32 %v7015_v32, %v6029_v9  ;;  %v7011_v50 = vld [vmem:[#allocation5 + $0x1ac] sm:$0xf]  ;;  %v6237_v32 = vld [vmem:[#allocation5 + $0x378] sm:$0xf0] }
 0x3be   :  { %11790 = vst [vmem:[#allocation161_spill] sm:$0xff] %v9159_v5  ;;  %1888 = vmatpush.bf16.msra.mxu0 %v9145_v57  ;;  %v7067_v9 = vld [vmem:[#allocation5 + $0x36c] sm:$0xf]  ;;  %v5869_v44 = vld [vmem:[#allocation5 + $0x98] sm:$0xf0] }
 0x3bf   :  { %1962 = vmatpush.bf16.msrb.mxu2 %v9140_v19  ;;  %11791 = vst [vmem:[#allocation162_spill] sm:$0xff] %v9164_v38  ;;  %v7027_v19 = vld [vmem:[#allocation5 + $0x22c] sm:$0xf]  ;;  %v6221_v21 = vld [vmem:[#allocation5 + $0x358] sm:$0xf0] }
 0x3c0   :  { %1973 = vmatpush.bf16.msrb.mxu3 %v9142_v20  ;;  %1901 = vmatpush.bf16.msra.mxu1 %v9149_v24  ;;  %11792 = vst [vmem:[#allocation163_spill] sm:$0xff] %v9167_v18  ;;  %v6013_v20 = vld [vmem:[#allocation5 + $0x1b8] sm:$0xf0]  ;;  %v6975_v52 = vld [vmem:[#allocation5 + $0x8c] sm:$0xf]  ;;  %v9185_v54 = vor.u32 %v7027_v19, %v6077_v15 }
 0x3c1   :  { %11793 = vst [vmem:[#allocation164_spill] sm:$0xff] %v9171_v27  ;;  %1889 = vmatmul.bf16.vlgmr.msra.gmra.mxu0 %v9018_v10  ;;  %v9181_v34 = vor.u32 %v7011_v50, %v6013_v20  ;;  %v7023_v57 = vld [vmem:[#allocation5 + $0x20c] sm:$0xf]  ;;  %v9190_v20 = vor.u32 %v6975_v52, %v5869_v44  ;;  %v5837_v44 = vld [vmem:[#allocation5 + $0x58] sm:$0xf0] }
 0x3c2   :  { %1933 = vmatpush.bf16.msrb.mxu0 %v9151_v13  ;;  %11794 = vst [vmem:[#allocation165_spill] sm:$0xff] %v9173_v51  ;;  %v5997_v13 = vld [vmem:[#allocation5 + $0x198] sm:$0xf0]  ;;  %v7063_v2 = vld [vmem:[#allocation5 + $0x34c] sm:$0xf] }
 0x3c3   :  { %1963 = vmatpush.bf16.msrb.mxu2 %v9157_v31  ;;  %1902 = vmatmul.bf16.vlgmr.msra.gmra.mxu1 %v9026_v59  ;;  %11795 = vst [vmem:[#allocation166_spill] sm:$0xff] %v9178_v8  ;;  %v7007_v31 = vld [vmem:[#allocation5 + $0x18c] sm:$0xf]  ;;  %v9199_v15 = vor.u32 %v7063_v2, %v6221_v21  ;;  %v5965_v2 = vld [vmem:[#allocation5 + $0x158] sm:$0xf0] }
 0x3c4   :  { %1946 = vmatpush.bf16.msrb.mxu1 %v9153_v6  ;;  %1974 = vmatpush.bf16.msrb.mxu3 %v9159_v5  ;;  %11796 = vst [vmem:[#allocation167_spill] sm:$0xff] %v9181_v34  ;;  %v9187_v5 = vor.u32 %v7067_v9, %v6237_v32  ;;  %v9193_v50 = vor.u32 %v7007_v31, %v5997_v13  ;;  %v7003_v9 = vld [vmem:[#allocation5 + $0x16c] sm:$0xf]  ;;  %v5981_v32 = vld [vmem:[#allocation5 + $0x178] sm:$0xf0] }
 0x3c5   :  { %11797 = vst [vmem:[#allocation168_spill] sm:$0xff] %v9185_v54  ;;  %v9205_v13 = vor.u32 %v7003_v9, %v5981_v32  ;;  %v6967_v31 = vld [vmem:[#allocation5 + $0x4c] sm:$0xf]  ;;  %v5821_v32 = vld [vmem:[#allocation5 + $0x38] sm:$0xf0] }
 0x3c6   :  { %1934 = vmatpush.bf16.msrb.mxu0 %v9164_v38  ;;  %11798 = vst [vmem:[#allocation169_spill] sm:$0xff] %v9187_v5  ;;  %v6061_v38 = vld [vmem:[#allocation5 + $0x218] sm:$0xf0]  ;;  %v7055_v21 = vld [vmem:[#allocation5 + $0x30c] sm:$0xf] }
 0x3c7   :  { %1964 = vmatpush.bf16.msrb.mxu2 %v9171_v27  ;;  %11799 = vst [vmem:[#allocation170_spill] sm:$0xff] %v9190_v20  ;;  %v6971_v27 = vld [vmem:[#allocation5 + $0x6c] sm:$0xf]  ;;  %v9197_v19 = vor.u32 %v7023_v57, %v6061_v38 }
 0x3c8   :  { %1947 = vmatpush.bf16.msrb.mxu1 %v9167_v18  ;;  %1975 = vmatpush.bf16.msrb.mxu3 %v9173_v51  ;;  %11800 = vst [vmem:[#allocation171_spill] sm:$0xff] %v9193_v50  ;;  %v5853_v51 = vld [vmem:[#allocation5 + $0x78] sm:$0xf0]  ;;  %v7059_v18 = vld [vmem:[#allocation5 + $0x32c] sm:$0xf] }
 0x3c9   :  { %11801 = vst [vmem:[#allocation172_spill] sm:$0xff] %v9197_v19  ;;  %v9202_v52 = vor.u32 %v6971_v27, %v5853_v51  ;;  %v6999_v38 = vld [vmem:[#allocation5 + $0x14c] sm:$0xf]  ;;  %v9212_v27 = vor.u32 %v6967_v31, %v5837_v44  ;;  %v5805_v44 = vld [vmem:[#allocation5 + $0x18] sm:$0xf0] }
 0x3ca   :  { %1935 = vmatpush.bf16.msrb.mxu0 %v9178_v8  ;;  %11802 = vst [vmem:[#allocation173_spill] sm:$0xff] %v9199_v15  ;;  %v6205_v8 = vld [vmem:[#allocation5 + $0x338] sm:$0xf0]  ;;  %v9216_v51 = vor.u32 %v6999_v38, %v5965_v2  ;;  %v6963_v9 = vld [vmem:[#allocation5 + $0x2c] sm:$0xf] }
 0x3cb   :  { %1965 = vmatpush.bf16.msrb.mxu2 %v9185_v54  ;;  %11803 = vst [vmem:[#allocation174_spill] sm:$0xff] %v9202_v52  ;;  %v9209_v57 = vor.u32 %v7059_v18, %v6205_v8  ;;  %v6995_v8 = vld [vmem:[#allocation5 + $0x12c] sm:$0xf]  ;;  %v5933_v2 = vld [vmem:[#allocation5 + $0x118] sm:$0xf0]  ;;  %v9247_v54 = vstv %s6307_s22  ;;  %s11990_s22 = sld [smem:[#allocation45_spill]] }
 0x3cc   :  { %1948 = vmatpush.bf16.msrb.mxu1 %v9181_v34  ;;  %1976 = vmatpush.bf16.msrb.mxu3 %v9187_v5  ;;  %11804 = vst [vmem:[#allocation175_spill] sm:$0xff] %v9205_v13  ;;  %v6189_v5 = vld [vmem:[#allocation5 + $0x318] sm:$0xf0]  ;;  %v6991_v38 = vld [vmem:[#allocation5 + $0x10c] sm:$0xf]  ;;  %v2020_v24 = vmul.f32 %v9247_v54, %v8586_v48  ;;  %v2018_v4 = vmul.f32 %v9247_v54, %v8592_v37 }
 0x3cd   :  { %11805 = vst [vmem:[#allocation176_spill] sm:$0xff] %v9209_v57  ;;  %v9219_v18 = vor.u32 %v7055_v21, %v6189_v5  ;;  %v9233_v21 = vor.u32 %v6991_v38, %v5933_v2 }
 0x3ce   :  { %1936 = vmatpush.bf16.msrb.mxu0 %v9190_v20  ;;  %11806 = vst [vmem:[#allocation177_spill] sm:$0xff] %v9212_v27 }
 0x3cf   :  { %1966 = vmatpush.bf16.msrb.mxu2 %v9197_v19  ;;  %11807 = vst [vmem:[#allocation178_spill] sm:$0xff] %v9216_v51  ;;  %v9222_v19 = vor.u32 %v6963_v9, %v5821_v32 }
 0x3d0   :  { %1949 = vmatpush.bf16.msrb.mxu1 %v9193_v50  ;;  %1977 = vmatpush.bf16.msrb.mxu3 %v9199_v15  ;;  %11808 = vst [vmem:[#allocation179_spill] sm:$0xff] %v9219_v18  ;;  %v5949_v15 = vld [vmem:[#allocation5 + $0x138] sm:$0xf0] }
 0x3d1   :  { %11809 = vst [vmem:[#allocation180_spill] sm:$0xff] %v9222_v19  ;;  %v9225_v31 = vor.u32 %v6995_v8, %v5949_v15 }
 0x3d2   :  { %1937 = vmatpush.bf16.msrb.mxu0 %v9202_v52  ;;  %1967 = vmatmul.bf16.vlgmr.msrb.gmra.mxu2 %v8963_v62  ;;  %v6959_v62 = vld [vmem:[#allocation5 + $0xc] sm:$0xf]  ;;  %11812 = vst [vmem:[#allocation183_spill] sm:$0xff] %v9233_v21 }
 0x3d3   :  { %11810 = vst [vmem:[#allocation181_spill] sm:$0xff] %v9225_v31  ;;  %v9229_v5 = vor.u32 %v6959_v62, %v5805_v44 }
 0x3d4   :  { %1950 = vmatpush.bf16.msrb.mxu1 %v9205_v13  ;;  %1978 = vmatpush.bf16.msrb.mxu3 %v9209_v57  ;;  %11815 = vst [vmem:[#allocation186_spill] sm:$0xff] %v9247_v54  ;;  %v9257_v13 = vstv %s6309_s20  ;;  %s6351_s20 = sld [smem:[#allocation2 + $0x281]] }
 0x3d5   :  { %11811 = vst [vmem:[#allocation182_spill] sm:$0xff] %v9229_v5  ;;  %v966_v15 = vpop.f32.mrf.mxu2 }
 0x3d6   :  { %1938 = vmatpush.bf16.msrb.mxu0 %v9212_v27  ;;  %11817 = vst [vmem:[#allocation188_spill] sm:$0xff] %v9257_v13 }
 0x3d8   :  { %1951 = vmatpush.bf16.msrb.mxu1 %v9216_v51  ;;  %1979 = vmatpush.bf16.msrb.mxu3 %v9219_v18  ;;  %v9241_v18 = vstv %s6306_s29  ;;  %v9255_v51 = vstv %s6310_s2  ;;  %s6336_s29 = sld [smem:[#allocation2 + $0x104]] }
 0x3d9   :  { %11813 = vst [vmem:[#allocation184_spill] sm:$0xff] %v9241_v18  ;;  %s6349_s2 = sld [smem:[#allocation2 + $0x283]] }
 0x3da   :  { %1939 = vmatpush.bf16.msrb.mxu0 %v9222_v19  ;;  %11816 = vst [vmem:[#allocation187_spill] sm:$0xff] %v9255_v51 }
 0x3db   :  { %1980 = vmatmul.bf16.vlgmr.msrb.gmra.mxu3 %v8992_v28 }
 0x3dc   :  { %1952 = vmatpush.bf16.msrb.mxu1 %v9225_v31  ;;  %v2019_v31 = vmul.f32 %v9247_v54, %v8588_v45 }
 0x3dd   :  { %v968_v9 = vpop.f32.mrf.mxu2  ;;  %v990_v32 = vpop.f32.mrf.mxu3 }
 0x3de   :  { %1940 = vmatpush.bf16.msrb.mxu0 %v9229_v5  ;;  %v9239_v8 = vpop.f32.mrf.mxu0  ;;  %v942_v62 = vpop.f32.mrf.mxu1  ;;  %v9243_v5 = vstv %s6305_s5  ;;  %v2039_v34 = vmul.f32 %v9257_v13, %v968_v9  ;;  %s6340_s5 = sld [smem:[#allocation2 + $0x204]] }
 0x3df   :  { %11814 = vst [vmem:[#allocation185_spill] sm:$0xff] %v9243_v5  ;;  %v2003_v57 = vmul.f32 %v9243_v5, %v966_v15  ;;  %v2002_v33 = vmul.f32 %v9243_v5, %v942_v62  ;;  %v9285_v62 = vstv %s6315_s24  ;;  %s12127_s24 = sld [smem:[#allocation47_spill]] }
 0x3e0   :  { %1953 = vmatpush.bf16.msrb.mxu1 %v9233_v21  ;;  %11821 = vst [vmem:[#allocation192_spill] sm:$0xff] %v9285_v62 }
 0x3e1   :  { %1941 = vmatmul.bf16.vlgmr.msrb.gmra.mxu0 %v9018_v10 }
 0x3e3   :  { %1954 = vmatmul.bf16.vlgmr.msrb.gmra.mxu1 %v9026_v59 }
 0x3e5   :  { %v992_v44 = vpop.f32.mrf.mxu3 }
 0x3e6   :  { %v920_v38 = vpop.f32.mrf.mxu0  ;;  %v944_v2 = vpop.f32.mrf.mxu1 }
 0x3e7   :  { %v971_v28 = vpop.f32.mrf.mxu2 }
 0x3ee   :  { %v923_v27 = vpop.f32.mrf.mxu0  ;;  %v9249_v21 = vpop.f32.mrf.mxu1 }
 0x3ef   :  { %v973_v10 = vpop.f32.mrf.mxu2  ;;  %v995_v59 = vpop.f32.mrf.mxu3 }
 0x3f0   :  { %v2009_v19 = vmul.f32 %v9241_v18, %v973_v10  ;;  %v9259_v10 = vstv %s6311_s26  ;;  %s6350_s26 = sld [smem:[#allocation2 + $0x282]] }
 0x3f1   :  { %11818 = vst [vmem:[#allocation189_spill] sm:$0xff] %v9259_v10  ;;  %v2055_v6 = vmul.f32 %v9259_v10, %v8588_v45 }
 0x3f2   :  { %v2013_v52 = vadd.f32 %v2009_v19, %v2003_v57  ;;  %v2004_v19 = vmul.f32 %v9243_v5, %v990_v32 }
 0x3f4   :  { %v9253_v20 = vadd.f32 %v2019_v31, %v2013_v52 }
 0x3f6   :  { %v9265_v31 = vpop.f32.mrf.mxu0  ;;  %v949_v14 = vpop.f32.mrf.mxu1 }
 0x3f7   :  { %v976_v15 = vpop.f32.mrf.mxu2  ;;  %v997_v50 = vpop.f32.mrf.mxu3  ;;  %v2008_v9 = vmul.f32 %v9241_v18, %v949_v14  ;;  %v2075_v14 = vmul.f32 %v9283_v11, %v971_v28 }
 0x3f8   :  { %v2045_v57 = vmul.f32 %v9255_v51, %v976_v15  ;;  %v2010_v52 = vmul.f32 %v9241_v18, %v997_v50 }
 0x3f9   :  { %v2012_v50 = vadd.f32 %v2008_v9, %v2002_v33 }
 0x3fa   :  { %v2049_v47 = vadd.f32 %v2045_v57, %v2039_v34  ;;  %v2014_v42 = vadd.f32 %v2010_v52, %v2004_v19  ;;  %v2056_v19 = vmul.f32 %v9259_v10, %v8586_v48 }
 0x3fb   :  { %v9281_v43 = vadd.f32 %v2018_v4, %v2012_v50  ;;  %v2091_v4 = vmul.f32 %v9285_v62, %v8588_v45  ;;  %v2053_v50 = vmul.f32 %v9259_v10, %v8590_v36 }
 0x3fc   :  { %v9273_v32 = vadd.f32 %v2055_v6, %v2049_v47  ;;  %v9275_v15 = vadd.f32 %v2020_v24, %v2014_v42  ;;  %v2040_v47 = vmul.f32 %v9257_v13, %v992_v44  ;;  %v2037_v24 = vmul.f32 %v9257_v13, %v920_v38 }
 0x3fd   :  { %v2038_v6 = vmul.f32 %v9257_v13, %v944_v2  ;;  %v2054_v38 = vmul.f32 %v9259_v10, %v8592_v37 }
 0x3fe   :  { %v928_v57 = vpop.f32.mrf.mxu0  ;;  %v952_v52 = vpop.f32.mrf.mxu1 }
 0x3ff   :  { %v978_v53 = vpop.f32.mrf.mxu2  ;;  %v1000_v34 = vpop.f32.mrf.mxu3  ;;  %v2043_v44 = vmul.f32 %v9255_v51, %v928_v57  ;;  %v2073_v57 = vmul.f32 %v9283_v11, %v923_v27 }
 0x400   :  { %v2081_v42 = vmul.f32 %v9279_v26, %v978_v53  ;;  %v2046_v33 = vmul.f32 %v9255_v51, %v1000_v34  ;;  %v2044_v53 = vmul.f32 %v9255_v51, %v952_v52  ;;  %v2092_v52 = vmul.f32 %v9285_v62, %v8586_v48 }
 0x401   :  { %v2047_v34 = vadd.f32 %v2043_v44, %v2037_v24  ;;  %v2074_v24 = vmul.f32 %v9283_v11, %v9249_v21  ;;  %v2090_v48 = vmul.f32 %v9285_v62, %v8592_v37 }
 0x402   :  { %v2085_v9 = vadd.f32 %v2081_v42, %v2075_v14  ;;  %v2050_v28 = vadd.f32 %v2046_v33, %v2040_v47  ;;  %v2048_v13 = vadd.f32 %v2044_v53, %v2038_v6  ;;  %v2076_v47 = vmul.f32 %v9283_v11, %v995_v59 }
 0x403   :  { %v2057_v58 = vadd.f32 %v2053_v50, %v2047_v34  ;;  %v2089_v59 = vmul.f32 %v9285_v62, %v8590_v36 }
 0x404   :  { %v9303_v2 = vadd.f32 %v2091_v4, %v2085_v9  ;;  %v9305_v45 = vadd.f32 %v2056_v19, %v2050_v28  ;;  %v9307_v17 = vadd.f32 %v2054_v38, %v2048_v13 }
 0x406   :  { %v930_v4 = vpop.f32.mrf.mxu0  ;;  %v954_v9 = vpop.f32.mrf.mxu1 }
 0x407   :  { %v1002_v14 = vpop.f32.mrf.mxu3  ;;  %v1812_v33 = vpop.f32.mrf.mxu2  ;;  %v2079_v13 = vmul.f32 %v9279_v26, %v930_v4  ;;  %v2080_v19 = vmul.f32 %v9279_v26, %v954_v9 }
 0x408   :  { %v2082_v42 = vmul.f32 %v9279_v26, %v1002_v14 }
 0x409   :  { %v2083_v44 = vadd.f32 %v2079_v13, %v2073_v57  ;;  %v2084_v27 = vadd.f32 %v2080_v19, %v2074_v24  ;;  %v2001_v57 = vmul.f32 %v9243_v5, %v9239_v8  ;;  %v9335_v13 = vstv %s6312_s8  ;;  %s7939_s8 = smov 3  }
 0x40a   :  { %v2086_v6 = vadd.f32 %v2082_v42, %v2076_v47  ;;  %v9324_v47 = vld [vmem:[#allocation27] sm:$0xf]  ;;  %v2007_v42 = vmul.f32 %v9241_v18, %v9265_v31  ;;  %11823 = vst [vmem:[#allocation194_spill] sm:$0xff] %v9335_v13  ;;  %v9337_v19 = vstv %s6316_s21  ;;  %v2017_v31 = vmul.f32 %v9247_v54, %v8590_v36  ;;  %s12149_s21 = sld [smem:[#allocation52_spill]] }
 0x40b   :  { %v2093_v53 = vadd.f32 %v2089_v59, %v2083_v44  ;;  %v2094_v50 = vadd.f32 %v2090_v48, %v2084_v27  ;;  %v9331_v37 = vperm.slane %v9324_v47, 0  ;;  %11824 = vst [vmem:[#allocation195_spill] sm:$0xff] %v9337_v19  ;;  %v9509_v54 = vld [vmem:[%s11689_s3 + $0xc0] sm:$0xff] }
 0x40c   :  { %v9320_v28 = vadd.f32 %v2092_v52, %v2086_v6  ;;  %v2011_v9 = vadd.f32 %v2007_v42, %v2001_v57  ;;  %v9333_v6 = vstv %s6308_s15  ;;  %11835 = vst [vmem:[#allocation206_spill] sm:$0xff] %v9509_v54  ;;  %s7938_s15 = smov 124  }
 0x40d   :  { %11822 = vst [vmem:[#allocation193_spill] sm:$0xff] %v9333_v6 }
 0x40e   :  { %v1786_v34 = vpop.f32.mrf.mxu0  ;;  %v1799_v14 = vpop.f32.mrf.mxu1  ;;  %v2021_v48 = vadd.f32 %v2017_v31, %v2011_v9 }
 0x40f   :  { %v1825_v21 = vpop.f32.mrf.mxu3  ;;  %v1814_v38 = vpop.f32.mrf.mxu2  ;;  %v1800_v52 = vadd.f32 %v1799_v14, %v1786_v34 }
 0x411   :  { %v1813_v4 = vadd.f32 %v1812_v33, %v1800_v52 }
 0x413   :  { %v1826_v24 = vadd.f32 %v1825_v21, %v1813_v4 }
 0x415   :  { %v1995_v44 = vmul.f32 %v9331_v37, %v1826_v24 }
 0x416   :  { %v1788_v8 = vpop.f32.mrf.mxu0  ;;  %v1801_v33 = vpop.f32.mrf.mxu1 }
 0x417   :  { %v1827_v59 = vpop.f32.mrf.mxu3  ;;  %v1864_v27 = vpop.f32.mrf.mxu2  ;;  %v2027_v38 = vmul.f32 %v9333_v6, %v1995_v44  ;;  %v2063_v21 = vmul.f32 %v9335_v13, %v1995_v44  ;;  %v2099_v34 = vmul.f32 %v9337_v19, %v1995_v44 }
 0x419   :  { %v9345_v14 = vadd.f32 %v2027_v38, %v2021_v48  ;;  %v9347_v42 = vadd.f32 %v2063_v21, %v2057_v58  ;;  %v9349_v52 = vadd.f32 %v2099_v34, %v2093_v53  ;;  %v9359_v58 = vperm.slane %v9324_v47, 1 }
 0x41b   :  { %v9352_v36 = vmax.f32 %v9345_v14, 0.0  ;;  %11825 = vst [vmem:[#allocation196_spill] sm:$0xff] %v9359_v58 }
 0x41d   :  { %2207 = vrot.lane.b32.xlu1 %v9352_v36, %s7927_s23  ;;  %2223 = vrot.lane.b32.xlu0 %v9352_v36, %s7925_s6 }
 0x41e   :  { %v1838_v9 = vpop.f32.mrf.mxu0  ;;  %v1851_v24 = vpop.f32.mrf.mxu1 }
 0x41f   :  { %v1877_v57 = vpop.f32.mrf.mxu3  ;;  %v1866_v4 = vpop.f32.mrf.mxu2  ;;  %v1852_v59 = vadd.f32 %v1851_v24, %v1838_v9 }
 0x421   :  { %v1865_v31 = vadd.f32 %v1864_v27, %v1852_v59 }
 0x423   :  { %v1878_v53 = vadd.f32 %v1877_v57, %v1865_v31 }
 0x425   :  { %v1996_v8 = vmul.f32 %v9359_v58, %v1878_v53  ;;  %2159 = vrot.lane.b32.xlu1 %v9352_v36, %s7930_s12  ;;  %2191 = vrot.lane.b32.xlu0 %v9352_v36, %s7926_s14 }
 0x426   :  { %v1840_v33 = vpop.f32.mrf.mxu0  ;;  %v1853_v48 = vpop.f32.mrf.mxu1 }
 0x427   :  { %v1879_v44 = vpop.f32.mrf.mxu3  ;;  %v2028_v38 = vmul.f32 %v9333_v6, %v1996_v8  ;;  %v2064_v21 = vmul.f32 %v9335_v13, %v1996_v8  ;;  %v2100_v27 = vmul.f32 %v9337_v19, %v1996_v8 }
 0x428   :  { %v9393_v44 = vperm.slane %v9324_v47, 2 }
 0x429   :  { %v9370_v34 = vadd.f32 %v2028_v38, %v9281_v43  ;;  %v9373_v57 = vadd.f32 %v2064_v21, %v9307_v17  ;;  %v9375_v4 = vadd.f32 %v2100_v27, %v2094_v50 }
 0x42a   :  { %11827 = vst [vmem:[#allocation198_spill] sm:$0xff] %v9393_v44 }
 0x42b   :  { %11826 = vst [vmem:[#allocation197_spill] sm:$0xff] %v9375_v4  ;;  %v9378_v9 = vmax.f32 %v9370_v34, 0.0 }
 0x42d   :  { %2175 = vrot.lane.b32.xlu0 %v9352_v36, %s7928_s30  ;;  %2209 = vrot.lane.b32.xlu2 %v9378_v9, %s7927_s23 }
 0x42e   :  { %2225 = vrot.lane.b32.xlu1 %v9378_v9, %s7925_s6 }
 0x435   :  { %v1916_v24 = vpop.f32.mrf.mxu2  ;;  %2143 = vrot.lane.b32.xlu0 %v9352_v36, %s7929_s28  ;;  %2177 = vrot.lane.b32.xlu2 %v9378_v9, %s7928_s30 }
 0x436   :  { %2193 = vrot.lane.b32.xlu1 %v9378_v9, %s7926_s14 }
 0x43d   :  { %v1918_v43 = vpop.f32.mrf.mxu2  ;;  %2161 = vrot.lane.b32.xlu0 %v9378_v9, %s7930_s12  ;;  %2113 = vrot.lane.b32.xlu2 %v9378_v9, %s7931_s1 }
 0x43e   :  { %v1929_v59 = vpop.f32.mrf.mxu3  ;;  %v1890_v50 = vpop.f32.mrf.mxu0  ;;  %2145 = vrot.lane.b32.xlu1 %v9378_v9, %s7929_s28 }
 0x440   :  { %v1903_v17 = vpop.f32.mrf.mxu1 }
 0x441   :  { %v1904_v31 = vadd.f32 %v1903_v17, %v1890_v50 }
 0x443   :  { %v1917_v53 = vadd.f32 %v1916_v24, %v1904_v31 }
 0x445   :  { %v1930_v8 = vadd.f32 %v1929_v59, %v1917_v53 }
 0x446   :  { %v1931_v48 = vpop.f32.mrf.mxu3  ;;  %v1892_v21 = vpop.f32.mrf.mxu0  ;;  %2129 = vrot.lane.b32.xlu1 %v9378_v9, %s7915_s25 }
 0x447   :  { %v1997_v33 = vmul.f32 %v9393_v44, %v1930_v8 }
 0x448   :  { %v1905_v38 = vpop.f32.mrf.mxu1 }
 0x449   :  { %v2029_v27 = vmul.f32 %v9333_v6, %v1997_v33  ;;  %v2065_v24 = vmul.f32 %v9335_v13, %v1997_v33  ;;  %v2101_v43 = vmul.f32 %v9337_v19, %v1997_v33  ;;  %v9430_v38 = vperm.slane %v9324_v47, 3 }
 0x44b   :  { %v9406_v59 = vadd.f32 %v2029_v27, %v9253_v20  ;;  %v9409_v17 = vadd.f32 %v2065_v24, %v9273_v32  ;;  %v9412_v50 = vadd.f32 %v2101_v43, %v9303_v2  ;;  %11830 = vst [vmem:[#allocation201_spill] sm:$0xff] %v9430_v38 }
 0x44d   :  { %11828 = vst [vmem:[#allocation199_spill] sm:$0xff] %v9409_v17  ;;  %v9415_v31 = vmax.f32 %v9406_v59, 0.0  ;;  %v9544_v17 = vld [vmem:[%s11689_s3 + $0x118] sm:$0xff] }
 0x44e   :  { %11829 = vst [vmem:[#allocation200_spill] sm:$0xff] %v9412_v50 }
 0x44f   :  { %2115 = vrot.lane.b32.xlu0 %v9415_v31, %s7931_s1  ;;  %2195 = vrot.lane.b32.xlu2 %v9415_v31, %s7926_s14  ;;  %11838 = vst [vmem:[#allocation209_spill] sm:$0xff] %v9544_v17 }
 0x450   :  { %2227 = vrot.lane.b32.xlu1 %v9415_v31, %s7925_s6 }
 0x455   :  { %v1968_v20 = vpop.f32.mrf.mxu2 }
 0x457   :  { %2179 = vrot.lane.b32.xlu2 %v9415_v31, %s7928_s30 }
 0x458   :  { %2211 = vrot.lane.b32.xlu1 %v9415_v31, %s7927_s23 }
 0x45d   :  { %v1970_v32 = vpop.f32.mrf.mxu2 }
 0x45e   :  { %v1981_v2 = vpop.f32.mrf.mxu3  ;;  %v1942_v53 = vpop.f32.mrf.mxu0 }
 0x45f   :  { %2147 = vrot.lane.b32.xlu2 %v9415_v31, %s7929_s28 }
 0x460   :  { %v1955_v8 = vpop.f32.mrf.mxu1  ;;  %2163 = vrot.lane.b32.xlu1 %v9415_v31, %s7930_s12 }
 0x461   :  { %v1956_v33 = vadd.f32 %v1955_v8, %v1942_v53 }
 0x463   :  { %v1969_v48 = vadd.f32 %v1968_v20, %v1956_v33 }
 0x465   :  { %v1982_v21 = vadd.f32 %v1981_v2, %v1969_v48 }
 0x466   :  { %v1983_v24 = vpop.f32.mrf.mxu3  ;;  %v1944_v43 = vpop.f32.mrf.mxu0 }
 0x467   :  { %v1998_v27 = vmul.f32 %v9430_v38, %v1982_v21  ;;  %2131 = vrot.lane.b32.xlu2 %v9415_v31, %s7915_s25 }
 0x468   :  { %v1957_v32 = vpop.f32.mrf.mxu1 }
 0x469   :  { %v2030_v62 = vmul.f32 %v9333_v6, %v1998_v27  ;;  %v2066_v53 = vmul.f32 %v9335_v13, %v1998_v27  ;;  %v2102_v8 = vmul.f32 %v9337_v19, %v1998_v27 }
 0x46b   :  { %v9441_v47 = vadd.f32 %v2030_v62, %v9275_v15  ;;  %v9446_v20 = vadd.f32 %v2066_v53, %v9305_v45  ;;  %v9449_v2 = vadd.f32 %v2102_v8, %v9320_v28  ;;  %v9487_v53 = vld [vmem:[%s11689_s3 + $0x100] sm:$0xff] }
 0x46c   :  { %11833 = vst [vmem:[#allocation204_spill] sm:$0xff] %v9487_v53 }
 0x46d   :  { %11831 = vst [vmem:[#allocation202_spill] sm:$0xff] %v9446_v20  ;;  %v9452_v33 = vmax.f32 %v9441_v47, 0.0 }
 0x46e   :  { %11832 = vst [vmem:[#allocation203_spill] sm:$0xff] %v9449_v2 }
 0x46f   :  { %2197 = vrot.lane.b32.xlu0 %v9452_v33, %s7926_s14  ;;  %2229 = vrot.lane.b32.xlu2 %v9452_v33, %s7925_s6 }
 0x470   :  { %2165 = vrot.lane.b32.xlu1 %v9452_v33, %s7930_s12 }
 0x477   :  { %2181 = vrot.lane.b32.xlu0 %v9452_v33, %s7928_s30  ;;  %2213 = vrot.lane.b32.xlu2 %v9452_v33, %s7927_s23 }
 0x478   :  { %2111 = vrot.lane.b32.xlu1 %v9352_v36, %s7931_s1 }
 0x47f   :  { %2149 = vrot.lane.b32.xlu0 %v9452_v33, %s7929_s28  ;;  %2117 = vrot.lane.b32.xlu2 %v9452_v33, %s7931_s1 }
 0x487   :  { %2133 = vrot.lane.b32.xlu0 %v9452_v33, %s7915_s25  ;;  %2127 = vrot.lane.b32.xlu2 %v9352_v36, %s7915_s25  ;;  %v2210_v15 = vpop.permute.xlu2 %2209 }
 0x48f   :  { %v9474_v62 = vpop.permute.xlu1 %2207  ;;  %v2178_v45 = vpop.permute.xlu2 %2177 }
 0x490   :  { %v2224_v28 = vpop.permute.xlu0 %2223  ;;  %v2217_v13 = vsel %vm595_vm3, %v9474_v62, %v2210_v15 }
 0x497   :  { %v9476_v48 = vpop.permute.xlu1 %2159  ;;  %v9478_v21 = vpop.permute.xlu2 %2113 }
 0x498   :  { %v9480_v27 = vpop.permute.xlu0 %2191 }
 0x4a0   :  { %v2226_v24 = vpop.permute.xlu1 %2225  ;;  %v9490_v26 = vpop.permute.xlu0 %2175 }
 0x4a1   :  { %v2233_v32 = vsel %vm617_vm0, %v2224_v28, %v2226_v24  ;;  %v2185_v6 = vsel %vm551_vm4, %v9490_v26, %v2178_v45 }
 0x4a2   :  { %v2235_v8 = vmul.f32 %v9487_v53, %v2233_v32 }
 0x4a4   :  { %v2255_v19 = vpack.c.bf16 %v2235_v8, %v2235_v8  ;;  %v9505_v8 = vld [vmem:[%s11689_s3 + $0xe0] sm:$0xff] }
 0x4a5   :  { %11834 = vst [vmem:[#allocation205_spill] sm:$0xff] %v9505_v8 }
 0x4a6   :  { %v2280_v11 = vsel %vm650_vm1, %v2255_v19, 0  ;;  %v2219_v19 = vmul.f32 %v9505_v8, %v2217_v13 }
 0x4a7   :  { %2294 = vmatpush.bf16.msra.mxu0 %v2280_v11  ;;  %v9513_v11 = vld [vmem:[%s11689_s3 + $0xa0] sm:$0xff] }
 0x4a8   :  { %v2194_v10 = vpop.permute.xlu1 %2193  ;;  %11836 = vst [vmem:[#allocation207_spill] sm:$0xff] %v9513_v11  ;;  %v2187_v5 = vmul.f32 %v9513_v11, %v2185_v6  ;;  %v9521_v13 = vpop.permute.xlu0 %2143 }
 0x4a9   :  { %v9482_v43 = vpop.permute.xlu2 %2195  ;;  %v2201_v32 = vsel %vm573_vm2, %v9480_v27, %v2194_v10 }
 0x4aa   :  { %v2203_v18 = vmul.f32 %v9509_v54, %v2201_v32  ;;  %v2247_v38 = vpack.c.bf16 %v2187_v5, %v9352_v36  ;;  %v9536_v5 = vld [vmem:[%s11689_s3 + $0x108] sm:$0xff] }
 0x4ac   :  { %v2251_v53 = vpack.c.bf16 %v2219_v19, %v2203_v18 }
 0x4ae   :  { %2295 = vmatpush.bf16.msra.mxu0 %v2251_v53 }
 0x4b0   :  { %v9516_v2 = vpop.permute.xlu1 %2145  ;;  %v9533_v11 = vpop.permute.xlu0 %2161 }
 0x4b1   :  { %v9496_v51 = vpop.permute.xlu2 %2179 }
 0x4b2   :  { %2296 = vmatpush.bf16.msra.mxu0 %v2247_v38  ;;  %v9540_v38 = vld [vmem:[%s11689_s3 + $0x110] sm:$0xff] }
 0x4b3   :  { %11837 = vst [vmem:[#allocation208_spill] sm:$0xff] %v9540_v38 }
 0x4b8   :  { %v9523_v8 = vpop.permute.xlu1 %2129 }
 0x4b9   :  { %v9518_v20 = vpop.permute.xlu2 %2147 }
 0x4c1   :  { %v9525_v32 = vpop.permute.xlu2 %2131 }
 0x4c2   :  { %v2228_v54 = vpop.permute.xlu1 %2227 }
 0x4c3   :  { %v2232_v18 = vsel %vm617_vm0, %v2226_v24, %v2228_v54 }
 0x4c4   :  { %v2236_v36 = vmul.f32 %v9536_v5, %v2232_v18 }
 0x4c6   :  { %v2256_v44 = vpack.c.bf16 %v2236_v36, %v2236_v36 }
 0x4c9   :  { %v2230_v6 = vpop.permute.xlu2 %2229 }
 0x4ca   :  { %v2231_v53 = vsel %vm617_vm0, %v2228_v54, %v2230_v6  ;;  %v2234_v19 = vsel %vm617_vm0, %v2230_v6, %v2224_v28  ;;  %v2283_v28 = vsel %vm650_vm1, %v2256_v44, 0 }
 0x4cb   :  { %v2237_v50 = vmul.f32 %v9540_v38, %v2231_v53  ;;  %v2238_v24 = vmul.f32 %v9544_v17, %v2234_v19  ;;  %v2200_v53 = vsel %vm573_vm2, %v2194_v10, %v9482_v43  ;;  %2313 = vmatpush.bf16.msra.mxu1 %v2283_v28  ;;  %v2212_v19 = vpop.permute.xlu1 %2211  ;;  %v9567_v28 = vld [vmem:[%s11689_s3 + $0xa8] sm:$0xff] }
 0x4cc   :  { %v2216_v44 = vsel %vm595_vm3, %v2210_v15, %v2212_v19  ;;  %11841 = vst [vmem:[#allocation212_spill] sm:$0xff] %v9567_v28  ;;  %v2169_v15 = vsel %vm529_vm6, %v9476_v48, %v9533_v11 }
 0x4cd   :  { %v2257_v54 = vpack.c.bf16 %v2237_v50, %v2237_v50  ;;  %v2258_v4 = vpack.c.bf16 %v2238_v24, %v2238_v24  ;;  %v2184_v50 = vsel %vm551_vm4, %v2178_v45, %v9496_v51  ;;  %v9559_v24 = vld [vmem:[%s11689_s3 + $0xc8] sm:$0xff]  ;;  %v2153_v45 = vsel %vm507_vm5, %v9521_v13, %v9516_v2 }
 0x4ce   :  { %11839 = vst [vmem:[#allocation210_spill] sm:$0xff] %v9559_v24 }
 0x4cf   :  { %v2286_v6 = vsel %vm650_vm1, %v2257_v54, 0  ;;  %v2289_v18 = vsel %vm650_vm1, %v2258_v4, 0  ;;  %v2204_v4 = vmul.f32 %v9559_v24, %v2200_v53  ;;  %v9563_v54 = vld [vmem:[%s11689_s3 + $0xe8] sm:$0xff]  ;;  %v9611_v24 = vld [vmem:[%s11689_s3 + $0xd0] sm:$0xff] }
 0x4d0   :  { %2332 = vmatpush.bf16.msra.mxu2 %v2286_v6  ;;  %2351 = vmatpush.bf16.msra.mxu3 %v2289_v18  ;;  %11840 = vst [vmem:[#allocation211_spill] sm:$0xff] %v9563_v54  ;;  %v2220_v10 = vmul.f32 %v9563_v54, %v2216_v44  ;;  %v2188_v6 = vmul.f32 %v9567_v28, %v2184_v50  ;;  %v9570_v18 = vpop.permute.xlu0 %2115  ;;  %v9581_v53 = vld [vmem:[%s11689_s3 + $0x68] sm:$0xff] }
 0x4d1   :  { %v2214_v36 = vpop.permute.xlu2 %2213  ;;  %11842 = vst [vmem:[#allocation213_spill] sm:$0xff] %v9581_v53  ;;  %v2172_v50 = vmul.f32 %v9581_v53, %v2169_v15  ;;  %v9585_v44 = vld [vmem:[%s11689_s3 + $0x48] sm:$0xff] }
 0x4d2   :  { %v2252_v17 = vpack.c.bf16 %v2220_v10, %v2204_v4  ;;  %11843 = vst [vmem:[#allocation214_spill] sm:$0xff] %v9585_v44  ;;  %v2156_v4 = vmul.f32 %v9585_v44, %v2153_v45  ;;  %v2248_v38 = vpack.c.bf16 %v2188_v6, %v9378_v9  ;;  %v2218_v54 = vsel %vm595_vm3, %v2214_v36, %v9474_v62  ;;  %v9603_v6 = vld [vmem:[%s11689_s3 + $0xf0] sm:$0xff]  ;;  %v9607_v44 = vld [vmem:[%s11689_s3 + $0xf8] sm:$0xff] }
 0x4d3   :  { %v2164_v10 = vpop.permute.xlu1 %2163 }
 0x4d4   :  { %2314 = vmatpush.bf16.msra.mxu1 %v2252_v17  ;;  %v2215_v17 = vsel %vm595_vm3, %v2212_v19, %v2214_v36  ;;  %v2244_v53 = vpack.c.bf16 %v2172_v50, %v2156_v4  ;;  %v2222_v19 = vmul.f32 %v9607_v44, %v2218_v54  ;;  %v9615_v36 = vld [vmem:[%s11689_s3 + $0xd8] sm:$0xff] }
 0x4d8   :  { %2315 = vmatpush.bf16.msra.mxu1 %v2248_v38  ;;  %v2221_v38 = vmul.f32 %v9603_v6, %v2215_v17 }
 0x4d9   :  { %v9589_v28 = vpop.permute.xlu2 %2117 }
 0x4dc   :  { %2316 = vmatpush.bf16.msra.mxu1 %v2244_v53 }
 0x4e1   :  { %v2198_v15 = vpop.permute.xlu0 %2197  ;;  %v9618_v17 = vpop.permute.xlu2 %2127 }
 0x4e2   :  { %v2199_v45 = vsel %vm573_vm2, %v9482_v43, %v2198_v15  ;;  %v2202_v9 = vsel %vm573_vm2, %v2198_v15, %v9480_v27  ;;  %v2166_v27 = vpop.permute.xlu1 %2165  ;;  %v2168_v15 = vsel %vm529_vm6, %v9533_v11, %v2164_v10 }
 0x4e3   :  { %v2205_v62 = vmul.f32 %v9611_v24, %v2199_v45  ;;  %v2206_v43 = vmul.f32 %v9615_v36, %v2202_v9  ;;  %v2152_v9 = vsel %vm507_vm5, %v9516_v2, %v9518_v20 }
 0x4e5   :  { %v2253_v50 = vpack.c.bf16 %v2221_v38, %v2205_v62  ;;  %v2254_v4 = vpack.c.bf16 %v2222_v19, %v2206_v43  ;;  %v9634_v38 = vld [vmem:[%s11689_s3 + $0xb0] sm:$0xff]  ;;  %v9638_v62 = vld [vmem:[%s11689_s3 + $0xb8] sm:$0xff] }
 0x4e6   :  { %11844 = vst [vmem:[#allocation215_spill] sm:$0xff] %v9634_v38 }
 0x4e7   :  { %2333 = vmatpush.bf16.msra.mxu2 %v2253_v50  ;;  %2352 = vmatpush.bf16.msra.mxu3 %v2254_v4  ;;  %11845 = vst [vmem:[#allocation216_spill] sm:$0xff] %v9638_v62 }
 0x4e9   :  { %v2182_v54 = vpop.permute.xlu0 %2181 }
 0x4ea   :  { %v2183_v45 = vsel %vm551_vm4, %v9496_v51, %v2182_v54  ;;  %v2186_v53 = vsel %vm551_vm4, %v2182_v54, %v9490_v26  ;;  %v2137_v26 = vsel %vm485_vm8, %v9618_v17, %v9523_v8  ;;  %v9646_v51 = vld [vmem:[%s11689_s3 + $0x70] sm:$0xff]  ;;  %v2112_v2 = vpop.permute.xlu1 %2111 }
 0x4eb   :  { %v2189_v19 = vmul.f32 %v9634_v38, %v2183_v45  ;;  %v2190_v11 = vmul.f32 %v9638_v62, %v2186_v53  ;;  %11846 = vst [vmem:[#allocation217_spill] sm:$0xff] %v9646_v51  ;;  %v2173_v43 = vmul.f32 %v9646_v51, %v2168_v15  ;;  %v9652_v54 = vld [vmem:[%s11689_s3 + $0x50] sm:$0xff]  ;;  %v2120_v53 = vsel %vm463_vm7, %v9478_v21, %v9570_v18 }
 0x4ec   :  { %11847 = vst [vmem:[#allocation218_spill] sm:$0xff] %v9652_v54  ;;  %v2157_v45 = vmul.f32 %v9652_v54, %v2152_v9  ;;  %v2136_v15 = vsel %vm485_vm8, %v9523_v8, %v9525_v32  ;;  %v9670_v9 = vld [vmem:[%s11689_s3 + $0x28] sm:$0xff]  ;;  %v9680_v8 = vld [vmem:[%s11689_s3 + $0x10] sm:$0xff] }
 0x4ed   :  { %v2249_v50 = vpack.c.bf16 %v2189_v19, %v9415_v31  ;;  %v2250_v4 = vpack.c.bf16 %v2190_v11, %v9452_v33  ;;  %v2121_v31 = vsel %vm463_vm7, %v2112_v2, %v9478_v21  ;;  %v2170_v33 = vsel %vm529_vm6, %v2166_v27, %v9476_v48  ;;  %11848 = vst [vmem:[#allocation219_spill] sm:$0xff] %v9670_v9  ;;  %v9674_v11 = vld [vmem:[%s11689_s3 + $0x8] sm:$0xff]  ;;  %v9684_v51 = vld [vmem:[%s11689_s3 + $0x30] sm:$0xff] }
 0x4ee   :  { %v2140_v19 = vmul.f32 %v9670_v9, %v2137_v26  ;;  %11849 = vst [vmem:[#allocation220_spill] sm:$0xff] %v9674_v11  ;;  %v2124_v54 = vmul.f32 %v9674_v11, %v2121_v31  ;;  %v2167_v21 = vsel %vm529_vm6, %v2164_v10, %v2166_v27  ;;  %v2125_v48 = vmul.f32 %v9680_v8, %v2120_v53  ;;  %v9688_v31 = vld [vmem:[%s11689_s3 + $0x60] sm:$0xff]  ;;  %v9698_v53 = vld [vmem:[%s11689_s3 + $0x78] sm:$0xff] }
 0x4ef   :  { %2334 = vmatpush.bf16.msra.mxu2 %v2249_v50  ;;  %2353 = vmatpush.bf16.msra.mxu3 %v2250_v4  ;;  %v2141_v26 = vmul.f32 %v9684_v51, %v2136_v15  ;;  %v2245_v38 = vpack.c.bf16 %v2173_v43, %v2157_v45  ;;  %v2171_v50 = vmul.f32 %v9688_v31, %v2170_v33  ;;  %v7086_v4 = vld [vmem:[#allocation9] sm:$0xff] }
 0x4f0   :  { %v2240_v62 = vpack.c.bf16 %v2140_v19, %v2124_v54  ;;  %v2174_v15 = vmul.f32 %v9698_v53, %v2167_v21  ;;  %v9702_v11 = vld [vmem:[%s11689_s3 + $0x40] sm:$0xff]  ;;  %v9706_v54 = vld [vmem:[%s11689_s3 + $0x58] sm:$0xff] }
 0x4f1   :  { %v2150_v9 = vpop.permute.xlu0 %2149 }
 0x4f2   :  { %v2151_v10 = vsel %vm507_vm5, %v9518_v20, %v2150_v9  ;;  %v2154_v27 = vsel %vm507_vm5, %v2150_v9, %v9521_v13  ;;  %2317 = vmatpush.bf16.msra.mxu1 %v2240_v62  ;;  %v2241_v13 = vpack.c.bf16 %v2141_v26, %v2125_v48  ;;  %v2119_v9 = vsel %vm463_vm7, %v9570_v18, %v9589_v28  ;;  %v9728_v18 = vld [vmem:[%s11689_s3 + $0x18] sm:$0xff]  ;;  %v9736_v26 = vld [vmem:[%s11689_s3 + $0x20] sm:$0xff] }
 0x4f3   :  { %v2155_v43 = vmul.f32 %v9702_v11, %v2154_v27  ;;  %v2158_v45 = vmul.f32 %v9706_v54, %v2151_v10  ;;  %2335 = vmatpush.bf16.msra.mxu2 %v2245_v38  ;;  %v2122_v38 = vsel %vm463_vm7, %v9589_v28, %v2112_v2  ;;  %v2126_v28 = vmul.f32 %v9728_v18, %v2119_v9  ;;  %v9732_v2 = vld [vmem:[%s11689_s3] sm:$0xff]  ;;  %v9740_v10 = vld [vmem:[%s11689_s3 + $0x38] sm:$0xff] }
 0x4f4   :  { %v2123_v48 = vmul.f32 %v9732_v2, %v2122_v38  ;;  %v11856_v9 = vld [vmem:[#allocation76_spill] sm:$0xff]  ;;  %v11857_v38 = vld [vmem:[#allocation77_spill] sm:$0xff] }
 0x4f5   :  { %v2243_v20 = vpack.c.bf16 %v2171_v50, %v2155_v43  ;;  %v2246_v33 = vpack.c.bf16 %v2174_v15, %v2158_v45  ;;  %6327 = vmatmul.msk.bf16.vlgmr.msra.gmra.mxu1 %vm646_vm9, %v7086_v4  ;;  %v7087_v15 = vld [vmem:[#allocation9 + $0x8] sm:$0xff]  ;;  %v11852_v45 = vld [vmem:[#allocation72_spill] sm:$0xff] }
 0x4f6   :  { %2384 = vmatpush.bf16.msrb.mxu1 %v8815_v0  ;;  %v11851_v43 = vld [vmem:[#allocation93_spill] sm:$0xff] }
 0x4f7   :  { %2297 = vmatpush.bf16.msra.mxu0 %v2243_v20  ;;  %2336 = vmatpush.bf16.msra.mxu2 %v2241_v13  ;;  %v11853_v20 = vld [vmem:[#allocation73_spill] sm:$0xff]  ;;  %v11854_v13 = vld [vmem:[#allocation95_spill] sm:$0xff] }
 0x4f8   :  { %2354 = vmatpush.bf16.msra.mxu3 %v2246_v33  ;;  %v11855_v33 = vld [vmem:[#allocation83_spill] sm:$0xff] }
 0x4f9   :  { %v2134_v62 = vpop.permute.xlu0 %2133 }
 0x4fa   :  { %2385 = vmatpush.bf16.msrb.mxu1 %v8830_v23  ;;  %v2135_v19 = vsel %vm485_vm8, %v9525_v32, %v2134_v62  ;;  %v2138_v21 = vsel %vm485_vm8, %v2134_v62, %v9618_v17  ;;  %6329 = vmatmul.msk.bf16.vlgmr.msra.gmra.mxu2 %vm646_vm9, %v7086_v4  ;;  %v9777_v62 = vpack.c.bf16 %v9370_v34, %v9370_v34 }
 0x4fb   :  { %2397 = vmatpush.bf16.msrb.mxu2 %v8770_v22  ;;  %v2139_v50 = vmul.f32 %v9736_v26, %v2138_v21  ;;  %v2142_v32 = vmul.f32 %v9740_v10, %v2135_v19  ;;  %v11858_v19 = vld [vmem:[#allocation99_spill] sm:$0xff]  ;;  %v11859_v21 = vld [vmem:[#allocation78_spill] sm:$0xff] }
 0x4fd   :  { %v2239_v17 = vpack.c.bf16 %v2139_v50, %v2123_v48  ;;  %v2242_v27 = vpack.c.bf16 %v2142_v32, %v2126_v28  ;;  %v11860_v28 = vld [vmem:[#allocation88_spill] sm:$0xff]  ;;  %v11861_v48 = vld [vmem:[#allocation81_spill] sm:$0xff]  ;;  %v9786_v50 = vpack.c.bf16 %v9406_v59, %v9406_v59  ;;  %v11862_v32 = vld [vmem:[#allocation103_spill] sm:$0xff] }
 0x4fe   :  { %2386 = vmatpush.bf16.msrb.mxu1 %v8848_v29 }
 0x4ff   :  { %2398 = vmatpush.bf16.msrb.mxu2 %v8776_v49  ;;  %2298 = vmatpush.bf16.msra.mxu0 %v2239_v17  ;;  %v11863_v17 = vld [vmem:[#allocation82_spill] sm:$0xff] }
 0x500   :  { %2355 = vmatpush.bf16.msra.mxu3 %v2242_v27  ;;  %v11864_v27 = vld [vmem:[#allocation92_spill] sm:$0xff] }
 0x502   :  { %2387 = vmatpush.bf16.msrb.mxu1 %v8860_v41  ;;  %6325 = vmatmul.msk.bf16.vlgmr.msra.gmra.mxu0 %vm646_vm9, %v7086_v4 }
 0x503   :  { %2371 = vmatpush.bf16.msrb.mxu0 %v8813_v63  ;;  %2399 = vmatpush.bf16.msrb.mxu2 %v8787_v35 }
 0x504   :  { %2410 = vmatpush.bf16.msrb.mxu3 %v8789_v16 }
 0x505   :  { %6331 = vmatmul.msk.bf16.vlgmr.msra.gmra.mxu3 %vm646_vm9, %v7086_v4  ;;  %6328 = vmatmul.msk.bf16.gmra.mxu1 %vm646_vm9, %v7087_v15  ;;  %v11850_v4 = vld [vmem:[#allocation79_spill] sm:$0xff] }
 0x506   :  { %2388 = vmatpush.bf16.msrb.mxu1 %v8876_v60 }
 0x507   :  { %2372 = vmatpush.bf16.msrb.mxu0 %v8828_v40  ;;  %2400 = vmatpush.bf16.msrb.mxu2 %v8798_v39  ;;  %v9942_v39 = vstv %s6338_s17  ;;  %v9952_v40 = vstv %s6336_s29  ;;  %s12151_s17 = sld [smem:[#allocation53_spill]] }
 0x508   :  { %2411 = vmatpush.bf16.msrb.mxu3 %v8800_v1  ;;  %11960 = vst [vmem:[#allocation224_spill] sm:$0xff] %v9942_v39 }
 0x509   :  { %11963 = vst [vmem:[#allocation227_spill] sm:$0xff] %v9952_v40 }
 0x50a   :  { %2389 = vmatpush.bf16.msrb.mxu1 %v8892_v30  ;;  %6330 = vmatmul.msk.bf16.gmra.mxu2 %vm646_vm9, %v7087_v15 }
 0x50b   :  { %2373 = vmatpush.bf16.msrb.mxu0 %v8846_v25  ;;  %2401 = vmatpush.bf16.msrb.mxu2 %v8817_v12  ;;  %v9950_v25 = vstv %s6339_s7 }
 0x50c   :  { %2412 = vmatpush.bf16.msrb.mxu3 %v8821_v56  ;;  %11962 = vst [vmem:[#allocation226_spill] sm:$0xff] %v9950_v25 }
 0x50e   :  { %2390 = vmatpush.bf16.msrb.mxu1 %v8912_v3  ;;  %v11872_v3 = vld [vmem:[#allocation90_spill] sm:$0xff] }
 0x50f   :  { %2374 = vmatpush.bf16.msrb.mxu0 %v8858_v55  ;;  %2402 = vmatpush.bf16.msrb.mxu2 %v8834_v61 }
 0x510   :  { %2413 = vmatpush.bf16.msrb.mxu3 %v8836_v46 }
 0x512   :  { %2391 = vmatpush.bf16.msrb.mxu1 %v11851_v43  ;;  %6326 = vmatmul.msk.bf16.gmra.mxu0 %vm646_vm9, %v7087_v15  ;;  %v11868_v43 = vld [vmem:[#allocation86_spill] sm:$0xff] }
 0x513   :  { %2375 = vmatpush.bf16.msrb.mxu0 %v11850_v4  ;;  %2403 = vmatpush.bf16.msrb.mxu2 %v11852_v45  ;;  %v11884_v45 = vld [vmem:[#allocation104_spill] sm:$0xff] }
 0x514   :  { %2414 = vmatpush.bf16.msrb.mxu3 %v11853_v20 }
 0x515   :  { %6332 = vmatmul.msk.bf16.gmra.mxu3 %vm646_vm9, %v7087_v15  ;;  %2392 = vmatmul.bf16.vlgmr.msrb.gmra.mxu1 %v9777_v62  ;;  %v11865_v15 = vld [vmem:[#allocation85_spill] sm:$0xff] }
 0x516   :  { %2436 = vmatpush.bf16.msra.mxu1 %v11854_v13  ;;  %v11867_v13 = vld [vmem:[#allocation107_spill] sm:$0xff] }
 0x517   :  { %2376 = vmatpush.bf16.msrb.mxu0 %v11855_v33  ;;  %2404 = vmatpush.bf16.msrb.mxu2 %v11856_v9  ;;  %v11870_v9 = vld [vmem:[#allocation98_spill] sm:$0xff] }
 0x518   :  { %2415 = vmatpush.bf16.msrb.mxu3 %v11857_v38 }
 0x51a   :  { %2437 = vmatpush.bf16.msra.mxu1 %v11858_v19  ;;  %2405 = vmatmul.bf16.vlgmr.msrb.gmra.mxu2 %v9786_v50  ;;  %v11866_v19 = vld [vmem:[#allocation94_spill] sm:$0xff] }
 0x51b   :  { %2449 = vmatpush.bf16.msra.mxu2 %v11859_v21  ;;  %2377 = vmatpush.bf16.msrb.mxu0 %v11860_v28  ;;  %v11869_v21 = vld [vmem:[#allocation87_spill] sm:$0xff]  ;;  %v11881_v28 = vld [vmem:[#allocation101_spill] sm:$0xff] }
 0x51c   :  { %2416 = vmatpush.bf16.msrb.mxu3 %v11861_v48  ;;  %v11883_v48 = vld [vmem:[#allocation125_spill] sm:$0xff] }
 0x51e   :  { %2438 = vmatpush.bf16.msra.mxu1 %v11862_v32  ;;  %v9800_v32 = vpack.c.bf16 %v9345_v14, %v9345_v14 }
 0x51f   :  { %2450 = vmatpush.bf16.msra.mxu2 %v11863_v17  ;;  %2378 = vmatpush.bf16.msrb.mxu0 %v11864_v27  ;;  %v11871_v17 = vld [vmem:[#allocation112_spill] sm:$0xff]  ;;  %v9806_v27 = vpack.c.bf16 %v9441_v47, %v9441_v47 }
 0x520   :  { %2417 = vmatpush.bf16.msrb.mxu3 %v11865_v15  ;;  %v11880_v15 = vld [vmem:[#allocation100_spill] sm:$0xff] }
 0x522   :  { %2439 = vmatpush.bf16.msra.mxu1 %v11867_v13  ;;  %2379 = vmatmul.bf16.vlgmr.msrb.gmra.mxu0 %v9800_v32  ;;  %v11874_v13 = vld [vmem:[#allocation102_spill] sm:$0xff] }
 0x523   :  { %2423 = vmatpush.bf16.msra.mxu0 %v11866_v19  ;;  %2451 = vmatpush.bf16.msra.mxu2 %v11868_v43  ;;  %v11873_v19 = vld [vmem:[#allocation91_spill] sm:$0xff]  ;;  %v11875_v43 = vld [vmem:[#allocation116_spill] sm:$0xff] }
 0x524   :  { %2462 = vmatpush.bf16.msra.mxu3 %v11869_v21  ;;  %v11877_v21 = vld [vmem:[#allocation97_spill] sm:$0xff] }
 0x525   :  { %2418 = vmatmul.bf16.vlgmr.msrb.gmra.mxu3 %v9806_v27 }
 0x526   :  { %2440 = vmatpush.bf16.msra.mxu1 %v11871_v17  ;;  %v11878_v17 = vld [vmem:[#allocation106_spill] sm:$0xff] }
 0x527   :  { %2424 = vmatpush.bf16.msra.mxu0 %v11870_v9  ;;  %2452 = vmatpush.bf16.msra.mxu2 %v11872_v3  ;;  %v11876_v9 = vld [vmem:[#allocation96_spill] sm:$0xff]  ;;  %v11879_v3 = vld [vmem:[#allocation121_spill] sm:$0xff] }
 0x528   :  { %2463 = vmatpush.bf16.msra.mxu3 %v11873_v19  ;;  %v11882_v19 = vld [vmem:[#allocation111_spill] sm:$0xff] }
 0x52a   :  { %2441 = vmatpush.bf16.msra.mxu1 %v11875_v43  ;;  %v11886_v43 = vld [vmem:[#allocation127_spill] sm:$0xff] }
 0x52b   :  { %2425 = vmatpush.bf16.msra.mxu0 %v11874_v13  ;;  %2453 = vmatpush.bf16.msra.mxu2 %v11876_v9  ;;  %v11885_v13 = vld [vmem:[#allocation105_spill] sm:$0xff]  ;;  %v11887_v9 = vld [vmem:[#allocation115_spill] sm:$0xff] }
 0x52c   :  { %2464 = vmatpush.bf16.msra.mxu3 %v11877_v21  ;;  %v11912_v21 = vld [vmem:[#allocation133_spill] sm:$0xff] }
 0x52e   :  { %2442 = vmatpush.bf16.msra.mxu1 %v11879_v3  ;;  %v11889_v3 = vld [vmem:[#allocation109_spill] sm:$0xff] }
 0x52f   :  { %2426 = vmatpush.bf16.msra.mxu0 %v11878_v17  ;;  %2454 = vmatpush.bf16.msra.mxu2 %v11880_v15  ;;  %v11888_v17 = vld [vmem:[#allocation108_spill] sm:$0xff]  ;;  %v11890_v15 = vld [vmem:[#allocation131_spill] sm:$0xff] }
 0x530   :  { %2465 = vmatpush.bf16.msra.mxu3 %v11881_v28  ;;  %v11891_v28 = vld [vmem:[#allocation110_spill] sm:$0xff] }
 0x532   :  { %2443 = vmatpush.bf16.msra.mxu1 %v11883_v48  ;;  %v11892_v48 = vld [vmem:[#allocation120_spill] sm:$0xff] }
 0x533   :  { %2427 = vmatpush.bf16.msra.mxu0 %v11882_v19  ;;  %2455 = vmatpush.bf16.msra.mxu2 %v11884_v45  ;;  %v11893_v45 = vld [vmem:[#allocation113_spill] sm:$0xff]  ;;  %v11894_v19 = vld [vmem:[#allocation135_spill] sm:$0xff] }
 0x534   :  { %2466 = vmatpush.bf16.msra.mxu3 %v11885_v13  ;;  %v11896_v13 = vld [vmem:[#allocation124_spill] sm:$0xff] }
 0x535   :  { %2444 = vmatmul.bf16.vlgmr.msra.gmra.mxu1 %v9777_v62 }
 0x536   :  { %2488 = vmatpush.bf16.msrb.mxu1 %v11886_v43  ;;  %v11895_v43 = vld [vmem:[#allocation114_spill] sm:$0xff] }
 0x537   :  { %2428 = vmatpush.bf16.msra.mxu0 %v11887_v9  ;;  %2456 = vmatpush.bf16.msra.mxu2 %v11888_v17  ;;  %v11897_v9 = vld [vmem:[#allocation126_spill] sm:$0xff]  ;;  %v11898_v17 = vld [vmem:[#allocation117_spill] sm:$0xff] }
 0x538   :  { %2467 = vmatpush.bf16.msra.mxu3 %v11889_v3  ;;  %v11899_v3 = vld [vmem:[#allocation139_spill] sm:$0xff] }
 0x53a   :  { %2489 = vmatpush.bf16.msrb.mxu1 %v11890_v15  ;;  %2457 = vmatmul.bf16.vlgmr.msra.gmra.mxu2 %v9786_v50  ;;  %v11900_v15 = vld [vmem:[#allocation119_spill] sm:$0xff] }
 0x53b   :  { %2501 = vmatpush.bf16.msrb.mxu2 %v11891_v28  ;;  %2429 = vmatpush.bf16.msra.mxu0 %v11892_v48  ;;  %v11901_v28 = vld [vmem:[#allocation118_spill] sm:$0xff] }
 0x53c   :  { %2468 = vmatpush.bf16.msra.mxu3 %v11893_v45  ;;  %v11902_v48 = vld [vmem:[#allocation130_spill] sm:$0xff]  ;;  %v11911_v45 = vld [vmem:[#allocation153_spill] sm:$0xff] }
 0x53e   :  { %2490 = vmatpush.bf16.msrb.mxu1 %v11894_v19  ;;  %v11903_v19 = vld [vmem:[#allocation144_spill] sm:$0xff] }
 0x53f   :  { %2502 = vmatpush.bf16.msrb.mxu2 %v11895_v43  ;;  %2430 = vmatpush.bf16.msra.mxu0 %v11896_v13  ;;  %v11904_v43 = vld [vmem:[#allocation123_spill] sm:$0xff]  ;;  %v11905_v13 = vld [vmem:[#allocation122_spill] sm:$0xff] }
 0x540   :  { %2469 = vmatpush.bf16.msra.mxu3 %v11898_v17  ;;  %v11907_v17 = vld [vmem:[#allocation148_spill] sm:$0xff] }
 0x542   :  { %2491 = vmatpush.bf16.msrb.mxu1 %v11899_v3  ;;  %2431 = vmatmul.bf16.vlgmr.msra.gmra.mxu0 %v9800_v32  ;;  %v11908_v3 = vld [vmem:[#allocation129_spill] sm:$0xff] }
 0x543   :  { %2475 = vmatpush.bf16.msrb.mxu0 %v11897_v9  ;;  %2503 = vmatpush.bf16.msrb.mxu2 %v11900_v15  ;;  %v11906_v9 = vld [vmem:[#allocation134_spill] sm:$0xff]  ;;  %v11909_v15 = vld [vmem:[#allocation128_spill] sm:$0xff] }
 0x544   :  { %2514 = vmatpush.bf16.msrb.mxu3 %v11901_v28  ;;  %v11910_v28 = vld [vmem:[#allocation138_spill] sm:$0xff] }
 0x545   :  { %2470 = vmatmul.bf16.vlgmr.msra.gmra.mxu3 %v9806_v27 }
 0x546   :  { %2492 = vmatpush.bf16.msrb.mxu1 %v11903_v19  ;;  %v11914_v19 = vld [vmem:[#allocation143_spill] sm:$0xff] }
 0x547   :  { %2476 = vmatpush.bf16.msrb.mxu0 %v11902_v48  ;;  %2504 = vmatpush.bf16.msrb.mxu2 %v11904_v43  ;;  %v11913_v48 = vld [vmem:[#allocation132_spill] sm:$0xff]  ;;  %v11915_v43 = vld [vmem:[#allocation157_spill] sm:$0xff] }
 0x548   :  { %2515 = vmatpush.bf16.msrb.mxu3 %v11905_v13  ;;  %v11916_v13 = vld [vmem:[#allocation137_spill] sm:$0xff] }
 0x54a   :  { %2493 = vmatpush.bf16.msrb.mxu1 %v11907_v17  ;;  %v11918_v17 = vld [vmem:[#allocation159_spill] sm:$0xff] }
 0x54b   :  { %2477 = vmatpush.bf16.msrb.mxu0 %v11906_v9  ;;  %2505 = vmatpush.bf16.msrb.mxu2 %v11908_v3  ;;  %v11917_v9 = vld [vmem:[#allocation136_spill] sm:$0xff]  ;;  %v11919_v3 = vld [vmem:[#allocation147_spill] sm:$0xff] }
 0x54c   :  { %2516 = vmatpush.bf16.msrb.mxu3 %v11909_v15  ;;  %v11944_v15 = vld [vmem:[#allocation164_spill] sm:$0xff] }
 0x54e   :  { %2494 = vmatpush.bf16.msrb.mxu1 %v11911_v45  ;;  %v11921_v45 = vld [vmem:[#allocation140_spill] sm:$0xff] }
 0x54f   :  { %2478 = vmatpush.bf16.msrb.mxu0 %v11910_v28  ;;  %2506 = vmatpush.bf16.msrb.mxu2 %v11912_v21  ;;  %v11920_v28 = vld [vmem:[#allocation141_spill] sm:$0xff]  ;;  %v11922_v21 = vld [vmem:[#allocation163_spill] sm:$0xff] }
 0x550   :  { %2517 = vmatpush.bf16.msrb.mxu3 %v11913_v48  ;;  %v11923_v48 = vld [vmem:[#allocation142_spill] sm:$0xff] }
 0x552   :  { %2495 = vmatpush.bf16.msrb.mxu1 %v11915_v43  ;;  %v11925_v43 = vld [vmem:[#allocation145_spill] sm:$0xff] }
 0x553   :  { %2479 = vmatpush.bf16.msrb.mxu0 %v11914_v19  ;;  %2507 = vmatpush.bf16.msrb.mxu2 %v11916_v13  ;;  %v11924_v19 = vld [vmem:[#allocation152_spill] sm:$0xff]  ;;  %v11926_v13 = vld [vmem:[#allocation167_spill] sm:$0xff] }
 0x554   :  { %2518 = vmatpush.bf16.msrb.mxu3 %v11917_v9  ;;  %v11928_v9 = vld [vmem:[#allocation156_spill] sm:$0xff] }
 0x555   :  { %2496 = vmatmul.bf16.vlgmr.msrb.gmra.mxu1 %v9777_v62 }
 0x556   :  { %2540 = vmatpush.bf16.msra.mxu1 %v11918_v17  ;;  %v11927_v17 = vld [vmem:[#allocation146_spill] sm:$0xff] }
 0x557   :  { %2480 = vmatpush.bf16.msrb.mxu0 %v11919_v3  ;;  %2508 = vmatpush.bf16.msrb.mxu2 %v11920_v28  ;;  %v11929_v3 = vld [vmem:[#allocation158_spill] sm:$0xff]  ;;  %v11930_v28 = vld [vmem:[#allocation149_spill] sm:$0xff] }
 0x558   :  { %2519 = vmatpush.bf16.msrb.mxu3 %v11921_v45  ;;  %v11931_v45 = vld [vmem:[#allocation171_spill] sm:$0xff] }
 0x55a   :  { %2541 = vmatpush.bf16.msra.mxu1 %v11922_v21  ;;  %2509 = vmatmul.bf16.vlgmr.msrb.gmra.mxu2 %v9786_v50  ;;  %v11932_v21 = vld [vmem:[#allocation150_spill] sm:$0xff] }
 0x55b   :  { %2553 = vmatpush.bf16.msra.mxu2 %v11923_v48  ;;  %2481 = vmatpush.bf16.msrb.mxu0 %v11924_v19  ;;  %v11933_v48 = vld [vmem:[#allocation151_spill] sm:$0xff]  ;;  %v11934_v19 = vld [vmem:[#allocation162_spill] sm:$0xff] }
 0x55c   :  { %2520 = vmatpush.bf16.msrb.mxu3 %v11925_v43  ;;  %v11943_v43 = vld [vmem:[#allocation181_spill] sm:$0xff] }
 0x55e   :  { %2542 = vmatpush.bf16.msra.mxu1 %v11926_v13  ;;  %v11935_v13 = vld [vmem:[#allocation175_spill] sm:$0xff] }
 0x55f   :  { %2554 = vmatpush.bf16.msra.mxu2 %v11927_v17  ;;  %2482 = vmatpush.bf16.msrb.mxu0 %v11928_v9  ;;  %v11936_v17 = vld [vmem:[#allocation154_spill] sm:$0xff]  ;;  %v11937_v9 = vld [vmem:[#allocation155_spill] sm:$0xff] }
 0x560   :  { %2521 = vmatpush.bf16.msrb.mxu3 %v11930_v28  ;;  %v11939_v28 = vld [vmem:[#allocation178_spill] sm:$0xff] }
 0x562   :  { %2543 = vmatpush.bf16.msra.mxu1 %v11931_v45  ;;  %2483 = vmatmul.bf16.vlgmr.msrb.gmra.mxu0 %v9800_v32  ;;  %v11940_v45 = vld [vmem:[#allocation160_spill] sm:$0xff] }
 0x563   :  { %2527 = vmatpush.bf16.msra.mxu0 %v11929_v3  ;;  %2555 = vmatpush.bf16.msra.mxu2 %v11932_v21  ;;  %v11938_v3 = vld [vmem:[#allocation166_spill] sm:$0xff]  ;;  %v11941_v21 = vld [vmem:[#allocation161_spill] sm:$0xff] }
 0x564   :  { %2566 = vmatpush.bf16.msra.mxu3 %v11933_v48  ;;  %v11942_v48 = vld [vmem:[#allocation170_spill] sm:$0xff] }
 0x565   :  { %2522 = vmatmul.bf16.vlgmr.msrb.gmra.mxu3 %v9806_v27 }
 0x566   :  { %2544 = vmatpush.bf16.msra.mxu1 %v11935_v13  ;;  %v11946_v13 = vld [vmem:[#allocation174_spill] sm:$0xff] }
 0x567   :  { %2528 = vmatpush.bf16.msra.mxu0 %v11934_v19  ;;  %2556 = vmatpush.bf16.msra.mxu2 %v11936_v17  ;;  %v11945_v19 = vld [vmem:[#allocation165_spill] sm:$0xff]  ;;  %v11947_v17 = vld [vmem:[#allocation183_spill] sm:$0xff] }
 0x568   :  { %2567 = vmatpush.bf16.msra.mxu3 %v11937_v9  ;;  %v11948_v9 = vld [vmem:[#allocation168_spill] sm:$0xff] }
 0x56a   :  { %2545 = vmatpush.bf16.msra.mxu1 %v11939_v28  ;;  %v11950_v28 = vld [vmem:[#allocation177_spill] sm:$0xff] }
 0x56b   :  { %2529 = vmatpush.bf16.msra.mxu0 %v11938_v3  ;;  %2557 = vmatpush.bf16.msra.mxu2 %v11940_v45  ;;  %v11949_v3 = vld [vmem:[#allocation169_spill] sm:$0xff]  ;;  %v11951_v45 = vld [vmem:[#allocation172_spill] sm:$0xff] }
 0x56c   :  { %2568 = vmatpush.bf16.msra.mxu3 %v11941_v21 }
 0x56e   :  { %2546 = vmatpush.bf16.msra.mxu1 %v11943_v43  ;;  %v11953_v43 = vld [vmem:[#allocation180_spill] sm:$0xff] }
 0x56f   :  { %2530 = vmatpush.bf16.msra.mxu0 %v11942_v48  ;;  %2558 = vmatpush.bf16.msra.mxu2 %v11944_v15  ;;  %v11952_v48 = vld [vmem:[#allocation173_spill] sm:$0xff]  ;;  %v11954_v15 = vld [vmem:[#allocation176_spill] sm:$0xff] }
 0x570   :  { %2569 = vmatpush.bf16.msra.mxu3 %v11945_v19 }
 0x572   :  { %2547 = vmatpush.bf16.msra.mxu1 %v11947_v17  ;;  %v11955_v17 = vld [vmem:[#allocation182_spill] sm:$0xff] }
 0x573   :  { %2531 = vmatpush.bf16.msra.mxu0 %v11946_v13  ;;  %2559 = vmatpush.bf16.msra.mxu2 %v11948_v9  ;;  %v2319_v13 = vpop.f32.mrf.mxu1  ;;  %v11956_v9 = vld [vmem:[#allocation179_spill] sm:$0xff] }
 0x574   :  { %2570 = vmatpush.bf16.msra.mxu3 %v11949_v3 }
 0x575   :  { %2548 = vmatmul.bf16.vlgmr.msra.gmra.mxu1 %v9777_v62 }
 0x577   :  { %2532 = vmatpush.bf16.msra.mxu0 %v11950_v28  ;;  %2560 = vmatpush.bf16.msra.mxu2 %v11951_v45  ;;  %v9910_v28 = vstv %s6334_s0  ;;  %s7940_s0 = smov 123  }
 0x578   :  { %2571 = vmatpush.bf16.msra.mxu3 %v11952_v48  ;;  %11958 = vst [vmem:[#allocation222_spill] sm:$0xff] %v9910_v28  ;;  %v9914_v48 = vstv %s6335_s4  ;;  %s7941_s4 = smov 5  }
 0x579   :  { %11959 = vst [vmem:[#allocation223_spill] sm:$0xff] %v9914_v48  ;;  %v2602_v19 = vmul.f32 %v9914_v48, %v9370_v34 }
 0x57a   :  { %2561 = vmatmul.bf16.vlgmr.msra.gmra.mxu2 %v9786_v50 }
 0x57b   :  { %2533 = vmatpush.bf16.msra.mxu0 %v11953_v43  ;;  %v9906_v62 = vpop.f32.mrf.mxu1  ;;  %v9908_v43 = vstv %s6333_s13  ;;  %s12150_s13 = sld [smem:[#allocation61_spill]] }
 0x57c   :  { %2572 = vmatpush.bf16.msra.mxu3 %v11954_v15  ;;  %11957 = vst [vmem:[#allocation221_spill] sm:$0xff] %v9908_v43  ;;  %v2586_v15 = vmul.f32 %v9908_v43, %v2319_v13 }
 0x57d   :  { %v2338_v45 = vpop.f32.mrf.mxu2 }
 0x57e   :  { %v2587_v38 = vmul.f32 %v9908_v43, %v2338_v45 }
 0x57f   :  { %2534 = vmatpush.bf16.msra.mxu0 %v11955_v17  ;;  %v2300_v50 = vpop.f32.mrf.mxu0 }
 0x580   :  { %2573 = vmatpush.bf16.msra.mxu3 %v11956_v9 }
 0x582   :  { %2535 = vmatmul.bf16.vlgmr.msra.gmra.mxu0 %v9800_v32 }
 0x583   :  { %2574 = vmatmul.bf16.vlgmr.msra.gmra.mxu3 %v9806_v27  ;;  %v2324_v17 = vpop.f32.mrf.mxu1 }
 0x584   :  { %v2592_v9 = vmul.f32 %v9910_v28, %v2324_v17 }
 0x585   :  { %v9916_v32 = vpop.f32.mrf.mxu2 }
 0x586   :  { %v2596_v3 = vadd.f32 %v2592_v9, %v2586_v15  ;;  %v2603_v9 = vmul.f32 %v9914_v48, %v9406_v59 }
 0x587   :  { %v2302_v21 = vpop.f32.mrf.mxu0 }
 0x588   :  { %v2357_v27 = vpop.f32.mrf.mxu3  ;;  %v9920_v30 = vadd.f32 %v2602_v19, %v2596_v3 }
 0x589   :  { %v2588_v3 = vmul.f32 %v9908_v43, %v2357_v27 }
 0x58b   :  { %v9922_v33 = vpop.f32.mrf.mxu1 }
 0x58d   :  { %v2343_v13 = vpop.f32.mrf.mxu2 }
 0x58e   :  { %v2593_v17 = vmul.f32 %v9910_v28, %v2343_v13  ;;  %v2604_v13 = vmul.f32 %v9914_v48, %v9441_v47 }
 0x58f   :  { %v2305_v60 = vpop.f32.mrf.mxu0 }
 0x590   :  { %v9925_v61 = vpop.f32.mrf.mxu3  ;;  %v2597_v4 = vadd.f32 %v2593_v17, %v2587_v38 }
 0x592   :  { %v9930_v15 = vadd.f32 %v2603_v9, %v2597_v4 }
 0x593   :  { %v2393_v20 = vpop.f32.mrf.mxu1 }
 0x595   :  { %v9933_v19 = vpop.f32.mrf.mxu2 }
 0x597   :  { %v2307_v41 = vpop.f32.mrf.mxu0 }
 0x598   :  { %v2362_v12 = vpop.f32.mrf.mxu3 }
 0x599   :  { %v2594_v45 = vmul.f32 %v9910_v28, %v2362_v12  ;;  %v2585_v12 = vmul.f32 %v9908_v43, %v2300_v50  ;;  %v9954_v50 = vstv %s6340_s5 }
 0x59a   :  { %11964 = vst [vmem:[#allocation228_spill] sm:$0xff] %v9954_v50 }
 0x59b   :  { %v2598_v55 = vadd.f32 %v2594_v45, %v2588_v3  ;;  %v2395_v17 = vpop.f32.mrf.mxu1  ;;  %v2591_v3 = vmul.f32 %v9910_v28, %v2305_v60  ;;  %v2631_v45 = vmul.f32 %v9942_v39, %v2307_v41  ;;  %v2601_v41 = vmul.f32 %v9914_v48, %v9345_v14 }
 0x59c   :  { %v2641_v60 = vmul.f32 %v9950_v25, %v9345_v14 }
 0x59d   :  { %v9938_v38 = vadd.f32 %v2604_v13, %v2598_v55  ;;  %v2406_v9 = vpop.f32.mrf.mxu2  ;;  %v9947_v55 = vstv %s6337_s18  ;;  %v2595_v35 = vadd.f32 %v2591_v3, %v2585_v12 }
 0x59e   :  { %11961 = vst [vmem:[#allocation225_spill] sm:$0xff] %v9947_v55  ;;  %v2625_v13 = vmul.f32 %v9947_v55, %v2302_v21 }
 0x59f   :  { %v2380_v27 = vpop.f32.mrf.mxu0 }
 0x5a0   :  { %v9940_v4 = vpop.f32.mrf.mxu3  ;;  %v2394_v46 = vadd.f32 %v2393_v20, %v2380_v27  ;;  %v2635_v23 = vadd.f32 %v2631_v45, %v2625_v13 }
 0x5a2   :  { %v2407_v29 = vadd.f32 %v2406_v9, %v2394_v46  ;;  %v2605_v46 = vadd.f32 %v2601_v41, %v2595_v35  ;;  %v2645_v9 = vadd.f32 %v2641_v60, %v2635_v23 }
 0x5a5   :  { %v2408_v17 = vpop.f32.mrf.mxu2 }
 0x5a7   :  { %v2382_v27 = vpop.f32.mrf.mxu0 }
 0x5a8   :  { %v2419_v56 = vpop.f32.mrf.mxu3 }
 0x5a9   :  { %v2420_v20 = vadd.f32 %v2419_v56, %v2407_v29 }
 0x5ab   :  { %v2579_v21 = vmul.f32 %v2420_v20, %v9331_v37 }
 0x5ad   :  { %v2611_v17 = vmul.f32 %v9952_v40, %v2579_v21  ;;  %v2651_v12 = vmul.f32 %v9954_v50, %v2579_v21 }
 0x5af   :  { %v2615_v56 = vadd.f32 %v2611_v17, %v2605_v46  ;;  %v2655_v29 = vadd.f32 %v2651_v12, %v2645_v9 }
 0x5b0   :  { %v2421_v45 = vpop.f32.mrf.mxu3 }
 0x5b1   :  { %v9964_v13 = vadd.f32 %v2615_v56, %v9347_v42  ;;  %v9967_v27 = vadd.f32 %v2655_v29, %v9349_v52  ;;  %v2626_v42 = vmul.f32 %v9947_v55, %v9906_v62  ;;  %v2632_v52 = vmul.f32 %v9942_v39, %v9922_v33 }
 0x5b2   :  { %v2445_v3 = vpop.f32.mrf.mxu1  ;;  %v2642_v56 = vmul.f32 %v9950_v25, %v9370_v34 }
 0x5b3   :  { %v9970_v14 = vmax.f32 %v9964_v13, 0.0  ;;  %v2636_v9 = vadd.f32 %v2632_v52, %v2626_v42 }
 0x5b5   :  { %2763 = vrot.lane.b32.xlu0 %v9970_v14, %s7927_s23  ;;  %2779 = vrot.lane.b32.xlu2 %v9970_v14, %s7925_s6 }
 0x5ba   :  { %v2447_v35 = vpop.f32.mrf.mxu1 }
 0x5bd   :  { %v2458_v23 = vpop.f32.mrf.mxu2  ;;  %2715 = vrot.lane.b32.xlu0 %v9970_v14, %s7930_s12  ;;  %2747 = vrot.lane.b32.xlu2 %v9970_v14, %s7926_s14 }
 0x5bf   :  { %v2432_v20 = vpop.f32.mrf.mxu0 }
 0x5c0   :  { %v2446_v41 = vadd.f32 %v2445_v3, %v2432_v20  ;;  %v2646_v3 = vadd.f32 %v2642_v56, %v2636_v9  ;;  %v2627_v9 = vmul.f32 %v9947_v55, %v9916_v32 }
 0x5c2   :  { %v2459_v21 = vadd.f32 %v2458_v23, %v2446_v41  ;;  %v11965_v41 = vld [vmem:[#allocation197_spill] sm:$0xff] }
 0x5c5   :  { %v2460_v60 = vpop.f32.mrf.mxu2  ;;  %2731 = vrot.lane.b32.xlu2 %v9970_v14, %s7928_s30 }
 0x5c7   :  { %v2434_v12 = vpop.f32.mrf.mxu0 }
 0x5c8   :  { %v2471_v46 = vpop.f32.mrf.mxu3 }
 0x5c9   :  { %v2472_v17 = vadd.f32 %v2471_v46, %v2459_v21  ;;  %v2633_v46 = vmul.f32 %v9942_v39, %v9933_v19 }
 0x5cb   :  { %v2580_v29 = vmul.f32 %v2472_v17, %v9359_v58 }
 0x5cd   :  { %v2612_v62 = vmul.f32 %v9952_v40, %v2580_v29  ;;  %v2652_v45 = vmul.f32 %v9954_v50, %v2580_v29  ;;  %2699 = vrot.lane.b32.xlu2 %v9970_v14, %s7929_s28  ;;  %v2637_v29 = vadd.f32 %v2633_v46, %v2627_v9 }
 0x5cf   :  { %v2616_v33 = vadd.f32 %v2612_v62, %v9920_v30  ;;  %v2656_v35 = vadd.f32 %v2652_v45, %v2646_v3  ;;  %v2643_v45 = vmul.f32 %v9950_v25, %v9406_v59 }
 0x5d0   :  { %v2473_v23 = vpop.f32.mrf.mxu3 }
 0x5d1   :  { %v9993_v20 = vadd.f32 %v2616_v33, %v9373_v57  ;;  %v9996_v42 = vadd.f32 %v2656_v35, %v11965_v41  ;;  %v11967_v33 = vld [vmem:[#allocation198_spill] sm:$0xff]  ;;  %v2647_v35 = vadd.f32 %v2643_v45, %v2637_v29  ;;  %v2634_v29 = vmul.f32 %v9942_v39, %v9940_v4 }
 0x5d2   :  { %v2497_v34 = vpop.f32.mrf.mxu1 }
 0x5d3   :  { %11966 = vst [vmem:[#allocation197_spill] sm:$0xff] %v9996_v42  ;;  %v9999_v52 = vmax.f32 %v9993_v20, 0.0 }
 0x5d5   :  { %2765 = vrot.lane.b32.xlu1 %v9999_v52, %s7927_s23  ;;  %2781 = vrot.lane.b32.xlu0 %v9999_v52, %s7925_s6 }
 0x5d6   :  { %2717 = vrot.lane.b32.xlu2 %v9999_v52, %s7930_s12 }
 0x5da   :  { %v2499_v30 = vpop.f32.mrf.mxu1 }
 0x5dd   :  { %v2510_v57 = vpop.f32.mrf.mxu2  ;;  %2733 = vrot.lane.b32.xlu1 %v9999_v52, %s7928_s30  ;;  %2749 = vrot.lane.b32.xlu0 %v9999_v52, %s7926_s14 }
 0x5df   :  { %v2484_v60 = vpop.f32.mrf.mxu0 }
 0x5e0   :  { %v2498_v21 = vadd.f32 %v2497_v34, %v2484_v60 }
 0x5e2   :  { %v2511_v17 = vadd.f32 %v2510_v57, %v2498_v21  ;;  %v11968_v57 = vld [vmem:[#allocation199_spill] sm:$0xff]  ;;  %v11969_v21 = vld [vmem:[#allocation200_spill] sm:$0xff] }
 0x5e5   :  { %v2512_v12 = vpop.f32.mrf.mxu2  ;;  %2669 = vrot.lane.b32.xlu1 %v9999_v52, %s7931_s1  ;;  %2701 = vrot.lane.b32.xlu0 %v9999_v52, %s7929_s28 }
 0x5e7   :  { %v2486_v62 = vpop.f32.mrf.mxu0 }
 0x5e8   :  { %v2523_v56 = vpop.f32.mrf.mxu3 }
 0x5e9   :  { %v2524_v3 = vadd.f32 %v2523_v56, %v2511_v17 }
 0x5eb   :  { %v2581_v19 = vmul.f32 %v2524_v3, %v11967_v33  ;;  %v2628_v3 = vmul.f32 %v9947_v55, %v9925_v61  ;;  %v11982_v33 = vld [vmem:[#allocation214_spill] sm:$0xff] }
 0x5ed   :  { %v2613_v32 = vmul.f32 %v9952_v40, %v2581_v19  ;;  %v2653_v23 = vmul.f32 %v9954_v50, %v2581_v19  ;;  %2685 = vrot.lane.b32.xlu0 %v9999_v52, %s7915_s25 }
 0x5ef   :  { %v2617_v41 = vadd.f32 %v2613_v32, %v9930_v15  ;;  %v2657_v34 = vadd.f32 %v2653_v23, %v2647_v35  ;;  %v2638_v32 = vadd.f32 %v2634_v29, %v2628_v3 }
 0x5f0   :  { %v2525_v30 = vpop.f32.mrf.mxu3 }
 0x5f1   :  { %v10030_v60 = vadd.f32 %v2617_v41, %v11968_v57  ;;  %v10033_v46 = vadd.f32 %v2657_v34, %v11969_v21  ;;  %v2644_v41 = vmul.f32 %v9950_v25, %v9441_v47  ;;  %v11971_v34 = vld [vmem:[#allocation201_spill] sm:$0xff] }
 0x5f2   :  { %v2549_v9 = vpop.f32.mrf.mxu1 }
 0x5f3   :  { %11970 = vst [vmem:[#allocation199_spill] sm:$0xff] %v10033_v46  ;;  %v10036_v59 = vmax.f32 %v10030_v60, 0.0  ;;  %v2648_v30 = vadd.f32 %v2644_v41, %v2638_v32  ;;  %v11975_v41 = vld [vmem:[#allocation204_spill] sm:$0xff] }
 0x5f5   :  { %2671 = vrot.lane.b32.xlu2 %v10036_v59, %s7931_s1  ;;  %2751 = vrot.lane.b32.xlu1 %v10036_v59, %s7926_s14 }
 0x5f6   :  { %2783 = vrot.lane.b32.xlu0 %v10036_v59, %s7925_s6 }
 0x5fa   :  { %v2551_v15 = vpop.f32.mrf.mxu1 }
 0x5fd   :  { %v2562_v17 = vpop.f32.mrf.mxu2  ;;  %2735 = vrot.lane.b32.xlu1 %v10036_v59, %s7928_s30 }
 0x5fe   :  { %2767 = vrot.lane.b32.xlu0 %v10036_v59, %s7927_s23 }
 0x5ff   :  { %v2536_v12 = vpop.f32.mrf.mxu0 }
 0x600   :  { %v2550_v56 = vadd.f32 %v2549_v9, %v2536_v12 }
 0x602   :  { %v2563_v45 = vadd.f32 %v2562_v17, %v2550_v56  ;;  %v11972_v17 = vld [vmem:[#allocation202_spill] sm:$0xff]  ;;  %v11973_v56 = vld [vmem:[#allocation203_spill] sm:$0xff] }
 0x605   :  { %v2564_v62 = vpop.f32.mrf.mxu2  ;;  %2703 = vrot.lane.b32.xlu1 %v10036_v59, %s7929_s28 }
 0x606   :  { %v2575_v35 = vpop.f32.mrf.mxu3  ;;  %2719 = vrot.lane.b32.xlu0 %v10036_v59, %s7930_s12 }
 0x607   :  { %v2538_v19 = vpop.f32.mrf.mxu0  ;;  %v2576_v23 = vadd.f32 %v2575_v35, %v2563_v45 }
 0x609   :  { %v2582_v4 = vmul.f32 %v2576_v23, %v11971_v34  ;;  %v11980_v34 = vld [vmem:[#allocation211_spill] sm:$0xff] }
 0x60b   :  { %v2614_v61 = vmul.f32 %v9952_v40, %v2582_v4  ;;  %v2654_v57 = vmul.f32 %v9954_v50, %v2582_v4  ;;  %v11978_v50 = vld [vmem:[#allocation207_spill] sm:$0xff] }
 0x60d   :  { %v2618_v21 = vadd.f32 %v2614_v61, %v9938_v38  ;;  %v2658_v9 = vadd.f32 %v2654_v57, %v2648_v30  ;;  %2687 = vrot.lane.b32.xlu1 %v10036_v59, %s7915_s25 }
 0x60e   :  { %v2577_v15 = vpop.f32.mrf.mxu3 }
 0x60f   :  { %v10065_v12 = vadd.f32 %v2618_v21, %v11972_v17  ;;  %v10068_v29 = vadd.f32 %v2658_v9, %v11973_v56  ;;  %v10093_v38 = vpop.permute.xlu2 %2779 }
 0x611   :  { %11974 = vst [vmem:[#allocation200_spill] sm:$0xff] %v10068_v29  ;;  %v10071_v47 = vmax.f32 %v10065_v12, 0.0  ;;  %v11979_v29 = vld [vmem:[#allocation210_spill] sm:$0xff] }
 0x613   :  { %2721 = vrot.lane.b32.xlu0 %v10071_v47, %s7930_s12  ;;  %2753 = vrot.lane.b32.xlu2 %v10071_v47, %s7926_s14 }
 0x615   :  { %2785 = vrot.lane.b32.xlu1 %v10071_v47, %s7925_s6 }
 0x617   :  { %v10097_v62 = vpop.permute.xlu2 %2747 }
 0x61b   :  { %2667 = vrot.lane.b32.xlu0 %v9970_v14, %s7931_s1  ;;  %2737 = vrot.lane.b32.xlu2 %v10071_v47, %s7928_s30 }
 0x61d   :  { %2769 = vrot.lane.b32.xlu1 %v10071_v47, %s7927_s23 }
 0x61f   :  { %v10099_v19 = vpop.permute.xlu2 %2731 }
 0x623   :  { %2705 = vrot.lane.b32.xlu2 %v10071_v47, %s7929_s28 }
 0x625   :  { %2673 = vrot.lane.b32.xlu1 %v10071_v47, %s7931_s1 }
 0x627   :  { %v10095_v3 = vpop.permute.xlu0 %2763  ;;  %v2700_v15 = vpop.permute.xlu2 %2699 }
 0x62b   :  { %2689 = vrot.lane.b32.xlu2 %v10071_v47, %s7915_s25 }
 0x62d   :  { %2683 = vrot.lane.b32.xlu1 %v9970_v14, %s7915_s25 }
 0x62f   :  { %v2716_v45 = vpop.permute.xlu0 %2715 }
 0x630   :  { %v10121_v40 = vpop.permute.xlu2 %2717 }
 0x647   :  { %v2766_v35 = vpop.permute.xlu1 %2765  ;;  %v2782_v32 = vpop.permute.xlu0 %2781 }
 0x648   :  { %v2789_v23 = vsel %vm617_vm0, %v10093_v38, %v2782_v32  ;;  %v2773_v57 = vsel %vm595_vm3, %v10095_v3, %v2766_v35 }
 0x649   :  { %v2791_v4 = vmul.f32 %v11975_v41, %v2789_v23  ;;  %v11976_v23 = vld [vmem:[#allocation205_spill] sm:$0xff] }
 0x64a   :  { %v2775_v41 = vmul.f32 %v11976_v23, %v2773_v57 }
 0x64b   :  { %v2811_v30 = vpack.c.bf16 %v2791_v4, %v2791_v4  ;;  %v11977_v4 = vld [vmem:[#allocation206_spill] sm:$0xff] }
 0x64d   :  { %v2826_v61 = vsel %vm650_vm1, %v2811_v30, 0 }
 0x64e   :  { %2840 = vmatpush.bf16.msrb.mxu0 %v2826_v61 }
 0x64f   :  { %v2734_v21 = vpop.permute.xlu1 %2733  ;;  %v2750_v9 = vpop.permute.xlu0 %2749 }
 0x650   :  { %v2741_v17 = vsel %vm551_vm4, %v10099_v19, %v2734_v21  ;;  %v2757_v56 = vsel %vm573_vm2, %v10097_v62, %v2750_v9  ;;  %v10127_v43 = vpop.permute.xlu2 %2671 }
 0x651   :  { %v2759_v30 = vmul.f32 %v11977_v4, %v2757_v56  ;;  %v2743_v25 = vmul.f32 %v11978_v50, %v2741_v17 }
 0x653   :  { %v2807_v39 = vpack.c.bf16 %v2775_v41, %v2759_v30  ;;  %v2803_v55 = vpack.c.bf16 %v2743_v25, %v9970_v14 }
 0x655   :  { %2841 = vmatpush.bf16.msrb.mxu0 %v2807_v39 }
 0x657   :  { %v10118_v61 = vpop.permute.xlu0 %2701  ;;  %v10123_v48 = vpop.permute.xlu1 %2669 }
 0x659   :  { %2842 = vmatpush.bf16.msrb.mxu0 %v2803_v55 }
 0x65f   :  { %v10125_v28 = vpop.permute.xlu0 %2685 }
 0x667   :  { %v2752_v57 = vpop.permute.xlu1 %2751 }
 0x668   :  { %v2784_v23 = vpop.permute.xlu0 %2783  ;;  %v2756_v55 = vsel %vm573_vm2, %v2750_v9, %v2752_v57 }
 0x669   :  { %v2788_v50 = vsel %vm617_vm0, %v2782_v32, %v2784_v23  ;;  %v2760_v32 = vmul.f32 %v11979_v29, %v2756_v55  ;;  %v11983_v55 = vld [vmem:[#allocation213_spill] sm:$0xff] }
 0x66a   :  { %v2792_v39 = vmul.f32 %v9536_v5, %v2788_v50  ;;  %v11981_v50 = vld [vmem:[#allocation212_spill] sm:$0xff] }
 0x66c   :  { %v2812_v56 = vpack.c.bf16 %v2792_v39, %v2792_v39 }
 0x66d   :  { %v2754_v17 = vpop.permute.xlu2 %2753 }
 0x66e   :  { %v2829_v25 = vsel %vm650_vm1, %v2812_v56, 0  ;;  %v2709_v56 = vsel %vm507_vm5, %v2700_v15, %v10118_v61 }
 0x66f   :  { %v2736_v41 = vpop.permute.xlu1 %2735  ;;  %2854 = vmatpush.bf16.msrb.mxu1 %v2829_v25 }
 0x670   :  { %v2768_v14 = vpop.permute.xlu0 %2767  ;;  %v2740_v4 = vsel %vm551_vm4, %v2734_v21, %v2736_v41  ;;  %v2725_v21 = vsel %vm529_vm6, %v2716_v45, %v10121_v40 }
 0x671   :  { %v2772_v30 = vsel %vm595_vm3, %v2766_v35, %v2768_v14  ;;  %v2744_v39 = vmul.f32 %v11981_v50, %v2740_v4  ;;  %v2712_v35 = vmul.f32 %v11982_v33, %v2709_v56 }
 0x672   :  { %v2776_v5 = vmul.f32 %v11980_v34, %v2772_v30  ;;  %v2728_v34 = vmul.f32 %v11983_v55, %v2725_v21  ;;  %v11984_v21 = vld [vmem:[#allocation208_spill] sm:$0xff] }
 0x673   :  { %v2804_v29 = vpack.c.bf16 %v2744_v39, %v9999_v52 }
 0x674   :  { %v2808_v46 = vpack.c.bf16 %v2776_v5, %v2760_v32  ;;  %v2800_v30 = vpack.c.bf16 %v2728_v34, %v2712_v35 }
 0x675   :  { %v2738_v9 = vpop.permute.xlu2 %2737 }
 0x676   :  { %2855 = vmatpush.bf16.msrb.mxu1 %v2808_v46 }
 0x677   :  { %v2704_v25 = vpop.permute.xlu1 %2703 }
 0x678   :  { %v2720_v4 = vpop.permute.xlu0 %2719 }
 0x67a   :  { %2856 = vmatpush.bf16.msrb.mxu1 %v2804_v29  ;;  %v11985_v29 = vld [vmem:[#allocation209_spill] sm:$0xff] }
 0x67d   :  { %v2706_v5 = vpop.permute.xlu2 %2705 }
 0x67e   :  { %2857 = vmatpush.bf16.msrb.mxu1 %v2800_v30  ;;  %v2710_v50 = vsel %vm507_vm5, %v2706_v5, %v2700_v15 }
 0x67f   :  { %v2688_v32 = vpop.permute.xlu1 %2687  ;;  %v2711_v58 = vmul.f32 %v9702_v11, %v2710_v50 }
 0x685   :  { %v2722_v46 = vpop.permute.xlu0 %2721 }
 0x686   :  { %v2726_v42 = vsel %vm529_vm6, %v2722_v46, %v2716_v45  ;;  %v2758_v45 = vsel %vm573_vm2, %v2754_v17, %v10097_v62 }
 0x687   :  { %v2727_v33 = vmul.f32 %v9688_v31, %v2726_v42  ;;  %v2786_v52 = vpop.permute.xlu1 %2785  ;;  %v2755_v42 = vsel %vm573_vm2, %v2752_v57, %v2754_v17  ;;  %v2762_v62 = vmul.f32 %v9615_v36, %v2758_v45 }
 0x688   :  { %v2787_v39 = vsel %vm617_vm0, %v2784_v23, %v2786_v52  ;;  %v2790_v56 = vsel %vm617_vm0, %v2786_v52, %v10093_v38  ;;  %v2742_v23 = vsel %vm551_vm4, %v2738_v9, %v10099_v19 }
 0x689   :  { %v2793_v35 = vmul.f32 %v11984_v21, %v2787_v39  ;;  %v2794_v15 = vmul.f32 %v11985_v29, %v2790_v56  ;;  %v2799_v55 = vpack.c.bf16 %v2727_v33, %v2711_v58  ;;  %v2739_v58 = vsel %vm551_vm4, %v2736_v41, %v2738_v9  ;;  %v11986_v41 = vld [vmem:[#allocation215_spill] sm:$0xff]  ;;  %v11987_v56 = vld [vmem:[#allocation216_spill] sm:$0xff]  ;;  %v2690_v29 = vpop.permute.xlu2 %2689 }
 0x68a   :  { %v2761_v33 = vmul.f32 %v9611_v24, %v2755_v42  ;;  %v2745_v39 = vmul.f32 %v11986_v41, %v2739_v58  ;;  %v2746_v21 = vmul.f32 %v11987_v56, %v2742_v23  ;;  %v2708_v24 = vsel %vm507_vm5, %v10118_v61, %v2704_v25  ;;  %v11991_v58 = vld [vmem:[#allocation220_spill] sm:$0xff]  ;;  %v12005_v56 = vld [vmem:[#allocation79_spill] sm:$0xff] }
 0x68b   :  { %v2813_v34 = vpack.c.bf16 %v2793_v35, %v2793_v35  ;;  %v2814_v30 = vpack.c.bf16 %v2794_v15, %v2794_v15  ;;  %2843 = vmatpush.bf16.msrb.mxu0 %v2799_v55  ;;  %v7088_v23 = vld [vmem:[%s11990_s22] sm:$0xff] }
 0x68c   :  { %v2806_v55 = vpack.c.bf16 %v2746_v21, %v10071_v47  ;;  %v12003_v41 = vld [vmem:[#allocation64_spill] sm:$0xff] }
 0x68d   :  { %v2832_v11 = vsel %vm650_vm1, %v2813_v34, 0  ;;  %v2835_v31 = vsel %vm650_vm1, %v2814_v30, 0  ;;  %v2668_v47 = vpop.permute.xlu0 %2667  ;;  %v12006_v21 = vld [vmem:[#allocation80_spill] sm:$0xff] }
 0x68e   :  { %2868 = vmatpush.bf16.msrb.mxu2 %v2832_v11  ;;  %2882 = vmatpush.bf16.msrb.mxu3 %v2835_v31  ;;  %v2677_v45 = vsel %vm463_vm7, %v2668_v47, %v10123_v48 }
 0x68f   :  { %v2770_v38 = vpop.permute.xlu1 %2769 }
 0x690   :  { %v2771_v50 = vsel %vm595_vm3, %v2768_v14, %v2770_v38  ;;  %v2774_v57 = vsel %vm595_vm3, %v2770_v38, %v10095_v3  ;;  %v2724_v14 = vsel %vm529_vm6, %v10121_v40, %v2720_v4  ;;  %v2723_v3 = vsel %vm529_vm6, %v2720_v4, %v2722_v46  ;;  %v11989_v46 = vld [vmem:[#allocation218_spill] sm:$0xff] }
 0x691   :  { %v2777_v17 = vmul.f32 %v9603_v6, %v2771_v50  ;;  %v2778_v52 = vmul.f32 %v9607_v44, %v2774_v57  ;;  %v2707_v44 = vsel %vm507_vm5, %v2704_v25, %v2706_v5  ;;  %v11988_v6 = vld [vmem:[#allocation217_spill] sm:$0xff]  ;;  %v2730_v35 = vmul.f32 %v9698_v53, %v2723_v3  ;;  %v11992_v57 = vld [vmem:[#allocation219_spill] sm:$0xff]  ;;  %v12010_v3 = vld [vmem:[#allocation84_spill] sm:$0xff] }
 0x692   :  { %v2729_v36 = vmul.f32 %v11988_v6, %v2724_v14  ;;  %v2805_v40 = vpack.c.bf16 %v2745_v39, %v10036_v59  ;;  %v2692_v4 = vsel %vm485_vm8, %v10125_v28, %v2688_v32  ;;  %v2713_v25 = vmul.f32 %v11989_v46, %v2708_v24  ;;  %v12004_v39 = vld [vmem:[#allocation73_spill] sm:$0xff]  ;;  %v12009_v14 = vld [vmem:[#allocation83_spill] sm:$0xff]  ;;  %v12011_v24 = vld [vmem:[#allocation72_spill] sm:$0xff] }
 0x693   :  { %v2809_v19 = vpack.c.bf16 %v2777_v17, %v2761_v33  ;;  %v2810_v9 = vpack.c.bf16 %v2778_v52, %v2762_v62  ;;  %v2714_v5 = vmul.f32 %v9706_v54, %v2707_v44  ;;  %v2676_v53 = vsel %vm463_vm7, %v10123_v48, %v10127_v43  ;;  %v12002_v52 = vld [vmem:[#allocation75_spill] sm:$0xff]  ;;  %v12012_v44 = vld [vmem:[#allocation81_spill] sm:$0xff]  ;;  %v12013_v6 = vld [vmem:[#allocation88_spill] sm:$0xff] }
 0x694   :  { %v2691_v59 = vsel %vm485_vm8, %v2688_v32, %v2690_v29  ;;  %v2697_v34 = vmul.f32 %v9684_v51, %v2692_v4  ;;  %v2801_v11 = vpack.c.bf16 %v2729_v36, %v2713_v25  ;;  %v2681_v54 = vmul.f32 %v9680_v8, %v2676_v53  ;;  %v12014_v36 = vld [vmem:[#allocation89_spill] sm:$0xff]  ;;  %v12021_v25 = vld [vmem:[#allocation94_spill] sm:$0xff] }
 0x695   :  { %2869 = vmatpush.bf16.msrb.mxu2 %v2809_v19  ;;  %2883 = vmatpush.bf16.msrb.mxu3 %v2810_v9  ;;  %v2802_v31 = vpack.c.bf16 %v2730_v35, %v2714_v5  ;;  %v2698_v42 = vmul.f32 %v9740_v10, %v2691_v59  ;;  %v12007_v19 = vld [vmem:[#allocation68_spill] sm:$0xff]  ;;  %v12008_v9 = vld [vmem:[#allocation77_spill] sm:$0xff]  ;;  %v10276_v4 = vpack.c.bf16 %v10065_v12, %v10065_v12  ;;  %v12022_v5 = vld [vmem:[#allocation95_spill] sm:$0xff] }
 0x696   :  { %v2797_v51 = vpack.c.bf16 %v2697_v34, %v2681_v54  ;;  %v12015_v35 = vld [vmem:[#allocation76_spill] sm:$0xff]  ;;  %v12020_v46 = vld [vmem:[#allocation93_spill] sm:$0xff]  ;;  %v10286_v53 = vpack.c.bf16 %v9964_v13, %v9964_v13  ;;  %v10290_v59 = vpack.c.bf16 %v9993_v20, %v9993_v20  ;;  %v12024_v34 = vld [vmem:[#allocation91_spill] sm:$0xff] }
 0x697   :  { %v2674_v15 = vpop.permute.xlu1 %2673  ;;  %v12028_v54 = vld [vmem:[#allocation97_spill] sm:$0xff] }
 0x698   :  { %v2675_v61 = vsel %vm463_vm7, %v10127_v43, %v2674_v15  ;;  %v2678_v43 = vsel %vm463_vm7, %v2674_v15, %v2668_v47  ;;  %v12017_v15 = vld [vmem:[#allocation78_spill] sm:$0xff] }
 0x699   :  { %2870 = vmatpush.bf16.msrb.mxu2 %v2805_v40  ;;  %2884 = vmatpush.bf16.msrb.mxu3 %v2806_v55  ;;  %v2682_v30 = vmul.f32 %v9728_v18, %v2675_v61  ;;  %v2680_v18 = vmul.f32 %v11991_v58, %v2677_v45  ;;  %v2679_v48 = vmul.f32 %v9732_v2, %v2678_v43  ;;  %v11995_v2 = vld [vmem:[#allocation62_spill] sm:$0xff]  ;;  %v12018_v40 = vld [vmem:[#allocation87_spill] sm:$0xff]  ;;  %v12019_v61 = vld [vmem:[#allocation92_spill] sm:$0xff] }
 0x69a   :  { %v10272_v55 = vpack.c.bf16 %v10030_v60, %v10030_v60  ;;  %v12023_v47 = vld [vmem:[#allocation82_spill] sm:$0xff]  ;;  %v12030_v45 = vld [vmem:[#allocation103_spill] sm:$0xff]  ;;  %v12035_v58 = vld [vmem:[#allocation96_spill] sm:$0xff] }
 0x69b   :  { %v2798_v38 = vpack.c.bf16 %v2698_v42, %v2682_v30  ;;  %v12025_v30 = vld [vmem:[#allocation98_spill] sm:$0xff] }
 0x69c   :  { %v12029_v42 = vld [vmem:[#allocation102_spill] sm:$0xff] }
 0x69d   :  { %2871 = vmatpush.bf16.msrb.mxu2 %v2801_v11  ;;  %2885 = vmatpush.bf16.msrb.mxu3 %v2802_v31  ;;  %v12026_v11 = vld [vmem:[#allocation99_spill] sm:$0xff]  ;;  %v12027_v31 = vld [vmem:[#allocation86_spill] sm:$0xff] }
 0x69e   :  { %v12031_v43 = vld [vmem:[#allocation90_spill] sm:$0xff] }
 0x69f   :  { %v2684_v32 = vpop.permute.xlu1 %2683 }
 0x6a0   :  { %v2693_v8 = vsel %vm485_vm8, %v2684_v32, %v10125_v28  ;;  %v2694_v10 = vsel %vm485_vm8, %v2690_v29, %v2684_v32  ;;  %v11997_v28 = vld [vmem:[#allocation70_spill] sm:$0xff]  ;;  %v12016_v29 = vld [vmem:[#allocation85_spill] sm:$0xff] }
 0x6a1   :  { %v2695_v50 = vmul.f32 %v9736_v26, %v2694_v10  ;;  %v2696_v33 = vmul.f32 %v11992_v57, %v2693_v8  ;;  %2872 = vmatpush.bf16.msrb.mxu2 %v2797_v51  ;;  %2886 = vmatpush.bf16.msrb.mxu3 %v2798_v38  ;;  %v11996_v26 = vld [vmem:[#allocation65_spill] sm:$0xff]  ;;  %v12033_v51 = vld [vmem:[#allocation106_spill] sm:$0xff]  ;;  %v12034_v38 = vld [vmem:[#allocation107_spill] sm:$0xff] }
 0x6a2   :  { %v12032_v32 = vld [vmem:[#allocation101_spill] sm:$0xff]  ;;  %v12037_v8 = vld [vmem:[#allocation111_spill] sm:$0xff]  ;;  %v12038_v10 = vld [vmem:[#allocation112_spill] sm:$0xff] }
 0x6a3   :  { %v2795_v62 = vpack.c.bf16 %v2695_v50, %v2679_v48  ;;  %v2796_v17 = vpack.c.bf16 %v2696_v33, %v2680_v18  ;;  %v12036_v18 = vld [vmem:[#allocation105_spill] sm:$0xff]  ;;  %v12041_v50 = vld [vmem:[#allocation115_spill] sm:$0xff]  ;;  %v12042_v57 = vld [vmem:[#allocation116_spill] sm:$0xff] }
 0x6a4   :  { %6347 = vmatmul.msk.bf16.vlgmr.msrb.gmra.mxu2 %vm646_vm9, %v7088_v23  ;;  %6348 = vmatmul.msk.bf16.vlgmr.msrb.gmra.mxu3 %vm646_vm9, %v7088_v23  ;;  %v12040_v48 = vld [vmem:[#allocation109_spill] sm:$0xff]  ;;  %v12043_v33 = vld [vmem:[#allocation104_spill] sm:$0xff] }
 0x6a5   :  { %2923 = vmatpush.bf16.msra.mxu2 %v8770_v22  ;;  %2936 = vmatpush.bf16.msra.mxu3 %v8789_v16  ;;  %v11993_v22 = vld [vmem:[#allocation66_spill] sm:$0xff]  ;;  %v11994_v16 = vld [vmem:[#allocation67_spill] sm:$0xff] }
 0x6a6   :  { %2844 = vmatpush.bf16.msrb.mxu0 %v2795_v62  ;;  %2858 = vmatpush.bf16.msrb.mxu1 %v2796_v17  ;;  %v12044_v62 = vld [vmem:[#allocation113_spill] sm:$0xff]  ;;  %v12045_v17 = vld [vmem:[#allocation120_spill] sm:$0xff] }
 0x6a9   :  { %2924 = vmatpush.bf16.msra.mxu2 %v8776_v49  ;;  %2937 = vmatpush.bf16.msra.mxu3 %v8800_v1  ;;  %v12000_v49 = vld [vmem:[#allocation69_spill] sm:$0xff]  ;;  %v12001_v1 = vld [vmem:[#allocation74_spill] sm:$0xff] }
 0x6aa   :  { %2897 = vmatpush.bf16.msra.mxu0 %v8813_v63  ;;  %2910 = vmatpush.bf16.msra.mxu1 %v8815_v0  ;;  %v11998_v63 = vld [vmem:[#allocation71_spill] sm:$0xff] }
 0x6ab   :  { %6345 = vmatmul.msk.bf16.vlgmr.msrb.gmra.mxu0 %vm646_vm9, %v7088_v23  ;;  %6346 = vmatmul.msk.bf16.vlgmr.msrb.gmra.mxu1 %vm646_vm9, %v7088_v23  ;;  %v11999_v0 = vld [vmem:[#allocation63_spill] sm:$0xff]  ;;  %v12039_v23 = vld [vmem:[#allocation100_spill] sm:$0xff] }
 0x6ad   :  { %2925 = vmatpush.bf16.msra.mxu2 %v11995_v2  ;;  %2938 = vmatpush.bf16.msra.mxu3 %v11996_v26  ;;  %v12048_v2 = vld [vmem:[#allocation117_spill] sm:$0xff]  ;;  %v12049_v26 = vld [vmem:[#allocation110_spill] sm:$0xff] }
 0x6ae   :  { %2898 = vmatpush.bf16.msra.mxu0 %v11993_v22  ;;  %2911 = vmatpush.bf16.msra.mxu1 %v11994_v16  ;;  %v12046_v22 = vld [vmem:[#allocation121_spill] sm:$0xff]  ;;  %v12047_v16 = vld [vmem:[#allocation108_spill] sm:$0xff] }
 0x6b1   :  { %2926 = vmatpush.bf16.msra.mxu2 %v11999_v0  ;;  %2939 = vmatpush.bf16.msra.mxu3 %v12000_v49  ;;  %v12052_v0 = vld [vmem:[#allocation125_spill] sm:$0xff]  ;;  %v12053_v49 = vld [vmem:[#allocation126_spill] sm:$0xff] }
 0x6b2   :  { %2899 = vmatpush.bf16.msra.mxu0 %v11997_v28  ;;  %2912 = vmatpush.bf16.msra.mxu1 %v11998_v63  ;;  %v12050_v28 = vld [vmem:[#allocation118_spill] sm:$0xff]  ;;  %v12051_v63 = vld [vmem:[#allocation124_spill] sm:$0xff] }
 0x6b5   :  { %2927 = vmatpush.bf16.msra.mxu2 %v12003_v41  ;;  %2940 = vmatpush.bf16.msra.mxu3 %v12004_v39  ;;  %v12056_v41 = vld [vmem:[#allocation122_spill] sm:$0xff] }
 0x6b6   :  { %2900 = vmatpush.bf16.msra.mxu0 %v12001_v1  ;;  %2913 = vmatpush.bf16.msra.mxu1 %v12002_v52  ;;  %v12054_v1 = vld [vmem:[#allocation127_spill] sm:$0xff]  ;;  %v12055_v52 = vld [vmem:[#allocation114_spill] sm:$0xff] }
 0x6b7   :  { %v12057_v39 = vld [vmem:[#allocation130_spill] sm:$0xff] }
 0x6b9   :  { %2928 = vmatpush.bf16.msra.mxu2 %v12007_v19  ;;  %2941 = vmatpush.bf16.msra.mxu3 %v12008_v9  ;;  %v12060_v19 = vld [vmem:[#allocation128_spill] sm:$0xff]  ;;  %v12061_v9 = vld [vmem:[#allocation134_spill] sm:$0xff] }
 0x6ba   :  { %2901 = vmatpush.bf16.msra.mxu0 %v12005_v56  ;;  %2914 = vmatpush.bf16.msra.mxu1 %v12006_v21  ;;  %v12058_v56 = vld [vmem:[#allocation131_spill] sm:$0xff] }
 0x6bb   :  { %v12059_v21 = vld [vmem:[#allocation119_spill] sm:$0xff] }
 0x6bd   :  { %2929 = vmatpush.bf16.msra.mxu2 %v12011_v24  ;;  %2942 = vmatpush.bf16.msra.mxu3 %v12012_v44  ;;  %v12064_v24 = vld [vmem:[#allocation132_spill] sm:$0xff]  ;;  %v12065_v44 = vld [vmem:[#allocation138_spill] sm:$0xff] }
 0x6be   :  { %2902 = vmatpush.bf16.msra.mxu0 %v12009_v14  ;;  %2915 = vmatpush.bf16.msra.mxu1 %v12010_v3  ;;  %v12062_v14 = vld [vmem:[#allocation135_spill] sm:$0xff] }
 0x6bf   :  { %v12063_v3 = vld [vmem:[#allocation123_spill] sm:$0xff] }
 0x6c1   :  { %2930 = vmatpush.bf16.msra.mxu2 %v12015_v35  ;;  %2943 = vmatpush.bf16.msra.mxu3 %v12016_v29  ;;  %v12068_v35 = vld [vmem:[#allocation136_spill] sm:$0xff]  ;;  %v12069_v29 = vld [vmem:[#allocation143_spill] sm:$0xff] }
 0x6c2   :  { %2903 = vmatpush.bf16.msra.mxu0 %v12013_v6  ;;  %2916 = vmatpush.bf16.msra.mxu1 %v12014_v36  ;;  %v12066_v6 = vld [vmem:[#allocation139_spill] sm:$0xff]  ;;  %v12067_v36 = vld [vmem:[#allocation129_spill] sm:$0xff] }
 0x6c4   :  { %2931 = vmatmul.bf16.vlgmr.msra.gmra.mxu2 %v10272_v55  ;;  %2944 = vmatmul.bf16.vlgmr.msra.gmra.mxu3 %v10276_v4 }
 0x6c5   :  { %2975 = vmatpush.bf16.msrb.mxu2 %v12017_v15  ;;  %2988 = vmatpush.bf16.msrb.mxu3 %v12018_v40  ;;  %v12070_v15 = vld [vmem:[#allocation144_spill] sm:$0xff]  ;;  %v12071_v40 = vld [vmem:[#allocation133_spill] sm:$0xff] }
 0x6c6   :  { %2904 = vmatpush.bf16.msra.mxu0 %v12019_v61  ;;  %2917 = vmatpush.bf16.msra.mxu1 %v12020_v46  ;;  %v12072_v61 = vld [vmem:[#allocation140_spill] sm:$0xff]  ;;  %v12073_v46 = vld [vmem:[#allocation147_spill] sm:$0xff] }
 0x6c9   :  { %2976 = vmatpush.bf16.msrb.mxu2 %v12023_v47  ;;  %2989 = vmatpush.bf16.msrb.mxu3 %v12024_v34  ;;  %v12076_v47 = vld [vmem:[#allocation145_spill] sm:$0xff]  ;;  %v12077_v34 = vld [vmem:[#allocation152_spill] sm:$0xff] }
 0x6ca   :  { %2949 = vmatpush.bf16.msrb.mxu0 %v12021_v25  ;;  %2962 = vmatpush.bf16.msrb.mxu1 %v12022_v5  ;;  %v12074_v25 = vld [vmem:[#allocation148_spill] sm:$0xff]  ;;  %v12075_v5 = vld [vmem:[#allocation137_spill] sm:$0xff] }
 0x6cb   :  { %2905 = vmatmul.bf16.vlgmr.msra.gmra.mxu0 %v10286_v53  ;;  %2918 = vmatmul.bf16.vlgmr.msra.gmra.mxu1 %v10290_v59 }
 0x6cd   :  { %2977 = vmatpush.bf16.msrb.mxu2 %v12027_v31  ;;  %2990 = vmatpush.bf16.msrb.mxu3 %v12028_v54  ;;  %v12080_v31 = vld [vmem:[#allocation149_spill] sm:$0xff]  ;;  %v12081_v54 = vld [vmem:[#allocation142_spill] sm:$0xff] }
 0x6ce   :  { %2950 = vmatpush.bf16.msrb.mxu0 %v12025_v30  ;;  %2963 = vmatpush.bf16.msrb.mxu1 %v12026_v11  ;;  %v12078_v30 = vld [vmem:[#allocation153_spill] sm:$0xff] }
 0x6cf   :  { %v12079_v11 = vld [vmem:[#allocation141_spill] sm:$0xff] }
 0x6d1   :  { %2978 = vmatpush.bf16.msrb.mxu2 %v12031_v43  ;;  %2991 = vmatpush.bf16.msrb.mxu3 %v12032_v32  ;;  %v12084_v43 = vld [vmem:[#allocation157_spill] sm:$0xff]  ;;  %v12085_v32 = vld [vmem:[#allocation158_spill] sm:$0xff] }
 0x6d2   :  { %2951 = vmatpush.bf16.msrb.mxu0 %v12029_v42  ;;  %2964 = vmatpush.bf16.msrb.mxu1 %v12030_v45  ;;  %v12082_v42 = vld [vmem:[#allocation151_spill] sm:$0xff]  ;;  %v12083_v45 = vld [vmem:[#allocation156_spill] sm:$0xff] }
 0x6d5   :  { %2979 = vmatpush.bf16.msrb.mxu2 %v12035_v58  ;;  %2992 = vmatpush.bf16.msrb.mxu3 %v12036_v18  ;;  %v12088_v58 = vld [vmem:[#allocation155_spill] sm:$0xff]  ;;  %v12089_v18 = vld [vmem:[#allocation162_spill] sm:$0xff] }
 0x6d6   :  { %2952 = vmatpush.bf16.msrb.mxu0 %v12033_v51  ;;  %2965 = vmatpush.bf16.msrb.mxu1 %v12034_v38  ;;  %v12086_v51 = vld [vmem:[#allocation159_spill] sm:$0xff]  ;;  %v12087_v38 = vld [vmem:[#allocation146_spill] sm:$0xff] }
 0x6d9   :  { %2980 = vmatpush.bf16.msrb.mxu2 %v12039_v23  ;;  %2993 = vmatpush.bf16.msrb.mxu3 %v12040_v48  ;;  %v12092_v23 = vld [vmem:[#allocation161_spill] sm:$0xff]  ;;  %v12093_v48 = vld [vmem:[#allocation166_spill] sm:$0xff] }
 0x6da   :  { %2953 = vmatpush.bf16.msrb.mxu0 %v12037_v8  ;;  %2966 = vmatpush.bf16.msrb.mxu1 %v12038_v10  ;;  %v12090_v8 = vld [vmem:[#allocation163_spill] sm:$0xff]  ;;  %v12091_v10 = vld [vmem:[#allocation150_spill] sm:$0xff] }
 0x6dd   :  { %2981 = vmatpush.bf16.msrb.mxu2 %v12043_v33  ;;  %2994 = vmatpush.bf16.msrb.mxu3 %v12044_v62  ;;  %v12096_v33 = vld [vmem:[#allocation165_spill] sm:$0xff]  ;;  %v12097_v62 = vld [vmem:[#allocation170_spill] sm:$0xff] }
 0x6de   :  { %2954 = vmatpush.bf16.msrb.mxu0 %v12041_v50  ;;  %2967 = vmatpush.bf16.msrb.mxu1 %v12042_v57  ;;  %v12094_v50 = vld [vmem:[#allocation167_spill] sm:$0xff]  ;;  %v12095_v57 = vld [vmem:[#allocation154_spill] sm:$0xff] }
 0x6e1   :  { %2982 = vmatpush.bf16.msrb.mxu2 %v12047_v16  ;;  %2995 = vmatpush.bf16.msrb.mxu3 %v12048_v2  ;;  %v12100_v16 = vld [vmem:[#allocation169_spill] sm:$0xff]  ;;  %v12101_v2 = vld [vmem:[#allocation174_spill] sm:$0xff] }
 0x6e2   :  { %2955 = vmatpush.bf16.msrb.mxu0 %v12045_v17  ;;  %2968 = vmatpush.bf16.msrb.mxu1 %v12046_v22  ;;  %v12098_v17 = vld [vmem:[#allocation171_spill] sm:$0xff]  ;;  %v12099_v22 = vld [vmem:[#allocation160_spill] sm:$0xff] }
 0x6e4   :  { %2983 = vmatmul.bf16.vlgmr.msrb.gmra.mxu2 %v10272_v55  ;;  %2996 = vmatmul.bf16.vlgmr.msrb.gmra.mxu3 %v10276_v4 }
 0x6e5   :  { %3027 = vmatpush.bf16.msra.mxu2 %v12049_v26  ;;  %3040 = vmatpush.bf16.msra.mxu3 %v12050_v28  ;;  %v12102_v26 = vld [vmem:[#allocation175_spill] sm:$0xff]  ;;  %v12103_v28 = vld [vmem:[#allocation164_spill] sm:$0xff] }
 0x6e6   :  { %2956 = vmatpush.bf16.msrb.mxu0 %v12051_v63  ;;  %2969 = vmatpush.bf16.msrb.mxu1 %v12052_v0  ;;  %v12104_v63 = vld [vmem:[#allocation173_spill] sm:$0xff] }
 0x6e7   :  { %v12105_v0 = vld [vmem:[#allocation177_spill] sm:$0xff] }
 0x6e9   :  { %3028 = vmatpush.bf16.msra.mxu2 %v12055_v52  ;;  %3041 = vmatpush.bf16.msra.mxu3 %v12056_v41  ;;  %v12108_v52 = vld [vmem:[#allocation176_spill] sm:$0xff] }
 0x6ea   :  { %3001 = vmatpush.bf16.msra.mxu0 %v12053_v49  ;;  %3014 = vmatpush.bf16.msra.mxu1 %v12054_v1  ;;  %v12106_v49 = vld [vmem:[#allocation178_spill] sm:$0xff]  ;;  %v12107_v1 = vld [vmem:[#allocation168_spill] sm:$0xff] }
 0x6eb   :  { %2957 = vmatmul.bf16.vlgmr.msrb.gmra.mxu0 %v10286_v53  ;;  %2970 = vmatmul.bf16.vlgmr.msrb.gmra.mxu1 %v10290_v59  ;;  %v12109_v41 = vld [vmem:[#allocation180_spill] sm:$0xff] }
 0x6ed   :  { %3029 = vmatpush.bf16.msra.mxu2 %v12059_v21  ;;  %3042 = vmatpush.bf16.msra.mxu3 %v12060_v19  ;;  %v12112_v21 = vld [vmem:[#allocation179_spill] sm:$0xff]  ;;  %v12113_v19 = vld [vmem:[#allocation182_spill] sm:$0xff] }
 0x6ee   :  { %3002 = vmatpush.bf16.msra.mxu0 %v12057_v39  ;;  %3015 = vmatpush.bf16.msra.mxu1 %v12058_v56  ;;  %v12110_v39 = vld [vmem:[#allocation181_spill] sm:$0xff]  ;;  %v12111_v56 = vld [vmem:[#allocation172_spill] sm:$0xff] }
 0x6f1   :  { %3030 = vmatpush.bf16.msra.mxu2 %v12063_v3  ;;  %3043 = vmatpush.bf16.msra.mxu3 %v12064_v24  ;;  %v10398_v24 = vstv %s6349_s2 }
 0x6f2   :  { %3003 = vmatpush.bf16.msra.mxu0 %v12061_v9  ;;  %3016 = vmatpush.bf16.msra.mxu1 %v12062_v14  ;;  %v12114_v9 = vld [vmem:[#allocation183_spill] sm:$0xff]  ;;  %12115 = vst [vmem:[#allocation202_spill] sm:$0xff] %v10398_v24 }
 0x6f5   :  { %3031 = vmatpush.bf16.msra.mxu2 %v12067_v36  ;;  %3044 = vmatpush.bf16.msra.mxu3 %v12068_v35 }
 0x6f6   :  { %3004 = vmatpush.bf16.msra.mxu0 %v12065_v44  ;;  %3017 = vmatpush.bf16.msra.mxu1 %v12066_v6 }
 0x6f9   :  { %3032 = vmatpush.bf16.msra.mxu2 %v12071_v40  ;;  %3045 = vmatpush.bf16.msra.mxu3 %v12072_v61 }
 0x6fa   :  { %3005 = vmatpush.bf16.msra.mxu0 %v12069_v29  ;;  %3018 = vmatpush.bf16.msra.mxu1 %v12070_v15  ;;  %v10406_v15 = vstv %s6351_s20 }
 0x6fb   :  { %12117 = vst [vmem:[#allocation204_spill] sm:$0xff] %v10406_v15  ;;  %v3129_v61 = vmul.f32 %v10406_v15, %v10030_v60 }
 0x6fd   :  { %3033 = vmatpush.bf16.msra.mxu2 %v12075_v5  ;;  %3046 = vmatpush.bf16.msra.mxu3 %v12076_v47 }
 0x6fe   :  { %3006 = vmatpush.bf16.msra.mxu0 %v12073_v46  ;;  %3019 = vmatpush.bf16.msra.mxu1 %v12074_v25  ;;  %v3130_v25 = vmul.f32 %v10406_v15, %v10065_v12  ;;  %v10418_v12 = vstv %s6352_s11 }
 0x6ff   :  { %12118 = vst [vmem:[#allocation205_spill] sm:$0xff] %v10418_v12 }
 0x701   :  { %3034 = vmatpush.bf16.msra.mxu2 %v12079_v11  ;;  %3047 = vmatpush.bf16.msra.mxu3 %v12080_v31 }
 0x702   :  { %3007 = vmatpush.bf16.msra.mxu0 %v12077_v34  ;;  %3020 = vmatpush.bf16.msra.mxu1 %v12078_v30 }
 0x704   :  { %3035 = vmatmul.bf16.vlgmr.msra.gmra.mxu2 %v10272_v55  ;;  %3048 = vmatmul.bf16.vlgmr.msra.gmra.mxu3 %v10276_v4 }
 0x705   :  { %3079 = vmatpush.bf16.msrb.mxu2 %v12081_v54  ;;  %3092 = vmatpush.bf16.msrb.mxu3 %v12082_v42 }
 0x706   :  { %3008 = vmatpush.bf16.msra.mxu0 %v12083_v45  ;;  %3021 = vmatpush.bf16.msra.mxu1 %v12084_v43 }
 0x709   :  { %3080 = vmatpush.bf16.msrb.mxu2 %v12087_v38  ;;  %3093 = vmatpush.bf16.msrb.mxu3 %v12088_v58  ;;  %v3127_v58 = vmul.f32 %v10406_v15, %v9964_v13 }
 0x70a   :  { %3053 = vmatpush.bf16.msrb.mxu0 %v12085_v32  ;;  %3066 = vmatpush.bf16.msrb.mxu1 %v12086_v51 }
 0x70b   :  { %3009 = vmatmul.bf16.vlgmr.msra.gmra.mxu0 %v10286_v53  ;;  %3022 = vmatmul.bf16.vlgmr.msra.gmra.mxu1 %v10290_v59 }
 0x70d   :  { %3081 = vmatpush.bf16.msrb.mxu2 %v12091_v10  ;;  %3094 = vmatpush.bf16.msrb.mxu3 %v12092_v23 }
 0x70e   :  { %3054 = vmatpush.bf16.msrb.mxu0 %v12089_v18  ;;  %3067 = vmatpush.bf16.msrb.mxu1 %v12090_v8 }
 0x711   :  { %3082 = vmatpush.bf16.msrb.mxu2 %v12095_v57  ;;  %3095 = vmatpush.bf16.msrb.mxu3 %v12096_v33 }
 0x712   :  { %3055 = vmatpush.bf16.msrb.mxu0 %v12093_v48  ;;  %3068 = vmatpush.bf16.msrb.mxu1 %v12094_v50 }
 0x715   :  { %3083 = vmatpush.bf16.msrb.mxu2 %v12099_v22  ;;  %3096 = vmatpush.bf16.msrb.mxu3 %v12100_v16 }
 0x716   :  { %3056 = vmatpush.bf16.msrb.mxu0 %v12097_v62  ;;  %3069 = vmatpush.bf16.msrb.mxu1 %v12098_v17 }
 0x719   :  { %3084 = vmatpush.bf16.msrb.mxu2 %v12103_v28  ;;  %3097 = vmatpush.bf16.msrb.mxu3 %v12104_v63 }
 0x71a   :  { %3057 = vmatpush.bf16.msrb.mxu0 %v12101_v2  ;;  %3070 = vmatpush.bf16.msrb.mxu1 %v12102_v26 }
 0x71d   :  { %3085 = vmatpush.bf16.msrb.mxu2 %v12107_v1  ;;  %3098 = vmatpush.bf16.msrb.mxu3 %v12108_v52  ;;  %v12119_v1 = vld [vmem:[#allocation196_spill] sm:$0xff] }
 0x71e   :  { %3058 = vmatpush.bf16.msrb.mxu0 %v12105_v0  ;;  %3071 = vmatpush.bf16.msrb.mxu1 %v12106_v49  ;;  %v3128_v49 = vmul.f32 %v10406_v15, %v9993_v20 }
 0x721   :  { %3086 = vmatpush.bf16.msrb.mxu2 %v12111_v56  ;;  %3099 = vmatpush.bf16.msrb.mxu3 %v12112_v21 }
 0x722   :  { %3059 = vmatpush.bf16.msrb.mxu0 %v12109_v41  ;;  %3072 = vmatpush.bf16.msrb.mxu1 %v12110_v39 }
 0x724   :  { %3087 = vmatmul.bf16.vlgmr.msrb.gmra.mxu2 %v10272_v55  ;;  %3100 = vmatmul.bf16.vlgmr.msrb.gmra.mxu3 %v10276_v4  ;;  %v10402_v4 = vstv %s6350_s26 }
 0x725   :  { %12116 = vst [vmem:[#allocation203_spill] sm:$0xff] %v10402_v4 }
 0x726   :  { %3060 = vmatpush.bf16.msrb.mxu0 %v12113_v19  ;;  %3073 = vmatpush.bf16.msrb.mxu1 %v12114_v9 }
 0x727   :  { %v2874_v14 = vpop.f32.mrf.mxu2  ;;  %v2888_v3 = vpop.f32.mrf.mxu3 }
 0x728   :  { %v3113_v44 = vmul.f32 %v10398_v24, %v2874_v14  ;;  %v3114_v55 = vmul.f32 %v10398_v24, %v2888_v3  ;;  %v2860_v29 = vpop.f32.mrf.mxu1  ;;  %v12120_v3 = vld [vmem:[#allocation197_spill] sm:$0xff] }
 0x729   :  { %3061 = vmatmul.bf16.vlgmr.msrb.gmra.mxu0 %v10286_v53  ;;  %3074 = vmatmul.bf16.vlgmr.msrb.gmra.mxu1 %v10290_v59  ;;  %v2846_v59 = vpop.f32.mrf.mxu0 }
 0x72a   :  { %v3111_v54 = vmul.f32 %v10398_v24, %v2846_v59 }
 0x72f   :  { %v2876_v6 = vpop.f32.mrf.mxu2  ;;  %v2890_v36 = vpop.f32.mrf.mxu3 }
 0x730   :  { %v3119_v35 = vmul.f32 %v10402_v4, %v2876_v6  ;;  %v3120_v53 = vmul.f32 %v10402_v4, %v2890_v36  ;;  %v2862_v30 = vpop.f32.mrf.mxu1 }
 0x731   :  { %v2848_v34 = vpop.f32.mrf.mxu0  ;;  %v3118_v22 = vmul.f32 %v10402_v4, %v2862_v30 }
 0x732   :  { %v3123_v40 = vadd.f32 %v3119_v35, %v3113_v44  ;;  %v3124_v46 = vadd.f32 %v3120_v53, %v3114_v55  ;;  %v3117_v42 = vmul.f32 %v10402_v4, %v2848_v34 }
 0x734   :  { %v10412_v5 = vadd.f32 %v3129_v61, %v3123_v40  ;;  %v10414_v47 = vadd.f32 %v3130_v25, %v3124_v46  ;;  %v3121_v51 = vadd.f32 %v3117_v42, %v3111_v54  ;;  %v12121_v40 = vld [vmem:[#allocation198_spill] sm:$0xff]  ;;  %v12122_v54 = vld [vmem:[#allocation199_spill] sm:$0xff] }
 0x736   :  { %v3131_v23 = vadd.f32 %v3127_v58, %v3121_v51 }
 0x747   :  { %v2932_v43 = vpop.f32.mrf.mxu2  ;;  %v2945_v60 = vpop.f32.mrf.mxu3 }
 0x748   :  { %v2906_v11 = vpop.f32.mrf.mxu0  ;;  %v2919_v31 = vpop.f32.mrf.mxu1 }
 0x749   :  { %v2920_v45 = vadd.f32 %v2919_v31, %v2906_v11 }
 0x74b   :  { %v2933_v32 = vadd.f32 %v2932_v43, %v2920_v45 }
 0x74d   :  { %v2946_v38 = vadd.f32 %v2945_v60, %v2933_v32 }
 0x74f   :  { %v3105_v18 = vmul.f32 %v2946_v38, %v9331_v37  ;;  %v2934_v50 = vpop.f32.mrf.mxu2  ;;  %v2947_v57 = vpop.f32.mrf.mxu3 }
 0x750   :  { %v2908_v8 = vpop.f32.mrf.mxu0  ;;  %v2921_v10 = vpop.f32.mrf.mxu1 }
 0x751   :  { %v3137_v48 = vmul.f32 %v10418_v12, %v3105_v18  ;;  %v12123_v18 = vld [vmem:[#allocation201_spill] sm:$0xff] }
 0x753   :  { %v3141_v33 = vadd.f32 %v3137_v48, %v3131_v23 }
 0x755   :  { %v10425_v62 = vadd.f32 %v3141_v33, %v9967_v27  ;;  %v3112_v27 = vmul.f32 %v10398_v24, %v2860_v29 }
 0x757   :  { %v10428_v17 = vmax.f32 %v10425_v62, 0.0  ;;  %v3122_v63 = vadd.f32 %v3118_v22, %v3112_v27 }
 0x759   :  { %3218 = vrot.lane.b32.xlu2 %v10428_v17, %s7928_s30  ;;  %3234 = vrot.lane.b32.xlu0 %v10428_v17, %s7926_s14  ;;  %v3132_v56 = vadd.f32 %v3128_v49, %v3122_v63 }
 0x75a   :  { %3266 = vrot.lane.b32.xlu1 %v10428_v17, %s7925_s6 }
 0x762   :  { %3250 = vrot.lane.b32.xlu1 %v10428_v17, %s7927_s23 }
 0x767   :  { %v2984_v2 = vpop.f32.mrf.mxu2  ;;  %v2997_v26 = vpop.f32.mrf.mxu3 }
 0x768   :  { %v2958_v37 = vpop.f32.mrf.mxu0  ;;  %v2971_v13 = vpop.f32.mrf.mxu1 }
 0x769   :  { %v2972_v16 = vadd.f32 %v2971_v13, %v2958_v37  ;;  %v12124_v37 = vld [vmem:[#allocation200_spill] sm:$0xff] }
 0x76b   :  { %v2985_v28 = vadd.f32 %v2984_v2, %v2972_v16 }
 0x76d   :  { %v2998_v0 = vadd.f32 %v2997_v26, %v2985_v28 }
 0x76f   :  { %v3106_v52 = vmul.f32 %v2998_v0, %v12119_v1  ;;  %v2986_v19 = vpop.f32.mrf.mxu2  ;;  %v2999_v9 = vpop.f32.mrf.mxu3  ;;  %v7342_v1 = vld [vmem:[%s11689_s3 + $0x100] sm:$0xff] }
 0x770   :  { %v2960_v41 = vpop.f32.mrf.mxu0  ;;  %v2973_v39 = vpop.f32.mrf.mxu1  ;;  %v7343_v9 = vld [vmem:[%s11689_s3 + $0x108] sm:$0xff] }
 0x771   :  { %v3138_v21 = vmul.f32 %v10418_v12, %v3106_v52 }
 0x773   :  { %v3142_v14 = vadd.f32 %v3138_v21, %v3132_v56 }
 0x775   :  { %v10445_v44 = vadd.f32 %v3142_v14, %v12120_v3 }
 0x777   :  { %v10448_v55 = vmax.f32 %v10445_v44, 0.0 }
 0x779   :  { %3204 = vrot.lane.b32.xlu2 %v10448_v55, %s7930_s12  ;;  %3188 = vrot.lane.b32.xlu0 %v10448_v55, %s7929_s28 }
 0x77a   :  { %3268 = vrot.lane.b32.xlu1 %v10448_v55, %s7925_s6 }
 0x781   :  { %3156 = vrot.lane.b32.xlu2 %v10448_v55, %s7931_s1  ;;  %3236 = vrot.lane.b32.xlu0 %v10448_v55, %s7926_s14 }
 0x782   :  { %3252 = vrot.lane.b32.xlu1 %v10448_v55, %s7927_s23 }
 0x787   :  { %v3036_v35 = vpop.f32.mrf.mxu2  ;;  %v3049_v53 = vpop.f32.mrf.mxu3 }
 0x788   :  { %v3010_v20 = vpop.f32.mrf.mxu0  ;;  %v3023_v6 = vpop.f32.mrf.mxu1 }
 0x789   :  { %v3024_v36 = vadd.f32 %v3023_v6, %v3010_v20  ;;  %v7344_v6 = vld [vmem:[%s11689_s3 + $0xc0] sm:$0xff] }
 0x78a   :  { %3172 = vrot.lane.b32.xlu1 %v10448_v55, %s7915_s25 }
 0x78b   :  { %v3037_v59 = vadd.f32 %v3036_v35, %v3024_v36 }
 0x78d   :  { %v3050_v29 = vadd.f32 %v3049_v53, %v3037_v59  ;;  %v7345_v59 = vld [vmem:[%s11689_s3 + $0xe0] sm:$0xff] }
 0x78f   :  { %v3107_v61 = vmul.f32 %v3050_v29, %v12121_v40  ;;  %v3038_v30 = vpop.f32.mrf.mxu2  ;;  %v3051_v11 = vpop.f32.mrf.mxu3 }
 0x790   :  { %v3012_v46 = vpop.f32.mrf.mxu0  ;;  %v3025_v25 = vpop.f32.mrf.mxu1 }
 0x791   :  { %v3139_v34 = vmul.f32 %v10418_v12, %v3107_v61 }
 0x793   :  { %v3143_v31 = vadd.f32 %v3139_v34, %v10412_v5 }
 0x795   :  { %v10468_v42 = vadd.f32 %v3143_v31, %v12122_v54 }
 0x797   :  { %v10471_v45 = vmax.f32 %v10468_v42, 0.0 }
 0x799   :  { %3206 = vrot.lane.b32.xlu0 %v10471_v45, %s7930_s12  ;;  %3254 = vrot.lane.b32.xlu1 %v10471_v45, %s7927_s23 }
 0x79a   :  { %3270 = vrot.lane.b32.xlu2 %v10471_v45, %s7925_s6 }
 0x7a1   :  { %3158 = vrot.lane.b32.xlu0 %v10471_v45, %s7931_s1  ;;  %3190 = vrot.lane.b32.xlu1 %v10471_v45, %s7929_s28 }
 0x7a2   :  { %3238 = vrot.lane.b32.xlu2 %v10471_v45, %s7926_s14 }
 0x7a6   :  { %v3062_v5 = vpop.f32.mrf.mxu0  ;;  %v3075_v43 = vpop.f32.mrf.mxu1 }
 0x7a7   :  { %v3076_v60 = vadd.f32 %v3075_v43, %v3062_v5  ;;  %v3088_v32 = vpop.f32.mrf.mxu2  ;;  %v3101_v51 = vpop.f32.mrf.mxu3  ;;  %v7346_v5 = vld [vmem:[%s11689_s3 + $0xc8] sm:$0xff] }
 0x7a9   :  { %v3089_v38 = vadd.f32 %v3088_v32, %v3076_v60  ;;  %v7347_v60 = vld [vmem:[%s11689_s3 + $0xe8] sm:$0xff] }
 0x7aa   :  { %3222 = vrot.lane.b32.xlu2 %v10471_v45, %s7928_s30 }
 0x7ab   :  { %v3102_v58 = vadd.f32 %v3101_v51, %v3089_v38 }
 0x7ad   :  { %v3108_v8 = vmul.f32 %v3102_v58, %v12123_v18 }
 0x7ae   :  { %v3064_v10 = vpop.f32.mrf.mxu0  ;;  %v3077_v23 = vpop.f32.mrf.mxu1 }
 0x7af   :  { %v3140_v48 = vmul.f32 %v10418_v12, %v3108_v8  ;;  %v3090_v50 = vpop.f32.mrf.mxu2  ;;  %v3103_v57 = vpop.f32.mrf.mxu3 }
 0x7b0   :  { %v7348_v57 = vld [vmem:[%s11689_s3 + $0xa0] sm:$0xff] }
 0x7b1   :  { %v3144_v33 = vadd.f32 %v3140_v48, %v10414_v47 }
 0x7b2   :  { %3174 = vrot.lane.b32.xlu2 %v10471_v45, %s7915_s25 }
 0x7b3   :  { %v10493_v13 = vadd.f32 %v3144_v33, %v12124_v37  ;;  %v10522_v47 = vpop.permute.xlu2 %3218  ;;  %v7349_v37 = vld [vmem:[%s11689_s3 + $0xa8] sm:$0xff] }
 0x7b5   :  { %v10496_v27 = vmax.f32 %v10493_v13, 0.0 }
 0x7b7   :  { %3192 = vrot.lane.b32.xlu1 %v10496_v27, %s7929_s28  ;;  %3272 = vrot.lane.b32.xlu0 %v10496_v27, %s7925_s6  ;;  %s7932_s6 = smov 120  }
 0x7ba   :  { %3256 = vrot.lane.b32.xlu2 %v10496_v27, %s7927_s23  ;;  %s7934_s23 = smov 119  }
 0x7bf   :  { %3176 = vrot.lane.b32.xlu1 %v10496_v27, %s7915_s25  ;;  %3240 = vrot.lane.b32.xlu0 %v10496_v27, %s7926_s14  ;;  %s7933_s14 = smov 121  }
 0x7c2   :  { %3208 = vrot.lane.b32.xlu2 %v10496_v27, %s7930_s12 }
 0x7c7   :  { %3202 = vrot.lane.b32.xlu1 %v10428_v17, %s7930_s12  ;;  %3224 = vrot.lane.b32.xlu0 %v10496_v27, %s7928_s30 }
 0x7ca   :  { %3220 = vrot.lane.b32.xlu2 %v10448_v55, %s7928_s30 }
 0x7cb   :  { %v10528_v2 = vpop.permute.xlu0 %3234 }
 0x7cc   :  { %v3267_v22 = vpop.permute.xlu1 %3266 }
 0x7cf   :  { %3186 = vrot.lane.b32.xlu0 %v10428_v17, %s7929_s28  ;;  %s7935_s28 = smov 7  }
 0x7d2   :  { %3154 = vrot.lane.b32.xlu2 %v10428_v17, %s7931_s1 }
 0x7d3   :  { %v10526_v16 = vpop.permute.xlu2 %3204 }
 0x7d4   :  { %v10530_v26 = vpop.permute.xlu1 %3250 }
 0x7d7   :  { %3160 = vrot.lane.b32.xlu0 %v10496_v27, %s7931_s1  ;;  %s12126_s1 = sld [smem:[#allocation60_spill]] }
 0x7db   :  { %v10532_v28 = vpop.permute.xlu2 %3156 }
 0x7df   :  { %3170 = vrot.lane.b32.xlu0 %v10428_v17, %s7915_s25  ;;  %s12125_s25 = sld [smem:[#allocation46_spill]] }
 0x7eb   :  { %v10534_v63 = vpop.permute.xlu0 %3188 }
 0x7ec   :  { %v3269_v0 = vpop.permute.xlu1 %3268 }
 0x7ed   :  { %v3276_v49 = vsel %vm617_vm0, %v3267_v22, %v3269_v0 }
 0x7ee   :  { %v3278_v52 = vmul.f32 %v7342_v1, %v3276_v49 }
 0x7f0   :  { %v3298_v41 = vpack.c.bf16 %v3278_v52, %v3278_v52 }
 0x7f2   :  { %v3306_v56 = vsel %vm650_vm1, %v3298_v41, 0 }
 0x7f3   :  { %3320 = vmatpush.bf16.msra.mxu0 %v3306_v56  ;;  %v3237_v19 = vpop.permute.xlu0 %3236 }
 0x7f4   :  { %v3271_v39 = vpop.permute.xlu2 %3270  ;;  %v3244_v3 = vsel %vm573_vm2, %v10528_v2, %v3237_v19  ;;  %v3253_v20 = vpop.permute.xlu1 %3252 }
 0x7f5   :  { %v3275_v21 = vsel %vm617_vm0, %v3269_v0, %v3271_v39  ;;  %v3246_v36 = vmul.f32 %v7344_v6, %v3244_v3  ;;  %v3260_v35 = vsel %vm595_vm3, %v10530_v26, %v3253_v20 }
 0x7f6   :  { %v3279_v14 = vmul.f32 %v7343_v9, %v3275_v21  ;;  %v3262_v29 = vmul.f32 %v7345_v59, %v3260_v35 }
 0x7f8   :  { %v3299_v53 = vpack.c.bf16 %v3279_v14, %v3279_v14  ;;  %v3294_v61 = vpack.c.bf16 %v3262_v29, %v3246_v36  ;;  %v7351_v14 = vld [vmem:[%s11689_s3 + $0x118] sm:$0xff]  ;;  %v7352_v29 = vld [vmem:[%s11689_s3 + $0xf0] sm:$0xff] }
 0x7fa   :  { %v3309_v40 = vsel %vm650_vm1, %v3299_v53, 0  ;;  %3321 = vmatpush.bf16.msra.mxu0 %v3294_v61  ;;  %v7353_v61 = vld [vmem:[%s11689_s3 + $0xf8] sm:$0xff] }
 0x7fb   :  { %3333 = vmatpush.bf16.msra.mxu1 %v3309_v40 }
 0x7fc   :  { %v3239_v46 = vpop.permute.xlu2 %3238  ;;  %v10552_v25 = vpop.permute.xlu1 %3172 }
 0x7fd   :  { %v3243_v30 = vsel %vm573_vm2, %v3237_v19, %v3239_v46  ;;  %v7350_v19 = vld [vmem:[%s11689_s3 + $0x110] sm:$0xff] }
 0x7fe   :  { %v3247_v43 = vmul.f32 %v7346_v5, %v3243_v30 }
 0x804   :  { %v10554_v34 = vpop.permute.xlu2 %3222 }
 0x80b   :  { %v3255_v11 = vpop.permute.xlu1 %3254  ;;  %v3207_v58 = vpop.permute.xlu0 %3206 }
 0x80c   :  { %v3259_v31 = vsel %vm595_vm3, %v3253_v20, %v3255_v11  ;;  %v10560_v54 = vpop.permute.xlu2 %3174 }
 0x80d   :  { %v3263_v32 = vmul.f32 %v7347_v60, %v3259_v31  ;;  %v7355_v31 = vld [vmem:[%s11689_s3 + $0xd8] sm:$0xff] }
 0x80f   :  { %v3295_v51 = vpack.c.bf16 %v3263_v32, %v3247_v43 }
 0x811   :  { %3334 = vmatpush.bf16.msra.mxu1 %v3295_v51 }
 0x813   :  { %v10566_v8 = vpop.permute.xlu0 %3158  ;;  %v3191_v10 = vpop.permute.xlu1 %3190 }
 0x814   :  { %v3257_v38 = vpop.permute.xlu2 %3256 }
 0x81c   :  { %v10564_v18 = vpop.permute.xlu2 %3208 }
 0x824   :  { %v3221_v23 = vpop.permute.xlu2 %3220 }
 0x825   :  { %v3227_v48 = vsel %vm551_vm4, %v3221_v23, %v10554_v34  ;;  %v3228_v50 = vsel %vm551_vm4, %v10522_v47, %v3221_v23  ;;  %v3211_v23 = vsel %vm529_vm6, %v10526_v16, %v3207_v58 }
 0x826   :  { %v3230_v33 = vmul.f32 %v7348_v57, %v3228_v50  ;;  %v3231_v0 = vmul.f32 %v7349_v37, %v3227_v48  ;;  %v7356_v48 = vld [vmem:[%s11689_s3 + $0xb0] sm:$0xff]  ;;  %v7357_v57 = vld [vmem:[%s11689_s3 + $0xb8] sm:$0xff] }
 0x828   :  { %v3290_v49 = vpack.c.bf16 %v3230_v33, %v10428_v17  ;;  %v3291_v1 = vpack.c.bf16 %v3231_v0, %v10448_v55  ;;  %v7358_v0 = vld [vmem:[%s11689_s3 + $0x50] sm:$0xff] }
 0x829   :  { %v10578_v52 = vpop.permute.xlu1 %3192  ;;  %v3273_v41 = vpop.permute.xlu0 %3272 }
 0x82a   :  { %v3274_v56 = vsel %vm617_vm0, %v3271_v39, %v3273_v41  ;;  %v3277_v21 = vsel %vm617_vm0, %v3273_v41, %v3267_v22  ;;  %3322 = vmatpush.bf16.msra.mxu0 %v3290_v49  ;;  %3335 = vmatpush.bf16.msra.mxu1 %v3291_v1  ;;  %v3258_v39 = vsel %vm595_vm3, %v3255_v11, %v3257_v38  ;;  %v7354_v11 = vld [vmem:[%s11689_s3 + $0xd0] sm:$0xff]  ;;  %v7359_v49 = vld [vmem:[%s11689_s3 + $0x58] sm:$0xff] }
 0x82b   :  { %v3280_v9 = vmul.f32 %v7350_v19, %v3274_v56  ;;  %v3281_v3 = vmul.f32 %v7351_v14, %v3277_v21  ;;  %v3261_v22 = vsel %vm595_vm3, %v3257_v38, %v10530_v26  ;;  %v3264_v40 = vmul.f32 %v7352_v29, %v3258_v39  ;;  %v7360_v56 = vld [vmem:[%s11689_s3 + $0x70] sm:$0xff] }
 0x82c   :  { %v3265_v30 = vmul.f32 %v7353_v61, %v3261_v22  ;;  %v3194_v32 = vsel %vm507_vm5, %v3191_v10, %v10578_v52  ;;  %v3216_v21 = vmul.f32 %v7360_v56, %v3211_v23  ;;  %v3163_v19 = vsel %vm463_vm7, %v10532_v28, %v10566_v8  ;;  %v7372_v56 = vld [vmem:[%s11689_s3 + $0x20] sm:$0xff] }
 0x82d   :  { %v3300_v17 = vpack.c.bf16 %v3280_v9, %v3280_v9  ;;  %v3301_v55 = vpack.c.bf16 %v3281_v3, %v3281_v3  ;;  %v3201_v1 = vmul.f32 %v7359_v49, %v3194_v32  ;;  %v7361_v9 = vld [vmem:[%s11689_s3 + $0x78] sm:$0xff] }
 0x82e   :  { %v7368_v32 = vld [vmem:[%s11689_s3 + $0x38] sm:$0xff] }
 0x82f   :  { %v3312_v20 = vsel %vm650_vm1, %v3300_v17, 0  ;;  %v3315_v6 = vsel %vm650_vm1, %v3301_v55, 0 }
 0x830   :  { %3346 = vmatpush.bf16.msra.mxu2 %v3312_v20  ;;  %3359 = vmatpush.bf16.msra.mxu3 %v3315_v6  ;;  %v7362_v20 = vld [vmem:[%s11689_s3 + $0x10] sm:$0xff] }
 0x831   :  { %v3241_v36 = vpop.permute.xlu0 %3240  ;;  %v10593_v35 = vpop.permute.xlu1 %3176  ;;  %v3168_v6 = vmul.f32 %v7362_v20, %v3163_v19  ;;  %v7373_v19 = vld [vmem:[%s11689_s3 + $0x28] sm:$0xff]  ;;  %v7094_v20 = vld [vmem:[#allocation12 + $0x28] sm:$0xff] }
 0x832   :  { %v3242_v53 = vsel %vm573_vm2, %v3239_v46, %v3241_v36  ;;  %v3245_v59 = vsel %vm573_vm2, %v3241_v36, %v10528_v2  ;;  %v3195_v2 = vsel %vm507_vm5, %v10534_v63, %v3191_v10  ;;  %v3210_v10 = vsel %vm529_vm6, %v3207_v58, %v10564_v18  ;;  %v7364_v36 = vld [vmem:[%s11689_s3 + $0x68] sm:$0xff] }
 0x833   :  { %v3248_v26 = vmul.f32 %v7354_v11, %v3242_v53  ;;  %v3249_v5 = vmul.f32 %v7355_v31, %v3245_v59  ;;  %v3217_v58 = vmul.f32 %v7361_v9, %v3210_v10  ;;  %v7365_v59 = vld [vmem:[%s11689_s3 + $0x40] sm:$0xff] }
 0x834   :  { %v7119_v10 = vld [vmem:[#allocation12 + $0xf0] sm:$0xff] }
 0x835   :  { %v3296_v43 = vpack.c.bf16 %v3264_v40, %v3248_v26  ;;  %v3297_v60 = vpack.c.bf16 %v3265_v30, %v3249_v5  ;;  %v3289_v55 = vpack.c.bf16 %v3217_v58, %v3201_v1  ;;  %v7366_v40 = vld [vmem:[%s11689_s3 + $0x48] sm:$0xff]  ;;  %v7367_v30 = vld [vmem:[%s11689_s3 + $0x30] sm:$0xff] }
 0x836   :  { %v7096_v58 = vld [vmem:[#allocation12 + $0x38] sm:$0xff] }
 0x837   :  { %3347 = vmatpush.bf16.msra.mxu2 %v3296_v43  ;;  %3360 = vmatpush.bf16.msra.mxu3 %v3297_v60  ;;  %v3149_v43 = vld [vmem:[%s12125_s25] sm:$0xf] }
 0x839   :  { %v3225_v46 = vpop.permute.xlu0 %3224  ;;  %v3203_v37 = vpop.permute.xlu1 %3202 }
 0x83a   :  { %v3226_v51 = vsel %vm551_vm4, %v10554_v34, %v3225_v46  ;;  %v3229_v38 = vsel %vm551_vm4, %v3225_v46, %v10522_v47  ;;  %v3200_v34 = vmul.f32 %v7358_v0, %v3195_v2  ;;  %v3213_v14 = vsel %vm529_vm6, %v10564_v18, %v3203_v37  ;;  %v7363_v18 = vld [vmem:[%s11689_s3 + $0x60] sm:$0xff]  ;;  %v7109_v0 = vld [vmem:[#allocation12 + $0xa0] sm:$0xff] }
 0x83b   :  { %v3232_v50 = vmul.f32 %v7356_v48, %v3226_v51  ;;  %v3233_v33 = vmul.f32 %v7357_v57, %v3229_v38  ;;  %v3214_v39 = vmul.f32 %v7363_v18, %v3213_v14  ;;  %v7111_v46 = vld [vmem:[#allocation12 + $0xb0] sm:$0xff]  ;;  %v7369_v38 = vld [vmem:[%s11689_s3 + $0x18] sm:$0xff]  ;;  %v7120_v48 = vld [vmem:[#allocation12 + $0xf8] sm:$0xff] }
 0x83c   :  { %v3288_v17 = vpack.c.bf16 %v3216_v21, %v3200_v34  ;;  %v7104_v14 = vld [vmem:[#allocation12 + $0x78] sm:$0xff]  ;;  %v7106_v18 = vld [vmem:[#allocation12 + $0x88] sm:$0xff] }
 0x83d   :  { %v3292_v47 = vpack.c.bf16 %v3232_v50, %v10471_v45  ;;  %v3293_v41 = vpack.c.bf16 %v3233_v33, %v10496_v27  ;;  %v3212_v45 = vsel %vm529_vm6, %v3203_v37, %v10526_v16  ;;  %v3179_v27 = vsel %vm485_vm8, %v10552_v25, %v10560_v54  ;;  %v3155_v50 = vpop.permute.xlu2 %3154 }
 0x83e   :  { %v3215_v53 = vmul.f32 %v7364_v36, %v3212_v45  ;;  %v3184_v11 = vmul.f32 %v7367_v30, %v3179_v27  ;;  %v3164_v33 = vsel %vm463_vm7, %v3155_v50, %v10532_v28  ;;  %v7370_v28 = vld [vmem:[%s11689_s3 + $0x8] sm:$0xff]  ;;  %v7105_v36 = vld [vmem:[#allocation12 + $0x80] sm:$0xff]  ;;  %v7143_v30 = vld [vmem:[#allocation11 + $0xb0] sm:$0xff] }
 0x83f   :  { %3348 = vmatpush.bf16.msra.mxu2 %v3292_v47  ;;  %3361 = vmatpush.bf16.msra.mxu3 %v3293_v41  ;;  %v3167_v1 = vmul.f32 %v7370_v28, %v3164_v33  ;;  %v7371_v47 = vld [vmem:[%s11689_s3] sm:$0xff]  ;;  %v7134_v33 = vld [vmem:[#allocation11 + $0x68] sm:$0xff]  ;;  %v7124_v28 = vld [vmem:[#allocation11 + $0x18] sm:$0xff]  ;;  %s7936_s3 = smov 9  }
 0x840   :  { %v3284_v5 = vpack.c.bf16 %v3184_v11, %v3168_v6  ;;  %v7102_v6 = vld [vmem:[#allocation12 + $0x68] sm:$0xff]  ;;  %v7091_v11 = vld [vmem:[#allocation12 + $0x10] sm:$0xff] }
 0x841   :  { %v3187_v3 = vpop.permute.xlu0 %3186 }
 0x842   :  { %v3196_v22 = vsel %vm507_vm5, %v3187_v3, %v10534_v63  ;;  %v3197_v16 = vsel %vm507_vm5, %v10578_v52, %v3187_v3  ;;  %v7112_v63 = vld [vmem:[#allocation12 + $0xb8] sm:$0xff]  ;;  %v3178_v52 = vsel %vm485_vm8, %v10560_v54, %v10593_v35  ;;  %v7110_v54 = vld [vmem:[#allocation12 + $0xa8] sm:$0xff] }
 0x843   :  { %v3198_v29 = vmul.f32 %v7365_v59, %v3197_v16  ;;  %v3199_v61 = vmul.f32 %v7366_v40, %v3196_v22  ;;  %3349 = vmatpush.bf16.msra.mxu2 %v3288_v17  ;;  %3362 = vmatpush.bf16.msra.mxu3 %v3289_v55  ;;  %v3185_v51 = vmul.f32 %v7368_v32, %v3178_v52  ;;  %v7118_v3 = vld [vmem:[#allocation12 + $0xe8] sm:$0xff]  ;;  %v7107_v17 = vld [vmem:[#allocation12 + $0x90] sm:$0xff]  ;;  %v7117_v55 = vld [vmem:[#allocation12 + $0xe0] sm:$0xff] }
 0x844   :  { %v7093_v22 = vld [vmem:[#allocation12 + $0x20] sm:$0xff]  ;;  %v7144_v59 = vld [vmem:[#allocation11 + $0xb8] sm:$0xff]  ;;  %v7090_v52 = vld [vmem:[#allocation12 + $0x8] sm:$0xff] }
 0x845   :  { %v3286_v26 = vpack.c.bf16 %v3214_v39, %v3198_v29  ;;  %v3287_v31 = vpack.c.bf16 %v3215_v53, %v3199_v61  ;;  %v7116_v39 = vld [vmem:[#allocation12 + $0xd8] sm:$0xff]  ;;  %v7101_v16 = vld [vmem:[#allocation12 + $0x60] sm:$0xff]  ;;  %v7115_v53 = vld [vmem:[#allocation12 + $0xd0] sm:$0xff] }
 0x846   :  { %v7092_v29 = vld [vmem:[#allocation12 + $0x18] sm:$0xff]  ;;  %v7114_v61 = vld [vmem:[#allocation12 + $0xc8] sm:$0xff] }
 0x847   :  { %3323 = vmatpush.bf16.msra.mxu0 %v3286_v26  ;;  %3336 = vmatpush.bf16.msra.mxu1 %v3287_v31  ;;  %v7100_v40 = vld [vmem:[#allocation12 + $0x58] sm:$0xff]  ;;  %v7099_v26 = vld [vmem:[#allocation12 + $0x50] sm:$0xff]  ;;  %v7113_v31 = vld [vmem:[#allocation12 + $0xc0] sm:$0xff] }
 0x848   :  { %3350 = vmatpush.bf16.msra.mxu2 %v3284_v5  ;;  %v7152_v5 = vld [vmem:[#allocation11 + $0xf8] sm:$0xff] }
 0x849   :  { %v3161_v60 = vpop.permute.xlu0 %3160  ;;  %v7136_v32 = vld [vmem:[#allocation11 + $0x78] sm:$0xff] }
 0x84a   :  { %v3162_v2 = vsel %vm463_vm7, %v10566_v8, %v3161_v60  ;;  %v3165_v8 = vsel %vm463_vm7, %v3161_v60, %v3155_v50  ;;  %v7089_v60 = vld [vmem:[#allocation12] sm:$0xff]  ;;  %v7140_v50 = vld [vmem:[#allocation11 + $0x98] sm:$0xff] }
 0x84b   :  { %v3169_v23 = vmul.f32 %v7369_v38, %v3162_v2  ;;  %6355 = vmatmul.msk.bf16.vlgmr.msra.gmra.mxu2 %vm646_vm9, %v3149_v43  ;;  %v3166_v41 = vmul.f32 %v7371_v47, %v3165_v8  ;;  %v7128_v2 = vld [vmem:[#allocation11 + $0x38] sm:$0xff]  ;;  %v7151_v38 = vld [vmem:[#allocation11 + $0xf0] sm:$0xff]  ;;  %v7137_v47 = vld [vmem:[#allocation11 + $0x80] sm:$0xff] }
 0x84c   :  { %3655 = vmatpush.bf16.msrb.mxu2 %v7112_v63  ;;  %v7142_v63 = vld [vmem:[#allocation11 + $0xa8] sm:$0xff]  ;;  %v7139_v8 = vld [vmem:[#allocation11 + $0x90] sm:$0xff] }
 0x84d   :  { %v3285_v57 = vpack.c.bf16 %v3185_v51, %v3169_v23  ;;  %v7141_v51 = vld [vmem:[#allocation11 + $0xa0] sm:$0xff]  ;;  %v7127_v23 = vld [vmem:[#allocation11 + $0x30] sm:$0xff] }
 0x84f   :  { %3363 = vmatpush.bf16.msra.mxu3 %v3285_v57  ;;  %v7150_v57 = vld [vmem:[#allocation11 + $0xe8] sm:$0xff] }
 0x850   :  { %3656 = vmatpush.bf16.msrb.mxu2 %v7111_v46  ;;  %v7097_v46 = vld [vmem:[#allocation12 + $0x40] sm:$0xff] }
 0x851   :  { %v3171_v37 = vpop.permute.xlu0 %3170 }
 0x852   :  { %v3180_v34 = vsel %vm485_vm8, %v3171_v37, %v10552_v25  ;;  %v3181_v49 = vsel %vm485_vm8, %v10593_v35, %v3171_v37  ;;  %6356 = vmatmul.msk.bf16.vlgmr.msra.gmra.mxu3 %vm646_vm9, %v3149_v43  ;;  %v7108_v25 = vld [vmem:[#allocation12 + $0x98] sm:$0xff]  ;;  %v7103_v35 = vld [vmem:[#allocation12 + $0x70] sm:$0xff]  ;;  %v7125_v37 = vld [vmem:[#allocation11 + $0x20] sm:$0xff] }
 0x853   :  { %3668 = vmatpush.bf16.msrb.mxu3 %v7120_v48  ;;  %v3182_v21 = vmul.f32 %v7372_v56, %v3181_v49  ;;  %v3183_v9 = vmul.f32 %v7373_v19, %v3180_v34  ;;  %v7135_v48 = vld [vmem:[#allocation11 + $0x70] sm:$0xff]  ;;  %v7138_v34 = vld [vmem:[#allocation11 + $0x88] sm:$0xff]  ;;  %v7148_v49 = vld [vmem:[#allocation11 + $0xd8] sm:$0xff] }
 0x854   :  { %3657 = vmatpush.bf16.msrb.mxu2 %v7110_v54  ;;  %v7126_v54 = vld [vmem:[#allocation11 + $0x28] sm:$0xff]  ;;  %v7123_v56 = vld [vmem:[#allocation11 + $0x10] sm:$0xff] }
 0x855   :  { %v3282_v45 = vpack.c.bf16 %v3182_v21, %v3166_v41  ;;  %v3283_v27 = vpack.c.bf16 %v3183_v9, %v3167_v1  ;;  %v7132_v1 = vld [vmem:[#allocation11 + $0x58] sm:$0xff]  ;;  %v7147_v41 = vld [vmem:[#allocation11 + $0xd0] sm:$0xff]  ;;  %v7146_v19 = vld [vmem:[#allocation11 + $0xc8] sm:$0xff] }
 0x856   :  { %v7131_v21 = vld [vmem:[#allocation11 + $0x50] sm:$0xff]  ;;  %v7122_v9 = vld [vmem:[#allocation11 + $0x8] sm:$0xff] }
 0x857   :  { %3669 = vmatpush.bf16.msrb.mxu3 %v7119_v10  ;;  %3324 = vmatpush.bf16.msra.mxu0 %v3282_v45  ;;  %v7149_v10 = vld [vmem:[#allocation11 + $0xe0] sm:$0xff] }
 0x858   :  { %3658 = vmatpush.bf16.msrb.mxu2 %v7109_v0  ;;  %3337 = vmatpush.bf16.msra.mxu1 %v3283_v27  ;;  %v7133_v0 = vld [vmem:[#allocation11 + $0x60] sm:$0xff] }
 0x859   :  { %v7121_v45 = vld [vmem:[#allocation11] sm:$0xff] }
 0x85a   :  { %6353 = vmatmul.msk.bf16.vlgmr.msra.gmra.mxu0 %vm646_vm9, %v3149_v43  ;;  %v7129_v27 = vld [vmem:[#allocation11 + $0x40] sm:$0xff] }
 0x85b   :  { %3629 = vmatpush.bf16.msrb.mxu0 %v7096_v58  ;;  %3670 = vmatpush.bf16.msrb.mxu3 %v7118_v3  ;;  %v7130_v58 = vld [vmem:[#allocation11 + $0x48] sm:$0xff] }
 0x85c   :  { %3642 = vmatpush.bf16.msrb.mxu1 %v7104_v14  ;;  %3659 = vmatpush.bf16.msrb.mxu2 %v7108_v25  ;;  %v7145_v14 = vld [vmem:[#allocation11 + $0xc0] sm:$0xff] }
 0x85d   :  { %6354 = vmatmul.msk.bf16.vlgmr.msra.gmra.mxu1 %vm646_vm9, %v3149_v43  ;;  %v7098_v43 = vld [vmem:[#allocation12 + $0x48] sm:$0xff] }
 0x85f   :  { %3630 = vmatpush.bf16.msrb.mxu0 %v7095_v7  ;;  %3671 = vmatpush.bf16.msrb.mxu3 %v7117_v55 }
 0x860   :  { %3643 = vmatpush.bf16.msrb.mxu1 %v7103_v35  ;;  %3660 = vmatpush.bf16.msrb.mxu2 %v7107_v17 }
 0x863   :  { %3631 = vmatpush.bf16.msrb.mxu0 %v7094_v20  ;;  %3672 = vmatpush.bf16.msrb.mxu3 %v7116_v39 }
 0x864   :  { %3644 = vmatpush.bf16.msrb.mxu1 %v7102_v6  ;;  %3661 = vmatpush.bf16.msrb.mxu2 %v7106_v18 }
 0x867   :  { %3632 = vmatpush.bf16.msrb.mxu0 %v7093_v22  ;;  %3673 = vmatpush.bf16.msrb.mxu3 %v7115_v53  ;;  %v3729_v22 = vpack.c.bf16 %v10468_v42, %v10468_v42  ;;  %v3730_v53 = vpack.c.bf16 %v10493_v13, %v10493_v13 }
 0x868   :  { %3645 = vmatpush.bf16.msrb.mxu1 %v7101_v16  ;;  %3662 = vmatpush.bf16.msrb.mxu2 %v7105_v36 }
 0x86b   :  { %3633 = vmatpush.bf16.msrb.mxu0 %v7092_v29  ;;  %3674 = vmatpush.bf16.msrb.mxu3 %v7114_v61  ;;  %v3728_v29 = vpack.c.bf16 %v10445_v44, %v10445_v44 }
 0x86c   :  { %4013 = vmatpush.bf16.msra.mxu2 %v7144_v59  ;;  %3646 = vmatpush.bf16.msrb.mxu1 %v7100_v40  ;;  %v3727_v59 = vpack.c.bf16 %v10425_v62, %v10425_v62 }
 0x86f   :  { %3634 = vmatpush.bf16.msrb.mxu0 %v7091_v11  ;;  %3675 = vmatpush.bf16.msrb.mxu3 %v7113_v31 }
 0x870   :  { %4014 = vmatpush.bf16.msra.mxu2 %v7143_v30  ;;  %3647 = vmatpush.bf16.msrb.mxu1 %v7099_v26 }
 0x873   :  { %4026 = vmatpush.bf16.msra.mxu3 %v7152_v5  ;;  %3635 = vmatpush.bf16.msrb.mxu0 %v7090_v52 }
 0x874   :  { %4015 = vmatpush.bf16.msra.mxu2 %v7142_v63  ;;  %3648 = vmatpush.bf16.msrb.mxu1 %v7098_v43 }
 0x877   :  { %3636 = vmatpush.bf16.msrb.mxu0 %v7089_v60  ;;  %4027 = vmatpush.bf16.msra.mxu3 %v7151_v38 }
 0x878   :  { %3649 = vmatpush.bf16.msrb.mxu1 %v7097_v46  ;;  %4016 = vmatpush.bf16.msra.mxu2 %v7141_v51 }
 0x87b   :  { %3987 = vmatpush.bf16.msra.mxu0 %v7128_v2  ;;  %4028 = vmatpush.bf16.msra.mxu3 %v7150_v57 }
 0x87c   :  { %4000 = vmatpush.bf16.msra.mxu1 %v7136_v32  ;;  %4017 = vmatpush.bf16.msra.mxu2 %v7140_v50 }
 0x87f   :  { %3988 = vmatpush.bf16.msra.mxu0 %v7127_v23  ;;  %4029 = vmatpush.bf16.msra.mxu3 %v7149_v10 }
 0x880   :  { %4001 = vmatpush.bf16.msra.mxu1 %v7135_v48  ;;  %4018 = vmatpush.bf16.msra.mxu2 %v7139_v8  ;;  %v10713_v8 = vld [vmem:[#allocation6 + $0x38] sm:$0xff] }
 0x883   :  { %3989 = vmatpush.bf16.msra.mxu0 %v7126_v54  ;;  %4030 = vmatpush.bf16.msra.mxu3 %v7148_v49  ;;  %v10722_v49 = vld [vmem:[#allocation6 + $0x28] sm:$0xff] }
 0x884   :  { %4002 = vmatpush.bf16.msra.mxu1 %v7134_v33  ;;  %4019 = vmatpush.bf16.msra.mxu2 %v7138_v34  ;;  %v4039_v33 = vld [vmem:[#allocation14] sm:$0xf] }
 0x887   :  { %3990 = vmatpush.bf16.msra.mxu0 %v7125_v37  ;;  %4031 = vmatpush.bf16.msra.mxu3 %v7147_v41  ;;  %v10716_v37 = vld [vmem:[#allocation6 + $0x30] sm:$0xff] }
 0x888   :  { %4003 = vmatpush.bf16.msra.mxu1 %v7133_v0  ;;  %4020 = vmatpush.bf16.msra.mxu2 %v7137_v47  ;;  %v10719_v0 = vld [vmem:[%s12126_s1 + $0x40] sm:$0xff]  ;;  %v10729_v41 = vld [vmem:[%s12126_s1 + $0x30] sm:$0xff] }
 0x88b   :  { %3991 = vmatpush.bf16.msra.mxu0 %v7124_v28  ;;  %4032 = vmatpush.bf16.msra.mxu3 %v7146_v19 }
 0x88c   :  { %4004 = vmatpush.bf16.msra.mxu1 %v7132_v1  ;;  %v10725_v1 = vld [vmem:[%s12126_s1 + $0x38] sm:$0xff] }
 0x88f   :  { %3992 = vmatpush.bf16.msra.mxu0 %v7123_v56  ;;  %4033 = vmatpush.bf16.msra.mxu3 %v7145_v14 }
 0x890   :  { %4005 = vmatpush.bf16.msra.mxu1 %v7131_v21  ;;  %v10732_v21 = vld [vmem:[#allocation6 + $0x20] sm:$0xff] }
 0x893   :  { %3993 = vmatpush.bf16.msra.mxu0 %v7122_v9 }
 0x894   :  { %4006 = vmatpush.bf16.msra.mxu1 %v7130_v58 }
 0x897   :  { %3994 = vmatpush.bf16.msra.mxu0 %v7121_v45  ;;  %v10738_v45 = vld [vmem:[%s12126_s1 + $0x28] sm:$0xff] }
 0x898   :  { %4007 = vmatpush.bf16.msra.mxu1 %v7129_v27  ;;  %v10741_v27 = vld [vmem:[#allocation6 + $0x18] sm:$0xff] }
 0x8ce   :  { %v3352_v25 = vpop.f32.mrf.mxu2 }
 0x8cf   :  { %v3371_v3 = vpack.c.bf16 %v3352_v25, %v3352_v25 }
 0x8d1   :  { %3663 = vmatmul.bf16.vlgmr.msrb.gmra.mxu2 %v3371_v3 }
 0x8d5   :  { %v3365_v7 = vpop.f32.mrf.mxu3 }
 0x8d6   :  { %v3354_v35 = vpop.f32.mrf.mxu2  ;;  %v3372_v17 = vpack.c.bf16 %v3365_v7, %v3365_v7  ;;  %v10744_v7 = vld [vmem:[%s12126_s1 + $0x18] sm:$0xff] }
 0x8d7   :  { %v3326_v55 = vpop.f32.mrf.mxu0 }
 0x8d8   :  { %v3369_v6 = vpack.c.bf16 %v3326_v55, %v3326_v55  ;;  %3676 = vmatmul.bf16.vlgmr.msrb.gmra.mxu3 %v3372_v17  ;;  %v10748_v55 = vld [vmem:[%s12126_s1 + $0x10] sm:$0xff] }
 0x8d9   :  { %4232 = vmatpush.bf16.msrb.mxu3 %v10713_v8 }
 0x8da   :  { %v3339_v20 = vpop.f32.mrf.mxu1  ;;  %3637 = vmatmul.bf16.vlgmr.msrb.gmra.mxu0 %v3369_v6 }
 0x8db   :  { %v3370_v18 = vpack.c.bf16 %v3339_v20, %v3339_v20 }
 0x8dd   :  { %3650 = vmatmul.bf16.vlgmr.msrb.gmra.mxu1 %v3370_v18  ;;  %v3367_v39 = vpop.f32.mrf.mxu3  ;;  %4233 = vmatpush.bf16.msrb.mxu3 %v10716_v37 }
 0x8de   :  { %v10755_v39 = vld [vmem:[%s12126_s1 + $0x8] sm:$0xff] }
 0x8df   :  { %v3328_v16 = vpop.f32.mrf.mxu0 }
 0x8e0   :  { %v10758_v16 = vld [vmem:[%s12126_s1] sm:$0xff] }
 0x8e1   :  { %4021 = vmatmul.bf16.vlgmr.msra.gmra.mxu2 %v3729_v22  ;;  %4234 = vmatpush.bf16.msrb.mxu3 %v10722_v49 }
 0x8e2   :  { %v3341_v36 = vpop.f32.mrf.mxu1 }
 0x8e5   :  { %4235 = vmatpush.bf16.msrb.mxu3 %v10732_v21 }
 0x8e8   :  { %4034 = vmatmul.bf16.vlgmr.msra.gmra.mxu3 %v3730_v53 }
 0x8e9   :  { %4236 = vmatpush.bf16.msrb.mxu3 %v10741_v27 }
 0x8ea   :  { %3995 = vmatmul.bf16.vlgmr.msra.gmra.mxu0 %v3727_v59 }
 0x8ed   :  { %4008 = vmatmul.bf16.vlgmr.msra.gmra.mxu1 %v3728_v29 }
 0x954   :  { %v3664_v40 = vpop.f32.mrf.mxu2 }
 0x957   :  { %v3638_v61 = vpop.f32.mrf.mxu0 }
 0x95a   :  { %v3651_v30 = vpop.f32.mrf.mxu1 }
 0x95b   :  { %v3652_v11 = vadd.f32 %v3651_v30, %v3638_v61  ;;  %v3677_v26 = vpop.f32.mrf.mxu3  ;;  %v3681_v61 = vld [vmem:[%s12127_s24] sm:$0xf]  ;;  %v10769_v30 = vld [vmem:[#allocation6 + $0x10] sm:$0xff] }
 0x95c   :  { %v3666_v31 = vpop.f32.mrf.mxu2  ;;  %4237 = vmatpush.bf16.msrb.mxu3 %v10769_v30 }
 0x95d   :  { %v3665_v42 = vadd.f32 %v3664_v40, %v3652_v11  ;;  %v10772_v11 = vld [vmem:[#allocation6 + $0x8] sm:$0xff]  ;;  %v10777_v31 = vld [vmem:[#allocation6] sm:$0xff] }
 0x95f   :  { %v3678_v63 = vadd.f32 %v3677_v26, %v3665_v42  ;;  %v3640_v13 = vpop.f32.mrf.mxu0 }
 0x960   :  { %4238 = vmatpush.bf16.msrb.mxu3 %v10772_v11 }
 0x961   :  { %v10693_v5 = vmax.f32 %v3678_v63, 0.0 }
 0x962   :  { %v3653_v52 = vpop.f32.mrf.mxu1 }
 0x963   :  { %3714 = vrot.lane.b32.xlu0 %v10693_v5, %s7932_s6  ;;  %3709 = vrot.lane.b32.xlu2 %v10693_v5, %s7933_s14  ;;  %v3679_v62 = vpop.f32.mrf.mxu3 }
 0x964   :  { %3719 = vrot.lane.b32.xlu1 %v10693_v5, %s7934_s23  ;;  %v4022_v44 = vpop.f32.mrf.mxu2  ;;  %4239 = vmatpush.bf16.msrb.mxu3 %v10777_v31 }
 0x967   :  { %v3996_v43 = vpop.f32.mrf.mxu0 }
 0x96a   :  { %v4009_v60 = vpop.f32.mrf.mxu1 }
 0x96b   :  { %v4010_v46 = vadd.f32 %v4009_v60, %v3996_v43  ;;  %3699 = vrot.lane.b32.xlu0 %v10693_v5, %s7930_s12  ;;  %3694 = vrot.lane.b32.xlu2 %v10693_v5, %s7935_s28  ;;  %v4035_v32 = vpop.f32.mrf.mxu3 }
 0x96c   :  { %3704 = vrot.lane.b32.xlu1 %v10693_v5, %s7928_s30  ;;  %v4024_v51 = vpop.f32.mrf.mxu2 }
 0x96d   :  { %v4023_v2 = vadd.f32 %v4022_v44, %v4010_v46 }
 0x96f   :  { %v4036_v38 = vadd.f32 %v4035_v32, %v4023_v2  ;;  %v3998_v48 = vpop.f32.mrf.mxu0 }
 0x971   :  { %v4040_v23 = vpack.c.bf16 %v4036_v38, %v4036_v38 }
 0x972   :  { %v4011_v50 = vpop.f32.mrf.mxu1 }
 0x973   :  { %v4046_v57 = vsel %vm650_vm1, %v4040_v23, 0  ;;  %3689 = vrot.lane.b32.xlu2 %v10693_v5, %s7909_s16  ;;  %v4037_v54 = vpop.f32.mrf.mxu3 }
 0x974   :  { %3684 = vrot.lane.b32.xlu1 %v10693_v5, %s7936_s3  ;;  %4055 = vmatpush.bf16.msrb.mxu0 %v4046_v57 }
 0x977   :  { %6620 = vmatmul.msk.bf16.vlgmr.msrb.gmra.mxu0 %vm4041_vm10, %v4039_v33 }
 0x9bd   :  { %v3710_v10 = vpop.permute.xlu2 %3709 }
 0x9be   :  { %v3711_v14 = vmul.f32 %v10729_v41, %v3710_v10 }
 0x9c5   :  { %v3695_v19 = vpop.permute.xlu2 %3694 }
 0x9c6   :  { %v3696_v18 = vmul.f32 %v10748_v55, %v3695_v19 }
 0x9cd   :  { %v3690_v22 = vpop.permute.xlu2 %3689 }
 0x9ce   :  { %v3691_v59 = vmul.f32 %v10755_v39, %v3690_v22  ;;  %v10806_v22 = vld [vmem:[#allocation29] ss:$0 sm:$0xff] }
 0x9d5   :  { %v3715_v34 = vpop.permute.xlu0 %3714 }
 0x9d6   :  { %v3720_v28 = vpop.permute.xlu1 %3719  ;;  %v3716_v9 = vmul.f32 %v10725_v1, %v3715_v34 }
 0x9d7   :  { %v3721_v47 = vmul.f32 %v10719_v0, %v3720_v28 }
 0x9d8   :  { %v3725_v25 = vpack.c.bf16 %v3716_v9, %v3711_v14 }
 0x9d9   :  { %v3726_v56 = vpack.c.bf16 %v3721_v47, %v3721_v47 }
 0x9db   :  { %v4065_v58 = vsel %vm650_vm1, %v3726_v56, 0 }
 0x9dc   :  { %4070 = vmatpush.bf16.msrb.mxu1 %v4065_v58 }
 0x9dd   :  { %v3700_v35 = vpop.permute.xlu0 %3699 }
 0x9de   :  { %v3705_v3 = vpop.permute.xlu1 %3704  ;;  %v3701_v6 = vmul.f32 %v10744_v7, %v3700_v35  ;;  %v7154_v35 = vld [vmem:[#allocation15 + $0x8] sm:$0xff] }
 0x9df   :  { %v3706_v17 = vmul.f32 %v10738_v45, %v3705_v3 }
 0x9e0   :  { %4071 = vmatpush.bf16.msrb.mxu1 %v3725_v25  ;;  %v3723_v36 = vpack.c.bf16 %v3701_v6, %v3696_v18  ;;  %v7153_v25 = vld [vmem:[#allocation15] sm:$0xff] }
 0x9e1   :  { %v3724_v20 = vpack.c.bf16 %v3706_v17, %v10693_v5  ;;  %v7155_v17 = vld [vmem:[#allocation15 + $0x10] sm:$0xff] }
 0x9e4   :  { %4072 = vmatpush.bf16.msrb.mxu1 %v3724_v20 }
 0x9e6   :  { %v3685_v53 = vpop.permute.xlu1 %3684 }
 0x9e7   :  { %v3686_v29 = vmul.f32 %v3685_v53, %v10758_v16 }
 0x9e8   :  { %4073 = vmatpush.bf16.msrb.mxu1 %v3723_v36 }
 0x9e9   :  { %v3722_v40 = vpack.c.bf16 %v3691_v59, %v3686_v29  ;;  %v12128_v59 = vld [vmem:[#allocation185_spill] sm:$0xff] }
 0x9ec   :  { %4074 = vmatpush.bf16.msrb.mxu1 %v3722_v40  ;;  %v12129_v40 = vld [vmem:[#allocation184_spill] sm:$0xff] }
 0x9ef   :  { %6621 = vmatmul.msk.bf16.vlgmr.msrb.gmra.mxu1 %vm646_vm9, %v3681_v61 }
 0x9f0   :  { %4344 = vmatpush.bf16.msra.mxu1 %v10713_v8 }
 0x9f4   :  { %4345 = vmatpush.bf16.msra.mxu1 %v10716_v37  ;;  %v4057_v42 = vpop.f32.mrf.mxu0 }
 0x9f8   :  { %4346 = vmatpush.bf16.msra.mxu1 %v10722_v49 }
 0x9fc   :  { %4347 = vmatpush.bf16.msra.mxu1 %v10732_v21  ;;  %v4059_v26 = vpop.f32.mrf.mxu0 }
 0x9fd   :  { %v12130_v26 = vld [vmem:[#allocation186_spill] sm:$0xff] }
 0xa00   :  { %4348 = vmatpush.bf16.msra.mxu1 %v10741_v27 }
 0xa04   :  { %4349 = vmatpush.bf16.msra.mxu1 %v10769_v30 }
 0xa08   :  { %4350 = vmatpush.bf16.msra.mxu1 %v10772_v11 }
 0xa0c   :  { %4351 = vmatpush.bf16.msra.mxu1 %v10777_v31 }
 0xa6c   :  { %v4076_v63 = vpop.f32.mrf.mxu1 }
 0xa6d   :  { %v10781_v5 = vadd.f32 %v4076_v63, %v4057_v42 }
 0xa6f   :  { %v4080_v13 = vmax.f32 %v10781_v5, 0.0  ;;  %v4167_v52 = vpack.c.bf16 %v10781_v5, %v10781_v5  ;;  %v4253_v63 = vmul.f32 %v10781_v5, %v12130_v26 }
 0xa71   :  { %4240 = vmatmul.bf16.vlgmr.msrb.gmra.mxu3 %v4167_v52  ;;  %4099 = vrot.lane.b32.xlu2 %v4080_v13, %s7932_s6 }
 0xa72   :  { %4096 = vrot.lane.b32.xlu1 %v4080_v13, %s7933_s14  ;;  %4102 = vrot.lane.b32.xlu0 %v4080_v13, %s7934_s23 }
 0xa74   :  { %v4078_v62 = vpop.f32.mrf.mxu1 }
 0xa79   :  { %4090 = vrot.lane.b32.xlu2 %v4080_v13, %s7930_s12 }
 0xa7a   :  { %4087 = vrot.lane.b32.xlu1 %v4080_v13, %s7935_s28  ;;  %4093 = vrot.lane.b32.xlu0 %v4080_v13, %s7928_s30 }
 0xa82   :  { %4084 = vrot.lane.b32.xlu1 %v4080_v13, %s7909_s16  ;;  %4081 = vrot.lane.b32.xlu0 %v4080_v13, %s7936_s3 }
 0xacb   :  { %v4100_v60 = vpop.permute.xlu2 %4099 }
 0xacc   :  { %v4101_v38 = vmul.f32 %v10725_v1, %v4100_v60  ;;  %v12132_v60 = vld [vmem:[#allocation188_spill] sm:$0xff] }
 0xad3   :  { %v4091_v54 = vpop.permute.xlu2 %4090 }
 0xad4   :  { %v4092_v34 = vmul.f32 %v10744_v7, %v4091_v54 }
 0xae4   :  { %v4097_v44 = vpop.permute.xlu1 %4096  ;;  %v4103_v43 = vpop.permute.xlu0 %4102 }
 0xae5   :  { %v4104_v46 = vmul.f32 %v10719_v0, %v4103_v43  ;;  %v4098_v32 = vmul.f32 %v10729_v41, %v4097_v44 }
 0xae7   :  { %v4109_v2 = vpack.c.bf16 %v4104_v46, %v4104_v46  ;;  %v4108_v23 = vpack.c.bf16 %v4101_v38, %v4098_v32  ;;  %v12133_v32 = vld [vmem:[#allocation187_spill] sm:$0xff] }
 0xae9   :  { %v4141_v51 = vsel %vm650_vm1, %v4109_v2, 0 }
 0xaea   :  { %4146 = vmatpush.bf16.msrb.mxu2 %v4141_v51 }
 0xaec   :  { %v4088_v48 = vpop.permute.xlu1 %4087  ;;  %v4094_v50 = vpop.permute.xlu0 %4093 }
 0xaed   :  { %v4095_v57 = vmul.f32 %v10738_v45, %v4094_v50  ;;  %v4089_v10 = vmul.f32 %v10748_v55, %v4088_v48  ;;  %v12134_v48 = vld [vmem:[#allocation189_spill] sm:$0xff] }
 0xaee   :  { %4147 = vmatpush.bf16.msrb.mxu2 %v4108_v23  ;;  %v4260_v50 = vmul.f32 %v10781_v5, %v12134_v48 }
 0xaef   :  { %v4107_v33 = vpack.c.bf16 %v4095_v57, %v4080_v13  ;;  %v4106_v28 = vpack.c.bf16 %v4092_v34, %v4089_v10  ;;  %v12131_v13 = vld [vmem:[#allocation193_spill] sm:$0xff]  ;;  %v12135_v57 = vld [vmem:[#allocation194_spill] sm:$0xff] }
 0xaf2   :  { %4148 = vmatpush.bf16.msrb.mxu2 %v4107_v33 }
 0xaf4   :  { %v4085_v47 = vpop.permute.xlu1 %4084  ;;  %v4082_v56 = vpop.permute.xlu0 %4081 }
 0xaf5   :  { %v4086_v19 = vmul.f32 %v10755_v39, %v4085_v47  ;;  %v4083_v9 = vmul.f32 %v4082_v56, %v10758_v16  ;;  %v4241_v58 = vpop.f32.mrf.mxu3  ;;  %v12137_v56 = vld [vmem:[#allocation190_spill] sm:$0xff] }
 0xaf6   :  { %4149 = vmatpush.bf16.msrb.mxu2 %v4106_v28  ;;  %v4249_v53 = vmul.f32 %v10806_v22, %v4241_v58  ;;  %v12136_v28 = vld [vmem:[#allocation191_spill] sm:$0xff]  ;;  %v12138_v58 = vld [vmem:[#allocation192_spill] sm:$0xff] }
 0xaf7   :  { %v4105_v14 = vpack.c.bf16 %v4086_v19, %v4083_v9 }
 0xaf8   :  { %v4255_v52 = vmul.f32 %v4249_v53, %v12131_v13  ;;  %v4262_v54 = vmul.f32 %v4249_v53, %v12135_v57 }
 0xafa   :  { %4150 = vmatpush.bf16.msrb.mxu2 %v4105_v14  ;;  %v4267_v14 = vmul.f32 %v10781_v5, %v12138_v58 }
 0xafd   :  { %6634 = vmatmul.msk.bf16.vlgmr.msrb.gmra.mxu2 %vm646_vm9, %v7153_v25  ;;  %v4243_v3 = vpop.f32.mrf.mxu3  ;;  %v12139_v25 = vld [vmem:[#allocation195_spill] sm:$0xff] }
 0xafe   :  { %v4269_v3 = vmul.f32 %v4249_v53, %v12139_v25 }
 0xb0d   :  { %6635 = vmatmul.msk.bf16.gmra.mxu2 %vm646_vm9, %v7154_v35 }
 0xb1d   :  { %6636 = vmatmul.msk.bf16.gmra.mxu2 %vm646_vm9, %v7155_v17 }
 0xb80   :  { %v4152_v20 = vpop.f32.mrf.mxu2 }
 0xb81   :  { %v4250_v29 = vmul.f32 %v4152_v20, %v12128_v59 }
 0xb88   :  { %v4154_v6 = vpop.f32.mrf.mxu2 }
 0xb89   :  { %v4257_v46 = vmul.f32 %v4154_v6, %v12132_v60 }
 0xb90   :  { %v4157_v18 = vpop.f32.mrf.mxu2 }
 0xb91   :  { %v4264_v47 = vmul.f32 %v4157_v18, %v12136_v28 }
 0xb98   :  { %v4159_v36 = vpop.f32.mrf.mxu2 }
 0xb99   :  { %v4251_v61 = vmul.f32 %v4159_v36, %v12129_v40 }
 0xb9b   :  { %v4252_v42 = vadd.f32 %v4251_v61, %v4250_v29 }
 0xb9d   :  { %v4254_v62 = vadd.f32 %v4253_v63, %v4252_v42 }
 0xb9f   :  { %v10814_v44 = vadd.f32 %v4255_v52, %v4254_v62 }
 0xba0   :  { %v4162_v43 = vpop.f32.mrf.mxu2 }
 0xba1   :  { %v4271_v2 = vmax.f32 %v10814_v44, 0.0  ;;  %v4258_v51 = vmul.f32 %v4162_v43, %v12133_v32  ;;  %v4343_v38 = vpack.c.bf16 %v10814_v44, %v10814_v44 }
 0xba3   :  { %v4259_v23 = vadd.f32 %v4258_v51, %v4257_v46  ;;  %4352 = vmatmul.bf16.vlgmr.msra.gmra.mxu1 %v4343_v38  ;;  %4290 = vrot.lane.b32.xlu1 %v4271_v2, %s7932_s6 }
 0xba4   :  { %4287 = vrot.lane.b32.xlu0 %v4271_v2, %s7933_s14  ;;  %4293 = vrot.lane.b32.xlu2 %v4271_v2, %s7934_s23 }
 0xba5   :  { %v4261_v33 = vadd.f32 %v4260_v50, %v4259_v23 }
 0xba7   :  { %v10827_v10 = vadd.f32 %v4262_v54, %v4261_v33 }
 0xba8   :  { %v4164_v34 = vpop.f32.mrf.mxu2 }
 0xba9   :  { %v4265_v19 = vmul.f32 %v4164_v34, %v12137_v56 }
 0xbab   :  { %v4266_v9 = vadd.f32 %v4265_v19, %v4264_v47  ;;  %4281 = vrot.lane.b32.xlu1 %v4271_v2, %s7930_s12 }
 0xbac   :  { %4278 = vrot.lane.b32.xlu0 %v4271_v2, %s7935_s28  ;;  %4284 = vrot.lane.b32.xlu2 %v4271_v2, %s7928_s30 }
 0xbad   :  { %v4268_v35 = vadd.f32 %v4267_v14, %v4266_v9  ;;  %v7164_v14 = vld [vmem:[#allocation17] sm:$0xff] }
 0xbaf   :  { %v10837_v17 = vadd.f32 %v4269_v3, %v4268_v35 }
 0xbb4   :  { %4275 = vrot.lane.b32.xlu0 %v4271_v2, %s7909_s16  ;;  %4272 = vrot.lane.b32.xlu2 %v4271_v2, %s7936_s3 }
 0xbfe   :  { %v4294_v20 = vpop.permute.xlu2 %4293 }
 0xbff   :  { %v4295_v6 = vmul.f32 %v10719_v0, %v4294_v20  ;;  %v12140_v20 = vld [vmem:[#allocation221_spill] sm:$0xff] }
 0xc01   :  { %v4300_v18 = vpack.c.bf16 %v4295_v6, %v4295_v6  ;;  %v12141_v6 = vld [vmem:[#allocation222_spill] sm:$0xff] }
 0xc03   :  { %v4322_v5 = vsel %vm650_vm1, %v4300_v18, 0 }
 0xc04   :  { %4327 = vmatpush.bf16.msra.mxu0 %v4322_v5  ;;  %v12142_v5 = vld [vmem:[#allocation223_spill] sm:$0xff] }
 0xc06   :  { %v4285_v29 = vpop.permute.xlu2 %4284 }
 0xc07   :  { %v4286_v63 = vmul.f32 %v10738_v45, %v4285_v29 }
 0xc09   :  { %v4298_v62 = vpack.c.bf16 %v4286_v63, %v4271_v2  ;;  %v7165_v2 = vld [vmem:[#allocation17 + $0x8] sm:$0xff]  ;;  %v12145_v63 = vld [vmem:[#allocation224_spill] sm:$0xff] }
 0xc0e   :  { %v4273_v54 = vpop.permute.xlu2 %4272 }
 0xc0f   :  { %v4274_v34 = vmul.f32 %v4273_v54, %v10758_v16 }
 0xc15   :  { %v4291_v36 = vpop.permute.xlu1 %4290 }
 0xc16   :  { %v4292_v61 = vmul.f32 %v10725_v1, %v4291_v36  ;;  %v4288_v42 = vpop.permute.xlu0 %4287  ;;  %v12143_v36 = vld [vmem:[#allocation227_spill] sm:$0xff] }
 0xc17   :  { %v4289_v53 = vmul.f32 %v10729_v41, %v4288_v42  ;;  %v12144_v42 = vld [vmem:[#allocation225_spill] sm:$0xff] }
 0xc19   :  { %v4299_v52 = vpack.c.bf16 %v4292_v61, %v4289_v53 }
 0xc1b   :  { %4328 = vmatpush.bf16.msra.mxu0 %v4299_v52 }
 0xc1d   :  { %v4282_v43 = vpop.permute.xlu1 %4281 }
 0xc1e   :  { %v4283_v46 = vmul.f32 %v10744_v7, %v4282_v43  ;;  %v4279_v51 = vpop.permute.xlu0 %4278 }
 0xc1f   :  { %v4280_v38 = vmul.f32 %v10748_v55, %v4279_v51  ;;  %4329 = vmatpush.bf16.msra.mxu0 %v4298_v62 }
 0xc20   :  { %v4353_v23 = vpop.f32.mrf.mxu1 }
 0xc21   :  { %v4297_v50 = vpack.c.bf16 %v4283_v46, %v4280_v38  ;;  %v12146_v46 = vld [vmem:[#allocation226_spill] sm:$0xff] }
 0xc22   :  { %v4369_v51 = vmul.f32 %v10814_v44, %v12146_v46 }
 0xc23   :  { %4330 = vmatpush.bf16.msra.mxu0 %v4297_v50 }
 0xc26   :  { %v4276_v33 = vpop.permute.xlu0 %4275 }
 0xc27   :  { %v4277_v47 = vmul.f32 %v10755_v39, %v4276_v33 }
 0xc28   :  { %v4355_v19 = vpop.f32.mrf.mxu1 }
 0xc29   :  { %v4296_v9 = vpack.c.bf16 %v4277_v47, %v4274_v34 }
 0xc2b   :  { %4331 = vmatpush.bf16.msra.mxu0 %v4296_v9 }
 0xc2e   :  { %6677 = vmatmul.msk.bf16.vlgmr.msra.gmra.mxu0 %vm646_vm9, %v7164_v14 }
 0xc2f   :  { %4432 = vmatpush.bf16.msrb.mxu0 %v10713_v8 }
 0xc33   :  { %4433 = vmatpush.bf16.msrb.mxu0 %v10716_v37  ;;  %v4357_v37 = vmul.f32 %v10806_v22, %v4353_v23  ;;  %v12147_v23 = vld [vmem:[#allocation228_spill] sm:$0xff] }
 0xc35   :  { %v4363_v29 = vmul.f32 %v4357_v37, %v12143_v36  ;;  %v4371_v50 = vmul.f32 %v4357_v37, %v12147_v23 }
 0xc37   :  { %4434 = vmatpush.bf16.msrb.mxu0 %v10722_v49 }
 0xc3b   :  { %4435 = vmatpush.bf16.msrb.mxu0 %v10732_v21 }
 0xc3e   :  { %6678 = vmatmul.msk.bf16.gmra.mxu0 %vm646_vm9, %v7165_v2 }
 0xc3f   :  { %4436 = vmatpush.bf16.msrb.mxu0 %v10741_v27  ;;  %v4361_v27 = vmul.f32 %v10814_v44, %v12142_v5 }
 0xc43   :  { %4437 = vmatpush.bf16.msrb.mxu0 %v10769_v30 }
 0xc47   :  { %4438 = vmatpush.bf16.msrb.mxu0 %v10772_v11 }
 0xc4b   :  { %4439 = vmatpush.bf16.msrb.mxu0 %v10777_v31 }
 0xcab   :  { %v4333_v8 = vpop.f32.mrf.mxu0 }
 0xcac   :  { %v4358_v49 = vmul.f32 %v4333_v8, %v12140_v20 }
 0xcb3   :  { %v4335_v3 = vpop.f32.mrf.mxu0 }
 0xcb4   :  { %v4366_v31 = vmul.f32 %v4335_v3, %v12144_v42 }
 0xcbb   :  { %v4338_v35 = vpop.f32.mrf.mxu0 }
 0xcbc   :  { %v4359_v21 = vmul.f32 %v4338_v35, %v12141_v6 }
 0xcbe   :  { %v4360_v18 = vadd.f32 %v4359_v21, %v4358_v49 }
 0xcc0   :  { %v4362_v30 = vadd.f32 %v4361_v27, %v4360_v18 }
 0xcc2   :  { %v4364_v61 = vadd.f32 %v4363_v29, %v4362_v30 }
 0xcc3   :  { %v4340_v11 = vpop.f32.mrf.mxu0 }
 0xcc4   :  { %v10868_v53 = vadd.f32 %v4364_v61, %v10827_v10  ;;  %v4367_v52 = vmul.f32 %v4340_v11, %v12145_v63 }
 0xcc6   :  { %v4374_v62 = vmax.f32 %v10868_v53, 0.0  ;;  %v4368_v43 = vadd.f32 %v4367_v52, %v4366_v31  ;;  %v4431_v38 = vpack.c.bf16 %v10868_v53, %v10868_v53 }
 0xcc8   :  { %v4370_v54 = vadd.f32 %v4369_v51, %v4368_v43  ;;  %4440 = vmatmul.bf16.vlgmr.msrb.gmra.mxu0 %v4431_v38  ;;  %4393 = vrot.lane.b32.xlu0 %v4374_v62, %s7932_s6  ;;  %v7185_v38 = vld [vmem:[#allocation18 + $0x38] sm:$0xff] }
 0xcc9   :  { %4390 = vrot.lane.b32.xlu2 %v4374_v62, %s7933_s14  ;;  %4396 = vrot.lane.b32.xlu1 %v4374_v62, %s7934_s23 }
 0xcca   :  { %v4372_v10 = vadd.f32 %v4371_v50, %v4370_v54  ;;  %v7166_v50 = vld [vmem:[%s12148_s9] sm:$0xff] }
 0xccb   :  { %v7183_v54 = vld [vmem:[#allocation18 + $0x28] sm:$0xff] }
 0xccc   :  { %v10881_v33 = vadd.f32 %v4372_v10, %v10837_v17  ;;  %v7182_v10 = vld [vmem:[#allocation18 + $0x20] sm:$0xff] }
 0xcd0   :  { %4384 = vrot.lane.b32.xlu0 %v4374_v62, %s7930_s12 }
 0xcd1   :  { %4381 = vrot.lane.b32.xlu2 %v4374_v62, %s7935_s28  ;;  %4387 = vrot.lane.b32.xlu1 %v4374_v62, %s7928_s30 }
 0xcd9   :  { %4378 = vrot.lane.b32.xlu2 %v4374_v62, %s7909_s16  ;;  %4375 = vrot.lane.b32.xlu1 %v4374_v62, %s7936_s3 }
 0xd23   :  { %v4391_v44 = vpop.permute.xlu2 %4390 }
 0xd24   :  { %v4392_v8 = vmul.f32 %v10729_v41, %v4391_v44  ;;  %v7181_v44 = vld [vmem:[#allocation18 + $0x18] sm:$0xff] }
 0xd2b   :  { %v4382_v14 = vpop.permute.xlu2 %4381 }
 0xd2c   :  { %v4383_v29 = vmul.f32 %v10748_v55, %v4382_v14 }
 0xd33   :  { %v4379_v30 = vpop.permute.xlu2 %4378 }
 0xd34   :  { %v4380_v31 = vmul.f32 %v10755_v39, %v4379_v30 }
 0xd3a   :  { %v4394_v34 = vpop.permute.xlu0 %4393 }
 0xd3b   :  { %v4397_v47 = vpop.permute.xlu1 %4396  ;;  %v4395_v17 = vmul.f32 %v10725_v1, %v4394_v34  ;;  %v7180_v34 = vld [vmem:[#allocation18 + $0x10] sm:$0xff] }
 0xd3c   :  { %v4398_v19 = vmul.f32 %v10719_v0, %v4397_v47  ;;  %v7179_v47 = vld [vmem:[#allocation18 + $0x8] sm:$0xff] }
 0xd3d   :  { %v4402_v3 = vpack.c.bf16 %v4395_v17, %v4392_v8 }
 0xd3e   :  { %v4403_v9 = vpack.c.bf16 %v4398_v19, %v4398_v19  ;;  %v7178_v19 = vld [vmem:[#allocation18] sm:$0xff] }
 0xd40   :  { %v4415_v2 = vsel %vm650_vm1, %v4403_v9, 0 }
 0xd41   :  { %4420 = vmatpush.bf16.msra.mxu3 %v4415_v2 }
 0xd42   :  { %v4385_v37 = vpop.permute.xlu0 %4384 }
 0xd43   :  { %v4388_v35 = vpop.permute.xlu1 %4387  ;;  %v4386_v27 = vmul.f32 %v10744_v7, %v4385_v37 }
 0xd44   :  { %v4389_v49 = vmul.f32 %v10738_v45, %v4388_v35  ;;  %v4449_v35 = vmul.f32 %v10868_v53, %v10406_v15  ;;  %v7174_v53 = vld [vmem:[#allocation20 + $0x30] sm:$0xff] }
 0xd45   :  { %4421 = vmatpush.bf16.msra.mxu3 %v4402_v3  ;;  %v4441_v21 = vpop.f32.mrf.mxu0  ;;  %v4400_v61 = vpack.c.bf16 %v4386_v27, %v4383_v29 }
 0xd46   :  { %v4401_v18 = vpack.c.bf16 %v4389_v49, %v4374_v62  ;;  %v7184_v62 = vld [vmem:[#allocation18 + $0x30] sm:$0xff]  ;;  %v4445_v17 = vmul.f32 %v10806_v22, %v4441_v21  ;;  %v7175_v22 = vld [vmem:[#allocation20 + $0x38] sm:$0xff] }
 0xd47   :  { %4576 = vmatpush.bf16.msrb.mxu1 %v7175_v22 }
 0xd48   :  { %v4451_v37 = vmul.f32 %v4445_v17, %v10418_v12 }
 0xd49   :  { %4422 = vmatpush.bf16.msra.mxu3 %v4401_v18 }
 0xd4b   :  { %v4376_v11 = vpop.permute.xlu1 %4375  ;;  %4577 = vmatpush.bf16.msrb.mxu1 %v7174_v53 }
 0xd4c   :  { %v4377_v52 = vmul.f32 %v4376_v11, %v10758_v16 }
 0xd4d   :  { %4423 = vmatpush.bf16.msra.mxu3 %v4400_v61  ;;  %v4443_v43 = vpop.f32.mrf.mxu0 }
 0xd4e   :  { %v4399_v51 = vpack.c.bf16 %v4380_v31, %v4377_v52  ;;  %v7172_v43 = vld [vmem:[#allocation20 + $0x20] sm:$0xff] }
 0xd51   :  { %4424 = vmatpush.bf16.msra.mxu3 %v4399_v51 }
 0xd54   :  { %6683 = vmatmul.msk.bf16.vlgmr.msra.gmra.mxu3 %vm646_vm9, %v7166_v50 }
 0xd55   :  { %4739 = vmatpush.bf16.msrb.mxu3 %v7185_v38 }
 0xd59   :  { %4740 = vmatpush.bf16.msrb.mxu3 %v7184_v62  ;;  %v7171_v62 = vld [vmem:[#allocation20 + $0x18] sm:$0xff] }
 0xd5d   :  { %4741 = vmatpush.bf16.msrb.mxu3 %v7183_v54 }
 0xd61   :  { %4742 = vmatpush.bf16.msrb.mxu3 %v7182_v10 }
 0xd65   :  { %4743 = vmatpush.bf16.msrb.mxu3 %v7181_v44 }
 0xd69   :  { %4744 = vmatpush.bf16.msrb.mxu3 %v7180_v34 }
 0xd6d   :  { %4745 = vmatpush.bf16.msrb.mxu3 %v7179_v47 }
 0xd71   :  { %4746 = vmatpush.bf16.msrb.mxu3 %v7178_v19 }
 0xdd7   :  { %v4426_v9 = vpop.f32.mrf.mxu3 }
 0xdd8   :  { %v4446_v2 = vmul.f32 %v4426_v9, %v10398_v24  ;;  %v6785_v24 = vld [vmem:[%s12151_s17 + $0x8] sm:$0xf0] }
 0xddf   :  { %v4428_v14 = vpop.f32.mrf.mxu3 }
 0xde0   :  { %v4447_v8 = vmul.f32 %v4428_v14, %v10402_v4  ;;  %v7187_v4 = vld [vmem:[%s12151_s17 + $0x4] sm:$0xf] }
 0xde2   :  { %v4448_v3 = vadd.f32 %v4447_v8, %v4446_v2 }
 0xde4   :  { %v4450_v49 = vadd.f32 %v4449_v35, %v4448_v3 }
 0xde6   :  { %v4452_v18 = vadd.f32 %v4451_v37, %v4450_v49  ;;  %v7167_v37 = vld [vmem:[#allocation21] sm:$0xff]  ;;  %v7169_v49 = vld [vmem:[#allocation20 + $0x8] sm:$0xff] }
 0xde8   :  { %v4453_v27 = vadd.f32 %v4452_v18, %v10881_v33  ;;  %v7173_v33 = vld [vmem:[#allocation20 + $0x28] sm:$0xff]  ;;  %v7168_v18 = vld [vmem:[#allocation20] sm:$0xff] }
 0xde9   :  { %4578 = vmatpush.bf16.msrb.mxu1 %v7173_v33 }
 0xdea   :  { %v4456_v29 = vmax.f32 %v4453_v27, 0.0  ;;  %v4674_v30 = vpack.c.bf16 %v4453_v27, %v4453_v27 }
 0xdec   :  { %4747 = vmatmul.bf16.vlgmr.msrb.gmra.mxu3 %v4674_v30  ;;  %4475 = vrot.lane.b32.xlu2 %v4456_v29, %s7932_s6 }
 0xded   :  { %4472 = vrot.lane.b32.xlu1 %v4456_v29, %s7933_s14  ;;  %4478 = vrot.lane.b32.xlu0 %v4456_v29, %s7934_s23 }
 0xdee   :  { %4579 = vmatpush.bf16.msrb.mxu1 %v7172_v43  ;;  %v10944_v43 = vld [vmem:[%s12150_s13 + $0x70] sm:$0xff] }
 0xdf2   :  { %4580 = vmatpush.bf16.msrb.mxu1 %v7171_v62 }
 0xdf4   :  { %4466 = vrot.lane.b32.xlu2 %v4456_v29, %s7930_s12 }
 0xdf5   :  { %4463 = vrot.lane.b32.xlu1 %v4456_v29, %s7935_s28  ;;  %4469 = vrot.lane.b32.xlu0 %v4456_v29, %s7928_s30 }
 0xdfd   :  { %4460 = vrot.lane.b32.xlu1 %v4456_v29, %s7909_s16  ;;  %4457 = vrot.lane.b32.xlu0 %v4456_v29, %s7936_s3  ;;  %s7937_s16 = smov 125  }
 0xe46   :  { %v4476_v11 = vpop.permute.xlu2 %4475 }
 0xe47   :  { %v4477_v50 = vmul.f32 %v10725_v1, %v4476_v11  ;;  %v7186_v11 = vld [vmem:[%s12149_s21] sm:$0xff] }
 0xe4e   :  { %v4467_v47 = vpop.permute.xlu2 %4466 }
 0xe5f   :  { %v4473_v21 = vpop.permute.xlu1 %4472  ;;  %v4479_v61 = vpop.permute.xlu0 %4478 }
 0xe60   :  { %v4480_v31 = vmul.f32 %v10719_v0, %v4479_v61  ;;  %v4474_v51 = vmul.f32 %v10729_v41, %v4473_v21  ;;  %v4468_v41 = vmul.f32 %v10744_v7, %v4467_v47 }
 0xe62   :  { %v4485_v52 = vpack.c.bf16 %v4480_v31, %v4480_v31  ;;  %v4484_v54 = vpack.c.bf16 %v4477_v50, %v4474_v51  ;;  %v10947_v51 = vld [vmem:[%s12150_s13 + $0x78] sm:$0xff]  ;;  %v10950_v50 = vld [vmem:[%s12150_s13 + $0x60] sm:$0xff] }
 0xe64   :  { %v4495_v38 = vsel %vm650_vm1, %v4485_v52, 0 }
 0xe65   :  { %4500 = vmatpush.bf16.msra.mxu2 %v4495_v38 }
 0xe67   :  { %v4464_v10 = vpop.permute.xlu1 %4463  ;;  %v4470_v44 = vpop.permute.xlu0 %4469 }
 0xe68   :  { %v4471_v34 = vmul.f32 %v10738_v45, %v4470_v44  ;;  %v4465_v19 = vmul.f32 %v10748_v55, %v4464_v10  ;;  %v7170_v55 = vld [vmem:[#allocation20 + $0x10] sm:$0xff] }
 0xe69   :  { %4501 = vmatpush.bf16.msra.mxu2 %v4484_v54  ;;  %4581 = vmatpush.bf16.msrb.mxu1 %v7170_v55  ;;  %v10974_v55 = vld [vmem:[%s12150_s13 + $0x20] sm:$0xff] }
 0xe6a   :  { %v4483_v0 = vpack.c.bf16 %v4471_v34, %v4456_v29  ;;  %v4482_v9 = vpack.c.bf16 %v4468_v41, %v4465_v19  ;;  %v10955_v34 = vld [vmem:[%s12150_s13 + $0x68] sm:$0xff]  ;;  %v10960_v41 = vld [vmem:[%s12150_s13 + $0x58] sm:$0xff] }
 0xe6d   :  { %4502 = vmatpush.bf16.msra.mxu2 %v4483_v0  ;;  %4582 = vmatpush.bf16.msrb.mxu1 %v7169_v49 }
 0xe6f   :  { %v4461_v14 = vpop.permute.xlu1 %4460  ;;  %v4458_v1 = vpop.permute.xlu0 %4457 }
 0xe70   :  { %v4462_v17 = vmul.f32 %v10755_v39, %v4461_v14  ;;  %v4459_v2 = vmul.f32 %v4458_v1, %v10758_v16  ;;  %v4748_v8 = vpop.f32.mrf.mxu3 }
 0xe71   :  { %v4754_v3 = vpack.c.bf16 %v4748_v8, %v4748_v8  ;;  %4503 = vmatpush.bf16.msra.mxu2 %v4482_v9  ;;  %4583 = vmatpush.bf16.msrb.mxu1 %v7168_v18  ;;  %v10963_v9 = vld [vmem:[%s12150_s13 + $0x50] sm:$0xff] }
 0xe72   :  { %v4481_v45 = vpack.c.bf16 %v4462_v17, %v4459_v2 }
 0xe73   :  { %v4764_v35 = vsel %vm650_vm1, %v4754_v3, 0 }
 0xe74   :  { %4773 = vmatpush.bf16.msra.mxu0 %v4764_v35  ;;  %v10968_v35 = vld [vmem:[%s12150_s13 + $0x30] sm:$0xff] }
 0xe75   :  { %4504 = vmatpush.bf16.msra.mxu2 %v4481_v45 }
 0xe77   :  { %6771 = vmatmul.msk.bf16.vlgmr.msra.gmra.mxu0 %vm4041_vm10, %v7186_v11  ;;  %v10993_v11 = vld [vmem:[%s12150_s13 + $0x10] sm:$0xff] }
 0xe78   :  { %6688 = vmatmul.msk.bf16.vlgmr.msra.gmra.mxu2 %vm646_vm9, %v7167_v37  ;;  %v4750_v7 = vpop.f32.mrf.mxu3  ;;  %v10971_v37 = vld [vmem:[%s12150_s13 + $0x38] sm:$0xff] }
 0xefb   :  { %v4506_v39 = vpop.f32.mrf.mxu2 }
 0xf03   :  { %v4508_v16 = vpop.f32.mrf.mxu2 }
 0xf04   :  { %v4511_v27 = vpack.c.bf16 %v4508_v16, %v4506_v39  ;;  %v10979_v16 = vld [vmem:[%s12150_s13 + $0x28] sm:$0xff] }
 0xf06   :  { %4584 = vmatmul.bf16.vlgmr.msrb.gmra.mxu1 %v4511_v27 }
 0xf83   :  { %v4585_v29 = vpop.f32.mrf.mxu1 }
 0xf84   :  { %v4592_v30 = vmax.f32 %v4585_v29, 0.0 }
 0xf86   :  { %4641 = vrot.lane.b32.xlu1 %v4592_v30, %s7937_s16  ;;  %4650 = vrot.lane.b32.xlu2 %v4592_v30, %s7938_s15 }
 0xf8b   :  { %v4587_v22 = vpop.f32.mrf.mxu1 }
 0xf8c   :  { %v4593_v53 = vmax.f32 %v4587_v22, 0.0  ;;  %v10984_v22 = vld [vmem:[%s12150_s13 + $0x88] sm:$0xff] }
 0xf8e   :  { %4634 = vrot.lane.b32.xlu1 %v4593_v53, %s7928_s30  ;;  %4643 = vrot.lane.b32.xlu2 %v4593_v53, %s7937_s16  ;;  %v4669_v33 = vpack.c.bf16 %v4593_v53, %v4592_v30 }
 0xf8f   :  { %4652 = vrot.lane.b32.xlu0 %v4593_v53, %s7938_s15 }
 0xf96   :  { %4614 = vrot.lane.b32.xlu1 %v4592_v30, %s7939_s8  ;;  %4623 = vrot.lane.b32.xlu2 %v4592_v30, %s7930_s12 }
 0xf97   :  { %4632 = vrot.lane.b32.xlu0 %v4592_v30, %s7928_s30 }
 0xf9e   :  { %4607 = vrot.lane.b32.xlu1 %v4593_v53, %s7901_s10  ;;  %4616 = vrot.lane.b32.xlu2 %v4593_v53, %s7939_s8 }
 0xf9f   :  { %4625 = vrot.lane.b32.xlu0 %v4593_v53, %s7930_s12 }
 0xfa6   :  { %4659 = vrot.lane.b32.xlu1 %v4592_v30, %s7940_s0  ;;  %4596 = vrot.lane.b32.xlu2 %v4592_v30, %s7941_s4 }
 0xfa7   :  { %4605 = vrot.lane.b32.xlu0 %v4592_v30, %s7901_s10 }
 0xfae   :  { %4661 = vrot.lane.b32.xlu2 %v4593_v53, %s7940_s0 }
 0xfaf   :  { %4598 = vrot.lane.b32.xlu0 %v4593_v53, %s7941_s4 }
 0xfe0   :  { %v4651_v21 = vpop.permute.xlu2 %4650 }
 0xfe1   :  { %v4654_v54 = vmul.f32 %v10944_v43, %v4651_v21  ;;  %v10987_v21 = vld [vmem:[%s12150_s13 + $0x80] sm:$0xff] }
 0xfe8   :  { %v4644_v61 = vpop.permute.xlu2 %4643 }
 0xfe9   :  { %v4646_v19 = vmul.f32 %v10955_v34, %v4644_v61  ;;  %v10990_v61 = vld [vmem:[%s12150_s13 + $0x18] sm:$0xff] }
 0xff0   :  { %v4624_v31 = vpop.permute.xlu2 %4623 }
 0xff1   :  { %v4627_v18 = vmul.f32 %v10968_v35, %v4624_v31 }
 0xff8   :  { %v4642_v52 = vpop.permute.xlu1 %4641  ;;  %v4617_v10 = vpop.permute.xlu2 %4616 }
 0xff9   :  { %v4645_v47 = vmul.f32 %v10950_v50, %v4642_v52  ;;  %v4619_v30 = vmul.f32 %v10979_v16, %v4617_v10  ;;  %v6776_v10 = vld [vmem:[#allocation23 + $0x8] sm:$0xf0] }
 0xffb   :  { %v4671_v14 = vpack.c.bf16 %v4646_v19, %v4645_v47 }
0x1000   :  { %v4635_v38 = vpop.permute.xlu1 %4634  ;;  %v4597_v3 = vpop.permute.xlu2 %4596 }
0x1001   :  { %v4653_v62 = vpop.permute.xlu0 %4652  ;;  %v4637_v2 = vmul.f32 %v10960_v41, %v4635_v38 }
0x1002   :  { %v4655_v44 = vmul.f32 %v10947_v51, %v4653_v62 }
0x1004   :  { %v4672_v0 = vpack.c.bf16 %v4655_v44, %v4654_v54  ;;  %v7176_v54 = vld [vmem:[#allocation23 + $0x4] sm:$0xf] }
0x1006   :  { %4793 = vmatpush.bf16.msrb.mxu2 %v4672_v0 }
0x1008   :  { %v4615_v1 = vpop.permute.xlu1 %4614  ;;  %v4662_v53 = vpop.permute.xlu2 %4661 }
0x1009   :  { %v4633_v17 = vpop.permute.xlu0 %4632  ;;  %v4618_v27 = vmul.f32 %v10974_v55, %v4615_v1  ;;  %v4664_v52 = vmul.f32 %v10984_v22, %v4662_v53  ;;  %v11000_v1 = vld [vmem:[%s12150_s13] sm:$0xff]  ;;  %v11020_v53 = vld [vmem:[#allocation8 + $0x18] sm:$0xff] }
0x100a   :  { %v4636_v8 = vmul.f32 %v10963_v9, %v4633_v17  ;;  %4794 = vmatpush.bf16.msrb.mxu2 %v4671_v14  ;;  %v6779_v14 = vor.u32 %v7176_v54, %v6776_v10  ;;  %v11003_v17 = vld [vmem:[%s12150_s13 + $0x8] sm:$0xff] }
0x100b   :  { %v4667_v31 = vpack.c.bf16 %v4619_v30, %v4618_v27  ;;  %v11008_v27 = vld [vmem:[#allocation8 + $0x38] sm:$0xff]  ;;  %v11014_v30 = vld [vmem:[#allocation8 + $0x28] sm:$0xff] }
0x100c   :  { %v4670_v45 = vpack.c.bf16 %v4637_v2, %v4636_v8  ;;  %v4600_v8 = vmul.f32 %v4597_v3, %v11000_v1  ;;  %v11017_v3 = vld [vmem:[#allocation8 + $0x20] sm:$0xff] }
0x100e   :  { %4795 = vmatpush.bf16.msrb.mxu2 %v4670_v45 }
0x1010   :  { %v4608_v7 = vpop.permute.xlu1 %4607 }
0x1011   :  { %v4626_v49 = vpop.permute.xlu0 %4625  ;;  %v4610_v44 = vmul.f32 %v10990_v61, %v4608_v7  ;;  %v6774_v7 = vld [vmem:[#allocation23] sm:$0xf] }
0x1012   :  { %v4628_v39 = vmul.f32 %v10971_v37, %v4626_v49  ;;  %4796 = vmatpush.bf16.msrb.mxu2 %v4669_v33  ;;  %v7177_v49 = vld [vmem:[#allocation23 + $0x4] sm:$0xf0] }
0x1014   :  { %v4668_v29 = vpack.c.bf16 %v4628_v39, %v4627_v18  ;;  %v6775_v39 = vor.u32 %v7177_v49, %v6774_v7 }
0x1016   :  { %4797 = vmatpush.bf16.msrb.mxu2 %v4668_v29  ;;  %v11011_v29 = vld [vmem:[#allocation8 + $0x30] sm:$0xff] }
0x1018   :  { %v4660_v33 = vpop.permute.xlu1 %4659 }
0x1019   :  { %v4663_v38 = vmul.f32 %v10987_v21, %v4660_v33  ;;  %v4606_v62 = vpop.permute.xlu0 %4605  ;;  %v11026_v33 = vld [vmem:[#allocation8 + $0x8] sm:$0xff] }
0x101a   :  { %v4609_v47 = vmul.f32 %v10993_v11, %v4606_v62  ;;  %4798 = vmatpush.bf16.msrb.mxu2 %v4667_v31  ;;  %v11023_v31 = vld [vmem:[#allocation8 + $0x10] sm:$0xff] }
0x101b   :  { %v4673_v0 = vpack.c.bf16 %v4664_v52, %v4663_v38  ;;  %v11029_v52 = vld [vmem:[#allocation8] sm:$0xff]  ;;  %v4775_v38 = vpop.f32.mrf.mxu0 }
0x101c   :  { %v4666_v19 = vpack.c.bf16 %v4610_v44, %v4609_v47 }
0x101d   :  { %4814 = vmatpush.bf16.msrb.mxu0 %v4673_v0 }
0x101e   :  { %4799 = vmatpush.bf16.msrb.mxu2 %v4666_v19 }
0x1020   :  { %6780 = vmatmul.msk.bf16.vlgmr.msrb.gmra.mxu0 %vm4789_vm11, %v6779_v14 }
0x1021   :  { %v4599_v2 = vpop.permute.xlu0 %4598  ;;  %5107 = vmatpush.bf16.msra.mxu0 %v11008_v27 }
0x1022   :  { %v4601_v45 = vmul.f32 %v4599_v2, %v11003_v17 }
0x1023   :  { %v4777_v62 = vpop.f32.mrf.mxu0 }
0x1024   :  { %v4665_v18 = vpack.c.bf16 %v4601_v45, %v4600_v8 }
0x1025   :  { %5108 = vmatpush.bf16.msra.mxu0 %v11011_v29 }
0x1026   :  { %4800 = vmatpush.bf16.msrb.mxu2 %v4665_v18 }
0x1029   :  { %4801 = vmatmul.bf16.vlgmr.msrb.gmra.mxu2 %v6775_v39  ;;  %5109 = vmatpush.bf16.msra.mxu0 %v11014_v30 }
0x102d   :  { %5110 = vmatpush.bf16.msra.mxu0 %v11017_v3 }
0x1031   :  { %5111 = vmatpush.bf16.msra.mxu0 %v11020_v53 }
0x1035   :  { %5112 = vmatpush.bf16.msra.mxu0 %v11023_v31 }
0x1039   :  { %5113 = vmatpush.bf16.msra.mxu0 %v11026_v33 }
0x103d   :  { %5114 = vmatpush.bf16.msra.mxu0 %v11029_v52 }
0x109d   :  { %v4816_v54 = vpop.f32.mrf.mxu0 }
0x10a5   :  { %v4818_v2 = vpop.f32.mrf.mxu0 }
0x10ac   :  { %v4802_v10 = vpop.f32.mrf.mxu2 }
0x10ad   :  { %v4803_v44 = vadd.f32 %v4802_v10, %v4775_v38 }
0x10af   :  { %v11032_v47 = vadd.f32 %v4816_v54, %v4803_v44 }
0x10b1   :  { %v4821_v0 = vmax.f32 %v11032_v47, 0.0 }
0x10b3   :  { %4847 = vrot.lane.b32.xlu1 %v4821_v0, %s7928_s30  ;;  %4853 = vrot.lane.b32.xlu2 %v4821_v0, %s7937_s16 }
0x10b4   :  { %4859 = vrot.lane.b32.xlu0 %v4821_v0, %s7938_s15  ;;  %v4804_v19 = vpop.f32.mrf.mxu2 }
0x10b5   :  { %v4805_v14 = vadd.f32 %v4804_v19, %v4777_v62 }
0x10b7   :  { %v11038_v8 = vadd.f32 %v4818_v2, %v4805_v14 }
0x10b9   :  { %v4822_v45 = vmax.f32 %v11038_v8, 0.0  ;;  %v5042_v7 = vpack.c.bf16 %v11038_v8, %v11032_v47  ;;  %v5134_v63 = vmul.f32 %v11038_v8, %v12130_v26 }
0x10bb   :  { %5115 = vmatmul.bf16.vlgmr.msra.gmra.mxu0 %v5042_v7  ;;  %4861 = vrot.lane.b32.xlu1 %v4822_v45, %s7938_s15  ;;  %v4875_v49 = vpack.c.bf16 %v4822_v45, %v4821_v0 }
0x10bc   :  { %4849 = vrot.lane.b32.xlu2 %v4822_v45, %s7928_s30  ;;  %4841 = vrot.lane.b32.xlu0 %v4821_v0, %s7930_s12 }
0x10c3   :  { %4865 = vrot.lane.b32.xlu1 %v4821_v0, %s7940_s0 }
0x10c4   :  { %4835 = vrot.lane.b32.xlu2 %v4821_v0, %s7939_s8  ;;  %4855 = vrot.lane.b32.xlu0 %v4822_v45, %s7937_s16 }
0x10cb   :  { %4843 = vrot.lane.b32.xlu1 %v4822_v45, %s7930_s12 }
0x10cc   :  { %4867 = vrot.lane.b32.xlu2 %v4822_v45, %s7940_s0  ;;  %4829 = vrot.lane.b32.xlu0 %v4821_v0, %s7901_s10 }
0x10d3   :  { %4831 = vrot.lane.b32.xlu1 %v4822_v45, %s7901_s10 }
0x10d4   :  { %4823 = vrot.lane.b32.xlu2 %v4821_v0, %s7941_s4  ;;  %4837 = vrot.lane.b32.xlu0 %v4822_v45, %s7939_s8 }
0x10dc   :  { %4825 = vrot.lane.b32.xlu0 %v4822_v45, %s7941_s4 }
0x110d   :  { %v4854_v18 = vpop.permute.xlu2 %4853 }
0x110e   :  { %v4857_v23 = vmul.f32 %v10950_v50, %v4854_v18 }
0x1116   :  { %v4850_v39 = vpop.permute.xlu2 %4849 }
0x111e   :  { %v4836_v54 = vpop.permute.xlu2 %4835 }
0x1125   :  { %v4848_v38 = vpop.permute.xlu1 %4847 }
0x1126   :  { %v4860_v62 = vpop.permute.xlu0 %4859  ;;  %v4868_v0 = vpop.permute.xlu2 %4867 }
0x1127   :  { %v4863_v44 = vmul.f32 %v10944_v43, %v4860_v62  ;;  %v4870_v12 = vmul.f32 %v10984_v22, %v4868_v0  ;;  %v4851_v62 = vmul.f32 %v10963_v9, %v4848_v38 }
0x112d   :  { %v4862_v10 = vpop.permute.xlu1 %4861 }
0x112e   :  { %v4864_v19 = vmul.f32 %v10947_v51, %v4862_v10  ;;  %v4842_v14 = vpop.permute.xlu0 %4841 }
0x1130   :  { %v4878_v2 = vpack.c.bf16 %v4864_v19, %v4863_v44  ;;  %v6788_v44 = vor.u32 %v7187_v4, %v6785_v24  ;;  %v4852_v19 = vmul.f32 %v10960_v41, %v4850_v39  ;;  %v7189_v24 = vld [vmem:[%s12151_s17 + $0x14] sm:$0xf]  ;;  %v6793_v4 = vld [vmem:[%s12151_s17 + $0x18] sm:$0xf0] }
0x1132   :  { %4964 = vmatpush.bf16.msra.mxu1 %v4878_v2  ;;  %v4876_v2 = vpack.c.bf16 %v4852_v19, %v4851_v62  ;;  %v6796_v62 = vor.u32 %v7189_v24, %v6793_v4  ;;  %v7190_v24 = vld [vmem:[%s12151_s17 + $0x14] sm:$0xf0] }
0x1135   :  { %v4866_v7 = vpop.permute.xlu1 %4865 }
0x1136   :  { %v4869_v45 = vmul.f32 %v10987_v21, %v4866_v7  ;;  %v4856_v15 = vpop.permute.xlu0 %4855 }
0x1137   :  { %v4858_v36 = vmul.f32 %v10955_v34, %v4856_v15  ;;  %v4845_v15 = vmul.f32 %v10968_v35, %v4842_v14 }
0x1138   :  { %v4879_v5 = vpack.c.bf16 %v4870_v12, %v4869_v45 }
0x1139   :  { %v4877_v10 = vpack.c.bf16 %v4858_v36, %v4857_v23 }
0x113a   :  { %5010 = vmatpush.bf16.msra.mxu3 %v4879_v5  ;;  %v4839_v5 = vmul.f32 %v10974_v55, %v4836_v54 }
0x113b   :  { %4965 = vmatpush.bf16.msra.mxu1 %v4877_v10 }
0x113d   :  { %v4844_v0 = vpop.permute.xlu1 %4843  ;;  %6829 = vmatmul.msk.bf16.vlgmr.msra.gmra.mxu3 %vm4789_vm11, %v6788_v44 }
0x113e   :  { %v4830_v7 = vpop.permute.xlu0 %4829  ;;  %v4846_v18 = vmul.f32 %v10971_v37, %v4844_v0  ;;  %v7188_v0 = vld [vmem:[%s12151_s17 + $0x4] sm:$0xf0] }
0x113f   :  { %4966 = vmatpush.bf16.msra.mxu1 %v4876_v2  ;;  %v4833_v10 = vmul.f32 %v10993_v11, %v4830_v7  ;;  %v6783_v2 = vld [vmem:[%s12151_s17] sm:$0xf]  ;;  %v7191_v7 = vld [vmem:[%s12151_s17 + $0x24] sm:$0xf] }
0x1140   :  { %v4874_v12 = vpack.c.bf16 %v4846_v18, %v4845_v15  ;;  %v6784_v15 = vor.u32 %v7188_v0, %v6783_v2  ;;  %v7197_v0 = vld [vmem:[%s12151_s17 + $0x54] sm:$0xf] }
0x1143   :  { %4967 = vmatpush.bf16.msra.mxu1 %v4875_v49  ;;  %v4824_v49 = vpop.permute.xlu2 %4823 }
0x1144   :  { %v4827_v54 = vmul.f32 %v4824_v49, %v11000_v1  ;;  %v7195_v49 = vld [vmem:[%s12151_s17 + $0x44] sm:$0xf] }
0x1145   :  { %v4832_v36 = vpop.permute.xlu1 %4831 }
0x1146   :  { %v4838_v23 = vpop.permute.xlu0 %4837  ;;  %v4834_v38 = vmul.f32 %v10990_v61, %v4832_v36 }
0x1147   :  { %v4840_v39 = vmul.f32 %v10979_v16, %v4838_v23  ;;  %4968 = vmatpush.bf16.msra.mxu1 %v4874_v12  ;;  %v6801_v12 = vld [vmem:[%s12151_s17 + $0x28] sm:$0xf0]  ;;  %v6791_v23 = vld [vmem:[%s12151_s17 + $0x10] sm:$0xf] }
0x1148   :  { %v4872_v14 = vpack.c.bf16 %v4834_v38, %v4833_v10  ;;  %v6804_v36 = vor.u32 %v7191_v7, %v6801_v12  ;;  %v6792_v4 = vor.u32 %v7190_v24, %v6791_v23  ;;  %v6815_v7 = vld [vmem:[%s12151_s17 + $0x40] sm:$0xf]  ;;  %v7196_v12 = vld [vmem:[%s12151_s17 + $0x44] sm:$0xf0]  ;;  %v6823_v23 = vld [vmem:[%s12151_s17 + $0x50] sm:$0xf] }
0x1149   :  { %v4873_v45 = vpack.c.bf16 %v4840_v39, %v4839_v5  ;;  %v7193_v5 = vld [vmem:[%s12151_s17 + $0x34] sm:$0xf]  ;;  %v6809_v39 = vld [vmem:[%s12151_s17 + $0x38] sm:$0xf0]  ;;  %v7198_v24 = vld [vmem:[%s12151_s17 + $0x54] sm:$0xf0] }
0x114a   :  { %v6812_v38 = vor.u32 %v7193_v5, %v6809_v39 }
0x114b   :  { %4969 = vmatpush.bf16.msra.mxu1 %v4873_v45  ;;  %v6799_v45 = vld [vmem:[%s12151_s17 + $0x20] sm:$0xf] }
0x114d   :  { %6830 = vmatmul.msk.bf16.gmra.mxu3 %vm4789_vm11, %v6796_v62  ;;  %v7192_v62 = vld [vmem:[%s12151_s17 + $0x24] sm:$0xf0] }
0x114e   :  { %v4826_v44 = vpop.permute.xlu0 %4825  ;;  %v6800_v10 = vor.u32 %v7192_v62, %v6799_v45 }
0x114f   :  { %v4828_v19 = vmul.f32 %v4826_v44, %v11003_v17  ;;  %4970 = vmatpush.bf16.msra.mxu1 %v4872_v14  ;;  %v6817_v14 = vld [vmem:[%s12151_s17 + $0x48] sm:$0xf0] }
0x1150   :  { %v6820_v44 = vor.u32 %v7195_v49, %v6817_v14 }
0x1151   :  { %v4871_v18 = vpack.c.bf16 %v4828_v19, %v4827_v54  ;;  %v6807_v54 = vld [vmem:[%s12151_s17 + $0x30] sm:$0xf]  ;;  %v7194_v19 = vld [vmem:[%s12151_s17 + $0x34] sm:$0xf0] }
0x1152   :  { %v6808_v2 = vor.u32 %v7194_v19, %v6807_v54 }
0x1153   :  { %4971 = vmatpush.bf16.msra.mxu1 %v4871_v18  ;;  %v6825_v18 = vld [vmem:[%s12151_s17 + $0x58] sm:$0xf0] }
0x1156   :  { %4972 = vmatmul.bf16.vlgmr.msra.gmra.mxu1 %v6784_v15  ;;  %v6828_v15 = vor.u32 %v7197_v0, %v6825_v18 }
0x1157   :  { %5517 = vmatpush.bf16.msrb.mxu1 %v11008_v27 }
0x115b   :  { %5518 = vmatpush.bf16.msrb.mxu1 %v11011_v29 }
0x115d   :  { %6831 = vmatmul.msk.bf16.gmra.mxu3 %vm4789_vm11, %v6804_v36  ;;  %v6816_v36 = vor.u32 %v7196_v12, %v6815_v7 }
0x115f   :  { %5519 = vmatpush.bf16.msrb.mxu1 %v11014_v30 }
0x1163   :  { %5520 = vmatpush.bf16.msrb.mxu1 %v11017_v3 }
0x1166   :  { %4977 = vmatmul.bf16.gmra.mxu1 %v6792_v4  ;;  %v6824_v4 = vor.u32 %v7198_v24, %v6823_v23  ;;  %v11114_v23 = vld [vmem:[#allocation30] ss:$0 sm:$0xff] }
0x1167   :  { %5521 = vmatpush.bf16.msrb.mxu1 %v11020_v53 }
0x116b   :  { %5522 = vmatpush.bf16.msrb.mxu1 %v11023_v31 }
0x116d   :  { %6832 = vmatmul.msk.bf16.gmra.mxu3 %vm4789_vm11, %v6812_v38 }
0x116f   :  { %5523 = vmatpush.bf16.msrb.mxu1 %v11026_v33 }
0x1173   :  { %5524 = vmatpush.bf16.msrb.mxu1 %v11029_v52 }
0x1176   :  { %4982 = vmatmul.bf16.gmra.mxu1 %v6800_v10 }
0x117d   :  { %6833 = vmatmul.msk.bf16.gmra.mxu3 %vm4789_vm11, %v6820_v44 }
0x1186   :  { %4987 = vmatmul.bf16.gmra.mxu1 %v6808_v2 }
0x118d   :  { %6834 = vmatmul.msk.bf16.gmra.mxu3 %vm4789_vm11, %v6828_v15 }
0x1196   :  { %4992 = vmatmul.bf16.gmra.mxu1 %v6816_v36  ;;  %v5116_v36 = vpop.f32.mrf.mxu0 }
0x11a6   :  { %4997 = vmatmul.bf16.gmra.mxu1 %v6824_v4 }
0x11c0   :  { %v5012_v5 = vpop.f32.mrf.mxu3 }
0x11c8   :  { %v5014_v39 = vpop.f32.mrf.mxu3 }
0x11d0   :  { %v5017_v38 = vpop.f32.mrf.mxu3 }
0x11d3   :  { %v4973_v45 = vpop.f32.mrf.mxu1 }
0x11d4   :  { %v5013_v24 = vadd.f32 %v5012_v5, %v4973_v45 }
0x11d8   :  { %v5019_v10 = vpop.f32.mrf.mxu3 }
0x11db   :  { %v4975_v62 = vpop.f32.mrf.mxu1 }
0x11e0   :  { %v5022_v44 = vpop.f32.mrf.mxu3 }
0x11e3   :  { %v4978_v49 = vpop.f32.mrf.mxu1 }
0x11e4   :  { %v5018_v14 = vadd.f32 %v5017_v38, %v4978_v49  ;;  %v11117_v38 = vmul.f32 %v11114_v23, %v5116_v36 }
0x11e8   :  { %v5024_v2 = vpop.f32.mrf.mxu3 }
0x11eb   :  { %v4980_v54 = vpop.f32.mrf.mxu1 }
0x11ec   :  { %v5020_v19 = vadd.f32 %v5019_v10, %v4980_v54  ;;  %v5127_v10 = vmul.f32 %v5013_v24, %v12128_v59  ;;  %v5133_v54 = vmul.f32 %v11032_v47, %v12130_v26 }
0x11f0   :  { %v5027_v15 = vpop.f32.mrf.mxu3 }
0x11f3   :  { %v4983_v0 = vpop.f32.mrf.mxu1 }
0x11f4   :  { %v11110_v18 = vadd.f32 %v5022_v44, %v4983_v0  ;;  %v5118_v0 = vpop.f32.mrf.mxu0 }
0x11f8   :  { %v5029_v20 = vpop.f32.mrf.mxu3 }
0x11fb   :  { %v4985_v7 = vpop.f32.mrf.mxu1 }
0x11fc   :  { %v11112_v12 = vadd.f32 %v5024_v2, %v4985_v7  ;;  %v5137_v2 = vmul.f32 %v11117_v38, %v12131_v13  ;;  %v5015_v7 = vadd.f32 %v5014_v39, %v4975_v62 }
0x11fe   :  { %v5128_v24 = vmul.f32 %v5015_v7, %v12128_v59 }
0x1200   :  { %v5032_v46 = vpop.f32.mrf.mxu3 }
0x1203   :  { %v4988_v4 = vpop.f32.mrf.mxu1 }
0x1204   :  { %v5028_v6 = vadd.f32 %v5027_v15, %v4988_v4  ;;  %v5126_v4 = vmul.f32 %v11114_v23, %v5118_v0 }
0x1206   :  { %v5129_v49 = vmul.f32 %v5028_v6, %v12129_v40 }
0x1208   :  { %v5131_v44 = vadd.f32 %v5129_v49, %v5127_v10 }
0x120a   :  { %v5135_v5 = vadd.f32 %v5133_v54, %v5131_v44  ;;  %v5034_v54 = vpop.f32.mrf.mxu3 }
0x120b   :  { %v4990_v45 = vpop.f32.mrf.mxu1 }
0x120c   :  { %v11125_v15 = vadd.f32 %v5137_v2, %v5135_v5  ;;  %v5030_v36 = vadd.f32 %v5029_v20, %v4990_v45  ;;  %v5138_v20 = vmul.f32 %v5126_v4, %v12131_v13  ;;  %v5147_v13 = vmul.f32 %v11032_v47, %v12134_v48 }
0x120e   :  { %v11130_v6 = vmax.f32 %v11125_v15, 0.0  ;;  %v5130_v10 = vmul.f32 %v5030_v36, %v12129_v40  ;;  %v5141_v40 = vmul.f32 %v5018_v14, %v12132_v60 }
0x1210   :  { %v5132_v49 = vadd.f32 %v5130_v10, %v5128_v24  ;;  %5201 = vrot.lane.b32.xlu0 %v11130_v6, %s7937_s16  ;;  %5207 = vrot.lane.b32.xlu1 %v11130_v6, %s7938_s15  ;;  %v5142_v24 = vmul.f32 %v5020_v19, %v12132_v60 }
0x1212   :  { %v5136_v39 = vadd.f32 %v5134_v63, %v5132_v49  ;;  %v5037_v49 = vpop.f32.mrf.mxu3 }
0x1213   :  { %v4993_v62 = vpop.f32.mrf.mxu1 }
0x1214   :  { %v11140_v59 = vadd.f32 %v5138_v20, %v5136_v39  ;;  %v5033_v44 = vadd.f32 %v5032_v46, %v4993_v62  ;;  %v5151_v46 = vmul.f32 %v11117_v38, %v12135_v57  ;;  %v5148_v39 = vmul.f32 %v11038_v8, %v12134_v48 }
0x1215   :  { %v5152_v62 = vmul.f32 %v5126_v4, %v12135_v57 }
0x1216   :  { %v11144_v2 = vmax.f32 %v11140_v59, 0.0  ;;  %v5143_v26 = vmul.f32 %v5033_v44, %v12133_v32  ;;  %v5342_v0 = vpack.c.bf16 %v11140_v59, %v11125_v15 }
0x1218   :  { %v5145_v7 = vadd.f32 %v5143_v26, %v5141_v40  ;;  %5197 = vrot.lane.b32.xlu0 %v11144_v2, %s7928_s30  ;;  %5203 = vrot.lane.b32.xlu1 %v11144_v2, %s7937_s16  ;;  %v5223_v63 = vpack.c.bf16 %v11144_v2, %v11130_v6  ;;  %v5161_v26 = vmul.f32 %v11032_v47, %v12138_v58 }
0x1219   :  { %5209 = vrot.lane.b32.xlu2 %v11144_v2, %s7938_s15  ;;  %v5156_v47 = vmul.f32 %v11112_v12, %v12136_v28 }
0x121a   :  { %v5149_v14 = vadd.f32 %v5147_v13, %v5145_v7  ;;  %v5039_v57 = vpop.f32.mrf.mxu3  ;;  %v5165_v7 = vmul.f32 %v11117_v38, %v12139_v25  ;;  %v5166_v38 = vmul.f32 %v5126_v4, %v12139_v25 }
0x121b   :  { %v4995_v5 = vpop.f32.mrf.mxu1 }
0x121c   :  { %v5035_v45 = vadd.f32 %v5034_v54, %v4995_v5  ;;  %v11161_v36 = vadd.f32 %v5151_v46, %v5149_v14  ;;  %v5155_v54 = vmul.f32 %v11110_v18, %v12136_v28 }
0x121e   :  { %v5144_v10 = vmul.f32 %v5035_v45, %v12133_v32 }
0x1220   :  { %v5146_v20 = vadd.f32 %v5144_v10, %v5142_v24  ;;  %5183 = vrot.lane.b32.xlu0 %v11130_v6, %s7939_s8  ;;  %5189 = vrot.lane.b32.xlu1 %v11130_v6, %s7930_s12  ;;  %v5162_v24 = vmul.f32 %v11038_v8, %v12138_v58 }
0x1221   :  { %5195 = vrot.lane.b32.xlu2 %v11130_v6, %s7928_s30 }
0x1222   :  { %v5150_v44 = vadd.f32 %v5148_v39, %v5146_v20 }
0x1223   :  { %v4998_v60 = vpop.f32.mrf.mxu1 }
0x1224   :  { %v5038_v19 = vadd.f32 %v5037_v49, %v4998_v60  ;;  %v11174_v32 = vadd.f32 %v5152_v62, %v5150_v44 }
0x1226   :  { %v5157_v48 = vmul.f32 %v5038_v19, %v12137_v56 }
0x1228   :  { %v5159_v40 = vadd.f32 %v5157_v48, %v5155_v54  ;;  %5179 = vrot.lane.b32.xlu0 %v11144_v2, %s7901_s10  ;;  %5185 = vrot.lane.b32.xlu1 %v11144_v2, %s7939_s8 }
0x1229   :  { %5191 = vrot.lane.b32.xlu2 %v11144_v2, %s7930_s12 }
0x122a   :  { %v5163_v18 = vadd.f32 %v5161_v26, %v5159_v40 }
0x122b   :  { %v5000_v13 = vpop.f32.mrf.mxu1 }
0x122c   :  { %v5040_v46 = vadd.f32 %v5039_v57, %v5000_v13  ;;  %v11189_v14 = vadd.f32 %v5165_v7, %v5163_v18 }
0x122e   :  { %v5158_v5 = vmul.f32 %v5040_v46, %v12137_v56 }
0x1230   :  { %v5160_v45 = vadd.f32 %v5158_v5, %v5156_v47  ;;  %5213 = vrot.lane.b32.xlu0 %v11130_v6, %s7940_s0  ;;  %5171 = vrot.lane.b32.xlu1 %v11130_v6, %s7941_s4 }
0x1231   :  { %5177 = vrot.lane.b32.xlu2 %v11130_v6, %s7901_s10 }
0x1232   :  { %v5164_v10 = vadd.f32 %v5162_v24, %v5160_v45 }
0x1234   :  { %v11203_v49 = vadd.f32 %v5166_v38, %v5164_v10 }
0x1238   :  { %5215 = vrot.lane.b32.xlu1 %v11144_v2, %s7940_s0 }
0x1239   :  { %5173 = vrot.lane.b32.xlu2 %v11144_v2, %s7941_s4 }
0x1273   :  { %v5210_v28 = vpop.permute.xlu2 %5209 }
0x1274   :  { %v5212_v12 = vmul.f32 %v10947_v51, %v5210_v28 }
0x127b   :  { %v5196_v56 = vpop.permute.xlu2 %5195 }
0x127c   :  { %v5199_v48 = vmul.f32 %v10963_v9, %v5196_v56 }
0x1282   :  { %v5202_v58 = vpop.permute.xlu0 %5201  ;;  %v5208_v8 = vpop.permute.xlu1 %5207 }
0x1283   :  { %v5211_v20 = vmul.f32 %v10944_v43, %v5208_v8  ;;  %v5205_v62 = vmul.f32 %v10950_v50, %v5202_v58  ;;  %v5192_v60 = vpop.permute.xlu2 %5191 }
0x1284   :  { %v5194_v13 = vmul.f32 %v10971_v37, %v5192_v60  ;;  %v7207_v60 = vld [vmem:[#allocation24 + $0x4] sm:$0xf] }
0x1285   :  { %v5226_v39 = vpack.c.bf16 %v5212_v12, %v5211_v20  ;;  %v7208_v12 = vld [vmem:[#allocation24 + $0x4] sm:$0xf0] }
0x1287   :  { %5284 = vmatpush.bf16.msra.mxu2 %v5226_v39 }
0x128a   :  { %v5198_v25 = vpop.permute.xlu0 %5197  ;;  %v5204_v4 = vpop.permute.xlu1 %5203 }
0x128b   :  { %v5206_v44 = vmul.f32 %v10955_v34, %v5204_v4  ;;  %v5200_v19 = vmul.f32 %v10960_v41, %v5198_v25  ;;  %v5178_v18 = vpop.permute.xlu2 %5177 }
0x128c   :  { %v5181_v28 = vmul.f32 %v10993_v11, %v5178_v18  ;;  %v7212_v18 = vld [vmem:[#allocation24 + $0x24] sm:$0xf0] }
0x128d   :  { %v5225_v54 = vpack.c.bf16 %v5206_v44, %v5205_v62  ;;  %v5224_v40 = vpack.c.bf16 %v5200_v19, %v5199_v48  ;;  %v6871_v19 = vld [vmem:[#allocation24 + $0x8] sm:$0xf0] }
0x128e   :  { %v6874_v48 = vor.u32 %v7207_v60, %v6871_v19 }
0x128f   :  { %5285 = vmatpush.bf16.msra.mxu2 %v5225_v54 }
0x1292   :  { %v5184_v26 = vpop.permute.xlu0 %5183  ;;  %v5190_v57 = vpop.permute.xlu1 %5189 }
0x1293   :  { %5286 = vmatpush.bf16.msra.mxu2 %v5224_v40  ;;  %v5193_v7 = vmul.f32 %v10968_v35, %v5190_v57  ;;  %v5187_v45 = vmul.f32 %v10974_v55, %v5184_v26  ;;  %v5174_v56 = vpop.permute.xlu2 %5173  ;;  %v6877_v40 = vld [vmem:[#allocation24 + $0x10] sm:$0xf]  ;;  %v7210_v26 = vld [vmem:[#allocation24 + $0x14] sm:$0xf0]  ;;  %v7209_v57 = vld [vmem:[#allocation24 + $0x14] sm:$0xf] }
0x1294   :  { %v5176_v6 = vmul.f32 %v5174_v56, %v11003_v17 }
0x1295   :  { %v5222_v46 = vpack.c.bf16 %v5194_v13, %v5193_v7  ;;  %v6879_v7 = vld [vmem:[#allocation24 + $0x18] sm:$0xf0] }
0x1297   :  { %5287 = vmatpush.bf16.msra.mxu2 %v5223_v63  ;;  %v6869_v63 = vld [vmem:[#allocation24] sm:$0xf] }
0x1298   :  { %v6870_v39 = vor.u32 %v7208_v12, %v6869_v63 }
0x129a   :  { %v5180_v47 = vpop.permute.xlu0 %5179  ;;  %v5186_v5 = vpop.permute.xlu1 %5185 }
0x129b   :  { %v5188_v24 = vmul.f32 %v10979_v16, %v5186_v5  ;;  %5288 = vmatpush.bf16.msra.mxu2 %v5222_v46  ;;  %v5182_v38 = vmul.f32 %v10990_v61, %v5180_v47  ;;  %v6887_v46 = vld [vmem:[#allocation24 + $0x28] sm:$0xf0]  ;;  %v7214_v5 = vld [vmem:[#allocation24 + $0x34] sm:$0xf0] }
0x129d   :  { %v5221_v10 = vpack.c.bf16 %v5188_v24, %v5187_v45  ;;  %v5220_v58 = vpack.c.bf16 %v5182_v38, %v5181_v28  ;;  %v6895_v24 = vld [vmem:[#allocation24 + $0x38] sm:$0xf0] }
0x129f   :  { %5289 = vmatpush.bf16.msra.mxu2 %v5221_v10 }
0x12a2   :  { %v5172_v8 = vpop.permute.xlu1 %5171  ;;  %v5214_v25 = vpop.permute.xlu0 %5213 }
0x12a3   :  { %v5175_v2 = vmul.f32 %v5172_v8, %v11000_v1  ;;  %5290 = vmatpush.bf16.msra.mxu2 %v5220_v58  ;;  %v5217_v62 = vmul.f32 %v10987_v21, %v5214_v25 }
0x12a5   :  { %v5219_v20 = vpack.c.bf16 %v5176_v6, %v5175_v2 }
0x12a7   :  { %5291 = vmatpush.bf16.msra.mxu2 %v5219_v20 }
0x12aa   :  { %v5216_v4 = vpop.permute.xlu1 %5215  ;;  %5292 = vmatmul.bf16.vlgmr.msra.gmra.mxu2 %v6870_v39 }
0x12ab   :  { %5343 = vmatpush.bf16.msrb.mxu2 %v11008_v27  ;;  %v5218_v44 = vmul.f32 %v10984_v22, %v5216_v4  ;;  %v6878_v27 = vor.u32 %v7210_v26, %v6877_v40  ;;  %v12153_v40 = vld [vmem:[#allocation226_spill] sm:$0xff] }
0x12ac   :  { %v5381_v26 = vmul.f32 %v11125_v15, %v12153_v40 }
0x12ad   :  { %v5227_v54 = vpack.c.bf16 %v5218_v44, %v5217_v62 }
0x12af   :  { %5344 = vmatpush.bf16.msrb.mxu2 %v11011_v29  ;;  %5320 = vmatpush.bf16.msrb.mxu0 %v5227_v54  ;;  %v6882_v29 = vor.u32 %v7209_v57, %v6879_v7 }
0x12b2   :  { %6899 = vmatmul.msk.bf16.vlgmr.msrb.gmra.mxu0 %vm4789_vm11, %v6874_v48 }
0x12b3   :  { %5345 = vmatpush.bf16.msrb.mxu2 %v11014_v30  ;;  %v6885_v30 = vld [vmem:[#allocation24 + $0x20] sm:$0xf] }
0x12b4   :  { %v6886_v13 = vor.u32 %v7212_v18, %v6885_v30  ;;  %v12154_v30 = vld [vmem:[#allocation222_spill] sm:$0xff] }
0x12b7   :  { %5346 = vmatpush.bf16.msrb.mxu2 %v11017_v3  ;;  %v7211_v3 = vld [vmem:[#allocation24 + $0x24] sm:$0xf] }
0x12b8   :  { %v6890_v47 = vor.u32 %v7211_v3, %v6887_v46  ;;  %v12155_v3 = vld [vmem:[#allocation221_spill] sm:$0xff] }
0x12ba   :  { %5297 = vmatmul.bf16.gmra.mxu2 %v6878_v27 }
0x12bb   :  { %5347 = vmatpush.bf16.msrb.mxu2 %v11020_v53  ;;  %v6893_v53 = vld [vmem:[#allocation24 + $0x30] sm:$0xf] }
0x12bc   :  { %v6894_v45 = vor.u32 %v7214_v5, %v6893_v53 }
0x12bf   :  { %5348 = vmatpush.bf16.msrb.mxu2 %v11023_v31  ;;  %v7213_v31 = vld [vmem:[#allocation24 + $0x34] sm:$0xf] }
0x12c2   :  { %6900 = vmatmul.msk.bf16.gmra.mxu0 %vm4789_vm11, %v6882_v29 }
0x12c3   :  { %5349 = vmatpush.bf16.msrb.mxu2 %v11026_v33  ;;  %v6898_v33 = vor.u32 %v7213_v31, %v6895_v24  ;;  %v5382_v24 = vmul.f32 %v11140_v59, %v12153_v40 }
0x12c7   :  { %5350 = vmatpush.bf16.msrb.mxu2 %v11029_v52 }
0x12ca   :  { %5302 = vmatmul.bf16.gmra.mxu2 %v6886_v13 }
0x12d2   :  { %6901 = vmatmul.msk.bf16.gmra.mxu0 %vm4789_vm11, %v6890_v47 }
0x12da   :  { %5307 = vmatmul.bf16.gmra.mxu2 %v6894_v45 }
0x12e2   :  { %6902 = vmatmul.msk.bf16.gmra.mxu0 %vm4789_vm11, %v6898_v33 }
0x12ea   :  { %5351 = vmatmul.bf16.vlgmr.msrb.gmra.mxu2 %v5342_v0  ;;  %v12152_v0 = vld [vmem:[#allocation224_spill] sm:$0xff] }
0x132d   :  { %v5293_v52 = vpop.f32.mrf.mxu2 }
0x132f   :  { %v5322_v38 = vpop.f32.mrf.mxu0 }
0x1330   :  { %v5323_v57 = vadd.f32 %v5322_v38, %v5293_v52  ;;  %v12156_v38 = vld [vmem:[#allocation223_spill] sm:$0xff] }
0x1332   :  { %v5359_v46 = vmul.f32 %v5323_v57, %v12155_v3 }
0x1335   :  { %v5295_v10 = vpop.f32.mrf.mxu2 }
0x1337   :  { %v5324_v28 = vpop.f32.mrf.mxu0 }
0x133d   :  { %v5298_v56 = vpop.f32.mrf.mxu2 }
0x133f   :  { %v5327_v58 = vpop.f32.mrf.mxu0 }
0x1340   :  { %v5328_v8 = vadd.f32 %v5327_v58, %v5298_v56  ;;  %v5325_v56 = vadd.f32 %v5324_v28, %v5295_v10  ;;  %v5365_v58 = vmul.f32 %v11125_v15, %v12156_v38 }
0x1342   :  { %v5375_v60 = vmul.f32 %v5328_v8, %v12144_v42 }
0x1345   :  { %v5300_v6 = vpop.f32.mrf.mxu2 }
0x1347   :  { %v5329_v2 = vpop.f32.mrf.mxu0 }
0x1348   :  { %v5330_v63 = vadd.f32 %v5329_v2, %v5300_v6 }
0x134a   :  { %v5376_v47 = vmul.f32 %v5330_v63, %v12144_v42  ;;  %v12157_v42 = vld [vmem:[#allocation227_spill] sm:$0xff] }
0x134d   :  { %v5303_v12 = vpop.f32.mrf.mxu2 }
0x134f   :  { %v5332_v20 = vpop.f32.mrf.mxu0 }
0x1350   :  { %v5333_v54 = vadd.f32 %v5332_v20, %v5303_v12  ;;  %v12158_v12 = vld [vmem:[#allocation228_spill] sm:$0xff] }
0x1352   :  { %v5361_v18 = vmul.f32 %v5333_v54, %v12154_v30 }
0x1354   :  { %v5363_v5 = vadd.f32 %v5361_v18, %v5359_v46 }
0x1355   :  { %v5305_v39 = vpop.f32.mrf.mxu2 }
0x1356   :  { %v5367_v2 = vadd.f32 %v5365_v58, %v5363_v5 }
0x1357   :  { %v5334_v25 = vpop.f32.mrf.mxu0 }
0x1358   :  { %v5335_v45 = vadd.f32 %v5334_v25, %v5305_v39  ;;  %v5360_v39 = vmul.f32 %v5325_v56, %v12155_v3 }
0x135a   :  { %v5362_v6 = vmul.f32 %v5335_v45, %v12154_v30 }
0x135d   :  { %v5308_v4 = vpop.f32.mrf.mxu2 }
0x135f   :  { %v5337_v62 = vpop.f32.mrf.mxu0 }
0x1360   :  { %v5338_v44 = vadd.f32 %v5337_v62, %v5308_v4  ;;  %v5364_v62 = vadd.f32 %v5362_v6, %v5360_v39 }
0x1362   :  { %v5377_v19 = vmul.f32 %v5338_v44, %v12152_v0 }
0x1364   :  { %v5379_v48 = vadd.f32 %v5377_v19, %v5375_v60 }
0x1365   :  { %v5310_v27 = vpop.f32.mrf.mxu2 }
0x1366   :  { %v5383_v7 = vadd.f32 %v5381_v26, %v5379_v48 }
0x1367   :  { %v5339_v29 = vpop.f32.mrf.mxu0 }
0x1368   :  { %v5340_v13 = vadd.f32 %v5339_v29, %v5310_v27 }
0x136a   :  { %v5378_v53 = vmul.f32 %v5340_v13, %v12152_v0  ;;  %v5366_v0 = vmul.f32 %v11140_v59, %v12156_v38 }
0x136c   :  { %v5380_v31 = vadd.f32 %v5378_v53, %v5376_v47  ;;  %v5368_v19 = vadd.f32 %v5366_v0, %v5364_v62 }
0x136d   :  { %v5352_v33 = vpop.f32.mrf.mxu2 }
0x136e   :  { %v5357_v52 = vmul.f32 %v11114_v23, %v5352_v33  ;;  %v5384_v8 = vadd.f32 %v5382_v24, %v5380_v31 }
0x1370   :  { %v5369_v63 = vmul.f32 %v5357_v52, %v12157_v42  ;;  %v5385_v20 = vmul.f32 %v5357_v52, %v12158_v12 }
0x1372   :  { %v5371_v25 = vadd.f32 %v5369_v63, %v5367_v2  ;;  %v5387_v4 = vadd.f32 %v5385_v20, %v5383_v7 }
0x1374   :  { %v11261_v10 = vadd.f32 %v5371_v25, %v11161_v36  ;;  %v11264_v28 = vadd.f32 %v5387_v4, %v11189_v14 }
0x1375   :  { %v5354_v15 = vpop.f32.mrf.mxu2 }
0x1376   :  { %v5391_v44 = vmax.f32 %v11261_v10, 0.0  ;;  %v5358_v60 = vmul.f32 %v11114_v23, %v5354_v15 }
0x1378   :  { %v5370_v54 = vmul.f32 %v5358_v60, %v12157_v42  ;;  %v5386_v48 = vmul.f32 %v5358_v60, %v12158_v12  ;;  %5423 = vrot.lane.b32.xlu1 %v5391_v44, %s7937_s16  ;;  %5429 = vrot.lane.b32.xlu2 %v5391_v44, %s7938_s15 }
0x137a   :  { %v5372_v36 = vadd.f32 %v5370_v54, %v5368_v19  ;;  %v5388_v14 = vadd.f32 %v5386_v48, %v5384_v8 }
0x137c   :  { %v11275_v40 = vadd.f32 %v5372_v36, %v11174_v32  ;;  %v11278_v26 = vadd.f32 %v5388_v14, %v11203_v49 }
0x137e   :  { %v5392_v27 = vmax.f32 %v11275_v40, 0.0  ;;  %v5516_v59 = vpack.c.bf16 %v11275_v40, %v11261_v10 }
0x1380   :  { %5525 = vmatmul.bf16.vlgmr.msrb.gmra.mxu1 %v5516_v59  ;;  %5419 = vrot.lane.b32.xlu1 %v5392_v27, %s7928_s30  ;;  %v5445_v57 = vpack.c.bf16 %v5392_v27, %v5391_v44 }
0x1381   :  { %5425 = vrot.lane.b32.xlu2 %v5392_v27, %s7937_s16  ;;  %5431 = vrot.lane.b32.xlu0 %v5392_v27, %s7938_s15 }
0x1388   :  { %5405 = vrot.lane.b32.xlu1 %v5391_v44, %s7939_s8 }
0x1389   :  { %5411 = vrot.lane.b32.xlu2 %v5391_v44, %s7930_s12  ;;  %5417 = vrot.lane.b32.xlu0 %v5391_v44, %s7928_s30  ;;  %s12160_s30 = sld [smem:[#allocation57_spill]] }
0x138f   :  { %v7225_v48 = vld [vmem:[%s12160_s30 + $0x30] sm:$0xff]  ;;  %v7224_v36 = vld [vmem:[%s12160_s30 + $0x28] sm:$0xff]  ;;  %v7223_v14 = vld [vmem:[%s12160_s30 + $0x20] sm:$0xff] }
0x1390   :  { %5401 = vrot.lane.b32.xlu1 %v5392_v27, %s7901_s10  ;;  %v7222_v59 = vld [vmem:[%s12160_s30 + $0x18] sm:$0xff] }
0x1391   :  { %5407 = vrot.lane.b32.xlu2 %v5392_v27, %s7939_s8  ;;  %5413 = vrot.lane.b32.xlu0 %v5392_v27, %s7930_s12  ;;  %s12165_s12 = sld [smem:[#allocation55_spill]] }
0x1398   :  { %5435 = vrot.lane.b32.xlu1 %v5391_v44, %s7940_s0 }
0x1399   :  { %5393 = vrot.lane.b32.xlu2 %v5391_v44, %s7941_s4  ;;  %5399 = vrot.lane.b32.xlu0 %v5391_v44, %s7901_s10  ;;  %s12159_s10 = sld [smem:[#allocation54_spill]] }
0x139f   :  { %v6907_v20 = vld [vmem:[%s12159_s10 + $0x8] sm:$0xf0]  ;;  %v6905_v4 = vld [vmem:[%s12159_s10] sm:$0xf]  ;;  %v7217_v44 = vld [vmem:[%s12159_s10 + $0x14] sm:$0xf] }
0x13a0   :  { %v6915_v60 = vld [vmem:[%s12159_s10 + $0x18] sm:$0xf0]  ;;  %v7218_v19 = vld [vmem:[%s12159_s10 + $0x14] sm:$0xf0] }
0x13a1   :  { %5437 = vrot.lane.b32.xlu2 %v5392_v27, %s7940_s0  ;;  %5395 = vrot.lane.b32.xlu0 %v5392_v27, %s7941_s4  ;;  %v6918_v0 = vor.u32 %v7217_v44, %v6915_v60 }
0x13d2   :  { %v5430_v32 = vpop.permute.xlu2 %5429 }
0x13d3   :  { %v5433_v13 = vmul.f32 %v10944_v43, %v5430_v32 }
0x13db   :  { %v5426_v49 = vpop.permute.xlu2 %5425 }
0x13dc   :  { %v5428_v5 = vmul.f32 %v10955_v34, %v5426_v49  ;;  %v7220_v49 = vld [vmem:[%s12160_s30 + $0x8] sm:$0xff] }
0x13e3   :  { %v5412_v7 = vpop.permute.xlu2 %5411 }
0x13ea   :  { %v5424_v29 = vpop.permute.xlu1 %5423 }
0x13eb   :  { %v5408_v3 = vpop.permute.xlu2 %5407  ;;  %v5427_v47 = vmul.f32 %v10950_v50, %v5424_v29  ;;  %v5415_v50 = vmul.f32 %v10968_v35, %v5412_v7  ;;  %v7215_v35 = vld [vmem:[%s12159_s10 + $0x4] sm:$0xf] }
0x13ec   :  { %v6910_v25 = vor.u32 %v7215_v35, %v6907_v20  ;;  %v7219_v29 = vld [vmem:[%s12160_s30] sm:$0xff] }
0x13ed   :  { %v5447_v45 = vpack.c.bf16 %v5428_v5, %v5427_v47  ;;  %v12161_v5 = vld [vmem:[#allocation202_spill] sm:$0xff] }
0x13f2   :  { %v5420_v30 = vpop.permute.xlu1 %5419 }
0x13f3   :  { %v5432_v18 = vpop.permute.xlu0 %5431  ;;  %v5422_v33 = vmul.f32 %v10960_v41, %v5420_v30  ;;  %v5394_v52 = vpop.permute.xlu2 %5393  ;;  %v5410_v41 = vmul.f32 %v10979_v16, %v5408_v3 }
0x13f4   :  { %v5434_v46 = vmul.f32 %v10947_v51, %v5432_v18 }
0x13f6   :  { %v5448_v53 = vpack.c.bf16 %v5434_v46, %v5433_v13 }
0x13f8   :  { %5478 = vmatpush.bf16.msrb.mxu3 %v5448_v53 }
0x13fa   :  { %v5406_v31 = vpop.permute.xlu1 %5405 }
0x13fb   :  { %v5418_v24 = vpop.permute.xlu0 %5417  ;;  %v5409_v58 = vmul.f32 %v10974_v55, %v5406_v31  ;;  %v5438_v6 = vpop.permute.xlu2 %5437  ;;  %v12162_v31 = vld [vmem:[#allocation203_spill] sm:$0xff] }
0x13fc   :  { %v5421_v56 = vmul.f32 %v10963_v9, %v5418_v24  ;;  %5479 = vmatpush.bf16.msrb.mxu3 %v5447_v45  ;;  %v5440_v42 = vmul.f32 %v10984_v22, %v5438_v6 }
0x13fd   :  { %v5443_v9 = vpack.c.bf16 %v5410_v41, %v5409_v58  ;;  %v5526_v18 = vpop.f32.mrf.mxu1 }
0x13fe   :  { %v5446_v38 = vpack.c.bf16 %v5422_v33, %v5421_v56  ;;  %v5531_v53 = vmul.f32 %v11114_v23, %v5526_v18  ;;  %v12163_v56 = vld [vmem:[#allocation204_spill] sm:$0xff] }
0x1400   :  { %5480 = vmatpush.bf16.msrb.mxu3 %v5446_v38  ;;  %v12164_v38 = vld [vmem:[#allocation205_spill] sm:$0xff] }
0x1402   :  { %v5402_v43 = vpop.permute.xlu1 %5401 }
0x1403   :  { %v5414_v51 = vpop.permute.xlu0 %5413 }
0x1404   :  { %v5416_v34 = vmul.f32 %v10971_v37, %v5414_v51  ;;  %5481 = vmatpush.bf16.msrb.mxu3 %v5445_v57  ;;  %v5404_v37 = vmul.f32 %v10990_v61, %v5402_v43  ;;  %v7221_v57 = vld [vmem:[%s12160_s30 + $0x10] sm:$0xff]  ;;  %v5543_v43 = vmul.f32 %v5531_v53, %v12164_v38 }
0x1405   :  { %v5528_v51 = vpop.f32.mrf.mxu1 }
0x1406   :  { %v5444_v8 = vpack.c.bf16 %v5416_v34, %v5415_v50 }
0x1408   :  { %5482 = vmatpush.bf16.msrb.mxu3 %v5444_v8 }
0x140a   :  { %v5436_v2 = vpop.permute.xlu1 %5435 }
0x140b   :  { %v5439_v63 = vmul.f32 %v10987_v21, %v5436_v2  ;;  %v5400_v12 = vpop.permute.xlu0 %5399  ;;  %v5397_v21 = vmul.f32 %v5394_v52, %v11000_v1  ;;  %v6913_v1 = vld [vmem:[%s12159_s10 + $0x10] sm:$0xf]  ;;  %v5539_v52 = vmul.f32 %v11261_v10, %v12163_v56 }
0x140c   :  { %v5403_v55 = vmul.f32 %v10993_v11, %v5400_v12  ;;  %5483 = vmatpush.bf16.msrb.mxu3 %v5443_v9  ;;  %v7216_v11 = vld [vmem:[%s12159_s10 + $0x4] sm:$0xf0]  ;;  %v6914_v54 = vor.u32 %v7218_v19, %v6913_v1  ;;  %v5532_v9 = vmul.f32 %v11114_v23, %v5528_v51  ;;  %v5540_v12 = vmul.f32 %v11275_v40, %v12163_v56 }
0x140d   :  { %v5449_v16 = vpack.c.bf16 %v5440_v42, %v5439_v63  ;;  %v6906_v15 = vor.u32 %v7216_v11, %v6905_v4 }
0x140e   :  { %v5442_v39 = vpack.c.bf16 %v5404_v37, %v5403_v55  ;;  %v5544_v35 = vmul.f32 %v5532_v9, %v12164_v38 }
0x140f   :  { %5504 = vmatpush.bf16.msra.mxu0 %v5449_v16 }
0x1410   :  { %5484 = vmatpush.bf16.msrb.mxu3 %v5442_v39 }
0x1412   :  { %6919 = vmatmul.msk.bf16.vlgmr.msra.gmra.mxu0 %vm4789_vm11, %v6910_v25 }
0x1413   :  { %v5396_v22 = vpop.permute.xlu0 %5395 }
0x1414   :  { %v5398_v61 = vmul.f32 %v5396_v22, %v11003_v17  ;;  %v7226_v17 = vld [vmem:[%s12160_s30 + $0x38] sm:$0xff] }
0x1415   :  { %5618 = vmatpush.bf16.msra.mxu2 %v7226_v17 }
0x1416   :  { %v5441_v62 = vpack.c.bf16 %v5398_v61, %v5397_v21  ;;  %v5640_v21 = vld [vmem:[%s12165_s12 + $0x8] sm:$0x3]  ;;  %v7942_v61 = vmov 0  }
0x1417   :  { %7306 = vset.pattern.permute.xlu0 %v7942_v61  ;;  %7307 = vset.pattern.permute.xlu1 %v7942_v61 }
0x1418   :  { %5485 = vmatpush.bf16.msrb.mxu3 %v5441_v62  ;;  %5648 = vperm.xlu1 %7307, %v5640_v21   ;;  %v5637_v62 = vld [vmem:[#allocation26] sm:$0xff] }
0x1419   :  { %5619 = vmatpush.bf16.msra.mxu2 %v7225_v48 }
0x141b   :  { %5486 = vmatmul.bf16.vlgmr.msrb.gmra.mxu3 %v6906_v15  ;;  %v5638_v15 = vld [vmem:[#allocation26 + $0x8] sm:$0x3] }
0x141d   :  { %5620 = vmatpush.bf16.msra.mxu2 %v7224_v36 }
0x1421   :  { %5621 = vmatpush.bf16.msra.mxu2 %v7223_v14 }
0x1422   :  { %6920 = vmatmul.msk.bf16.gmra.mxu0 %vm4789_vm11, %v6918_v0 }
0x1425   :  { %5622 = vmatpush.bf16.msra.mxu2 %v7222_v59 }
0x1429   :  { %5623 = vmatpush.bf16.msra.mxu2 %v7221_v57 }
0x142b   :  { %5491 = vmatmul.bf16.gmra.mxu3 %v6914_v54 }
0x142d   :  { %5624 = vmatpush.bf16.msra.mxu2 %v7220_v49 }
0x1431   :  { %5625 = vmatpush.bf16.msra.mxu2 %v7219_v29 }
0x148a   :  { %v5649_v1 = vpop.permute.xlu1 %5648 }
0x148f   :  { %v5506_v27 = vpop.f32.mrf.mxu0 }
0x1497   :  { %v5508_v7 = vpop.f32.mrf.mxu0 }
0x149e   :  { %v5487_v32 = vpop.f32.mrf.mxu3 }
0x149f   :  { %v5511_v13 = vpop.f32.mrf.mxu0  ;;  %v5507_v3 = vadd.f32 %v5506_v27, %v5487_v32 }
0x14a1   :  { %v5533_v45 = vmul.f32 %v5507_v3, %v12161_v5 }
0x14a6   :  { %v5489_v30 = vpop.f32.mrf.mxu3 }
0x14a7   :  { %v5509_v50 = vadd.f32 %v5508_v7, %v5489_v30  ;;  %v5513_v8 = vpop.f32.mrf.mxu0 }
0x14a9   :  { %v5534_v2 = vmul.f32 %v5509_v50, %v12161_v5 }
0x14ae   :  { %v5492_v46 = vpop.f32.mrf.mxu3 }
0x14af   :  { %v5512_v47 = vadd.f32 %v5511_v13, %v5492_v46 }
0x14b1   :  { %v5535_v24 = vmul.f32 %v5512_v47, %v12162_v31 }
0x14b3   :  { %v5537_v33 = vadd.f32 %v5535_v24, %v5533_v45 }
0x14b5   :  { %v5541_v34 = vadd.f32 %v5539_v52, %v5537_v33 }
0x14b6   :  { %v5494_v58 = vpop.f32.mrf.mxu3 }
0x14b7   :  { %v5545_v41 = vadd.f32 %v5543_v43, %v5541_v34  ;;  %v5514_v6 = vadd.f32 %v5513_v8, %v5494_v58 }
0x14b9   :  { %v5547_v42 = vadd.f32 %v5545_v41, %v11264_v28  ;;  %v5536_v63 = vmul.f32 %v5514_v6, %v12162_v31  ;;  %v5639_v28 = vld [vmem:[%s12165_s12] sm:$0xff] }
0x14ba   :  { %5643 = vperm.xlu0 %7306, %v5639_v28  }
0x14bb   :  { %v5538_v10 = vadd.f32 %v5536_v63, %v5534_v2  ;;  %v5549_v55 = vmax.f32 %v5547_v42, 0.0 }
0x14bd   :  { %v5542_v20 = vadd.f32 %v5540_v12, %v5538_v10  ;;  %v5551_v39 = vmul.f32 0.999995, %v5549_v55 }
0x14bf   :  { %v5546_v37 = vadd.f32 %v5544_v35, %v5542_v20 }
0x14c1   :  { %v5548_v16 = vadd.f32 %v5546_v37, %v11278_v26 }
0x14c3   :  { %v5550_v23 = vmax.f32 %v5548_v16, 0.0 }
0x14c5   :  { %v5552_v25 = vmul.f32 0.999995, %v5550_v23 }
0x14c7   :  { %v5553_v22 = vpack.c.bf16 %v5552_v25, %v5551_v39 }
0x14c9   :  { %5626 = vmatmul.bf16.vlgmr.msra.gmra.mxu2 %v5553_v22 }
0x152c   :  { %v5644_v44 = vpop.permute.xlu0 %5643 }
0x154c   :  { %v5627_v40 = vpop.f32.mrf.mxu2 }
0x154d   :  { %v5632_v4 = vmul.f32 0.0625, %v5627_v40 }
0x154f   :  { %5635 = vst.msk [vmem:[%s8121_s27] sm:$0xff] %vm5634_vm12, %v5632_v4 }
0x1554   :  { %v5629_v26 = vpop.f32.mrf.mxu2 }
0x1555   :  { %v5633_v11 = vmul.f32 0.0625, %v5629_v26 }
0x1557   :  { %5636 = vst.msk [vmem:[%s8121_s27 + $0x8] sm:$0xff] %vm5634_vm12, %v5633_v11  ;;  %5671 = vmatpush.msra.mxu1 %v5633_v11 }
0x1559   :  { %5672 = vmatpush.msra.mxu1 %v5632_v4 }
0x155a   :  { %6953 = vmatmul.msk.f32.vlgmr.msra.gmra.mxu1 %vm4789_vm11, %v5637_v62 }
0x1562   :  { %6954 = vmatmul.msk.f32.gmra.mxu1 %vm4789_vm11, %v5638_v15 }
0x15d7   :  { %v5674_v60 = vpop.f32.mrf.mxu1 }
0x15d8   :  { %v5675_v0 = vadd.f32 %v5674_v60, %v5644_v44 }
0x15da   :  { %5680 = vst.msk [vmem:[%s8126_s19] sm:$0xff] %vm5634_vm12, %v5675_v0 }
0x15df   :  { %v5677_v19 = vpop.f32.mrf.mxu1 }
0x15e0   :  { %v5678_v54 = vadd.f32 %v5677_v19, %v5649_v1 }
0x15e2   :  { %5682 = vst.msk [vmem:[%s8126_s19 + $0x8] sm:$0x3] %vm5681_vm13, %v5678_v54 }
0x15e3   :  { %5691 = vsyncpa [#allocation3], 1 }
0x15e4   :  { %5692 = vsyncpa [#allocation7], 1 }
0x15e5   :  { %5693 = vsyncpa [#allocation10], 1 }
0x15e6   :  { %5694 = vsyncpa [#allocation13], 1 }
0x15e7   :  { %5695 = vsyncpa [#allocation16], 1 }
0x15e8   :  { %5696 = vsyncpa [#allocation19], 1 }
0x15e9   :  { %5697 = vsyncpa [#allocation22], 1 }
0x15ea   :  { %5698 = vsyncpa [#allocation25], 1 }
0x15eb   :  { %5699 = vsyncpa [#allocation28], 1 }
0x15ec   :  { %5700 = vsyncpa [#allocation31], 1 }
0x15ed   :  { %5701 = vsyncpa [#allocation4], 1 }

</bundles_post_ra>
